<compile_context>
chip_gen: v7x
topology: tpu7x:2x2x1
jax: 0.10.0
libtpu: 0.0.40
codegen_flags: <defaults>
</compile_context>

<pallas_src>
import math
import functools

import numpy as np
import jax
import jax.numpy as jnp
from jax.experimental import pallas as pl
from jax.experimental.pallas import tpu as pltpu

# ---- config (mirrors the PyTorch `config` object) --------------------------
N_EMBD   = 32          # config.n_embd
N_HEAD   = 2           # config.n_head
HEAD_DIM = N_EMBD // N_HEAD
N_LAYER  = 2           # config.n_layer
Y_N_POS  = 16          # config.y_n_positions
FREQ_EMB = 32          # TimestepEmbedder.frequency_embedding_size
SEQ_T    = 3           # [t_emb, x_t_emb, features_emb]
EPS_RMS  = 1e-5
EPS_LN   = 1e-5

GROUPS   = 4                    # batch rows packed into the 128-lane axis
CP       = GROUPS * N_EMBD      # 128 : packed embedding width
IN_W     = 64                   # per-batch-row input lanes: [t_freq(32)|x_t(1)|features(16)|pad(15)]


def _round_up(x, m):
    return (x + m - 1) // m * m


# =============================================================================
# Fused Pallas kernel: embeddings + both Blocks + final LN/head for a batch tile
# =============================================================================
def cfm_kernel(xin_ref,
               w_in_ref, b_in_ref, te_w2_ref, te_b2_ref,
               wqkv_ref, wo_ref, wfc_ref, wmp_ref, rmsw_ref, rmshw_ref,
               gsum32_ref, gsum16_ref, pswap_ref, cos_ref, sin_ref,
               lnf_w_ref, lnf_b_ref, head_w_ref, head_b_ref,
               out_ref):
    f32, bf16 = jnp.float32, jnp.bfloat16
    C, D, T = N_EMBD, HEAD_DIM, SEQ_T
    M = xin_ref.shape[0]                       # packed rows per tile (= batch_tile / 4)
    inv_c = 1.0 / float(C)
    inv_d = 1.0 / float(D)
    scale = 1.0 / math.sqrt(float(D))

    gsum32 = gsum32_ref[...]                   # (128,128) bf16: 1 within each 32-lane group
    gsum16 = gsum16_ref[...]                   # (128,128) bf16: 1 within each 16-lane (head) segment
    pswap = pswap_ref[...]                     # (128,128) bf16: within-head half-swap permutation

    def dot_bf(a, b):                          # bf16 MXU operands, f32 accumulate
        return jnp.dot(a.astype(bf16), b, preferred_element_type=f32)

    def rms(x, w):                             # RMSNorm over each 32-lane embedding group
        ms = dot_bf(x * x, gsum32) * inv_c + EPS_RMS
        return x * jax.lax.rsqrt(ms) * w

    def head_rms(x, w):                        # RMSNorm over each 16-lane head segment
        ms = dot_bf(x * x, gsum16) * inv_d + EPS_RMS
        return x * jax.lax.rsqrt(ms) * w

    # ---------------- input embeddings: one fused projection ----------------
    # xin lanes per batch sub-row g: [t_freq | x_t | features | pad]
    # w_in emits [h1 | x_t_emb | feat_emb] in the packed (group-of-32) layout.
    proj = dot_bf(xin_ref[...], w_in_ref[...]) + b_in_ref[...]        # (M, 3*CP)
    h1 = proj[:, :CP]
    h1 = h1 * (1.0 / (1.0 + jnp.exp(-h1)))                            # SiLU
    t_emb = dot_bf(h1, te_w2_ref[...]) + te_b2_ref[...]               # (M, CP)
    # sequence order: [t_emb, x_t_emb, features_emb], stacked along rows
    x = jnp.concatenate([t_emb, proj[:, CP:2 * CP], proj[:, 2 * CP:]], axis=0)   # (3M, CP)

    # ---------------- rotary tables, broadcast once (hoisted) ----------------
    cos_stack = jnp.concatenate(
        [jnp.broadcast_to(cos_ref[tt:tt + 1, :], (M, CP)) for tt in range(T)], axis=0)
    sin_stack = jnp.concatenate(
        [jnp.broadcast_to(sin_ref[tt:tt + 1, :], (M, CP)) for tt in range(T)], axis=0)

    # ---------------- transformer blocks (both layers fused) ----------------
    for layer in range(N_LAYER):
        rw = rmsw_ref[layer]                  # (1, CP)
        rhw = rmshw_ref[layer]                # (1, CP)

        # --- attention: one fused QKV matmul over the whole 3-token slab ---
        xn = rms(x, rw)
        qkv = dot_bf(xn, wqkv_ref[layer])                              # (3M, 3*CP)
        q = head_rms(qkv[:, :CP], rhw)
        k = head_rms(qkv[:, CP:2 * CP], rhw)
        v = qkv[:, 2 * CP:]
        q = q * cos_stack + dot_bf(q, pswap) * sin_stack
        k = k * cos_stack + dot_bf(k, pswap) * sin_stack

        qs = [q[tt * M:(tt + 1) * M] for tt in range(T)]
        ks = [k[tt * M:(tt + 1) * M] for tt in range(T)]
        vs = [v[tt * M:(tt + 1) * M] for tt in range(T)]

        # per-head scores via one stacked segmented-sum matmul
        # (the all-ones float attn_mask adds a constant that cancels in softmax)
        prod = jnp.concatenate([qs[i] * ks[j] for i in range(T) for j in range(T)],
                               axis=0)                                  # (9M, CP)
        sc_all = dot_bf(prod, gsum16) * scale                           # (9M, CP)
        ys = []
        for i in range(T):
            sc = [sc_all[(i * T + j) * M:(i * T + j + 1) * M] for j in range(T)]
            m = jnp.maximum(jnp.maximum(sc[0], sc[1]), sc[2])
            p = [jnp.exp(sc[j] - m) for j in range(T)]
            inv = pl.reciprocal(p[0] + p[1] + p[2], approx=True)
            ys.append((p[0] * vs[0] + p[1] * vs[1] + p[2] * vs[2]) * inv)
        y = jnp.concatenate(ys, axis=0)                                 # (3M, CP)
        x = x + dot_bf(y, wo_ref[layer])

        # --- MLP: squared ReLU, stacked over the 3 tokens ---
        xn2 = rms(x, rw)
        h = dot_bf(xn2, wfc_ref[layer])                                 # (3M, 4*CP)
        h = jnp.square(jnp.maximum(h, 0.0))
        x = x + dot_bf(h, wmp_ref[layer])

    # ---------------- final LayerNorm + head on the x_t token ----------------
    xr = x[M:2 * M]                                                     # token 1 = x_t_emb
    mu = dot_bf(xr, gsum32) * inv_c
    xc = xr - mu
    var = dot_bf(xc * xc, gsum32) * inv_c
    xnf = xc * jax.lax.rsqrt(var + EPS_LN) * lnf_w_ref[...] + lnf_b_ref[...]
    out_ref[...] = dot_bf(xnf, head_w_ref[...]) + head_b_ref[...]       # (M, 4)


# =============================================================================
# Wrapper: one pallas_call for the whole forward, grid tiled over the batch
# =============================================================================
def timestep_embedding(t, dim, max_period=10000.0):
    half = dim // 2
    freqs = jnp.exp(-math.log(max_period) *
                    jnp.arange(half, dtype=jnp.float32) / half)
    args = t.astype(jnp.float32)[..., None] * freqs
    return jnp.concatenate([jnp.cos(args), jnp.sin(args)], axis=-1)


def cfm_forward_pallas(t, x_t, features, kparams, *, block_b=1024):
    B = t.shape[0]
    G = GROUPS

    # ---- grid sizing: balanced tiles; even split on dual-TC (v7x) chips ----
    try:
        kind = jax.devices()[0].device_kind.lower()
    except Exception:
        kind = ""
    n_tc = 2 if ("v7" in kind or "7x" in kind) else 1
    n_tiles = max(n_tc, pl.cdiv(B, block_b))
    n_tiles = pl.cdiv(n_tiles, n_tc) * n_tc
    bt = _round_up(pl.cdiv(B, n_tiles), 8 * G)        # batch rows per tile (mult of 32)
    n_tiles = max(1, pl.cdiv(B, bt))
    Bp = n_tiles * bt
    mt = bt // G                                      # packed rows per tile

    # ---- pack inputs into one lane-dense slab: (Bp/4, 4*64) ----
    # TODO(synk): the tiny sinusoidal timestep table stays as host-side JAX glue
    # (Mosaic sin/cos lowering not relied on); it is folded into the single
    # packed input slab so the kernel still sees exactly one per-step DMA.
    t_freq = timestep_embedding(t, FREQ_EMB)                            # (B, 32)
    per_row = jnp.concatenate(
        [t_freq, x_t.astype(jnp.float32), features.astype(jnp.float32),
         jnp.zeros((B, IN_W - FREQ_EMB - 1 - Y_N_POS), jnp.float32)], axis=1)   # (B, 64)
    if Bp > B:
        per_row = jnp.pad(per_row, ((0, Bp - B), (0, 0)))
    xin = per_row.reshape(Bp // G, G * IN_W)                            # (Bp/4, 256)

    consts = (kparams["w_in"], kparams["b_in"], kparams["te_w2"], kparams["te_b2"],
              kparams["wqkv"], kparams["wo"], kparams["wfc"], kparams["wmp"],
              kparams["rms_w"], kparams["rms_hw"],
              kparams["gsum32"], kparams["gsum16"], kparams["pswap"],
              kparams["cos_row"], kparams["sin_row"],
              kparams["lnf_w"], kparams["lnf_b"],
              kparams["head_w"], kparams["head_b"])

    def const_spec(a):
        return pl.BlockSpec(a.shape, lambda i, _n=a.ndim: (0,) * _n)

    in_specs = ([pl.BlockSpec((mt, G * IN_W), lambda i: (i, 0))] +
                [const_spec(c) for c in consts])

    out = pl.pallas_call(
        cfm_kernel,
        out_shape=jax.ShapeDtypeStruct((Bp // G, G), jnp.float32),
        grid=(n_tiles,),
        in_specs=in_specs,
        out_specs=pl.BlockSpec((mt, G), lambda i: (i, 0)),
        compiler_params=pltpu.CompilerParams(
            dimension_semantics=("parallel",),
            vmem_limit_bytes=48 * 1024 * 1024),
    )(xin, *consts)

    return out.reshape(Bp)[:B].reshape(B, 1, 1)                         # (B, 1, 1)


# =============================================================================
# Pure-JAX reference (mirrors the PyTorch module) for correctness checking
# =============================================================================
def _rms_ref(x, w, eps=EPS_RMS):
    var = jnp.mean(x * x, axis=-1, keepdims=True) + eps
    return x * jax.lax.rsqrt(var) * w


def block_ref(x, cos, sin, bp):
    B, T, C = x.shape
    D, H = HEAD_DIM, N_HEAD

    def rope(z):                                   # z: (B, T, H, D)
        d = D // 2
        z1, z2 = z[..., :d], z[..., d:]
        c = cos[None, :, None, :]
        s = sin[None, :, None, :]
        return jnp.concatenate([z1 * c + z2 * s, -z1 * s + z2 * c], axis=-1)

    xn = _rms_ref(x, bp["rms_w"])
    q = (xn @ bp["wq"]).reshape(B, T, H, D)
    k = (xn @ bp["wk"]).reshape(B, T, H, D)
    v = (xn @ bp["wv"]).reshape(B, T, H, D)
    q = rope(_rms_ref(q, bp["rms_hw"]))
    k = rope(_rms_ref(k, bp["rms_hw"]))
    s = jnp.einsum("bqhd,bkhd->bhqk", q, k) / math.sqrt(D) + 1.0   # ones float mask
    p = jax.nn.softmax(s, axis=-1)
    y = jnp.einsum("bhqk,bkhd->bqhd", p, v).reshape(B, T, C)
    x = x + y @ bp["wo"]
    xn2 = _rms_ref(x, bp["rms_w"])
    h = jnp.square(jax.nn.relu(xn2 @ bp["wfc"]))
    return x + h @ bp["wmp"]


def cfm_forward_ref(t, x_t, features, params):
    t_freq = timestep_embedding(t, FREQ_EMB)
    h = t_freq @ params["te_w1"] + params["te_b1"]
    h = h * jax.nn.sigmoid(h)
    t_emb = h @ params["te_w2"] + params["te_b2"]
    x_t_emb = x_t @ params["xt_w"] + params["xt_b"]
    feat_emb = features @ params["fp_w"] + params["fp_b"]
    x = jnp.stack([t_emb, x_t_emb, feat_emb], axis=1)        # (B, 3, C)

    for bp in params["blocks"]:
        x = block_ref(x, params["cos"], params["sin"], bp)

    xr = x[:, 1, :]
    mu = jnp.mean(xr, axis=-1, keepdims=True)
    var = jnp.mean((xr - mu) ** 2, axis=-1, keepdims=True)
    xr = (xr - mu) * jax.lax.rsqrt(var + EPS_LN) * params["lnf_w"] + params["lnf_b"]
    out = xr @ params["head_w"] + params["head_b"]
    return out[:, None, :]


# =============================================================================
# Deterministic parameter init + packing into the lane-packed kernel layout
# =============================================================================
def init_params(key):
    def nrm(k, shape, std=0.05):
        return std * jax.random.normal(k, shape, dtype=jnp.float32)

    keys = iter(jax.random.split(key, 64))
    C = N_EMBD
    params = {
        "fp_w": nrm(next(keys), (Y_N_POS, C)),   "fp_b": jnp.zeros((1, C)),
        "xt_w": nrm(next(keys), (1, C)),         "xt_b": jnp.zeros((1, C)),
        "te_w1": nrm(next(keys), (FREQ_EMB, C)), "te_b1": jnp.zeros((1, C)),
        "te_w2": nrm(next(keys), (C, C)),        "te_b2": jnp.zeros((1, C)),
        "lnf_w": jnp.ones((1, C)), "lnf_b": jnp.zeros((1, C)),
        "head_w": nrm(next(keys), (C, 1)), "head_b": jnp.zeros((1, 1)),
    }
    blocks = []
    for _ in range(N_LAYER):
        blocks.append({
            "wq": nrm(next(keys), (C, C)),
            "wk": nrm(next(keys), (C, C)),
            "wv": nrm(next(keys), (C, C)),
            # NOTE: the module zero-inits c_proj weights; small random values
            # are used here so the kernel compute path is actually exercised.
            "wo": nrm(next(keys), (C, C)),
            "wfc": nrm(next(keys), (C, 4 * C)),
            "wmp": nrm(next(keys), (4 * C, C)),
            "rms_w": jnp.ones((1, C)),
            "rms_hw": jnp.ones((1, HEAD_DIM)),
        })
    params["blocks"] = blocks

    # Rotary cos/sin cache (matches Rotary: computed in f32, stored via bf16).
    inv_freq = 1.0 / (10000.0 ** (jnp.arange(0, HEAD_DIM, 2, dtype=jnp.float32)
                                  / HEAD_DIM))
    tt = jnp.arange(SEQ_T, dtype=jnp.float32)
    freqs = jnp.outer(tt, inv_freq)
    params["cos"] = jnp.cos(freqs).astype(jnp.bfloat16).astype(jnp.float32)
    params["sin"] = jnp.sin(freqs).astype(jnp.bfloat16).astype(jnp.float32)
    return params


def pack_kernel_params(params):
    """Repack weights as 4x block-diagonal (128-lane-packed) bf16 matrices."""
    C, D, H, G = N_EMBD, HEAD_DIM, N_HEAD, GROUPS

    def bd4(w):                                   # (a,b) -> (4a,4b) block diagonal
        w = np.asarray(w, np.float32)
        a, b = w.shape
        out = np.zeros((G * a, G * b), np.float32)
        for g in range(G):
            out[g * a:(g + 1) * a, g * b:(g + 1) * b] = w
        return out

    def tile_np(v, rep):
        return np.tile(np.asarray(v, np.float32), (1, rep))

    bf16 = lambda a: jnp.asarray(a, jnp.bfloat16)
    f32 = lambda a: jnp.asarray(a, jnp.float32)

    # ---- fused input projection: [t_freq|x_t|features|pad] -> [h1|x_t_emb|feat_emb]
    te_w1 = np.asarray(params["te_w1"], np.float32)
    xt_w = np.asarray(params["xt_w"], np.float32)
    fp_w = np.asarray(params["fp_w"], np.float32)
    w_in = np.zeros((G * IN_W, 3 * CP), np.float32)
    for g in range(G):
        r, c = IN_W * g, C * g
        w_in[r:r + FREQ_EMB, c:c + C] = te_w1                              # t_freq -> h1
        w_in[r + FREQ_EMB, CP + c:CP + c + C] = xt_w[0]                    # x_t    -> x_t_emb
        w_in[r + FREQ_EMB + 1:r + FREQ_EMB + 1 + Y_N_POS,
             2 * CP + c:2 * CP + c + C] = fp_w                             # feats  -> feat_emb
    b_in = np.concatenate([tile_np(params["te_b1"], G),
                           tile_np(params["xt_b"], G),
                           tile_np(params["fp_b"], G)], axis=1)

    # ---- per-layer weights, stacked on a leading layer axis ----
    wqkv, wo, wfc, wmp, rms_w, rms_hw = [], [], [], [], [], []
    for bp in params["blocks"]:
        wqkv.append(np.concatenate([bd4(bp["wq"]), bd4(bp["wk"]), bd4(bp["wv"])], axis=1))
        wo.append(bd4(bp["wo"]))
        wfc.append(bd4(bp["wfc"]))
        wmp.append(bd4(bp["wmp"]))
        rms_w.append(tile_np(bp["rms_w"], G))
        rms_hw.append(tile_np(bp["rms_hw"], H * G))

    # ---- constant lane-structure matrices ----
    lane = np.arange(CP)
    grp32 = lane // C
    grp16 = lane // D
    gsum32 = (grp32[:, None] == grp32[None, :]).astype(np.float32)
    gsum16 = (grp16[:, None] == grp16[None, :]).astype(np.float32)
    partner = (lane // D) * D + (lane % D + D // 2) % D
    pswap = np.zeros((CP, CP), np.float32)
    pswap[partner, lane] = 1.0                   # (x @ pswap)[:, l] = x[:, partner[l]]

    cos = np.asarray(params["cos"], np.float32)  # (T, D/2)
    sin = np.asarray(params["sin"], np.float32)
    cos_row = np.tile(cos, (1, 2 * H * G))                                  # (T, CP)
    sin_row = np.tile(np.concatenate([sin, -sin], axis=1), (1, H * G))      # (T, CP)

    head_pk = bd4(params["head_w"])                                         # (CP, G)
    head_b = np.full((1, G), float(np.asarray(params["head_b"])[0, 0]), np.float32)

    return {
        "w_in": bf16(w_in), "b_in": f32(b_in),
        "te_w2": bf16(bd4(params["te_w2"])), "te_b2": f32(tile_np(params["te_b2"], G)),
        "wqkv": bf16(np.stack(wqkv)), "wo": bf16(np.stack(wo)),
        "wfc": bf16(np.stack(wfc)), "wmp": bf16(np.stack(wmp)),
        "rms_w": f32(np.stack(rms_w)), "rms_hw": f32(np.stack(rms_hw)),
        "gsum32": bf16(gsum32), "gsum16": bf16(gsum16), "pswap": bf16(pswap),
        "cos_row": f32(cos_row), "sin_row": f32(sin_row),
        "lnf_w": f32(tile_np(params["lnf_w"], G)), "lnf_b": f32(tile_np(params["lnf_b"], G)),
        "head_w": bf16(head_pk), "head_b": f32(head_b),
    }


# =============================================================================
if __name__ == "__main__":
    B = 200                       # non-multiple of 32: exercises the padding path
    key = jax.random.PRNGKey(0)
    kp, k1, k2, k3 = jax.random.split(key, 4)

    params = init_params(kp)
    kparams = pack_kernel_params(params)

    t = jax.random.uniform(k1, (B,), dtype=jnp.float32)          # scalar timesteps
    x_t = jax.random.normal(k2, (B, 1), dtype=jnp.float32)       # x_t (last dim 1)
    features = jax.random.normal(k3, (B, Y_N_POS), dtype=jnp.float32)

    fwd = jax.jit(functools.partial(cfm_forward_pallas, block_b=1024))
    out_kernel = jax.block_until_ready(fwd(t, x_t, features, kparams))

    out_ref = jax.block_until_ready(cfm_forward_ref(t, x_t, features, params))

    assert out_kernel.shape == (B, 1, 1), out_kernel.shape
    assert bool(jnp.all(jnp.isfinite(out_kernel)))
    # bf16 MXU operands (f32 accumulate) vs the pure-f32 reference -> slightly
    # looser tolerance than exact f32 parity; real layout/math bugs give O(1) error.
    assert bool(jnp.allclose(out_kernel, out_ref, rtol=3e-2, atol=3e-2)), (
        float(jnp.max(jnp.abs(out_kernel - out_ref))))

    print("KERNEL_OK")
</pallas_src>

<mosaic_0001>
module attributes {stable_mosaic.version = 11 : i64} {
  func.func @cfm_kernel(%arg0: i32, %arg1: memref<56x256xf32, #tpu.memory_space<vmem>>, %arg2: memref<256x384xbf16, #tpu.memory_space<vmem>>, %arg3: memref<1x384xf32, #tpu.memory_space<vmem>>, %arg4: memref<128x128xbf16, #tpu.memory_space<vmem>>, %arg5: memref<1x128xf32, #tpu.memory_space<vmem>>, %arg6: memref<2x128x384xbf16, #tpu.memory_space<vmem>>, %arg7: memref<2x128x128xbf16, #tpu.memory_space<vmem>>, %arg8: memref<2x128x512xbf16, #tpu.memory_space<vmem>>, %arg9: memref<2x512x128xbf16, #tpu.memory_space<vmem>>, %arg10: memref<2x1x128xf32, #tpu.memory_space<vmem>>, %arg11: memref<2x1x128xf32, #tpu.memory_space<vmem>>, %arg12: memref<128x128xbf16, #tpu.memory_space<vmem>>, %arg13: memref<128x128xbf16, #tpu.memory_space<vmem>>, %arg14: memref<128x128xbf16, #tpu.memory_space<vmem>>, %arg15: memref<3x128xf32, #tpu.memory_space<vmem>>, %arg16: memref<3x128xf32, #tpu.memory_space<vmem>>, %arg17: memref<1x128xf32, #tpu.memory_space<vmem>>, %arg18: memref<1x128xf32, #tpu.memory_space<vmem>>, %arg19: memref<128x4xbf16, #tpu.memory_space<vmem>>, %arg20: memref<1x4xf32, #tpu.memory_space<vmem>>, %arg21: memref<56x4xf32, #tpu.memory_space<vmem>>) attributes {dimension_semantics = [#tpu.dimension_semantics<parallel>], iteration_bounds = array<i64: 1>, scalar_prefetch = 0 : i64, scratch_operands = 0 : i64, tpu.core_type = #tpu.core_type<tc>, window_params = [{transform_indices = @transform_0, window_bounds = array<i64: 56, 256>}, {pipeline_mode = #tpu.pipeline_mode<synchronous>, transform_indices = @transform_1, window_bounds = array<i64: 256, 384>}, {pipeline_mode = #tpu.pipeline_mode<synchronous>, transform_indices = @transform_2, window_bounds = array<i64: 1, 384>}, {pipeline_mode = #tpu.pipeline_mode<synchronous>, transform_indices = @transform_3, window_bounds = array<i64: 128, 128>}, {pipeline_mode = #tpu.pipeline_mode<synchronous>, transform_indices = @transform_4, window_bounds = array<i64: 1, 128>}, {pipeline_mode = #tpu.pipeline_mode<synchronous>, transform_indices = @transform_5, window_bounds = array<i64: 2, 128, 384>}, {pipeline_mode = #tpu.pipeline_mode<synchronous>, transform_indices = @transform_6, window_bounds = array<i64: 2, 128, 128>}, {pipeline_mode = #tpu.pipeline_mode<synchronous>, transform_indices = @transform_7, window_bounds = array<i64: 2, 128, 512>}, {pipeline_mode = #tpu.pipeline_mode<synchronous>, transform_indices = @transform_8, window_bounds = array<i64: 2, 512, 128>}, {pipeline_mode = #tpu.pipeline_mode<synchronous>, transform_indices = @transform_9, window_bounds = array<i64: 2, 1, 128>}, {pipeline_mode = #tpu.pipeline_mode<synchronous>, transform_indices = @transform_10, window_bounds = array<i64: 2, 1, 128>}, {pipeline_mode = #tpu.pipeline_mode<synchronous>, transform_indices = @transform_11, window_bounds = array<i64: 128, 128>}, {pipeline_mode = #tpu.pipeline_mode<synchronous>, transform_indices = @transform_12, window_bounds = array<i64: 128, 128>}, {pipeline_mode = #tpu.pipeline_mode<synchronous>, transform_indices = @transform_13, window_bounds = array<i64: 128, 128>}, {pipeline_mode = #tpu.pipeline_mode<synchronous>, transform_indices = @transform_14, window_bounds = array<i64: 3, 128>}, {pipeline_mode = #tpu.pipeline_mode<synchronous>, transform_indices = @transform_15, window_bounds = array<i64: 3, 128>}, {pipeline_mode = #tpu.pipeline_mode<synchronous>, transform_indices = @transform_16, window_bounds = array<i64: 1, 128>}, {pipeline_mode = #tpu.pipeline_mode<synchronous>, transform_indices = @transform_17, window_bounds = array<i64: 1, 128>}, {pipeline_mode = #tpu.pipeline_mode<synchronous>, transform_indices = @transform_18, window_bounds = array<i64: 128, 4>}, {pipeline_mode = #tpu.pipeline_mode<synchronous>, transform_indices = @transform_19, window_bounds = array<i64: 1, 4>}, {transform_indices = @transform_20, window_bounds = array<i64: 56, 4>}]} {
    %c0 = arith.constant 0 : index
    %c0_0 = arith.constant 0 : index
    %0 = vector.load %arg12[%c0, %c0_0] : memref<128x128xbf16, #tpu.memory_space<vmem>>, vector<128x128xbf16>
    %c0_1 = arith.constant 0 : index
    %c0_2 = arith.constant 0 : index
    %1 = vector.load %arg13[%c0_1, %c0_2] : memref<128x128xbf16, #tpu.memory_space<vmem>>, vector<128x128xbf16>
    %c0_3 = arith.constant 0 : index
    %c0_4 = arith.constant 0 : index
    %2 = vector.load %arg14[%c0_3, %c0_4] : memref<128x128xbf16, #tpu.memory_space<vmem>>, vector<128x128xbf16>
    %c0_5 = arith.constant 0 : index
    %c0_6 = arith.constant 0 : index
    %3 = vector.load %arg1[%c0_5, %c0_6] : memref<56x256xf32, #tpu.memory_space<vmem>>, vector<56x256xf32>
    %c0_7 = arith.constant 0 : index
    %c0_8 = arith.constant 0 : index
    %4 = vector.load %arg2[%c0_7, %c0_8] : memref<256x384xbf16, #tpu.memory_space<vmem>>, vector<256x384xbf16>
    %5 = arith.truncf %3 : vector<56x256xf32> to vector<56x256xbf16>
    %cst = arith.constant dense<0.000000e+00> : vector<56x384xf32>
    %6 = tpu.matmul %5, %4, %cst {dimension_numbers = #tpu.dot_dimension_numbers<[1], [0], [0], [1], [0, 0, 1, 1], [], []>} : vector<56x256xbf16>, vector<256x384xbf16>, vector<56x384xf32> -> vector<56x384xf32>
    %c0_9 = arith.constant 0 : index
    %c0_10 = arith.constant 0 : index
    %7 = vector.load %arg3[%c0_9, %c0_10] : memref<1x384xf32, #tpu.memory_space<vmem>>, vector<1x384xf32>
    %8 = vector.broadcast %7 : vector<1x384xf32> to vector<56x384xf32>
    %9 = arith.addf %6, %8 : vector<56x384xf32>
    %10 = vector.extract_strided_slice %9 {offsets = [0, 0], sizes = [56, 128], strides = [1, 1]} : vector<56x384xf32> to vector<56x128xf32>
    %cst_11 = arith.constant 0.000000e+00 : f32
    %11 = vector.broadcast %cst_11 : f32 to vector<56x128xf32>
    %12 = arith.subf %11, %10 : vector<56x128xf32>
    %13 = math.exp %12 : vector<56x128xf32>
    %cst_12 = arith.constant 1.000000e+00 : f32
    %14 = vector.broadcast %cst_12 : f32 to vector<56x128xf32>
    %15 = arith.addf %14, %13 : vector<56x128xf32>
    %cst_13 = arith.constant 1.000000e+00 : f32
    %16 = vector.broadcast %cst_13 : f32 to vector<56x128xf32>
    %17 = arith.divf %16, %15 : vector<56x128xf32>
    %18 = arith.mulf %10, %17 : vector<56x128xf32>
    %c0_14 = arith.constant 0 : index
    %c0_15 = arith.constant 0 : index
    %19 = vector.load %arg4[%c0_14, %c0_15] : memref<128x128xbf16, #tpu.memory_space<vmem>>, vector<128x128xbf16>
    %20 = arith.truncf %18 : vector<56x128xf32> to vector<56x128xbf16>
    %cst_16 = arith.constant dense<0.000000e+00> : vector<56x128xf32>
    %21 = tpu.matmul %20, %19, %cst_16 {dimension_numbers = #tpu.dot_dimension_numbers<[1], [0], [0], [1], [0, 0, 1, 1], [], []>} : vector<56x128xbf16>, vector<128x128xbf16>, vector<56x128xf32> -> vector<56x128xf32>
    %c0_17 = arith.constant 0 : index
    %c0_18 = arith.constant 0 : index
    %22 = vector.load %arg5[%c0_17, %c0_18] : memref<1x128xf32, #tpu.memory_space<vmem>>, vector<1x128xf32>
    %23 = vector.broadcast %22 : vector<1x128xf32> to vector<56x128xf32>
    %24 = arith.addf %21, %23 : vector<56x128xf32>
    %25 = vector.extract_strided_slice %9 {offsets = [0, 128], sizes = [56, 128], strides = [1, 1]} : vector<56x384xf32> to vector<56x128xf32>
    %26 = vector.extract_strided_slice %9 {offsets = [0, 256], sizes = [56, 128], strides = [1, 1]} : vector<56x384xf32> to vector<56x128xf32>
    %27 = tpu.concatenate %24, %25, %26 in 0 : vector<56x128xf32>, vector<56x128xf32>, vector<56x128xf32> -> vector<168x128xf32>
    %c0_19 = arith.constant 0 : index
    %c0_20 = arith.constant 0 : index
    %28 = vector.load %arg15[%c0_19, %c0_20] : memref<3x128xf32, #tpu.memory_space<vmem>>, vector<1x128xf32>
    %29 = vector.shape_cast %28 : vector<1x128xf32> to vector<1x128xf32>
    %30 = vector.broadcast %29 : vector<1x128xf32> to vector<56x128xf32>
    %c1 = arith.constant 1 : index
    %c0_21 = arith.constant 0 : index
    %31 = vector.load %arg15[%c1, %c0_21] : memref<3x128xf32, #tpu.memory_space<vmem>>, vector<1x128xf32>
    %32 = vector.shape_cast %31 : vector<1x128xf32> to vector<1x128xf32>
    %33 = vector.broadcast %32 : vector<1x128xf32> to vector<56x128xf32>
    %c2 = arith.constant 2 : index
    %c0_22 = arith.constant 0 : index
    %34 = vector.load %arg15[%c2, %c0_22] : memref<3x128xf32, #tpu.memory_space<vmem>>, vector<1x128xf32>
    %35 = vector.shape_cast %34 : vector<1x128xf32> to vector<1x128xf32>
    %36 = vector.broadcast %35 : vector<1x128xf32> to vector<56x128xf32>
    %37 = tpu.concatenate %30, %33, %36 in 0 : vector<56x128xf32>, vector<56x128xf32>, vector<56x128xf32> -> vector<168x128xf32>
    %c0_23 = arith.constant 0 : index
    %c0_24 = arith.constant 0 : index
    %38 = vector.load %arg16[%c0_23, %c0_24] : memref<3x128xf32, #tpu.memory_space<vmem>>, vector<1x128xf32>
    %39 = vector.shape_cast %38 : vector<1x128xf32> to vector<1x128xf32>
    %40 = vector.broadcast %39 : vector<1x128xf32> to vector<56x128xf32>
    %c1_25 = arith.constant 1 : index
    %c0_26 = arith.constant 0 : index
    %41 = vector.load %arg16[%c1_25, %c0_26] : memref<3x128xf32, #tpu.memory_space<vmem>>, vector<1x128xf32>
    %42 = vector.shape_cast %41 : vector<1x128xf32> to vector<1x128xf32>
    %43 = vector.broadcast %42 : vector<1x128xf32> to vector<56x128xf32>
    %c2_27 = arith.constant 2 : index
    %c0_28 = arith.constant 0 : index
    %44 = vector.load %arg16[%c2_27, %c0_28] : memref<3x128xf32, #tpu.memory_space<vmem>>, vector<1x128xf32>
    %45 = vector.shape_cast %44 : vector<1x128xf32> to vector<1x128xf32>
    %46 = vector.broadcast %45 : vector<1x128xf32> to vector<56x128xf32>
    %47 = tpu.concatenate %40, %43, %46 in 0 : vector<56x128xf32>, vector<56x128xf32>, vector<56x128xf32> -> vector<168x128xf32>
    %c0_29 = arith.constant 0 : index
    %c0_30 = arith.constant 0 : index
    %c0_31 = arith.constant 0 : index
    %48 = vector.load %arg10[%c0_29, %c0_30, %c0_31] : memref<2x1x128xf32, #tpu.memory_space<vmem>>, vector<1x1x128xf32>
    %49 = vector.shape_cast %48 : vector<1x1x128xf32> to vector<1x128xf32>
    %c0_32 = arith.constant 0 : index
    %c0_33 = arith.constant 0 : index
    %c0_34 = arith.constant 0 : index
    %50 = vector.load %arg11[%c0_32, %c0_33, %c0_34] : memref<2x1x128xf32, #tpu.memory_space<vmem>>, vector<1x1x128xf32>
    %51 = vector.shape_cast %50 : vector<1x1x128xf32> to vector<1x128xf32>
    %52 = arith.mulf %27, %27 : vector<168x128xf32>
    %53 = arith.truncf %52 : vector<168x128xf32> to vector<168x128xbf16>
    %cst_35 = arith.constant dense<0.000000e+00> : vector<168x128xf32>
    %54 = tpu.matmul %53, %0, %cst_35 {dimension_numbers = #tpu.dot_dimension_numbers<[1], [0], [0], [1], [0, 0, 1, 1], [], []>} : vector<168x128xbf16>, vector<128x128xbf16>, vector<168x128xf32> -> vector<168x128xf32>
    %cst_36 = arith.constant 3.125000e-02 : f32
    %55 = vector.broadcast %cst_36 : f32 to vector<168x128xf32>
    %56 = arith.mulf %54, %55 : vector<168x128xf32>
    %cst_37 = arith.constant 9.99999974E-6 : f32
    %57 = vector.broadcast %cst_37 : f32 to vector<168x128xf32>
    %58 = arith.addf %56, %57 : vector<168x128xf32>
    %59 = math.rsqrt %58 : vector<168x128xf32>
    %60 = arith.mulf %27, %59 : vector<168x128xf32>
    %61 = vector.broadcast %49 : vector<1x128xf32> to vector<168x128xf32>
    %62 = arith.mulf %60, %61 : vector<168x128xf32>
    %c0_38 = arith.constant 0 : index
    %c0_39 = arith.constant 0 : index
    %c0_40 = arith.constant 0 : index
    %63 = vector.load %arg6[%c0_38, %c0_39, %c0_40] : memref<2x128x384xbf16, #tpu.memory_space<vmem>>, vector<1x128x384xbf16>
    %64 = vector.shape_cast %63 : vector<1x128x384xbf16> to vector<128x384xbf16>
    %65 = arith.truncf %62 : vector<168x128xf32> to vector<168x128xbf16>
    %cst_41 = arith.constant dense<0.000000e+00> : vector<168x384xf32>
    %66 = tpu.matmul %65, %64, %cst_41 {dimension_numbers = #tpu.dot_dimension_numbers<[1], [0], [0], [1], [0, 0, 1, 1], [], []>} : vector<168x128xbf16>, vector<128x384xbf16>, vector<168x384xf32> -> vector<168x384xf32>
    %67 = vector.extract_strided_slice %66 {offsets = [0, 0], sizes = [168, 128], strides = [1, 1]} : vector<168x384xf32> to vector<168x128xf32>
    %68 = arith.mulf %67, %67 : vector<168x128xf32>
    %69 = arith.truncf %68 : vector<168x128xf32> to vector<168x128xbf16>
    %cst_42 = arith.constant dense<0.000000e+00> : vector<168x128xf32>
    %70 = tpu.matmul %69, %1, %cst_42 {dimension_numbers = #tpu.dot_dimension_numbers<[1], [0], [0], [1], [0, 0, 1, 1], [], []>} : vector<168x128xbf16>, vector<128x128xbf16>, vector<168x128xf32> -> vector<168x128xf32>
    %cst_43 = arith.constant 6.250000e-02 : f32
    %71 = vector.broadcast %cst_43 : f32 to vector<168x128xf32>
    %72 = arith.mulf %70, %71 : vector<168x128xf32>
    %cst_44 = arith.constant 9.99999974E-6 : f32
    %73 = vector.broadcast %cst_44 : f32 to vector<168x128xf32>
    %74 = arith.addf %72, %73 : vector<168x128xf32>
    %75 = math.rsqrt %74 : vector<168x128xf32>
    %76 = arith.mulf %67, %75 : vector<168x128xf32>
    %77 = vector.broadcast %51 : vector<1x128xf32> to vector<168x128xf32>
    %78 = arith.mulf %76, %77 : vector<168x128xf32>
    %79 = vector.extract_strided_slice %66 {offsets = [0, 128], sizes = [168, 128], strides = [1, 1]} : vector<168x384xf32> to vector<168x128xf32>
    %80 = arith.mulf %79, %79 : vector<168x128xf32>
    %81 = arith.truncf %80 : vector<168x128xf32> to vector<168x128xbf16>
    %cst_45 = arith.constant dense<0.000000e+00> : vector<168x128xf32>
    %82 = tpu.matmul %81, %1, %cst_45 {dimension_numbers = #tpu.dot_dimension_numbers<[1], [0], [0], [1], [0, 0, 1, 1], [], []>} : vector<168x128xbf16>, vector<128x128xbf16>, vector<168x128xf32> -> vector<168x128xf32>
    %cst_46 = arith.constant 6.250000e-02 : f32
    %83 = vector.broadcast %cst_46 : f32 to vector<168x128xf32>
    %84 = arith.mulf %82, %83 : vector<168x128xf32>
    %cst_47 = arith.constant 9.99999974E-6 : f32
    %85 = vector.broadcast %cst_47 : f32 to vector<168x128xf32>
    %86 = arith.addf %84, %85 : vector<168x128xf32>
    %87 = math.rsqrt %86 : vector<168x128xf32>
    %88 = arith.mulf %79, %87 : vector<168x128xf32>
    %89 = vector.broadcast %51 : vector<1x128xf32> to vector<168x128xf32>
    %90 = arith.mulf %88, %89 : vector<168x128xf32>
    %91 = vector.extract_strided_slice %66 {offsets = [0, 256], sizes = [168, 128], strides = [1, 1]} : vector<168x384xf32> to vector<168x128xf32>
    %92 = arith.mulf %78, %37 : vector<168x128xf32>
    %93 = arith.truncf %78 : vector<168x128xf32> to vector<168x128xbf16>
    %cst_48 = arith.constant dense<0.000000e+00> : vector<168x128xf32>
    %94 = tpu.matmul %93, %2, %cst_48 {dimension_numbers = #tpu.dot_dimension_numbers<[1], [0], [0], [1], [0, 0, 1, 1], [], []>} : vector<168x128xbf16>, vector<128x128xbf16>, vector<168x128xf32> -> vector<168x128xf32>
    %95 = arith.mulf %94, %47 : vector<168x128xf32>
    %96 = arith.addf %92, %95 : vector<168x128xf32>
    %97 = arith.mulf %90, %37 : vector<168x128xf32>
    %98 = arith.truncf %90 : vector<168x128xf32> to vector<168x128xbf16>
    %cst_49 = arith.constant dense<0.000000e+00> : vector<168x128xf32>
    %99 = tpu.matmul %98, %2, %cst_49 {dimension_numbers = #tpu.dot_dimension_numbers<[1], [0], [0], [1], [0, 0, 1, 1], [], []>} : vector<168x128xbf16>, vector<128x128xbf16>, vector<168x128xf32> -> vector<168x128xf32>
    %100 = arith.mulf %99, %47 : vector<168x128xf32>
    %101 = arith.addf %97, %100 : vector<168x128xf32>
    %102 = vector.extract_strided_slice %96 {offsets = [0, 0], sizes = [56, 128], strides = [1, 1]} : vector<168x128xf32> to vector<56x128xf32>
    %103 = vector.extract_strided_slice %96 {offsets = [56, 0], sizes = [56, 128], strides = [1, 1]} : vector<168x128xf32> to vector<56x128xf32>
    %104 = vector.extract_strided_slice %96 {offsets = [112, 0], sizes = [56, 128], strides = [1, 1]} : vector<168x128xf32> to vector<56x128xf32>
    %105 = vector.extract_strided_slice %101 {offsets = [0, 0], sizes = [56, 128], strides = [1, 1]} : vector<168x128xf32> to vector<56x128xf32>
    %106 = vector.extract_strided_slice %101 {offsets = [56, 0], sizes = [56, 128], strides = [1, 1]} : vector<168x128xf32> to vector<56x128xf32>
    %107 = vector.extract_strided_slice %101 {offsets = [112, 0], sizes = [56, 128], strides = [1, 1]} : vector<168x128xf32> to vector<56x128xf32>
    %108 = vector.extract_strided_slice %91 {offsets = [0, 0], sizes = [56, 128], strides = [1, 1]} : vector<168x128xf32> to vector<56x128xf32>
    %109 = vector.extract_strided_slice %91 {offsets = [56, 0], sizes = [56, 128], strides = [1, 1]} : vector<168x128xf32> to vector<56x128xf32>
    %110 = vector.extract_strided_slice %91 {offsets = [112, 0], sizes = [56, 128], strides = [1, 1]} : vector<168x128xf32> to vector<56x128xf32>
    %111 = arith.mulf %102, %105 : vector<56x128xf32>
    %112 = arith.mulf %102, %106 : vector<56x128xf32>
    %113 = arith.mulf %102, %107 : vector<56x128xf32>
    %114 = arith.mulf %103, %105 : vector<56x128xf32>
    %115 = arith.mulf %103, %106 : vector<56x128xf32>
    %116 = arith.mulf %103, %107 : vector<56x128xf32>
    %117 = arith.mulf %104, %105 : vector<56x128xf32>
    %118 = arith.mulf %104, %106 : vector<56x128xf32>
    %119 = arith.mulf %104, %107 : vector<56x128xf32>
    %120 = tpu.concatenate %111, %112, %113, %114, %115, %116, %117, %118, %119 in 0 : vector<56x128xf32>, vector<56x128xf32>, vector<56x128xf32>, vector<56x128xf32>, vector<56x128xf32>, vector<56x128xf32>, vector<56x128xf32>, vector<56x128xf32>, vector<56x128xf32> -> vector<504x128xf32>
    %121 = arith.truncf %120 : vector<504x128xf32> to vector<504x128xbf16>
    %cst_50 = arith.constant dense<0.000000e+00> : vector<504x128xf32>
    %122 = tpu.matmul %121, %1, %cst_50 {dimension_numbers = #tpu.dot_dimension_numbers<[1], [0], [0], [1], [0, 0, 1, 1], [], []>} : vector<504x128xbf16>, vector<128x128xbf16>, vector<504x128xf32> -> vector<504x128xf32>
    %cst_51 = arith.constant 2.500000e-01 : f32
    %123 = vector.broadcast %cst_51 : f32 to vector<504x128xf32>
    %124 = arith.mulf %122, %123 : vector<504x128xf32>
    %125 = vector.extract_strided_slice %124 {offsets = [0, 0], sizes = [56, 128], strides = [1, 1]} : vector<504x128xf32> to vector<56x128xf32>
    %126 = vector.extract_strided_slice %124 {offsets = [56, 0], sizes = [56, 128], strides = [1, 1]} : vector<504x128xf32> to vector<56x128xf32>
    %127 = vector.extract_strided_slice %124 {offsets = [112, 0], sizes = [56, 128], strides = [1, 1]} : vector<504x128xf32> to vector<56x128xf32>
    %128 = arith.maximumf %125, %126 : vector<56x128xf32>
    %129 = arith.maximumf %128, %127 : vector<56x128xf32>
    %130 = arith.subf %125, %129 : vector<56x128xf32>
    %131 = math.exp %130 : vector<56x128xf32>
    %132 = arith.subf %126, %129 : vector<56x128xf32>
    %133 = math.exp %132 : vector<56x128xf32>
    %134 = arith.subf %127, %129 : vector<56x128xf32>
    %135 = math.exp %134 : vector<56x128xf32>
    %136 = arith.addf %131, %133 : vector<56x128xf32>
    %137 = arith.addf %136, %135 : vector<56x128xf32>
    %138 = tpu.reciprocal %137 {approx = true} : vector<56x128xf32> -> vector<56x128xf32>
    %139 = arith.mulf %131, %108 : vector<56x128xf32>
    %140 = arith.mulf %133, %109 : vector<56x128xf32>
    %141 = arith.addf %139, %140 : vector<56x128xf32>
    %142 = arith.mulf %135, %110 : vector<56x128xf32>
    %143 = arith.addf %141, %142 : vector<56x128xf32>
    %144 = arith.mulf %143, %138 : vector<56x128xf32>
    %145 = vector.extract_strided_slice %124 {offsets = [168, 0], sizes = [56, 128], strides = [1, 1]} : vector<504x128xf32> to vector<56x128xf32>
    %146 = vector.extract_strided_slice %124 {offsets = [224, 0], sizes = [56, 128], strides = [1, 1]} : vector<504x128xf32> to vector<56x128xf32>
    %147 = vector.extract_strided_slice %124 {offsets = [280, 0], sizes = [56, 128], strides = [1, 1]} : vector<504x128xf32> to vector<56x128xf32>
    %148 = arith.maximumf %145, %146 : vector<56x128xf32>
    %149 = arith.maximumf %148, %147 : vector<56x128xf32>
    %150 = arith.subf %145, %149 : vector<56x128xf32>
    %151 = math.exp %150 : vector<56x128xf32>
    %152 = arith.subf %146, %149 : vector<56x128xf32>
    %153 = math.exp %152 : vector<56x128xf32>
    %154 = arith.subf %147, %149 : vector<56x128xf32>
    %155 = math.exp %154 : vector<56x128xf32>
    %156 = arith.addf %151, %153 : vector<56x128xf32>
    %157 = arith.addf %156, %155 : vector<56x128xf32>
    %158 = tpu.reciprocal %157 {approx = true} : vector<56x128xf32> -> vector<56x128xf32>
    %159 = arith.mulf %151, %108 : vector<56x128xf32>
    %160 = arith.mulf %153, %109 : vector<56x128xf32>
    %161 = arith.addf %159, %160 : vector<56x128xf32>
    %162 = arith.mulf %155, %110 : vector<56x128xf32>
    %163 = arith.addf %161, %162 : vector<56x128xf32>
    %164 = arith.mulf %163, %158 : vector<56x128xf32>
    %165 = vector.extract_strided_slice %124 {offsets = [336, 0], sizes = [56, 128], strides = [1, 1]} : vector<504x128xf32> to vector<56x128xf32>
    %166 = vector.extract_strided_slice %124 {offsets = [392, 0], sizes = [56, 128], strides = [1, 1]} : vector<504x128xf32> to vector<56x128xf32>
    %167 = vector.extract_strided_slice %124 {offsets = [448, 0], sizes = [56, 128], strides = [1, 1]} : vector<504x128xf32> to vector<56x128xf32>
    %168 = arith.maximumf %165, %166 : vector<56x128xf32>
    %169 = arith.maximumf %168, %167 : vector<56x128xf32>
    %170 = arith.subf %165, %169 : vector<56x128xf32>
    %171 = math.exp %170 : vector<56x128xf32>
    %172 = arith.subf %166, %169 : vector<56x128xf32>
    %173 = math.exp %172 : vector<56x128xf32>
    %174 = arith.subf %167, %169 : vector<56x128xf32>
    %175 = math.exp %174 : vector<56x128xf32>
    %176 = arith.addf %171, %173 : vector<56x128xf32>
    %177 = arith.addf %176, %175 : vector<56x128xf32>
    %178 = tpu.reciprocal %177 {approx = true} : vector<56x128xf32> -> vector<56x128xf32>
    %179 = arith.mulf %171, %108 : vector<56x128xf32>
    %180 = arith.mulf %173, %109 : vector<56x128xf32>
    %181 = arith.addf %179, %180 : vector<56x128xf32>
    %182 = arith.mulf %175, %110 : vector<56x128xf32>
    %183 = arith.addf %181, %182 : vector<56x128xf32>
    %184 = arith.mulf %183, %178 : vector<56x128xf32>
    %185 = tpu.concatenate %144, %164, %184 in 0 : vector<56x128xf32>, vector<56x128xf32>, vector<56x128xf32> -> vector<168x128xf32>
    %c0_52 = arith.constant 0 : index
    %c0_53 = arith.constant 0 : index
    %c0_54 = arith.constant 0 : index
    %186 = vector.load %arg7[%c0_52, %c0_53, %c0_54] : memref<2x128x128xbf16, #tpu.memory_space<vmem>>, vector<1x128x128xbf16>
    %187 = vector.shape_cast %186 : vector<1x128x128xbf16> to vector<128x128xbf16>
    %188 = arith.truncf %185 : vector<168x128xf32> to vector<168x128xbf16>
    %cst_55 = arith.constant dense<0.000000e+00> : vector<168x128xf32>
    %189 = tpu.matmul %188, %187, %cst_55 {dimension_numbers = #tpu.dot_dimension_numbers<[1], [0], [0], [1], [0, 0, 1, 1], [], []>} : vector<168x128xbf16>, vector<128x128xbf16>, vector<168x128xf32> -> vector<168x128xf32>
    %190 = arith.addf %27, %189 : vector<168x128xf32>
    %191 = arith.mulf %190, %190 : vector<168x128xf32>
    %192 = arith.truncf %191 : vector<168x128xf32> to vector<168x128xbf16>
    %cst_56 = arith.constant dense<0.000000e+00> : vector<168x128xf32>
    %193 = tpu.matmul %192, %0, %cst_56 {dimension_numbers = #tpu.dot_dimension_numbers<[1], [0], [0], [1], [0, 0, 1, 1], [], []>} : vector<168x128xbf16>, vector<128x128xbf16>, vector<168x128xf32> -> vector<168x128xf32>
    %cst_57 = arith.constant 3.125000e-02 : f32
    %194 = vector.broadcast %cst_57 : f32 to vector<168x128xf32>
    %195 = arith.mulf %193, %194 : vector<168x128xf32>
    %cst_58 = arith.constant 9.99999974E-6 : f32
    %196 = vector.broadcast %cst_58 : f32 to vector<168x128xf32>
    %197 = arith.addf %195, %196 : vector<168x128xf32>
    %198 = math.rsqrt %197 : vector<168x128xf32>
    %199 = arith.mulf %190, %198 : vector<168x128xf32>
    %200 = vector.broadcast %49 : vector<1x128xf32> to vector<168x128xf32>
    %201 = arith.mulf %199, %200 : vector<168x128xf32>
    %c0_59 = arith.constant 0 : index
    %c0_60 = arith.constant 0 : index
    %c0_61 = arith.constant 0 : index
    %202 = vector.load %arg8[%c0_59, %c0_60, %c0_61] : memref<2x128x512xbf16, #tpu.memory_space<vmem>>, vector<1x128x512xbf16>
    %203 = vector.shape_cast %202 : vector<1x128x512xbf16> to vector<128x512xbf16>
    %204 = arith.truncf %201 : vector<168x128xf32> to vector<168x128xbf16>
    %cst_62 = arith.constant dense<0.000000e+00> : vector<168x512xf32>
    %205 = tpu.matmul %204, %203, %cst_62 {dimension_numbers = #tpu.dot_dimension_numbers<[1], [0], [0], [1], [0, 0, 1, 1], [], []>} : vector<168x128xbf16>, vector<128x512xbf16>, vector<168x512xf32> -> vector<168x512xf32>
    %cst_63 = arith.constant 0.000000e+00 : f32
    %206 = vector.broadcast %cst_63 : f32 to vector<168x512xf32>
    %207 = arith.maximumf %205, %206 : vector<168x512xf32>
    %208 = arith.mulf %207, %207 : vector<168x512xf32>
    %c0_64 = arith.constant 0 : index
    %c0_65 = arith.constant 0 : index
    %c0_66 = arith.constant 0 : index
    %209 = vector.load %arg9[%c0_64, %c0_65, %c0_66] : memref<2x512x128xbf16, #tpu.memory_space<vmem>>, vector<1x512x128xbf16>
    %210 = vector.shape_cast %209 : vector<1x512x128xbf16> to vector<512x128xbf16>
    %211 = arith.truncf %208 : vector<168x512xf32> to vector<168x512xbf16>
    %cst_67 = arith.constant dense<0.000000e+00> : vector<168x128xf32>
    %212 = tpu.matmul %211, %210, %cst_67 {dimension_numbers = #tpu.dot_dimension_numbers<[1], [0], [0], [1], [0, 0, 1, 1], [], []>} : vector<168x512xbf16>, vector<512x128xbf16>, vector<168x128xf32> -> vector<168x128xf32>
    %213 = arith.addf %190, %212 : vector<168x128xf32>
    %c1_68 = arith.constant 1 : index
    %c0_69 = arith.constant 0 : index
    %c0_70 = arith.constant 0 : index
    %214 = vector.load %arg10[%c1_68, %c0_69, %c0_70] : memref<2x1x128xf32, #tpu.memory_space<vmem>>, vector<1x1x128xf32>
    %215 = vector.shape_cast %214 : vector<1x1x128xf32> to vector<1x128xf32>
    %c1_71 = arith.constant 1 : index
    %c0_72 = arith.constant 0 : index
    %c0_73 = arith.constant 0 : index
    %216 = vector.load %arg11[%c1_71, %c0_72, %c0_73] : memref<2x1x128xf32, #tpu.memory_space<vmem>>, vector<1x1x128xf32>
    %217 = vector.shape_cast %216 : vector<1x1x128xf32> to vector<1x128xf32>
    %218 = arith.mulf %213, %213 : vector<168x128xf32>
    %219 = arith.truncf %218 : vector<168x128xf32> to vector<168x128xbf16>
    %cst_74 = arith.constant dense<0.000000e+00> : vector<168x128xf32>
    %220 = tpu.matmul %219, %0, %cst_74 {dimension_numbers = #tpu.dot_dimension_numbers<[1], [0], [0], [1], [0, 0, 1, 1], [], []>} : vector<168x128xbf16>, vector<128x128xbf16>, vector<168x128xf32> -> vector<168x128xf32>
    %cst_75 = arith.constant 3.125000e-02 : f32
    %221 = vector.broadcast %cst_75 : f32 to vector<168x128xf32>
    %222 = arith.mulf %220, %221 : vector<168x128xf32>
    %cst_76 = arith.constant 9.99999974E-6 : f32
    %223 = vector.broadcast %cst_76 : f32 to vector<168x128xf32>
    %224 = arith.addf %222, %223 : vector<168x128xf32>
    %225 = math.rsqrt %224 : vector<168x128xf32>
    %226 = arith.mulf %213, %225 : vector<168x128xf32>
    %227 = vector.broadcast %215 : vector<1x128xf32> to vector<168x128xf32>
    %228 = arith.mulf %226, %227 : vector<168x128xf32>
    %c1_77 = arith.constant 1 : index
    %c0_78 = arith.constant 0 : index
    %c0_79 = arith.constant 0 : index
    %229 = vector.load %arg6[%c1_77, %c0_78, %c0_79] : memref<2x128x384xbf16, #tpu.memory_space<vmem>>, vector<1x128x384xbf16>
    %230 = vector.shape_cast %229 : vector<1x128x384xbf16> to vector<128x384xbf16>
    %231 = arith.truncf %228 : vector<168x128xf32> to vector<168x128xbf16>
    %cst_80 = arith.constant dense<0.000000e+00> : vector<168x384xf32>
    %232 = tpu.matmul %231, %230, %cst_80 {dimension_numbers = #tpu.dot_dimension_numbers<[1], [0], [0], [1], [0, 0, 1, 1], [], []>} : vector<168x128xbf16>, vector<128x384xbf16>, vector<168x384xf32> -> vector<168x384xf32>
    %233 = vector.extract_strided_slice %232 {offsets = [0, 0], sizes = [168, 128], strides = [1, 1]} : vector<168x384xf32> to vector<168x128xf32>
    %234 = arith.mulf %233, %233 : vector<168x128xf32>
    %235 = arith.truncf %234 : vector<168x128xf32> to vector<168x128xbf16>
    %cst_81 = arith.constant dense<0.000000e+00> : vector<168x128xf32>
    %236 = tpu.matmul %235, %1, %cst_81 {dimension_numbers = #tpu.dot_dimension_numbers<[1], [0], [0], [1], [0, 0, 1, 1], [], []>} : vector<168x128xbf16>, vector<128x128xbf16>, vector<168x128xf32> -> vector<168x128xf32>
    %cst_82 = arith.constant 6.250000e-02 : f32
    %237 = vector.broadcast %cst_82 : f32 to vector<168x128xf32>
    %238 = arith.mulf %236, %237 : vector<168x128xf32>
    %cst_83 = arith.constant 9.99999974E-6 : f32
    %239 = vector.broadcast %cst_83 : f32 to vector<168x128xf32>
    %240 = arith.addf %238, %239 : vector<168x128xf32>
    %241 = math.rsqrt %240 : vector<168x128xf32>
    %242 = arith.mulf %233, %241 : vector<168x128xf32>
    %243 = vector.broadcast %217 : vector<1x128xf32> to vector<168x128xf32>
    %244 = arith.mulf %242, %243 : vector<168x128xf32>
    %245 = vector.extract_strided_slice %232 {offsets = [0, 128], sizes = [168, 128], strides = [1, 1]} : vector<168x384xf32> to vector<168x128xf32>
    %246 = arith.mulf %245, %245 : vector<168x128xf32>
    %247 = arith.truncf %246 : vector<168x128xf32> to vector<168x128xbf16>
    %cst_84 = arith.constant dense<0.000000e+00> : vector<168x128xf32>
    %248 = tpu.matmul %247, %1, %cst_84 {dimension_numbers = #tpu.dot_dimension_numbers<[1], [0], [0], [1], [0, 0, 1, 1], [], []>} : vector<168x128xbf16>, vector<128x128xbf16>, vector<168x128xf32> -> vector<168x128xf32>
    %cst_85 = arith.constant 6.250000e-02 : f32
    %249 = vector.broadcast %cst_85 : f32 to vector<168x128xf32>
    %250 = arith.mulf %248, %249 : vector<168x128xf32>
    %cst_86 = arith.constant 9.99999974E-6 : f32
    %251 = vector.broadcast %cst_86 : f32 to vector<168x128xf32>
    %252 = arith.addf %250, %251 : vector<168x128xf32>
    %253 = math.rsqrt %252 : vector<168x128xf32>
    %254 = arith.mulf %245, %253 : vector<168x128xf32>
    %255 = vector.broadcast %217 : vector<1x128xf32> to vector<168x128xf32>
    %256 = arith.mulf %254, %255 : vector<168x128xf32>
    %257 = vector.extract_strided_slice %232 {offsets = [0, 256], sizes = [168, 128], strides = [1, 1]} : vector<168x384xf32> to vector<168x128xf32>
    %258 = arith.mulf %244, %37 : vector<168x128xf32>
    %259 = arith.truncf %244 : vector<168x128xf32> to vector<168x128xbf16>
    %cst_87 = arith.constant dense<0.000000e+00> : vector<168x128xf32>
    %260 = tpu.matmul %259, %2, %cst_87 {dimension_numbers = #tpu.dot_dimension_numbers<[1], [0], [0], [1], [0, 0, 1, 1], [], []>} : vector<168x128xbf16>, vector<128x128xbf16>, vector<168x128xf32> -> vector<168x128xf32>
    %261 = arith.mulf %260, %47 : vector<168x128xf32>
    %262 = arith.addf %258, %261 : vector<168x128xf32>
    %263 = arith.mulf %256, %37 : vector<168x128xf32>
    %264 = arith.truncf %256 : vector<168x128xf32> to vector<168x128xbf16>
    %cst_88 = arith.constant dense<0.000000e+00> : vector<168x128xf32>
    %265 = tpu.matmul %264, %2, %cst_88 {dimension_numbers = #tpu.dot_dimension_numbers<[1], [0], [0], [1], [0, 0, 1, 1], [], []>} : vector<168x128xbf16>, vector<128x128xbf16>, vector<168x128xf32> -> vector<168x128xf32>
    %266 = arith.mulf %265, %47 : vector<168x128xf32>
    %267 = arith.addf %263, %266 : vector<168x128xf32>
    %268 = vector.extract_strided_slice %262 {offsets = [0, 0], sizes = [56, 128], strides = [1, 1]} : vector<168x128xf32> to vector<56x128xf32>
    %269 = vector.extract_strided_slice %262 {offsets = [56, 0], sizes = [56, 128], strides = [1, 1]} : vector<168x128xf32> to vector<56x128xf32>
    %270 = vector.extract_strided_slice %262 {offsets = [112, 0], sizes = [56, 128], strides = [1, 1]} : vector<168x128xf32> to vector<56x128xf32>
    %271 = vector.extract_strided_slice %267 {offsets = [0, 0], sizes = [56, 128], strides = [1, 1]} : vector<168x128xf32> to vector<56x128xf32>
    %272 = vector.extract_strided_slice %267 {offsets = [56, 0], sizes = [56, 128], strides = [1, 1]} : vector<168x128xf32> to vector<56x128xf32>
    %273 = vector.extract_strided_slice %267 {offsets = [112, 0], sizes = [56, 128], strides = [1, 1]} : vector<168x128xf32> to vector<56x128xf32>
    %274 = vector.extract_strided_slice %257 {offsets = [0, 0], sizes = [56, 128], strides = [1, 1]} : vector<168x128xf32> to vector<56x128xf32>
    %275 = vector.extract_strided_slice %257 {offsets = [56, 0], sizes = [56, 128], strides = [1, 1]} : vector<168x128xf32> to vector<56x128xf32>
    %276 = vector.extract_strided_slice %257 {offsets = [112, 0], sizes = [56, 128], strides = [1, 1]} : vector<168x128xf32> to vector<56x128xf32>
    %277 = arith.mulf %268, %271 : vector<56x128xf32>
    %278 = arith.mulf %268, %272 : vector<56x128xf32>
    %279 = arith.mulf %268, %273 : vector<56x128xf32>
    %280 = arith.mulf %269, %271 : vector<56x128xf32>
    %281 = arith.mulf %269, %272 : vector<56x128xf32>
    %282 = arith.mulf %269, %273 : vector<56x128xf32>
    %283 = arith.mulf %270, %271 : vector<56x128xf32>
    %284 = arith.mulf %270, %272 : vector<56x128xf32>
    %285 = arith.mulf %270, %273 : vector<56x128xf32>
    %286 = tpu.concatenate %277, %278, %279, %280, %281, %282, %283, %284, %285 in 0 : vector<56x128xf32>, vector<56x128xf32>, vector<56x128xf32>, vector<56x128xf32>, vector<56x128xf32>, vector<56x128xf32>, vector<56x128xf32>, vector<56x128xf32>, vector<56x128xf32> -> vector<504x128xf32>
    %287 = arith.truncf %286 : vector<504x128xf32> to vector<504x128xbf16>
    %cst_89 = arith.constant dense<0.000000e+00> : vector<504x128xf32>
    %288 = tpu.matmul %287, %1, %cst_89 {dimension_numbers = #tpu.dot_dimension_numbers<[1], [0], [0], [1], [0, 0, 1, 1], [], []>} : vector<504x128xbf16>, vector<128x128xbf16>, vector<504x128xf32> -> vector<504x128xf32>
    %cst_90 = arith.constant 2.500000e-01 : f32
    %289 = vector.broadcast %cst_90 : f32 to vector<504x128xf32>
    %290 = arith.mulf %288, %289 : vector<504x128xf32>
    %291 = vector.extract_strided_slice %290 {offsets = [0, 0], sizes = [56, 128], strides = [1, 1]} : vector<504x128xf32> to vector<56x128xf32>
    %292 = vector.extract_strided_slice %290 {offsets = [56, 0], sizes = [56, 128], strides = [1, 1]} : vector<504x128xf32> to vector<56x128xf32>
    %293 = vector.extract_strided_slice %290 {offsets = [112, 0], sizes = [56, 128], strides = [1, 1]} : vector<504x128xf32> to vector<56x128xf32>
    %294 = arith.maximumf %291, %292 : vector<56x128xf32>
    %295 = arith.maximumf %294, %293 : vector<56x128xf32>
    %296 = arith.subf %291, %295 : vector<56x128xf32>
    %297 = math.exp %296 : vector<56x128xf32>
    %298 = arith.subf %292, %295 : vector<56x128xf32>
    %299 = math.exp %298 : vector<56x128xf32>
    %300 = arith.subf %293, %295 : vector<56x128xf32>
    %301 = math.exp %300 : vector<56x128xf32>
    %302 = arith.addf %297, %299 : vector<56x128xf32>
    %303 = arith.addf %302, %301 : vector<56x128xf32>
    %304 = tpu.reciprocal %303 {approx = true} : vector<56x128xf32> -> vector<56x128xf32>
    %305 = arith.mulf %297, %274 : vector<56x128xf32>
    %306 = arith.mulf %299, %275 : vector<56x128xf32>
    %307 = arith.addf %305, %306 : vector<56x128xf32>
    %308 = arith.mulf %301, %276 : vector<56x128xf32>
    %309 = arith.addf %307, %308 : vector<56x128xf32>
    %310 = arith.mulf %309, %304 : vector<56x128xf32>
    %311 = vector.extract_strided_slice %290 {offsets = [168, 0], sizes = [56, 128], strides = [1, 1]} : vector<504x128xf32> to vector<56x128xf32>
    %312 = vector.extract_strided_slice %290 {offsets = [224, 0], sizes = [56, 128], strides = [1, 1]} : vector<504x128xf32> to vector<56x128xf32>
    %313 = vector.extract_strided_slice %290 {offsets = [280, 0], sizes = [56, 128], strides = [1, 1]} : vector<504x128xf32> to vector<56x128xf32>
    %314 = arith.maximumf %311, %312 : vector<56x128xf32>
    %315 = arith.maximumf %314, %313 : vector<56x128xf32>
    %316 = arith.subf %311, %315 : vector<56x128xf32>
    %317 = math.exp %316 : vector<56x128xf32>
    %318 = arith.subf %312, %315 : vector<56x128xf32>
    %319 = math.exp %318 : vector<56x128xf32>
    %320 = arith.subf %313, %315 : vector<56x128xf32>
    %321 = math.exp %320 : vector<56x128xf32>
    %322 = arith.addf %317, %319 : vector<56x128xf32>
    %323 = arith.addf %322, %321 : vector<56x128xf32>
    %324 = tpu.reciprocal %323 {approx = true} : vector<56x128xf32> -> vector<56x128xf32>
    %325 = arith.mulf %317, %274 : vector<56x128xf32>
    %326 = arith.mulf %319, %275 : vector<56x128xf32>
    %327 = arith.addf %325, %326 : vector<56x128xf32>
    %328 = arith.mulf %321, %276 : vector<56x128xf32>
    %329 = arith.addf %327, %328 : vector<56x128xf32>
    %330 = arith.mulf %329, %324 : vector<56x128xf32>
    %331 = vector.extract_strided_slice %290 {offsets = [336, 0], sizes = [56, 128], strides = [1, 1]} : vector<504x128xf32> to vector<56x128xf32>
    %332 = vector.extract_strided_slice %290 {offsets = [392, 0], sizes = [56, 128], strides = [1, 1]} : vector<504x128xf32> to vector<56x128xf32>
    %333 = vector.extract_strided_slice %290 {offsets = [448, 0], sizes = [56, 128], strides = [1, 1]} : vector<504x128xf32> to vector<56x128xf32>
    %334 = arith.maximumf %331, %332 : vector<56x128xf32>
    %335 = arith.maximumf %334, %333 : vector<56x128xf32>
    %336 = arith.subf %331, %335 : vector<56x128xf32>
    %337 = math.exp %336 : vector<56x128xf32>
    %338 = arith.subf %332, %335 : vector<56x128xf32>
    %339 = math.exp %338 : vector<56x128xf32>
    %340 = arith.subf %333, %335 : vector<56x128xf32>
    %341 = math.exp %340 : vector<56x128xf32>
    %342 = arith.addf %337, %339 : vector<56x128xf32>
    %343 = arith.addf %342, %341 : vector<56x128xf32>
    %344 = tpu.reciprocal %343 {approx = true} : vector<56x128xf32> -> vector<56x128xf32>
    %345 = arith.mulf %337, %274 : vector<56x128xf32>
    %346 = arith.mulf %339, %275 : vector<56x128xf32>
    %347 = arith.addf %345, %346 : vector<56x128xf32>
    %348 = arith.mulf %341, %276 : vector<56x128xf32>
    %349 = arith.addf %347, %348 : vector<56x128xf32>
    %350 = arith.mulf %349, %344 : vector<56x128xf32>
    %351 = tpu.concatenate %310, %330, %350 in 0 : vector<56x128xf32>, vector<56x128xf32>, vector<56x128xf32> -> vector<168x128xf32>
    %c1_91 = arith.constant 1 : index
    %c0_92 = arith.constant 0 : index
    %c0_93 = arith.constant 0 : index
    %352 = vector.load %arg7[%c1_91, %c0_92, %c0_93] : memref<2x128x128xbf16, #tpu.memory_space<vmem>>, vector<1x128x128xbf16>
    %353 = vector.shape_cast %352 : vector<1x128x128xbf16> to vector<128x128xbf16>
    %354 = arith.truncf %351 : vector<168x128xf32> to vector<168x128xbf16>
    %cst_94 = arith.constant dense<0.000000e+00> : vector<168x128xf32>
    %355 = tpu.matmul %354, %353, %cst_94 {dimension_numbers = #tpu.dot_dimension_numbers<[1], [0], [0], [1], [0, 0, 1, 1], [], []>} : vector<168x128xbf16>, vector<128x128xbf16>, vector<168x128xf32> -> vector<168x128xf32>
    %356 = arith.addf %213, %355 : vector<168x128xf32>
    %357 = arith.mulf %356, %356 : vector<168x128xf32>
    %358 = arith.truncf %357 : vector<168x128xf32> to vector<168x128xbf16>
    %cst_95 = arith.constant dense<0.000000e+00> : vector<168x128xf32>
    %359 = tpu.matmul %358, %0, %cst_95 {dimension_numbers = #tpu.dot_dimension_numbers<[1], [0], [0], [1], [0, 0, 1, 1], [], []>} : vector<168x128xbf16>, vector<128x128xbf16>, vector<168x128xf32> -> vector<168x128xf32>
    %cst_96 = arith.constant 3.125000e-02 : f32
    %360 = vector.broadcast %cst_96 : f32 to vector<168x128xf32>
    %361 = arith.mulf %359, %360 : vector<168x128xf32>
    %cst_97 = arith.constant 9.99999974E-6 : f32
    %362 = vector.broadcast %cst_97 : f32 to vector<168x128xf32>
    %363 = arith.addf %361, %362 : vector<168x128xf32>
    %364 = math.rsqrt %363 : vector<168x128xf32>
    %365 = arith.mulf %356, %364 : vector<168x128xf32>
    %366 = vector.broadcast %215 : vector<1x128xf32> to vector<168x128xf32>
    %367 = arith.mulf %365, %366 : vector<168x128xf32>
    %c1_98 = arith.constant 1 : index
    %c0_99 = arith.constant 0 : index
    %c0_100 = arith.constant 0 : index
    %368 = vector.load %arg8[%c1_98, %c0_99, %c0_100] : memref<2x128x512xbf16, #tpu.memory_space<vmem>>, vector<1x128x512xbf16>
    %369 = vector.shape_cast %368 : vector<1x128x512xbf16> to vector<128x512xbf16>
    %370 = arith.truncf %367 : vector<168x128xf32> to vector<168x128xbf16>
    %cst_101 = arith.constant dense<0.000000e+00> : vector<168x512xf32>
    %371 = tpu.matmul %370, %369, %cst_101 {dimension_numbers = #tpu.dot_dimension_numbers<[1], [0], [0], [1], [0, 0, 1, 1], [], []>} : vector<168x128xbf16>, vector<128x512xbf16>, vector<168x512xf32> -> vector<168x512xf32>
    %cst_102 = arith.constant 0.000000e+00 : f32
    %372 = vector.broadcast %cst_102 : f32 to vector<168x512xf32>
    %373 = arith.maximumf %371, %372 : vector<168x512xf32>
    %374 = arith.mulf %373, %373 : vector<168x512xf32>
    %c1_103 = arith.constant 1 : index
    %c0_104 = arith.constant 0 : index
    %c0_105 = arith.constant 0 : index
    %375 = vector.load %arg9[%c1_103, %c0_104, %c0_105] : memref<2x512x128xbf16, #tpu.memory_space<vmem>>, vector<1x512x128xbf16>
    %376 = vector.shape_cast %375 : vector<1x512x128xbf16> to vector<512x128xbf16>
    %377 = arith.truncf %374 : vector<168x512xf32> to vector<168x512xbf16>
    %cst_106 = arith.constant dense<0.000000e+00> : vector<168x128xf32>
    %378 = tpu.matmul %377, %376, %cst_106 {dimension_numbers = #tpu.dot_dimension_numbers<[1], [0], [0], [1], [0, 0, 1, 1], [], []>} : vector<168x512xbf16>, vector<512x128xbf16>, vector<168x128xf32> -> vector<168x128xf32>
    %379 = arith.addf %356, %378 : vector<168x128xf32>
    %380 = vector.extract_strided_slice %379 {offsets = [56, 0], sizes = [56, 128], strides = [1, 1]} : vector<168x128xf32> to vector<56x128xf32>
    %381 = arith.truncf %380 : vector<56x128xf32> to vector<56x128xbf16>
    %cst_107 = arith.constant dense<0.000000e+00> : vector<56x128xf32>
    %382 = tpu.matmul %381, %0, %cst_107 {dimension_numbers = #tpu.dot_dimension_numbers<[1], [0], [0], [1], [0, 0, 1, 1], [], []>} : vector<56x128xbf16>, vector<128x128xbf16>, vector<56x128xf32> -> vector<56x128xf32>
    %cst_108 = arith.constant 3.125000e-02 : f32
    %383 = vector.broadcast %cst_108 : f32 to vector<56x128xf32>
    %384 = arith.mulf %382, %383 : vector<56x128xf32>
    %385 = arith.subf %380, %384 : vector<56x128xf32>
    %386 = arith.mulf %385, %385 : vector<56x128xf32>
    %387 = arith.truncf %386 : vector<56x128xf32> to vector<56x128xbf16>
    %cst_109 = arith.constant dense<0.000000e+00> : vector<56x128xf32>
    %388 = tpu.matmul %387, %0, %cst_109 {dimension_numbers = #tpu.dot_dimension_numbers<[1], [0], [0], [1], [0, 0, 1, 1], [], []>} : vector<56x128xbf16>, vector<128x128xbf16>, vector<56x128xf32> -> vector<56x128xf32>
    %cst_110 = arith.constant 3.125000e-02 : f32
    %389 = vector.broadcast %cst_110 : f32 to vector<56x128xf32>
    %390 = arith.mulf %388, %389 : vector<56x128xf32>
    %cst_111 = arith.constant 9.99999974E-6 : f32
    %391 = vector.broadcast %cst_111 : f32 to vector<56x128xf32>
    %392 = arith.addf %390, %391 : vector<56x128xf32>
    %393 = math.rsqrt %392 : vector<56x128xf32>
    %394 = arith.mulf %385, %393 : vector<56x128xf32>
    %c0_112 = arith.constant 0 : index
    %c0_113 = arith.constant 0 : index
    %395 = vector.load %arg17[%c0_112, %c0_113] : memref<1x128xf32, #tpu.memory_space<vmem>>, vector<1x128xf32>
    %396 = vector.broadcast %395 : vector<1x128xf32> to vector<56x128xf32>
    %397 = arith.mulf %394, %396 : vector<56x128xf32>
    %c0_114 = arith.constant 0 : index
    %c0_115 = arith.constant 0 : index
    %398 = vector.load %arg18[%c0_114, %c0_115] : memref<1x128xf32, #tpu.memory_space<vmem>>, vector<1x128xf32>
    %399 = vector.broadcast %398 : vector<1x128xf32> to vector<56x128xf32>
    %400 = arith.addf %397, %399 : vector<56x128xf32>
    %c0_116 = arith.constant 0 : index
    %c0_117 = arith.constant 0 : index
    %401 = vector.load %arg19[%c0_116, %c0_117] : memref<128x4xbf16, #tpu.memory_space<vmem>>, vector<128x4xbf16>
    %402 = arith.truncf %400 : vector<56x128xf32> to vector<56x128xbf16>
    %cst_118 = arith.constant dense<0.000000e+00> : vector<56x4xf32>
    %403 = tpu.matmul %402, %401, %cst_118 {dimension_numbers = #tpu.dot_dimension_numbers<[1], [0], [0], [1], [0, 0, 1, 1], [], []>} : vector<56x128xbf16>, vector<128x4xbf16>, vector<56x4xf32> -> vector<56x4xf32>
    %c0_119 = arith.constant 0 : index
    %c0_120 = arith.constant 0 : index
    %404 = vector.load %arg20[%c0_119, %c0_120] : memref<1x4xf32, #tpu.memory_space<vmem>>, vector<1x4xf32>
    %405 = vector.broadcast %404 : vector<1x4xf32> to vector<56x4xf32>
    %406 = arith.addf %403, %405 : vector<56x4xf32>
    %c0_121 = arith.constant 0 : index
    %c0_122 = arith.constant 0 : index
    %407 = vector.load %arg21[%c0_121, %c0_122] : memref<56x4xf32, #tpu.memory_space<vmem>>, vector<56x4xf32>
    tpu.vector_store %arg21[%c0_121, %c0_122], %406 {strides = array<i32>} : memref<56x4xf32, #tpu.memory_space<vmem>>, vector<56x4xf32>,
    return
  }
  func.func @transform_0(%arg0: i32) -> (i32, i32) {
    %c0_i32 = arith.constant 0 : i32
    %c0_i32_0 = arith.constant 0 : i32
    return %arg0, %c0_i32 : i32, i32
  }
  func.func @transform_1(%arg0: i32) -> (i32, i32) {
    %c0_i32 = arith.constant 0 : i32
    %c0_i32_0 = arith.constant 0 : i32
    %c0_i32_1 = arith.constant 0 : i32
    return %c0_i32, %c0_i32_0 : i32, i32
  }
  func.func @transform_2(%arg0: i32) -> (i32, i32) {
    %c0_i32 = arith.constant 0 : i32
    %c0_i32_0 = arith.constant 0 : i32
    %c0_i32_1 = arith.constant 0 : i32
    return %c0_i32, %c0_i32_0 : i32, i32
  }
  func.func @transform_3(%arg0: i32) -> (i32, i32) {
    %c0_i32 = arith.constant 0 : i32
    %c0_i32_0 = arith.constant 0 : i32
    %c0_i32_1 = arith.constant 0 : i32
    return %c0_i32, %c0_i32_0 : i32, i32
  }
  func.func @transform_4(%arg0: i32) -> (i32, i32) {
    %c0_i32 = arith.constant 0 : i32
    %c0_i32_0 = arith.constant 0 : i32
    %c0_i32_1 = arith.constant 0 : i32
    return %c0_i32, %c0_i32_0 : i32, i32
  }
  func.func @transform_5(%arg0: i32) -> (i32, i32, i32) {
    %c0_i32 = arith.constant 0 : i32
    %c0_i32_0 = arith.constant 0 : i32
    %c0_i32_1 = arith.constant 0 : i32
    %c0_i32_2 = arith.constant 0 : i32
    return %c0_i32, %c0_i32_0, %c0_i32_1 : i32, i32, i32
  }
  func.func @transform_6(%arg0: i32) -> (i32, i32, i32) {
    %c0_i32 = arith.constant 0 : i32
    %c0_i32_0 = arith.constant 0 : i32
    %c0_i32_1 = arith.constant 0 : i32
    %c0_i32_2 = arith.constant 0 : i32
    return %c0_i32, %c0_i32_0, %c0_i32_1 : i32, i32, i32
  }
  func.func @transform_7(%arg0: i32) -> (i32, i32, i32) {
    %c0_i32 = arith.constant 0 : i32
    %c0_i32_0 = arith.constant 0 : i32
    %c0_i32_1 = arith.constant 0 : i32
    %c0_i32_2 = arith.constant 0 : i32
    return %c0_i32, %c0_i32_0, %c0_i32_1 : i32, i32, i32
  }
  func.func @transform_8(%arg0: i32) -> (i32, i32, i32) {
    %c0_i32 = arith.constant 0 : i32
    %c0_i32_0 = arith.constant 0 : i32
    %c0_i32_1 = arith.constant 0 : i32
    %c0_i32_2 = arith.constant 0 : i32
    return %c0_i32, %c0_i32_0, %c0_i32_1 : i32, i32, i32
  }
  func.func @transform_9(%arg0: i32) -> (i32, i32, i32) {
    %c0_i32 = arith.constant 0 : i32
    %c0_i32_0 = arith.constant 0 : i32
    %c0_i32_1 = arith.constant 0 : i32
    %c0_i32_2 = arith.constant 0 : i32
    return %c0_i32, %c0_i32_0, %c0_i32_1 : i32, i32, i32
  }
  func.func @transform_10(%arg0: i32) -> (i32, i32, i32) {
    %c0_i32 = arith.constant 0 : i32
    %c0_i32_0 = arith.constant 0 : i32
    %c0_i32_1 = arith.constant 0 : i32
    %c0_i32_2 = arith.constant 0 : i32
    return %c0_i32, %c0_i32_0, %c0_i32_1 : i32, i32, i32
  }
  func.func @transform_11(%arg0: i32) -> (i32, i32) {
    %c0_i32 = arith.constant 0 : i32
    %c0_i32_0 = arith.constant 0 : i32
    %c0_i32_1 = arith.constant 0 : i32
    return %c0_i32, %c0_i32_0 : i32, i32
  }
  func.func @transform_12(%arg0: i32) -> (i32, i32) {
    %c0_i32 = arith.constant 0 : i32
    %c0_i32_0 = arith.constant 0 : i32
    %c0_i32_1 = arith.constant 0 : i32
    return %c0_i32, %c0_i32_0 : i32, i32
  }
  func.func @transform_13(%arg0: i32) -> (i32, i32) {
    %c0_i32 = arith.constant 0 : i32
    %c0_i32_0 = arith.constant 0 : i32
    %c0_i32_1 = arith.constant 0 : i32
    return %c0_i32, %c0_i32_0 : i32, i32
  }
  func.func @transform_14(%arg0: i32) -> (i32, i32) {
    %c0_i32 = arith.constant 0 : i32
    %c0_i32_0 = arith.constant 0 : i32
    %c0_i32_1 = arith.constant 0 : i32
    return %c0_i32, %c0_i32_0 : i32, i32
  }
  func.func @transform_15(%arg0: i32) -> (i32, i32) {
    %c0_i32 = arith.constant 0 : i32
    %c0_i32_0 = arith.constant 0 : i32
    %c0_i32_1 = arith.constant 0 : i32
    return %c0_i32, %c0_i32_0 : i32, i32
  }
  func.func @transform_16(%arg0: i32) -> (i32, i32) {
    %c0_i32 = arith.constant 0 : i32
    %c0_i32_0 = arith.constant 0 : i32
    %c0_i32_1 = arith.constant 0 : i32
    return %c0_i32, %c0_i32_0 : i32, i32
  }
  func.func @transform_17(%arg0: i32) -> (i32, i32) {
    %c0_i32 = arith.constant 0 : i32
    %c0_i32_0 = arith.constant 0 : i32
    %c0_i32_1 = arith.constant 0 : i32
    return %c0_i32, %c0_i32_0 : i32, i32
  }
  func.func @transform_18(%arg0: i32) -> (i32, i32) {
    %c0_i32 = arith.constant 0 : i32
    %c0_i32_0 = arith.constant 0 : i32
    %c0_i32_1 = arith.constant 0 : i32
    return %c0_i32, %c0_i32_0 : i32, i32
  }
  func.func @transform_19(%arg0: i32) -> (i32, i32) {
    %c0_i32 = arith.constant 0 : i32
    %c0_i32_0 = arith.constant 0 : i32
    %c0_i32_1 = arith.constant 0 : i32
    return %c0_i32, %c0_i32_0 : i32, i32
  }
  func.func @transform_20(%arg0: i32) -> (i32, i32) {
    %c0_i32 = arith.constant 0 : i32
    %c0_i32_0 = arith.constant 0 : i32
    return %arg0, %c0_i32 : i32, i32
  }
}

</mosaic_0001>

<bundles_post_ra>
// kernel: cfm_forward_pallas.1
= control target key start
LH: loop header
LB: loop body
LE: loop exit
PB: predicated region body
PF: predicated region fallthrough
CT: control target
= control target key end

     0   :  { %s18212_s0 = inlined_call_operand.vmem [shape: f32[56,256], index: 0, kind: input, shape index: {}]   ;;  %s18213_s1 = inlined_call_operand.vmem [shape: bf16[256,384], index: 1, kind: input, shape index: {}]   ;;  %s18214_s2 = inlined_call_operand.vmem [shape: f32[1,384], index: 2, kind: input, shape index: {}]   ;;  %s18215_s3 = inlined_call_operand.vmem [shape: bf16[128,128], index: 3, kind: input, shape index: {}]   ;;  %s18216_s4 = inlined_call_operand.hbm [shape: f32[1,128], index: 4, kind: input, shape index: {}]   ;;  %s18217_s5 = inlined_call_operand.hbm [shape: bf16[2,128,384], index: 5, kind: input, shape index: {}]   ;;  %s18218_s6 = inlined_call_operand.hbm [shape: bf16[2,128,128], index: 6, kind: input, shape index: {}]   ;;  %s18219_s7 = inlined_call_operand.vmem [shape: bf16[2,128,512], index: 7, kind: input, shape index: {}]   ;;  %s18220_s8 = inlined_call_operand.vmem [shape: bf16[2,512,128], index: 8, kind: input, shape index: {}]   ;;  %s18221_s9 = inlined_call_operand.hbm [shape: f32[2,1,128], index: 9, kind: input, shape index: {}]   ;;  %s18222_s10 = inlined_call_operand.hbm [shape: f32[2,1,128], index: 10, kind: input, shape index: {}]   ;;  %s18223_s11 = inlined_call_operand.vmem [shape: bf16[128,128], index: 11, kind: input, shape index: {}]   ;;  %s18224_s12 = inlined_call_operand.hbm [shape: bf16[128,128], index: 12, kind: input, shape index: {}]   ;;  %s18225_s13 = inlined_call_operand.hbm [shape: bf16[128,128], index: 13, kind: input, shape index: {}]   ;;  %s18226_s14 = inlined_call_operand.vmem [shape: f32[3,128], index: 14, kind: input, shape index: {}]   ;;  %s18227_s15 = inlined_call_operand.hbm [shape: f32[3,128], index: 15, kind: input, shape index: {}]   ;;  %s18228_s16 = inlined_call_operand.hbm [shape: f32[1,128], index: 16, kind: input, shape index: {}]   ;;  %s18229_s17 = inlined_call_operand.hbm [shape: f32[1,128], index: 17, kind: input, shape index: {}]   ;;  %s18230_s18 = inlined_call_operand.vmem [shape: bf16[128,4], index: 18, kind: input, shape index: {}]   ;;  %s18231_s19 = inlined_call_operand.hbm [shape: f32[1,4], index: 19, kind: input, shape index: {}]   ;;  %s18232_s20 = inlined_call_operand.vmem [shape: f32[56,4], index: 20, kind: output, shape index: {}]  }
   0x1   :  { %18359 = sst [smem:[#allocation78_spill]] %s18212_s0 }
   0x2   :  { %18360 = sst [smem:[#allocation79_spill]] %s18213_s1 }
   0x3   :  { %18361 = sst [smem:[#allocation80_spill]] %s18214_s2 }
   0x4   :  { %18362 = sst [smem:[#allocation81_spill]] %s18215_s3 }
   0x5   :  { %18363 = sst [smem:[#allocation82_spill]] %s18216_s4 }
   0x6   :  { %25 = vsyncpa [#allocation3], 0 }
   0x7   :  { %26 = vsyncpa [#allocation5], 0 }
   0x8   :  { %27 = vsyncpa [#allocation8], 0 }
   0x9   :  { %28 = vsyncpa [#allocation11], 0 }
   0xa   :  { %29 = vsyncpa [#allocation14], 0 }
   0xb   :  { %30 = vsyncpa [#allocation17], 0  ;;  %s13567_s1 = smov [#allocation4]   ;;  %s13313_s2 = scalar_lea.hbm %s18217_s5, 6144 }
   0xc   :  { %s54_s22 = sshll.u32 %s13567_s1, 4  ;;  %p13314_p0 = scmp.ne.s32.totalorder %s18217_s5, %s13313_s2  ;;  %s55_s22 = int_to_ptr.vmem [resolvable:$true] %s54_s22 }
   0xd   :  { %p13317_p1 = scmp.lt.u32.totalorder %s13313_s2, %s18217_s5 }
   0xf   :  { %p13319_p2 = pnand %p13317_p1, %p13314_p0 }
  0x11   :  { %13322 = shalt.err (!%p13319_p2)
}
  0x12   :  { %s13323_s28 = scalar_lea.vmem %s55_s22, 6144  ;;  %p13328_p4 = scmp.lt.s32.totalorder %s55_s22, %s55_s22 }
  0x13   :  { %p13324_p3 = scmp.ne.s32.totalorder %s55_s22, %s13323_s28  ;;  %p13329_p5 = scmp.lt.s32.totalorder %s13323_s28, %s13323_s28 }
  0x15   :  { %p13330_p6 = por %p13329_p5, %p13328_p4 }
  0x17   :  { %p13331_p7 = pnand %p13330_p6, %p13324_p3 }
  0x19   :  { %13334 = shalt.err (!%p13331_p7)
}
  0x1a   :  { %s13568_s4 = smov 192   ;;  %s13569_s29 = smov 12  }
  0x1b   :  { %60 = dma.hbm_to_vmem [thread:$0]  %s18217_s5, 6144, %s55_s22, [#allocation5], %s13568_s4, %s13568_s4, %s13569_s29  }
  0x1c   :  { %s13570_s21 = smov [#allocation7]   ;;  %s13335_s2 = scalar_lea.hbm %s18221_s9, 32 }
  0x1d   :  { %s82_s1 = sshll.u32 %s13570_s21, 4  ;;  %p13336_p8 = scmp.ne.s32.totalorder %s18221_s9, %s13335_s2  ;;  %s83_s1 = int_to_ptr.vmem [resolvable:$true] %s82_s1 }
  0x1e   :  { %p13339_p9 = scmp.lt.u32.totalorder %s13335_s2, %s18221_s9 }
  0x20   :  { %p13341_p10 = pnand %p13339_p9, %p13336_p8 }
  0x22   :  { %13344 = shalt.err (!%p13341_p10)
}
  0x23   :  { %s13345_s28 = scalar_lea.vmem %s83_s1, 32  ;;  %p13350_p12 = scmp.lt.s32.totalorder %s83_s1, %s83_s1 }
  0x24   :  { %p13346_p11 = scmp.ne.s32.totalorder %s83_s1, %s13345_s28  ;;  %p13351_p13 = scmp.lt.s32.totalorder %s13345_s28, %s13345_s28 }
  0x26   :  { %p13352_p0 = por %p13351_p13, %p13350_p12 }
  0x28   :  { %p13353_p1 = pnand %p13352_p0, %p13346_p11 }
  0x2a   :  { %13356 = shalt.err (!%p13353_p1)
}
  0x2b   :  { %s13571_s5 = smov 16   ;;  %s13572_s22 = smov 1  }
  0x2c   :  { %88 = dma.hbm_to_vmem [thread:$0]  %s18221_s9, 32, %s83_s1, [#allocation8], %s13571_s5, %s13571_s5, %s13572_s22  }
  0x2d   :  { %s13573_s30 = smov [#allocation10]   ;;  %s13574_s21 = smov [#allocation13]  }
  0x2e   :  { %s108_s0 = sshll.u32 %s13573_s30, 4  ;;  %s135_s23 = sshll.u32 %s13574_s21, 4  ;;  %s109_s0 = int_to_ptr.vmem [resolvable:$true] %s108_s0  ;;  %s136_s23 = int_to_ptr.vmem [resolvable:$true] %s135_s23 }
  0x2f   :  { %s13357_s25 = scalar_lea.hbm %s18224_s12, 1024 }
  0x30   :  { %p13358_p2 = scmp.ne.s32.totalorder %s18224_s12, %s13357_s25  ;;  %p13361_p3 = scmp.lt.u32.totalorder %s13357_s25, %s18224_s12 }
  0x32   :  { %p13363_p4 = pnand %p13361_p3, %p13358_p2 }
  0x34   :  { %13366 = shalt.err (!%p13363_p4)
}
  0x35   :  { %s13367_s9 = scalar_lea.vmem %s109_s0, 1024  ;;  %p13372_p6 = scmp.lt.s32.totalorder %s109_s0, %s109_s0 }
  0x36   :  { %p13368_p5 = scmp.ne.s32.totalorder %s109_s0, %s13367_s9  ;;  %p13373_p7 = scmp.lt.s32.totalorder %s13367_s9, %s13367_s9 }
  0x38   :  { %p13374_p8 = por %p13373_p7, %p13372_p6 }
  0x3a   :  { %p13375_p9 = pnand %p13374_p8, %p13368_p5 }
  0x3c   :  { %13378 = shalt.err (!%p13375_p9)
}
  0x3d   :  { %s13575_s1 = smov 64   ;;  %s13576_s4 = smov 4  }
  0x3e   :  { %114 = dma.hbm_to_vmem [thread:$0]  %s18224_s12, 1024, %s109_s0, [#allocation11], %s13575_s1, %s13575_s1, %s13576_s4  }
  0x3f   :  { %s13379_s2 = scalar_lea.hbm %s18227_s15, 64 }
  0x40   :  { %p13380_p10 = scmp.ne.s32.totalorder %s18227_s15, %s13379_s2  ;;  %p13383_p11 = scmp.lt.u32.totalorder %s13379_s2, %s18227_s15 }
  0x42   :  { %p13385_p12 = pnand %p13383_p11, %p13380_p10 }
  0x44   :  { %13388 = shalt.err (!%p13385_p12)
}
  0x45   :  { %s13389_s28 = scalar_lea.vmem %s136_s23, 64  ;;  %p13394_p0 = scmp.lt.s32.totalorder %s136_s23, %s136_s23 }
  0x46   :  { %p13390_p13 = scmp.ne.s32.totalorder %s136_s23, %s13389_s28  ;;  %p13395_p1 = scmp.lt.s32.totalorder %s13389_s28, %s13389_s28 }
  0x48   :  { %p13396_p2 = por %p13395_p1, %p13394_p0 }
  0x4a   :  { %p13397_p3 = pnand %p13396_p2, %p13390_p13 }
  0x4c   :  { %13400 = shalt.err (!%p13397_p3)
}
  0x4d   :  { %138 = dma.hbm_to_vmem [thread:$0]  %s18227_s15, 64, %s136_s23, [#allocation14]  }
  0x4e   :  { %s13577_s9 = smov [#allocation16]   ;;  %s13578_s30 = smov [#allocation2]  }
  0x4f   :  { %s155_s29 = sshll.u32 %s13577_s9, 4  ;;  %s45_s21 = sshll.u32 %s13578_s30, 4  ;;  %s156_s29 = int_to_ptr.vmem [resolvable:$true] %s155_s29  ;;  %s46_s21 = int_to_ptr.vmem [resolvable:$true] %s45_s21 }
  0x50   :  { %s13401_s25 = scalar_lea.hbm %s18229_s17, 16 }
  0x51   :  { %p13402_p4 = scmp.ne.s32.totalorder %s18229_s17, %s13401_s25  ;;  %p13405_p5 = scmp.lt.u32.totalorder %s13401_s25, %s18229_s17 }
  0x53   :  { %p13407_p6 = pnand %p13405_p5, %p13402_p4 }
  0x55   :  { %13410 = shalt.err (!%p13407_p6)
}
  0x56   :  { %s13411_s15 = scalar_lea.vmem %s156_s29, 16  ;;  %s13415_s23 = scalar_lea.vmem %s156_s29, 32 }
  0x57   :  { %p13412_p7 = scmp.ne.s32.totalorder %s156_s29, %s13411_s15  ;;  %p13416_p8 = scmp.lt.s32.totalorder %s156_s29, %s156_s29 }
  0x58   :  { %p13417_p9 = scmp.lt.s32.totalorder %s13415_s23, %s13411_s15 }
  0x5a   :  { %p13418_p10 = por %p13417_p9, %p13416_p8 }
  0x5c   :  { %p13419_p11 = pnand %p13418_p10, %p13412_p7 }
  0x5e   :  { %13422 = shalt.err (!%p13419_p11)
}
  0x5f   :  { %158 = dma.hbm_to_vmem [thread:$0]  %s18229_s17, 16, %s156_s29, [#allocation17]  }
  0x60   :  { %s18364_s24 = sld [smem:[#allocation82_spill]] }
  0x66   :  { %s13423_s2 = scalar_lea.hbm %s18364_s24, 16 }
  0x67   :  { %p13424_p12 = scmp.ne.s32.totalorder %s18364_s24, %s13423_s2  ;;  %p13427_p13 = scmp.lt.u32.totalorder %s13423_s2, %s18364_s24 }
  0x69   :  { %p13429_p0 = pnand %p13427_p13, %p13424_p12 }
  0x6b   :  { %13432 = shalt.err (!%p13429_p0)
}
  0x6c   :  { %s13433_s28 = scalar_lea.vmem %s46_s21, 16  ;;  %s13437_s15 = scalar_lea.vmem %s46_s21, 32 }
  0x6d   :  { %p13434_p1 = scmp.ne.s32.totalorder %s46_s21, %s13433_s28  ;;  %p13438_p2 = scmp.lt.s32.totalorder %s46_s21, %s46_s21 }
  0x6e   :  { %p13439_p3 = scmp.lt.s32.totalorder %s13437_s15, %s13433_s28 }
  0x70   :  { %p13440_p4 = por %p13439_p3, %p13438_p2 }
  0x72   :  { %p13441_p5 = pnand %p13440_p4, %p13434_p1 }
  0x74   :  { %13444 = shalt.err (!%p13441_p5)
}
  0x75   :  { %48 = dma.hbm_to_vmem [thread:$0]  %s18364_s24, 16, %s46_s21, [#allocation3]  }
  0x76   :  { %s13579_s23 = smov [#allocation6]   ;;  %s13580_s0 = smov [#allocation9]  }
  0x77   :  { %s66_s12 = sshll.u32 %s13579_s23, 4  ;;  %s94_s9 = sshll.u32 %s13580_s0, 4  ;;  %s67_s12 = int_to_ptr.vmem [resolvable:$true] %s66_s12  ;;  %s13770_s9 = int_to_ptr.vmem [resolvable:$true] %s94_s9 }
  0x78   :  { %s13445_s3 = scalar_lea.hbm %s18218_s6, 2048 }
  0x79   :  { %p13446_p6 = scmp.ne.s32.totalorder %s18218_s6, %s13445_s3  ;;  %p13449_p7 = scmp.lt.u32.totalorder %s13445_s3, %s18218_s6 }
  0x7b   :  { %p13451_p8 = pnand %p13449_p7, %p13446_p6 }
  0x7d   :  { %13454 = shalt.err (!%p13451_p8)
}
  0x7e   :  { %s13455_s21 = scalar_lea.vmem %s67_s12, 2048  ;;  %p13460_p10 = scmp.lt.s32.totalorder %s67_s12, %s67_s12 }
  0x7f   :  { %p13456_p9 = scmp.ne.s32.totalorder %s67_s12, %s13455_s21  ;;  %p13461_p11 = scmp.lt.s32.totalorder %s13455_s21, %s13455_s21 }
  0x81   :  { %p13462_p12 = por %p13461_p11, %p13460_p10 }
  0x83   :  { %p13463_p13 = pnand %p13462_p12, %p13456_p9 }
  0x85   :  { %13466 = shalt.err (!%p13463_p13)
}
  0x86   :  { %72 = dma.hbm_to_vmem [thread:$0]  %s18218_s6, 2048, %s67_s12, [#allocation5], %s13575_s1, %s13575_s1, %s13576_s4  }
  0x87   :  { %s13467_s23 = scalar_lea.hbm %s18222_s10, 32 }
  0x88   :  { %p13468_p0 = scmp.ne.s32.totalorder %s18222_s10, %s13467_s23  ;;  %p13471_p1 = scmp.lt.u32.totalorder %s13467_s23, %s18222_s10 }
  0x8a   :  { %p13473_p2 = pnand %p13471_p1, %p13468_p0 }
  0x8c   :  { %13476 = shalt.err (!%p13473_p2)
}
  0x8d   :  { %s13477_s25 = scalar_lea.vmem %s13770_s9, 32  ;;  %p13482_p4 = scmp.lt.s32.totalorder %s13770_s9, %s13770_s9 }
  0x8e   :  { %p13478_p3 = scmp.ne.s32.totalorder %s13770_s9, %s13477_s25  ;;  %p13483_p5 = scmp.lt.s32.totalorder %s13477_s25, %s13477_s25 }
  0x90   :  { %p13484_p6 = por %p13483_p5, %p13482_p4 }
  0x92   :  { %p13485_p7 = pnand %p13484_p6, %p13478_p3 }
  0x94   :  { %13488 = shalt.err (!%p13485_p7)
}
  0x95   :  { %100 = dma.hbm_to_vmem [thread:$0]  %s18222_s10, 32, %s13770_s9, [#allocation8], %s13571_s5, %s13571_s5, %s13572_s22  }
  0x96   :  { %s13581_s26 = smov [#allocation12]   ;;  %s13582_s28 = smov [#allocation15]  }
  0x97   :  { %s120_s27 = sshll.u32 %s13581_s26, 4  ;;  %s145_s21 = sshll.u32 %s13582_s28, 4  ;;  %s121_s27 = int_to_ptr.vmem [resolvable:$true] %s120_s27  ;;  %s146_s21 = int_to_ptr.vmem [resolvable:$true] %s145_s21 }
  0x98   :  { %s13489_s17 = scalar_lea.hbm %s18225_s13, 1024 }
  0x99   :  { %p13490_p8 = scmp.ne.s32.totalorder %s18225_s13, %s13489_s17  ;;  %p13493_p9 = scmp.lt.u32.totalorder %s13489_s17, %s18225_s13 }
  0x9b   :  { %p13495_p10 = pnand %p13493_p9, %p13490_p8 }
  0x9d   :  { %13498 = shalt.err (!%p13495_p10)
}
  0x9e   :  { %s13499_s10 = scalar_lea.vmem %s121_s27, 1024  ;;  %p13504_p12 = scmp.lt.s32.totalorder %s121_s27, %s121_s27 }
  0x9f   :  { %p13500_p11 = scmp.ne.s32.totalorder %s121_s27, %s13499_s10  ;;  %p13505_p13 = scmp.lt.s32.totalorder %s13499_s10, %s13499_s10 }
  0xa1   :  { %p13506_p0 = por %p13505_p13, %p13504_p12 }
  0xa3   :  { %p13507_p1 = pnand %p13506_p0, %p13500_p11 }
  0xa5   :  { %13510 = shalt.err (!%p13507_p1)
}
  0xa6   :  { %126 = dma.hbm_to_vmem [thread:$0]  %s18225_s13, 1024, %s121_s27, [#allocation11], %s13575_s1, %s13575_s1, %s13576_s4  }
  0xa7   :  { %s13511_s3 = scalar_lea.hbm %s18228_s16, 16 }
  0xa8   :  { %p13512_p2 = scmp.ne.s32.totalorder %s18228_s16, %s13511_s3  ;;  %p13515_p3 = scmp.lt.u32.totalorder %s13511_s3, %s18228_s16 }
  0xaa   :  { %p13517_p4 = pnand %p13515_p3, %p13512_p2 }
  0xac   :  { %13520 = shalt.err (!%p13517_p4)
}
  0xad   :  { %s13521_s28 = scalar_lea.vmem %s146_s21, 16  ;;  %s13525_s24 = scalar_lea.vmem %s146_s21, 32 }
  0xae   :  { %p13522_p5 = scmp.ne.s32.totalorder %s146_s21, %s13521_s28  ;;  %p13526_p6 = scmp.lt.s32.totalorder %s146_s21, %s146_s21 }
  0xaf   :  { %p13527_p7 = scmp.lt.s32.totalorder %s13525_s24, %s13521_s28 }
  0xb1   :  { %p13528_p8 = por %p13527_p7, %p13526_p6 }
  0xb3   :  { %p13529_p9 = pnand %p13528_p8, %p13522_p5 }
  0xb5   :  { %13532 = shalt.err (!%p13529_p9)
}
  0xb6   :  { %148 = dma.hbm_to_vmem [thread:$0]  %s18228_s16, 16, %s146_s21, [#allocation14]  }
  0xb7   :  { %s13583_s4 = smov [#allocation18]   ;;  %s13533_s29 = scalar_lea.hbm %s18231_s19, 16 }
  0xb8   :  { %s167_s27 = sshll.u32 %s13583_s4, 4  ;;  %p13534_p10 = scmp.ne.s32.totalorder %s18231_s19, %s13533_s29  ;;  %s168_s27 = int_to_ptr.vmem [resolvable:$true] %s167_s27 }
  0xb9   :  { %p13537_p11 = scmp.lt.u32.totalorder %s13533_s29, %s18231_s19 }
  0xbb   :  { %p13539_p12 = pnand %p13537_p11, %p13534_p10 }
  0xbd   :  { %13542 = shalt.err (!%p13539_p12)
}
  0xbe   :  { %s13543_s5 = scalar_lea.vmem %s168_s27, 16  ;;  %s13547_s16 = scalar_lea.vmem %s168_s27, 32 }
  0xbf   :  { %p13544_p13 = scmp.ne.s32.totalorder %s168_s27, %s13543_s5  ;;  %p13548_p0 = scmp.lt.s32.totalorder %s168_s27, %s168_s27 }
  0xc0   :  { %p13549_p1 = scmp.lt.s32.totalorder %s13547_s16, %s13543_s5 }
  0xc2   :  { %p13550_p2 = por %p13549_p1, %p13548_p0 }
  0xc4   :  { %p13551_p3 = pnand %p13550_p2, %p13544_p13 }
  0xc6   :  { %13554 = shalt.err (!%p13551_p3)
}
  0xc7   :  { %170 = dma.hbm_to_vmem [thread:$0]  %s18231_s19, 16, %s168_s27, [#allocation17]  }
  0xc8   :  { %13555 = dma.done.wait [#allocation3], 16  }
  0xc9   :  { %13556 = vsyncadd [#allocation3], 4294967280 }
  0xca   :  { %13557 = dma.done.wait [#allocation5], 8192  }
  0xcb   :  { %13558 = vsyncadd [#allocation5], 4294959104 }
  0xcc   :  { %13559 = dma.done.wait [#allocation8], 64  }
  0xcd   :  { %13560 = vsyncadd [#allocation8], 4294967232 }
  0xce   :  { %13561 = dma.done.wait [#allocation11], 2048  }
  0xcf   :  { %13562 = vsyncadd [#allocation11], 4294965248 }
  0xd0   :  { %13563 = dma.done.wait [#allocation14], 80  }
  0xd1   :  { %13564 = vsyncadd [#allocation14], 4294967216 }
  0xd2   :  { %13565 = dma.done.wait [#allocation17], 32  }
  0xd3   :  { %13566 = vsyncadd [#allocation17], 4294967264  ;;  %s18365_s3 = sld [smem:[#allocation79_spill]]  ;;  %s18366_s19 = sld [smem:[#allocation78_spill]]  ;;  %vm13585_vm0 = vmmov 0   ;;  %vm9741_vm1 = vcmask 31744  }
  0xd4   :  { %s18367_s1 = sld [smem:[#allocation81_spill]]  ;;  %s18368_s24 = sld [smem:[#allocation80_spill]] }
  0xd9   :  { %v12185_v0 = vld [vmem:[%s18365_s3 + $0x4] ss:$12 sps:$4 sm:$0xff]   ;;  %v12187_v1 = vld [vmem:[%s18365_s3] ss:$12 sps:$4 sm:$0xff]   ;;  %v12188_v2 = vld [vmem:[%s18365_s3 + $0x1c] ss:$12 sps:$4 sm:$0xff]  }
  0xda   :  { %612 = vmatprep.subr.bf16.mxu0 %v12185_v0  ;;  %v12190_v3 = vld [vmem:[%s18365_s3 + $0x18] ss:$12 sps:$4 sm:$0xff]   ;;  %v12191_v4 = vld [vmem:[%s18365_s3 + $0x34] ss:$12 sps:$4 sm:$0xff]   ;;  %v12193_v5 = vld [vmem:[%s18365_s3 + $0x30] ss:$12 sps:$4 sm:$0xff]  }
  0xdb   :  { %613 = vmatpush1.bf16.msra.mxu0 %v12187_v1  ;;  %v12194_v6 = vld [vmem:[%s18365_s3 + $0x4c] ss:$12 sps:$4 sm:$0xff]   ;;  %v12196_v7 = vld [vmem:[%s18365_s3 + $0x48] ss:$12 sps:$4 sm:$0xff]   ;;  %v12197_v8 = vld [vmem:[%s18365_s3 + $0x64] ss:$12 sps:$4 sm:$0xff]  }
  0xdc   :  { %614 = vmatprep.subr.bf16.mxu0 %v12188_v2  ;;  %v12199_v9 = vld [vmem:[%s18365_s3 + $0x60] ss:$12 sps:$4 sm:$0xff]   ;;  %v12200_v10 = vld [vmem:[%s18365_s3 + $0x7c] ss:$12 sps:$4 sm:$0xff]   ;;  %v12202_v11 = vld [vmem:[%s18365_s3 + $0x78] ss:$12 sps:$4 sm:$0xff]  }
  0xdd   :  { %v12203_v12 = vld [vmem:[%s18365_s3 + $0x94] ss:$12 sps:$4 sm:$0xff]   ;;  %v254_v13 = vld [vmem:[%s18366_s19 + $0x8] sm:$0xff]  ;;  %v256_v14 = vld [vmem:[%s18366_s19 + $0x18] sm:$0xff] }
  0xde   :  { %v332_v15 = vpack.c.bf16 %v256_v14, %v254_v13  ;;  %v12205_v16 = vld [vmem:[%s18365_s3 + $0x90] ss:$12 sps:$4 sm:$0xff]   ;;  %v12206_v17 = vld [vmem:[%s18365_s3 + $0xac] ss:$12 sps:$4 sm:$0xff]   ;;  %v12208_v18 = vld [vmem:[%s18365_s3 + $0xa8] ss:$12 sps:$4 sm:$0xff]  }
  0xdf   :  { %615 = vmatpush1.bf16.msra.mxu0 %v12190_v3  ;;  %v12209_v19 = vld [vmem:[%s18365_s3 + $0xc4] ss:$12 sps:$4 sm:$0xff]   ;;  %v12233_v20 = vld [vmem:[%s18365_s3 + $0xc8] ss:$12 sps:$4 sm:$0xff]   ;;  %v12235_v22 = vld [vmem:[%s18365_s3 + $0xe0] ss:$12 sps:$4 sm:$0xff]  }
  0xe0   :  { %616 = vmatprep.subr.bf16.mxu0 %v12191_v4  ;;  %644 = vmatprep.mubr.bf16.mxu0 %v332_v15  ;;  %v12234_v21 = vld [vmem:[%s18365_s3 + $0x8] ss:$12 sps:$4 sm:$0xff]   ;;  %v12236_v23 = vld [vmem:[%s18365_s3 + $0x20] ss:$12 sps:$4 sm:$0xff]   ;;  %v12237_v24 = vld [vmem:[%s18365_s3 + $0xf8] ss:$12 sps:$4 sm:$0xff]  }
  0xe1   :  { %715 = vmatprep.mubr.bf16.mxu1 %v332_v15  ;;  %10149 = vmatprep.subr.bf16.mxu1 %v12233_v20  ;;  %v12211_v25 = vld [vmem:[%s18365_s3 + $0xc0] ss:$12 sps:$4 sm:$0xff]   ;;  %v12212_v26 = vld [vmem:[%s18365_s3 + $0xdc] ss:$12 sps:$4 sm:$0xff]   ;;  %v12238_v27 = vld [vmem:[%s18365_s3 + $0x38] ss:$12 sps:$4 sm:$0xff]  }
  0xe2   :  { %10150 = vmatpush3.bf16.msra.mxu1 %v12234_v21  ;;  %v12239_v28 = vld [vmem:[%s18365_s3 + $0x110] ss:$12 sps:$4 sm:$0xff]   ;;  %v12214_v29 = vld [vmem:[%s18365_s3 + $0xd8] ss:$12 sps:$4 sm:$0xff]   ;;  %v12215_v30 = vld [vmem:[%s18365_s3 + $0xf4] ss:$12 sps:$4 sm:$0xff]  }
  0xe3   :  { %617 = vmatpush1.bf16.msra.mxu0 %v12193_v5  ;;  %10151 = vmatprep.subr.bf16.mxu1 %v12235_v22  ;;  %v12217_v31 = vld [vmem:[%s18365_s3 + $0xf0] ss:$12 sps:$4 sm:$0xff]   ;;  %v12218_v33 = vld [vmem:[%s18365_s3 + $0x10c] ss:$12 sps:$4 sm:$0xff]   ;;  %v12241_v34 = vld [vmem:[%s18365_s3 + $0x128] ss:$12 sps:$4 sm:$0xff]  }
  0xe4   :  { %618 = vmatprep.subr.bf16.mxu0 %v12194_v6  ;;  %v12240_v32 = vld [vmem:[%s18365_s3 + $0x50] ss:$12 sps:$4 sm:$0xff]   ;;  %v12242_v35 = vld [vmem:[%s18365_s3 + $0x68] ss:$12 sps:$4 sm:$0xff]   ;;  %v12243_v36 = vld [vmem:[%s18365_s3 + $0x140] ss:$12 sps:$4 sm:$0xff]  }
  0xe5   :  { %v12220_v37 = vld [vmem:[%s18365_s3 + $0x108] ss:$12 sps:$4 sm:$0xff]   ;;  %v12221_v38 = vld [vmem:[%s18365_s3 + $0x124] ss:$12 sps:$4 sm:$0xff]   ;;  %v12244_v39 = vld [vmem:[%s18365_s3 + $0x80] ss:$12 sps:$4 sm:$0xff]  }
  0xe6   :  { %10152 = vmatpush3.bf16.msra.mxu1 %v12236_v23  ;;  %v12223_v40 = vld [vmem:[%s18365_s3 + $0x120] ss:$12 sps:$4 sm:$0xff]   ;;  %v12224_v41 = vld [vmem:[%s18365_s3 + $0x13c] ss:$12 sps:$4 sm:$0xff]   ;;  %v12226_v42 = vld [vmem:[%s18365_s3 + $0x138] ss:$12 sps:$4 sm:$0xff]  }
  0xe7   :  { %619 = vmatpush1.bf16.msra.mxu0 %v12196_v7  ;;  %10153 = vmatprep.subr.bf16.mxu1 %v12237_v24  ;;  %v12227_v43 = vld [vmem:[%s18365_s3 + $0x154] ss:$12 sps:$4 sm:$0xff]   ;;  %v12229_v44 = vld [vmem:[%s18365_s3 + $0x150] ss:$12 sps:$4 sm:$0xff]   ;;  %v12230_v45 = vld [vmem:[%s18365_s3 + $0x16c] ss:$12 sps:$4 sm:$0xff]  }
  0xe8   :  { %620 = vmatprep.subr.bf16.mxu0 %v12197_v8  ;;  %v12232_v46 = vld [vmem:[%s18365_s3 + $0x168] ss:$12 sps:$4 sm:$0xff]   ;;  %v253_v47 = vld [vmem:[%s18366_s19] sm:$0xff]  ;;  %v260_v50 = vld [vmem:[%s18366_s19 + $0x38] sm:$0xff]  ;;  %v18240_v15 = vmov 0.0  }
  0xe9   :  { %v255_v48 = vld [vmem:[%s18366_s19 + $0x10] sm:$0xff]  ;;  %v258_v49 = vld [vmem:[%s18366_s19 + $0x28] sm:$0xff]  ;;  %v257_v53 = vld [vmem:[%s18366_s19 + $0x20] sm:$0xff] }
  0xea   :  { %10154 = vmatpush3.bf16.msra.mxu1 %v12238_v27  ;;  %v331_v51 = vpack.c.bf16 %v255_v48, %v253_v47  ;;  %v334_v52 = vpack.c.bf16 %v260_v50, %v258_v49  ;;  %v259_v54 = vld [vmem:[%s18366_s19 + $0x30] sm:$0xff]  ;;  %v262_v55 = vld [vmem:[%s18366_s19 + $0x48] sm:$0xff]  ;;  %v264_v56 = vld [vmem:[%s18366_s19 + $0x58] sm:$0xff] }
  0xeb   :  { %621 = vmatpush1.bf16.msra.mxu0 %v12199_v9  ;;  %10155 = vmatprep.subr.bf16.mxu1 %v12239_v28  ;;  %v333_v57 = vpack.c.bf16 %v259_v54, %v257_v53  ;;  %v336_v58 = vpack.c.bf16 %v264_v56, %v262_v55  ;;  %v261_v59 = vld [vmem:[%s18366_s19 + $0x40] sm:$0xff]  ;;  %v263_v60 = vld [vmem:[%s18366_s19 + $0x50] sm:$0xff]  ;;  %v266_v61 = vld [vmem:[%s18366_s19 + $0x68] sm:$0xff] }
  0xec   :  { %622 = vmatprep.subr.bf16.mxu0 %v12200_v10  ;;  %v335_v62 = vpack.c.bf16 %v263_v60, %v261_v59  ;;  %v338_v63 = vpack.c.bf16 %v266_v61, %v266_v61  ;;  %v265_v0 = vld [vmem:[%s18366_s19 + $0x60] sm:$0xff]  ;;  %v12247_v4 = vld [vmem:[%s18365_s3 + $0x170] ss:$12 sps:$4 sm:$0xff]   ;;  %v12250_v7 = vld [vmem:[%s18367_s1 + $0x8] sm:$0xff]  }
  0xed   :  { %v337_v1 = vpack.c.bf16 %v265_v0, %v265_v0  ;;  %v12245_v2 = vld [vmem:[%s18365_s3 + $0x158] ss:$12 sps:$4 sm:$0xff]   ;;  %v12248_v5 = vld [vmem:[%s18365_s3 + $0xb0] ss:$12 sps:$4 sm:$0xff]   ;;  %v14075_v21 = vld [vmem:[%s18368_s24] sm:$0x7] }
  0xee   :  { %10156 = vmatpush3.bf16.msra.mxu1 %v12240_v32  ;;  %v12246_v3 = vld [vmem:[%s18365_s3 + $0x98] ss:$12 sps:$4 sm:$0xff]   ;;  %v12251_v8 = vld [vmem:[%s18367_s1 + $0x10] sm:$0xff]  }
  0xef   :  { %623 = vmatpush1.bf16.msra.mxu0 %v12202_v11  ;;  %10157 = vmatprep.subr.bf16.mxu1 %v12241_v34  ;;  %v12249_v6 = vld [vmem:[%s18367_s1] sm:$0xff]   ;;  %v12252_v9 = vld [vmem:[%s18367_s1 + $0x18] sm:$0xff]   ;;  %v12254_v11 = vld [vmem:[%s18367_s1 + $0x28] sm:$0xff]  }
  0xf0   :  { %624 = vmatprep.subr.bf16.mxu0 %v12203_v12  ;;  %v12253_v10 = vld [vmem:[%s18367_s1 + $0x20] sm:$0xff]   ;;  %v12255_v12 = vld [vmem:[%s18367_s1 + $0x30] sm:$0xff]   ;;  %v12256_v13 = vld [vmem:[%s18367_s1 + $0x38] sm:$0xff]  }
  0xf1   :  { %v12257_v14 = vld [vmem:[%s18223_s11] sm:$0xff]   ;;  %v12260_v22 = vld [vmem:[%s18223_s11 + $0x18] sm:$0xff]  }
  0xf2   :  { %10158 = vmatpush3.bf16.msra.mxu1 %v12242_v35  ;;  %v12261_v23 = vld [vmem:[%s18223_s11 + $0x20] sm:$0xff]  }
  0xf3   :  { %625 = vmatpush1.bf16.msra.mxu0 %v12205_v16  ;;  %10159 = vmatprep.subr.bf16.mxu1 %v12243_v36  ;;  %v341_v16 = vlaneseq }
  0xf4   :  { %626 = vmatprep.subr.bf16.mxu0 %v12206_v17  ;;  %v12258_v17 = vld [vmem:[%s18223_s11 + $0x8] sm:$0xff]  }
  0xf6   :  { %10160 = vmatpush3.bf16.msra.mxu1 %v12244_v39 }
  0xf7   :  { %627 = vmatpush1.bf16.msra.mxu0 %v12208_v18  ;;  %10161 = vmatprep.subr.bf16.mxu1 %v12245_v2  ;;  %v12259_v18 = vld [vmem:[%s18223_s11 + $0x10] sm:$0xff]  }
  0xf8   :  { %628 = vmatprep.subr.bf16.mxu0 %v12209_v19  ;;  %v14067_v19 = vshrl.u32 %v341_v16, 7 }
  0xfa   :  { %10162 = vmatpush3.bf16.msra.mxu1 %v12246_v3  ;;  %v343_v20 = vsub.s32 0, %v14067_v19 }
  0xfb   :  { %629 = vmatpush1.bf16.msra.mxu0 %v12211_v25  ;;  %10163 = vmatprep.subr.bf16.mxu1 %v12247_v4 }
  0xfc   :  { %630 = vmatprep.subr.bf16.mxu0 %v12212_v26  ;;  %v344_v24 = vrot.slane %v14075_v21, %v343_v20  ;;  %v12262_v26 = vld [vmem:[%s18223_s11 + $0x28] sm:$0xff]  }
  0xfe   :  { %10164 = vmatpush3.bf16.msra.mxu1 %v12248_v5 }
  0xff   :  { %631 = vmatpush1.bf16.msra.mxu0 %v12214_v29  ;;  %10949 = vmatprep.subr.bf16.mxu1 %v12249_v6 }
 0x100   :  { %632 = vmatprep.subr.bf16.mxu0 %v12215_v30 }
 0x101   :  { %716 = vmatmul.mubr.bf16.vlgmr.msra.gmra.mrb[0].mxu1 %v331_v51 }
 0x102   :  { %723 = vmatprep.mubr.bf16.mxu1 %v334_v52  ;;  %10950 = vmatpush3.bf16.msra.mxu1 %v12249_v6 }
 0x103   :  { %633 = vmatpush1.bf16.msra.mxu0 %v12217_v31  ;;  %10951 = vmatprep.subr.bf16.mxu1 %v12250_v7 }
 0x104   :  { %634 = vmatprep.subr.bf16.mxu0 %v12218_v33 }
 0x106   :  { %10952 = vmatpush3.bf16.msra.mxu1 %v12250_v7 }
 0x107   :  { %635 = vmatpush1.bf16.msra.mxu0 %v12220_v37  ;;  %10953 = vmatprep.subr.bf16.mxu1 %v12251_v8 }
 0x108   :  { %636 = vmatprep.subr.bf16.mxu0 %v12221_v38 }
 0x109   :  { %724 = vmatmul.mubr.bf16.gmra.mrb[4].mxu1 %v333_v57 }
 0x10a   :  { %731 = vmatprep.mubr.bf16.mxu1 %v336_v58  ;;  %10954 = vmatpush3.bf16.msra.mxu1 %v12251_v8 }
 0x10b   :  { %637 = vmatpush1.bf16.msra.mxu0 %v12223_v40  ;;  %10955 = vmatprep.subr.bf16.mxu1 %v12252_v9 }
 0x10c   :  { %638 = vmatprep.subr.bf16.mxu0 %v12224_v41 }
 0x10e   :  { %10956 = vmatpush3.bf16.msra.mxu1 %v12252_v9 }
 0x10f   :  { %639 = vmatpush1.bf16.msra.mxu0 %v12226_v42  ;;  %10957 = vmatprep.subr.bf16.mxu1 %v12253_v10 }
 0x110   :  { %640 = vmatprep.subr.bf16.mxu0 %v12227_v43 }
 0x111   :  { %732 = vmatmul.mubr.bf16.gmra.mrb[8].mxu1 %v335_v62 }
 0x112   :  { %739 = vmatprep.mubr.bf16.mxu1 %v338_v63  ;;  %10958 = vmatpush3.bf16.msra.mxu1 %v12253_v10 }
 0x113   :  { %641 = vmatpush1.bf16.msra.mxu0 %v12229_v44  ;;  %10959 = vmatprep.subr.bf16.mxu1 %v12254_v11 }
 0x114   :  { %642 = vmatprep.subr.bf16.mxu0 %v12230_v45 }
 0x116   :  { %10960 = vmatpush3.bf16.msra.mxu1 %v12254_v11 }
 0x117   :  { %643 = vmatpush1.bf16.msra.mxu0 %v12232_v46  ;;  %10961 = vmatprep.subr.bf16.mxu1 %v12255_v12 }
 0x118   :  { %10973 = vmatprep.subr.bf16.mxu0 %v18240_v15 }
 0x119   :  { %740 = vmatmul.mubr.bf16.gmra.mrb[12].mxu1 %v337_v1 }
 0x11a   :  { %645 = vmatmul.mubr.bf16.vlgmr.msra.gmra.mrb[0].mxu0 %v331_v51  ;;  %10962 = vmatpush3.bf16.msra.mxu1 %v12255_v12 }
 0x11b   :  { %654 = vmatprep.mubr.bf16.mxu0 %v334_v52  ;;  %10963 = vmatprep.subr.bf16.mxu1 %v12256_v13 }
 0x11c   :  { %10974 = vmatpush3.bf16.msra.mxu0 %v12257_v14 }
 0x11d   :  { %10975 = vmatprep.subr.bf16.mxu0 %v18240_v15 }
 0x11e   :  { %10964 = vmatpush3.bf16.msra.mxu1 %v12256_v13 }
 0x120   :  { %10976 = vmatpush3.bf16.msra.mxu0 %v12258_v17 }
 0x121   :  { %10977 = vmatprep.subr.bf16.mxu0 %v18240_v15 }
 0x122   :  { %655 = vmatmul.mubr.bf16.gmra.mrb[4].mxu0 %v333_v57 }
 0x123   :  { %664 = vmatprep.mubr.bf16.mxu0 %v336_v58 }
 0x124   :  { %10978 = vmatpush3.bf16.msra.mxu0 %v12259_v18 }
 0x125   :  { %10979 = vmatprep.subr.bf16.mxu0 %v18240_v15 }
 0x128   :  { %10980 = vmatpush3.bf16.msra.mxu0 %v12260_v22 }
 0x129   :  { %10981 = vmatprep.subr.bf16.mxu0 %v18240_v15 }
 0x12a   :  { %665 = vmatmul.mubr.bf16.gmra.mrb[8].mxu0 %v335_v62 }
 0x12b   :  { %674 = vmatprep.mubr.bf16.mxu0 %v338_v63 }
 0x12c   :  { %10982 = vmatpush3.bf16.msra.mxu0 %v12261_v23 }
 0x12d   :  { %10983 = vmatprep.subr.bf16.mxu0 %v18240_v15 }
 0x130   :  { %10984 = vmatpush3.bf16.msra.mxu0 %v12262_v26 }
 0x131   :  { %10985 = vmatprep.subr.bf16.mxu0 %v18240_v15 }
 0x132   :  { %675 = vmatmul.mubr.bf16.gmra.mrb[12].mxu0 %v337_v1 }
 0x133   :  { %10989 = vmatprep.mubr.msk.bf16.mxu0 %vm13585_vm0, %v18240_v15 }
 0x1ed   :  { %v646_v25 = vpop.f32.mrb[0].mxu0 }
 0x1ee   :  { %v647_v27 = vadd.f32 %v646_v25, %v344_v24  ;;  %v14088_v28 = vpop.f32.mrb[1].mxu0 }
 0x1ef   :  { %v650_v29 = vpop.f32.mrb[2].mxu0 }
 0x1f0   :  { %v747_v30 = vsub.f32 0.0, %v647_v27  ;;  %v651_v31 = vadd.f32 %v650_v29, %v344_v24  ;;  %v14091_v32 = vpop.f32.mrb[3].mxu0 }
 0x1f2   :  { %v754_v33 = vmul.f32 1.442695, %v747_v30  ;;  %v748_v34 = vsub.f32 0.0, %v651_v31 }
 0x1f4   :  { %12529 = vpow2.f32 %v754_v33  ;;  %v756_v35 = vmul.f32 1.442695, %v748_v34 }
 0x1f5   :  { %v656_v36 = vpop.f32.mrb[4].mxu0 }
 0x1f6   :  { %12531 = vpow2.f32 %v756_v35  ;;  %v657_v37 = vadd.f32 %v656_v36, %v344_v24  ;;  %v14094_v38 = vpop.f32.mrb[5].mxu0  ;;  %v10165_v36 = vpop.f32.mrb[0].mxu1 }
 0x1f7   :  { %v660_v39 = vpop.f32.mrb[6].mxu0 }
 0x1f8   :  { %v749_v40 = vsub.f32 0.0, %v657_v37  ;;  %v661_v41 = vadd.f32 %v660_v39, %v344_v24  ;;  %v14096_v42 = vpop.f32.mrb[7].mxu0  ;;  %v10166_v39 = vpop.f32.mrb[1].mxu1 }
 0x1fa   :  { %v758_v43 = vmul.f32 1.442695, %v749_v40  ;;  %v750_v44 = vsub.f32 0.0, %v661_v41  ;;  %v14104_v40 = vadd.f32 %v10166_v39, %v10165_v36 }
 0x1fc   :  { %12533 = vpow2.f32 %v758_v43  ;;  %v760_v45 = vmul.f32 1.442695, %v750_v44 }
 0x1fd   :  { %v666_v46 = vpop.f32.mrb[8].mxu0 }
 0x1fe   :  { %v12530_v47 = vpop.eup %12529  ;;  %12535 = vpow2.f32 %v760_v45  ;;  %v667_v48 = vadd.f32 %v666_v46, %v344_v24  ;;  %v14098_v49 = vpop.f32.mrb[9].mxu0 }
 0x1ff   :  { %v768_v50 = vadd.f32 1.0, %v12530_v47  ;;  %v670_v51 = vpop.f32.mrb[10].mxu0 }
 0x200   :  { %v12532_v52 = vpop.eup %12531  ;;  %v751_v53 = vsub.f32 0.0, %v667_v48  ;;  %v671_v54 = vadd.f32 %v670_v51, %v344_v24  ;;  %v14100_v55 = vpop.f32.mrb[11].mxu0 }
 0x201   :  { %12537 = vrcp.f32 %v768_v50  ;;  %v769_v56 = vadd.f32 1.0, %v12532_v52 }
 0x202   :  { %v762_v57 = vmul.f32 1.442695, %v751_v53  ;;  %v752_v58 = vsub.f32 0.0, %v671_v54 }
 0x203   :  { %12539 = vrcp.f32 %v769_v56 }
 0x204   :  { %12541 = vpow2.f32 %v762_v57  ;;  %v764_v59 = vmul.f32 1.442695, %v752_v58 }
 0x205   :  { %v676_v60 = vpop.f32.mrb[12].mxu0 }
 0x206   :  { %v12534_v61 = vpop.eup %12533  ;;  %12543 = vpow2.f32 %v764_v59  ;;  %v677_v62 = vadd.f32 %v676_v60, %v344_v24  ;;  %v14102_v63 = vpop.f32.mrb[13].mxu0 }
 0x207   :  { %v770_v0 = vadd.f32 1.0, %v12534_v61  ;;  %v680_v1 = vpop.f32.mrb[14].mxu0 }
 0x208   :  { %v12536_v2 = vpop.eup %12535  ;;  %v753_v3 = vsub.f32 0.0, %v677_v62  ;;  %v681_v4 = vpop.f32.mrb[15].mxu0  ;;  %v12264_v1 = vld [vmem:[%s18223_s11 + $0x38] sm:$0xff]  }
 0x209   :  { %12545 = vrcp.f32 %v770_v0  ;;  %v771_v5 = vadd.f32 1.0, %v12536_v2  ;;  %v12263_v0 = vld [vmem:[%s18223_s11 + $0x30] sm:$0xff]   ;;  %v12271_v4 = vld [vmem:[#allocation4 + $0x1c] ss:$12 sps:$4 sm:$0xff]  }
 0x20a   :  { %v766_v6 = vmul.f32 1.442695, %v753_v3  ;;  %10986 = vmatpush3.bf16.msra.mxu0 %v12263_v0  ;;  %v12265_v2 = vld [vmem:[#allocation4] ss:$12 sps:$4 sm:$0xff]   ;;  %v12267_v3 = vld [vmem:[#allocation4 + $0x4] ss:$12 sps:$4 sm:$0xff]  }
 0x20b   :  { %v12538_v7 = vpop.eup %12537  ;;  %12547 = vrcp.f32 %v771_v5  ;;  %10987 = vmatprep.subr.bf16.mxu0 %v18240_v15  ;;  %1449 = vmatprep.subr.bf16.mxu1 %v12267_v3  ;;  %v12269_v5 = vld [vmem:[#allocation4 + $0x18] ss:$12 sps:$4 sm:$0xff]  }
 0x20c   :  { %12549 = vpow2.f32 %v766_v6  ;;  %v789_v10 = vmul.f32 %v12538_v7, %v647_v27  ;;  %v9807_v6 = vld [vmem:[#allocation2] ss:$0 sm:$0xff] }
 0x20d   :  { %v12540_v8 = vpop.eup %12539 }
 0x20e   :  { %v12542_v9 = vpop.eup %12541  ;;  %v790_v11 = vmul.f32 %v12540_v8, %v651_v31  ;;  %10988 = vmatpush3.bf16.msra.mxu0 %v12264_v1 }
 0x20f   :  { %v772_v12 = vadd.f32 1.0, %v12542_v9  ;;  %11033 = vmatprep.subr.bf16.mxu0 %v18240_v15 }
 0x210   :  { %v12544_v13 = vpop.eup %12543  ;;  %v812_v14 = vpack.c.bf16 %v790_v11, %v789_v10 }
 0x211   :  { %12551 = vrcp.f32 %v772_v12  ;;  %v773_v16 = vadd.f32 1.0, %v12544_v13 }
 0x212   :  { %10965 = vmatprep.mubr.bf16.mxu1 %v812_v14 }
 0x213   :  { %v12546_v17 = vpop.eup %12545  ;;  %12553 = vrcp.f32 %v773_v16  ;;  %v12268_v16 = vld [vmem:[#allocation4 + $0x8] ss:$12 sps:$4 sm:$0xff]  }
 0x214   :  { %v791_v22 = vmul.f32 %v12546_v17, %v657_v37  ;;  %v10168_v37 = vpop.f32.mrb[2].mxu1 }
 0x215   :  { %v12548_v18 = vpop.eup %12547 }
 0x216   :  { %v12550_v20 = vpop.eup %12549  ;;  %v792_v23 = vmul.f32 %v12548_v18, %v661_v41  ;;  %v10169_v41 = vpop.f32.mrb[3].mxu1 }
 0x217   :  { %v774_v24 = vadd.f32 1.0, %v12550_v20  ;;  %v14106_v43 = vadd.f32 %v10169_v41, %v10168_v37  ;;  %v10171_v44 = vpop.f32.mrb[4].mxu1 }
 0x218   :  { %v813_v25 = vpack.c.bf16 %v792_v23, %v791_v22  ;;  %v10172_v45 = vpop.f32.mrb[5].mxu1  ;;  %v12272_v22 = vld [vmem:[#allocation4 + $0x20] ss:$12 sps:$4 sm:$0xff]  }
 0x219   :  { %12555 = vrcp.f32 %v774_v24  ;;  %v14108_v46 = vadd.f32 %v10172_v45, %v10171_v44  ;;  %v10174_v47 = vpop.f32.mrb[6].mxu1 }
 0x21a   :  { %10966 = vmatmul.mubr.bf16.vlgmr.msra.gmra.mrb[16].mxu1 %v813_v25 }
 0x21b   :  { %v12552_v26 = vpop.eup %12551  ;;  %1450 = vmatpush1.bf16.msra.mxu1 %v12265_v2 }
 0x21c   :  { %v793_v27 = vmul.f32 %v12552_v26, %v667_v48  ;;  %v10175_v48 = vpop.f32.mrb[7].mxu1  ;;  %1451 = vmatprep.subr.bf16.mxu1 %v12271_v4 }
 0x21d   :  { %v12554_v29 = vpop.eup %12553  ;;  %v14110_v50 = vadd.f32 %v10175_v48, %v10174_v47  ;;  %v10177_v51 = vpop.f32.mrb[8].mxu1 }
 0x21e   :  { %v794_v30 = vmul.f32 %v12554_v29, %v671_v54  ;;  %v10178_v52 = vpop.f32.mrb[9].mxu1 }
 0x21f   :  { %v14112_v53 = vadd.f32 %v10178_v52, %v10177_v51  ;;  %v10180_v54 = vpop.f32.mrb[10].mxu1  ;;  %1452 = vmatpush1.bf16.msra.mxu1 %v12269_v5 }
 0x220   :  { %v814_v31 = vpack.c.bf16 %v794_v30, %v793_v27  ;;  %v10181_v56 = vpop.f32.mrb[11].mxu1 }
 0x221   :  { %v14114_v57 = vadd.f32 %v10181_v56, %v10180_v54  ;;  %v10183_v58 = vpop.f32.mrb[12].mxu1 }
 0x222   :  { %10969 = vmatprep.mubr.bf16.mxu1 %v814_v31  ;;  %v10184_v59 = vpop.f32.mrb[13].mxu1  ;;  %v347_v31 = vsub.s32 1, %v14067_v19 }
 0x223   :  { %v12556_v33 = vpop.eup %12555  ;;  %v14116_v60 = vadd.f32 %v10184_v59, %v10183_v58  ;;  %v10186_v61 = vpop.f32.mrb[14].mxu1 }
 0x224   :  { %v795_v34 = vmul.f32 %v12556_v33, %v677_v62  ;;  %v10187_v62 = vpop.f32.mrb[15].mxu1  ;;  %v348_v36 = vrot.slane %v14075_v21, %v347_v31  ;;  %v12291_v31 = vld [vmem:[#allocation4 + $0x94] ss:$12 sps:$4 sm:$0xff]  }
 0x226   :  { %v815_v35 = vpack.c.bf16 %v795_v34, %v795_v34  ;;  %v14163_v44 = vadd.f32 %v14088_v28, %v348_v36  ;;  %v14172_v48 = vadd.f32 %v14094_v38, %v348_v36  ;;  %v14175_v52 = vadd.f32 %v14091_v32, %v348_v36 }
 0x227   :  { %v14184_v56 = vadd.f32 %v14098_v49, %v348_v36  ;;  %v14187_v38 = vadd.f32 %v14096_v42, %v348_v36  ;;  %v14196_v61 = vadd.f32 %v14102_v63, %v348_v36  ;;  %v351_v49 = vsub.s32 2, %v14067_v19 }
 0x228   :  { %10970 = vmatmul.mubr.bf16.gmra.mrb[20].mxu1 %v815_v35  ;;  %18376 = vst [vmem:[#allocation32_spill] sm:$0xff] %v14163_v44  ;;  %v974_v47 = vmul.f32 %v14163_v44, %v14163_v44  ;;  %18377 = vst [vmem:[#allocation33_spill] sm:$0xff] %v14172_v48  ;;  %v976_v28 = vmul.f32 %v14172_v48, %v14172_v48  ;;  %v975_v54 = vmul.f32 %v14175_v52, %v14175_v52 }
 0x229   :  { %18378 = vst [vmem:[#allocation34_spill] sm:$0xff] %v14175_v52  ;;  %18379 = vst [vmem:[#allocation35_spill] sm:$0xff] %v14184_v56  ;;  %v978_v32 = vmul.f32 %v14184_v56, %v14184_v56  ;;  %v977_v59 = vmul.f32 %v14187_v38, %v14187_v38  ;;  %v14200_v0 = vadd.f32 %v14100_v55, %v348_v36  ;;  %v12292_v36 = vld [vmem:[#allocation4 + $0x98] ss:$12 sps:$4 sm:$0xff]  }
 0x22a   :  { %v992_v58 = vpack.c.bf16 %v976_v28, %v975_v54  ;;  %18380 = vst [vmem:[#allocation36_spill] sm:$0xff] %v14187_v38  ;;  %18381 = vst [vmem:[#allocation37_spill] sm:$0xff] %v14196_v61  ;;  %v352_v42 = vrot.slane %v14075_v21, %v351_v49  ;;  %v980_v1 = vmul.f32 %v14196_v61, %v14196_v61 }
 0x22b   :  { %v993_v62 = vpack.c.bf16 %v978_v32, %v977_v59  ;;  %18382 = vst [vmem:[#allocation38_spill] sm:$0xff] %v14200_v0  ;;  %v979_v2 = vmul.f32 %v14200_v0, %v14200_v0 }
 0x22c   :  { %v14210_v63 = vadd.f32 %v14104_v40, %v352_v42  ;;  %v14213_v19 = vadd.f32 %v14106_v43, %v352_v42  ;;  %v14222_v4 = vadd.f32 %v14108_v46, %v352_v42  ;;  %v14225_v40 = vadd.f32 %v14110_v50, %v352_v42 }
 0x22d   :  { %v994_v55 = vpack.c.bf16 %v980_v1, %v979_v2  ;;  %v14237_v46 = vadd.f32 %v14114_v57, %v352_v42 }
 0x22e   :  { %18383 = vst [vmem:[#allocation39_spill] sm:$0xff] %v14210_v63  ;;  %18384 = vst [vmem:[#allocation40_spill] sm:$0xff] %v14213_v19  ;;  %v981_v21 = vmul.f32 %v14210_v63, %v14210_v63  ;;  %v982_v3 = vmul.f32 %v14213_v19, %v14213_v19  ;;  %v983_v43 = vmul.f32 %v14222_v4, %v14222_v4 }
 0x22f   :  { %18385 = vst [vmem:[#allocation41_spill] sm:$0xff] %v14222_v4  ;;  %18386 = vst [vmem:[#allocation42_spill] sm:$0xff] %v14225_v40 }
 0x230   :  { %v995_v5 = vpack.c.bf16 %v982_v3, %v981_v21  ;;  %18388 = vst [vmem:[#allocation44_spill] sm:$0xff] %v14237_v46 }
 0x2ed   :  { %v10967_v7 = vpop.f32.mrb[16].mxu1 }
 0x2ee   :  { %v905_v8 = vpop.f32.mrb[17].mxu1  ;;  %v14138_v20 = vadd.f32 %v10967_v7, %v9807_v6  ;;  %v14234_v7 = vadd.f32 %v14112_v53, %v352_v42 }
 0x2ef   :  { %v14128_v9 = vadd.f32 %v9807_v6, %v905_v8  ;;  %v10968_v10 = vpop.f32.mrb[18].mxu1 }
 0x2f0   :  { %v908_v11 = vpop.f32.mrb[19].mxu1  ;;  %v14136_v17 = vadd.f32 %v10968_v10, %v9807_v6  ;;  %18372 = vst [vmem:[#allocation28_spill] sm:$0xff] %v14138_v20  ;;  %v969_v25 = vmul.f32 %v14138_v20, %v14138_v20  ;;  %18387 = vst [vmem:[#allocation43_spill] sm:$0xff] %v14234_v7  ;;  %v985_v50 = vmul.f32 %v14234_v7, %v14234_v7 }
 0x2f1   :  { %18369 = vst [vmem:[#allocation25_spill] sm:$0xff] %v14128_v9  ;;  %v14130_v12 = vadd.f32 %v9807_v6, %v908_v11  ;;  %v967_v13 = vmul.f32 %v14128_v9, %v14128_v9  ;;  %v986_v10 = vmul.f32 %v14237_v46, %v14237_v46  ;;  %v14246_v11 = vadd.f32 %v14116_v60, %v352_v42  ;;  %v12279_v60 = vld [vmem:[#allocation4 + $0x4c] ss:$12 sps:$4 sm:$0xff]  }
 0x2f2   :  { %18371 = vst [vmem:[#allocation27_spill] sm:$0xff] %v14136_v17  ;;  %v970_v23 = vmul.f32 %v14136_v17, %v14136_v17 }
 0x2f3   :  { %18370 = vst [vmem:[#allocation26_spill] sm:$0xff] %v14130_v12  ;;  %v968_v14 = vmul.f32 %v14130_v12, %v14130_v12  ;;  %18389 = vst [vmem:[#allocation45_spill] sm:$0xff] %v14246_v11  ;;  %v987_v53 = vmul.f32 %v14246_v11, %v14246_v11 }
 0x2f4   :  { %v989_v27 = vpack.c.bf16 %v970_v23, %v969_v25  ;;  %v12280_v23 = vld [vmem:[#allocation4 + $0x50] ss:$12 sps:$4 sm:$0xff]   ;;  %v12281_v25 = vld [vmem:[#allocation4 + $0x60] ss:$12 sps:$4 sm:$0xff]  }
 0x2f5   :  { %v988_v18 = vpack.c.bf16 %v968_v14, %v967_v13  ;;  %v997_v13 = vpack.c.bf16 %v986_v10, %v985_v50  ;;  %v998_v57 = vpack.c.bf16 %v987_v53, %v987_v53  ;;  %v12275_v14 = vld [vmem:[#allocation4 + $0x34] ss:$12 sps:$4 sm:$0xff]  }
 0x2f6   :  { %1453 = vmatprep.subr.bf16.mxu1 %v12275_v14 }
 0x2f7   :  { %10990 = vmatmul.mubr.bf16.vlgmr.msra.gmra.mrb[16].mxu0 %v988_v18  ;;  %v12276_v18 = vld [vmem:[#allocation4 + $0x38] ss:$12 sps:$4 sm:$0xff]  }
 0x2f8   :  { %10993 = vmatprep.mubr.msk.bf16.mxu0 %vm13585_vm0, %v18240_v15  ;;  %11034 = vmatpush3.bf16.msra.mxu0 %v12268_v16  ;;  %v12273_v16 = vld [vmem:[#allocation4 + $0x30] ss:$12 sps:$4 sm:$0xff]  }
 0x2f9   :  { %11035 = vmatprep.subr.bf16.mxu0 %v18240_v15  ;;  %1454 = vmatpush1.bf16.msra.mxu1 %v12273_v16 }
 0x2fa   :  { %1455 = vmatprep.subr.bf16.mxu1 %v12279_v60 }
 0x2fb   :  { %v10971_v24 = vpop.f32.mrb[20].mxu1 }
 0x2fc   :  { %v921_v26 = vpop.f32.mrb[21].mxu1  ;;  %11036 = vmatpush3.bf16.msra.mxu0 %v12272_v22  ;;  %v14160_v37 = vadd.f32 %v10971_v24, %v9807_v6  ;;  %v12277_v22 = vld [vmem:[#allocation4 + $0x48] ss:$12 sps:$4 sm:$0xff]   ;;  %v12283_v24 = vld [vmem:[#allocation4 + $0x64] ss:$12 sps:$4 sm:$0xff]  }
 0x2fd   :  { %v10972_v29 = vpop.f32.mrb[22].mxu1  ;;  %11037 = vmatprep.subr.bf16.mxu0 %v18240_v15  ;;  %v14149_v33 = vadd.f32 %v9807_v6, %v921_v26  ;;  %1456 = vmatpush1.bf16.msra.mxu1 %v12277_v22  ;;  %v12284_v26 = vld [vmem:[#allocation4 + $0x68] ss:$12 sps:$4 sm:$0xff]  }
 0x2fe   :  { %v924_v30 = vpop.f32.mrb[23].mxu1  ;;  %18375 = vst [vmem:[#allocation31_spill] sm:$0xff] %v14160_v37  ;;  %v973_v45 = vmul.f32 %v14160_v37, %v14160_v37  ;;  %1457 = vmatprep.subr.bf16.mxu1 %v12283_v24  ;;  %v12287_v29 = vld [vmem:[#allocation4 + $0x7c] ss:$12 sps:$4 sm:$0xff]  }
 0x2ff   :  { %18373 = vst [vmem:[#allocation29_spill] sm:$0xff] %v14149_v33  ;;  %v14151_v34 = vadd.f32 %v9807_v6, %v924_v30  ;;  %10994 = vmatmul.mubr.bf16.gmra.mrb[20].mxu0 %v989_v27  ;;  %v971_v39 = vmul.f32 %v14149_v33, %v14149_v33  ;;  %v984_v6 = vmul.f32 %v14225_v40, %v14225_v40  ;;  %v12285_v27 = vld [vmem:[#allocation4 + $0x78] ss:$12 sps:$4 sm:$0xff]   ;;  %v12288_v30 = vld [vmem:[#allocation4 + $0x80] ss:$12 sps:$4 sm:$0xff]  }
 0x300   :  { %10997 = vmatprep.mubr.msk.bf16.mxu0 %vm13585_vm0, %v18240_v15  ;;  %v991_v51 = vpack.c.bf16 %v974_v47, %v973_v45  ;;  %11038 = vmatpush3.bf16.msra.mxu0 %v12276_v18  ;;  %v12296_v45 = vld [vmem:[#allocation4 + $0xb0] ss:$12 sps:$4 sm:$0xff]   ;;  %v18237_v47 = vmov 0  }
 0x301   :  { %18374 = vst [vmem:[#allocation30_spill] sm:$0xff] %v14151_v34  ;;  %v972_v35 = vmul.f32 %v14151_v34, %v14151_v34  ;;  %v996_v8 = vpack.c.bf16 %v984_v6, %v983_v43  ;;  %11039 = vmatprep.subr.bf16.mxu0 %v18240_v15  ;;  %1458 = vmatpush1.bf16.msra.mxu1 %v12281_v25 }
 0x302   :  { %1459 = vmatprep.subr.bf16.mxu1 %v12287_v29  ;;  %1481 = vmatprep.mubr.bf16.mxu1 %v18237_v47  ;;  %v14268_v29 = vld [vmem:[#allocation10] sm:$0xff]  }
 0x303   :  { %v990_v41 = vpack.c.bf16 %v972_v35, %v971_v39  ;;  %v12289_v35 = vld [vmem:[#allocation4 + $0x90] ss:$12 sps:$4 sm:$0xff]   ;;  %v12295_v39 = vld [vmem:[#allocation4 + $0xac] ss:$12 sps:$4 sm:$0xff]  }
 0x304   :  { %11040 = vmatpush3.bf16.msra.mxu0 %v12280_v23 }
 0x305   :  { %11041 = vmatprep.subr.bf16.mxu0 %v18240_v15  ;;  %1460 = vmatpush1.bf16.msra.mxu1 %v12285_v27 }
 0x306   :  { %1461 = vmatprep.subr.bf16.mxu1 %v12291_v31 }
 0x307   :  { %10998 = vmatmul.mubr.bf16.gmra.mrb[24].mxu0 %v990_v41  ;;  %v12293_v41 = vld [vmem:[#allocation4 + $0xa8] ss:$12 sps:$4 sm:$0xff]  }
 0x308   :  { %11001 = vmatprep.mubr.msk.bf16.mxu0 %vm13585_vm0, %v18240_v15  ;;  %11042 = vmatpush3.bf16.msra.mxu0 %v12284_v26 }
 0x309   :  { %11043 = vmatprep.subr.bf16.mxu0 %v18240_v15  ;;  %1462 = vmatpush1.bf16.msra.mxu1 %v12289_v35 }
 0x30a   :  { %1463 = vmatprep.subr.bf16.mxu1 %v12295_v39 }
 0x30c   :  { %11044 = vmatpush3.bf16.msra.mxu0 %v12288_v30 }
 0x30d   :  { %11045 = vmatprep.subr.bf16.mxu0 %v18240_v15  ;;  %1464 = vmatpush1.bf16.msra.mxu1 %v12293_v41 }
 0x30e   :  { %11093 = vmatprep.subr.bf16.mxu1 %v18240_v15 }
 0x30f   :  { %11002 = vmatmul.mubr.bf16.gmra.mrb[28].mxu0 %v991_v51 }
 0x310   :  { %11005 = vmatprep.mubr.msk.bf16.mxu0 %vm13585_vm0, %v18240_v15  ;;  %11046 = vmatpush3.bf16.msra.mxu0 %v12292_v36 }
 0x311   :  { %11047 = vmatprep.subr.bf16.mxu0 %v18240_v15 }
 0x314   :  { %11048 = vmatpush3.bf16.msra.mxu0 %v12296_v45 }
 0x315   :  { %11153 = vmatprep.subr.bf16.mxu0 %v18240_v15 }
 0x317   :  { %11006 = vmatmul.mubr.bf16.gmra.mrb[32].mxu0 %v992_v58 }
 0x318   :  { %11009 = vmatprep.mubr.msk.bf16.mxu0 %vm13585_vm0, %v18240_v15 }
 0x31f   :  { %11010 = vmatmul.mubr.bf16.gmra.mrb[36].mxu0 %v993_v62 }
 0x320   :  { %11013 = vmatprep.mubr.msk.bf16.mxu0 %vm13585_vm0, %v18240_v15 }
 0x327   :  { %11014 = vmatmul.mubr.bf16.gmra.mrb[40].mxu0 %v994_v55 }
 0x328   :  { %11017 = vmatprep.mubr.msk.bf16.mxu0 %vm13585_vm0, %v18240_v15 }
 0x32f   :  { %11018 = vmatmul.mubr.bf16.gmra.mrb[44].mxu0 %v995_v5 }
 0x330   :  { %11021 = vmatprep.mubr.msk.bf16.mxu0 %vm13585_vm0, %v18240_v15 }
 0x337   :  { %11022 = vmatmul.mubr.bf16.gmra.mrb[48].mxu0 %v996_v8 }
 0x338   :  { %11025 = vmatprep.mubr.msk.bf16.mxu0 %vm13585_vm0, %v18240_v15 }
 0x33f   :  { %11026 = vmatmul.mubr.bf16.gmra.mrb[52].mxu0 %v997_v13 }
 0x340   :  { %11029 = vmatprep.mubr.msk.bf16.mxu0 %vm13585_vm0, %v18240_v15 }
 0x347   :  { %11030 = vmatmul.mubr.bf16.gmra.mrb[56].mxu0 %v998_v57  ;;  %v14263_v57 = vld [vmem:[#allocation7] ss:$0 sm:$0xff] }
 0x348   :  { %11049 = vmatprep.mubr.msk.bf16.mxu0 %vm13585_vm0, %v18240_v15 }
 0x3ca   :  { %v1081_v51 = vpop.f32.mrb[16].mxu0 }
 0x3cb   :  { %v1167_v28 = vmul.f32 0.03125, %v1081_v51  ;;  %v10991_v54 = vpop.f32.mrb[17].mxu0  ;;  %v12298_v51 = vld [vmem:[#allocation10 + $0x8] sm:$0xff]  }
 0x3cc   :  { %v1084_v58 = vpop.f32.mrb[18].mxu0 }
 0x3cd   :  { %v1188_v32 = vadd.f32 1e-05, %v1167_v28  ;;  %v1168_v59 = vmul.f32 0.03125, %v1084_v58  ;;  %v10992_v49 = vpop.f32.mrb[19].mxu0 }
 0x3cf   :  { %12557 = vrsqrt.f32 %v1188_v32  ;;  %v1189_v62 = vadd.f32 1e-05, %v1168_v59 }
 0x3d1   :  { %12559 = vrsqrt.f32 %v1189_v62 }
 0x3d2   :  { %v1089_v42 = vpop.f32.mrb[20].mxu0 }
 0x3d3   :  { %v1169_v1 = vmul.f32 0.03125, %v1089_v42  ;;  %v10995_v2 = vpop.f32.mrb[21].mxu0  ;;  %v12299_v42 = vld [vmem:[#allocation10 + $0x10] sm:$0xff]  }
 0x3d4   :  { %v1092_v55 = vpop.f32.mrb[22].mxu0 }
 0x3d5   :  { %v1190_v21 = vadd.f32 1e-05, %v1169_v1  ;;  %v1170_v3 = vmul.f32 0.03125, %v1092_v55  ;;  %v10996_v5 = vpop.f32.mrb[23].mxu0 }
 0x3d7   :  { %12561 = vrsqrt.f32 %v1190_v21  ;;  %v1191_v43 = vadd.f32 1e-05, %v1170_v3 }
 0x3d9   :  { %v12558_v6 = vpop.eup %12557  ;;  %12563 = vrsqrt.f32 %v1191_v43 }
 0x3da   :  { %v1230_v8 = vmul.f32 %v12558_v6, %v14128_v9  ;;  %v1097_v50 = vpop.f32.mrb[24].mxu0 }
 0x3db   :  { %v12560_v10 = vpop.eup %12559  ;;  %v1171_v13 = vmul.f32 0.03125, %v1097_v50  ;;  %v10999_v53 = vpop.f32.mrb[25].mxu0 }
 0x3dc   :  { %v1231_v14 = vmul.f32 %v12560_v10, %v14130_v12  ;;  %v1100_v16 = vpop.f32.mrb[26].mxu0  ;;  %v1257_v23 = vmul.f32 %v14263_v57, %v1230_v8  ;;  %v12300_v8 = vld [vmem:[#allocation10 + $0x18] sm:$0xff]  }
 0x3dd   :  { %v1192_v18 = vadd.f32 1e-05, %v1171_v13  ;;  %v1172_v60 = vmul.f32 0.03125, %v1100_v16  ;;  %v11000_v22 = vpop.f32.mrb[27].mxu0 }
 0x3de   :  { %v1258_v24 = vmul.f32 %v14263_v57, %v1231_v14 }
 0x3df   :  { %12565 = vrsqrt.f32 %v1192_v18  ;;  %v1193_v25 = vadd.f32 1e-05, %v1172_v60  ;;  %v12301_v60 = vld [vmem:[#allocation10 + $0x20] sm:$0xff]  }
 0x3e0   :  { %v1310_v26 = vpack.c.bf16 %v1258_v24, %v1257_v23 }
 0x3e1   :  { %v12562_v27 = vpop.eup %12561  ;;  %12567 = vrsqrt.f32 %v1193_v25 }
 0x3e2   :  { %v1105_v30 = vpop.f32.mrb[28].mxu0  ;;  %1482 = vmatmul.mubr.bf16.vlgmr.msra.gmra.mrb[24].mxu1 %v1310_v26  ;;  %11050 = vmatmul.mubr.bf16.vlgmr.msra.gmra.mrb[60].mxu0 %v1310_v26  ;;  %v1232_v31 = vmul.f32 %v12562_v27, %v14138_v20 }
 0x3e3   :  { %v12564_v35 = vpop.eup %12563  ;;  %v1173_v36 = vmul.f32 0.03125, %v1105_v30  ;;  %v11003_v39 = vpop.f32.mrb[29].mxu0  ;;  %1491 = vmatprep.mubr.bf16.mxu1 %v18237_v47  ;;  %11053 = vmatprep.mubr.msk.bf16.mxu0 %vm13585_vm0, %v18240_v15 }
 0x3e4   :  { %v1108_v41 = vpop.f32.mrb[30].mxu0  ;;  %v1233_v45 = vmul.f32 %v12564_v35, %v14136_v17  ;;  %11154 = vmatpush3.bf16.msra.mxu0 %v14268_v29  ;;  %11094 = vmatpush3.bf16.msra.mxu1 %v14268_v29  ;;  %v1259_v32 = vmul.f32 %v14263_v57, %v1232_v31  ;;  %v12302_v35 = vld [vmem:[#allocation10 + $0x28] sm:$0xff]  }
 0x3e5   :  { %v1194_v28 = vadd.f32 1e-05, %v1173_v36  ;;  %v1174_v54 = vmul.f32 0.03125, %v1108_v41  ;;  %v11004_v58 = vpop.f32.mrb[31].mxu0  ;;  %11155 = vmatprep.subr.bf16.mxu0 %v18240_v15  ;;  %11095 = vmatprep.subr.bf16.mxu1 %v18240_v15 }
 0x3e6   :  { %v1260_v59 = vmul.f32 %v14263_v57, %v1233_v45  ;;  %v12303_v58 = vld [vmem:[#allocation10 + $0x30] sm:$0xff]  }
 0x3e7   :  { %12569 = vrsqrt.f32 %v1194_v28  ;;  %v1195_v49 = vadd.f32 1e-05, %v1174_v54 }
 0x3e8   :  { %v1311_v62 = vpack.c.bf16 %v1260_v59, %v1259_v32  ;;  %11156 = vmatpush3.bf16.msra.mxu0 %v12298_v51  ;;  %11096 = vmatpush3.bf16.msra.mxu1 %v12298_v51 }
 0x3e9   :  { %v12566_v1 = vpop.eup %12565  ;;  %12571 = vrsqrt.f32 %v1195_v49  ;;  %11157 = vmatprep.subr.bf16.mxu0 %v18240_v15  ;;  %11097 = vmatprep.subr.bf16.mxu1 %v18240_v15 }
 0x3ea   :  { %v1113_v2 = vpop.f32.mrb[32].mxu0  ;;  %1492 = vmatmul.mubr.bf16.gmra.mrb[28].mxu1 %v1311_v62  ;;  %11054 = vmatmul.mubr.bf16.gmra.mrb[64].mxu0 %v1311_v62  ;;  %v1234_v55 = vmul.f32 %v12566_v1, %v14149_v33 }
 0x3eb   :  { %v12568_v21 = vpop.eup %12567  ;;  %v1175_v3 = vmul.f32 0.03125, %v1113_v2  ;;  %v11007_v5 = vpop.f32.mrb[33].mxu0  ;;  %1501 = vmatprep.mubr.bf16.mxu1 %v18237_v47  ;;  %11057 = vmatprep.mubr.msk.bf16.mxu0 %vm13585_vm0, %v18240_v15 }
 0x3ec   :  { %v1116_v43 = vpop.f32.mrb[34].mxu0  ;;  %v1235_v6 = vmul.f32 %v12568_v21, %v14151_v34  ;;  %11158 = vmatpush3.bf16.msra.mxu0 %v12299_v42  ;;  %11098 = vmatpush3.bf16.msra.mxu1 %v12299_v42  ;;  %v1261_v53 = vmul.f32 %v14263_v57, %v1234_v55  ;;  %v12304_v21 = vld [vmem:[#allocation10 + $0x38] sm:$0xff]  }
 0x3ed   :  { %v1196_v50 = vadd.f32 1e-05, %v1175_v3  ;;  %v1176_v10 = vmul.f32 0.03125, %v1116_v43  ;;  %v11008_v13 = vpop.f32.mrb[35].mxu0  ;;  %11159 = vmatprep.subr.bf16.mxu0 %v18240_v15  ;;  %11099 = vmatprep.subr.bf16.mxu1 %v18240_v15 }
 0x3ee   :  { %v1262_v14 = vmul.f32 %v14263_v57, %v1235_v6 }
 0x3ef   :  { %12573 = vrsqrt.f32 %v1196_v50  ;;  %v1197_v16 = vadd.f32 1e-05, %v1176_v10 }
 0x3f0   :  { %v1312_v18 = vpack.c.bf16 %v1262_v14, %v1261_v53  ;;  %11160 = vmatpush3.bf16.msra.mxu0 %v12300_v8  ;;  %11100 = vmatpush3.bf16.msra.mxu1 %v12300_v8 }
 0x3f1   :  { %v12570_v22 = vpop.eup %12569  ;;  %12575 = vrsqrt.f32 %v1197_v16  ;;  %11161 = vmatprep.subr.bf16.mxu0 %v18240_v15  ;;  %11101 = vmatprep.subr.bf16.mxu1 %v18240_v15 }
 0x3f2   :  { %v1121_v23 = vpop.f32.mrb[36].mxu0  ;;  %1502 = vmatmul.mubr.bf16.gmra.mrb[32].mxu1 %v1312_v18  ;;  %11058 = vmatmul.mubr.bf16.gmra.mrb[68].mxu0 %v1312_v18  ;;  %v1236_v24 = vmul.f32 %v12570_v22, %v14160_v37 }
 0x3f3   :  { %v12572_v25 = vpop.eup %12571  ;;  %v1177_v26 = vmul.f32 0.03125, %v1121_v23  ;;  %v11011_v27 = vpop.f32.mrb[37].mxu0  ;;  %1511 = vmatprep.mubr.bf16.mxu1 %v18237_v47  ;;  %11061 = vmatprep.mubr.msk.bf16.mxu0 %vm13585_vm0, %v18240_v15 }
 0x3f4   :  { %v1124_v30 = vpop.f32.mrb[38].mxu0  ;;  %v1237_v31 = vmul.f32 %v12572_v25, %v14163_v44  ;;  %11162 = vmatpush3.bf16.msra.mxu0 %v12301_v60  ;;  %11102 = vmatpush3.bf16.msra.mxu1 %v12301_v60  ;;  %v1263_v45 = vmul.f32 %v14263_v57, %v1236_v24 }
 0x3f5   :  { %v1198_v36 = vadd.f32 1e-05, %v1177_v26  ;;  %v1178_v39 = vmul.f32 0.03125, %v1124_v30  ;;  %v11012_v41 = vpop.f32.mrb[39].mxu0  ;;  %11163 = vmatprep.subr.bf16.mxu0 %v18240_v15  ;;  %11103 = vmatprep.subr.bf16.mxu1 %v18240_v15 }
 0x3f6   :  { %v1264_v51 = vmul.f32 %v14263_v57, %v1237_v31 }
 0x3f7   :  { %12577 = vrsqrt.f32 %v1198_v36  ;;  %v1199_v28 = vadd.f32 1e-05, %v1178_v39 }
 0x3f8   :  { %v1313_v54 = vpack.c.bf16 %v1264_v51, %v1263_v45  ;;  %11164 = vmatpush3.bf16.msra.mxu0 %v12302_v35  ;;  %11104 = vmatpush3.bf16.msra.mxu1 %v12302_v35 }
 0x3f9   :  { %v12574_v32 = vpop.eup %12573  ;;  %12579 = vrsqrt.f32 %v1199_v28  ;;  %11165 = vmatprep.subr.bf16.mxu0 %v18240_v15  ;;  %11105 = vmatprep.subr.bf16.mxu1 %v18240_v15 }
 0x3fa   :  { %v1129_v59 = vpop.f32.mrb[40].mxu0  ;;  %1512 = vmatmul.mubr.bf16.gmra.mrb[36].mxu1 %v1313_v54  ;;  %11062 = vmatmul.mubr.bf16.gmra.mrb[72].mxu0 %v1313_v54  ;;  %v1238_v49 = vmul.f32 %v12574_v32, %v14175_v52 }
 0x3fb   :  { %v12576_v62 = vpop.eup %12575  ;;  %v1179_v42 = vmul.f32 0.03125, %v1129_v59  ;;  %v11015_v1 = vpop.f32.mrb[41].mxu0  ;;  %1521 = vmatprep.mubr.bf16.mxu1 %v18237_v47  ;;  %11065 = vmatprep.mubr.msk.bf16.mxu0 %vm13585_vm0, %v18240_v15 }
 0x3fc   :  { %v1132_v2 = vpop.f32.mrb[42].mxu0  ;;  %v1239_v55 = vmul.f32 %v12576_v62, %v14172_v48  ;;  %11166 = vmatpush3.bf16.msra.mxu0 %v12303_v58  ;;  %11106 = vmatpush3.bf16.msra.mxu1 %v12303_v58  ;;  %v1265_v6 = vmul.f32 %v14263_v57, %v1238_v49 }
 0x3fd   :  { %v1200_v3 = vadd.f32 1e-05, %v1179_v42  ;;  %v1180_v5 = vmul.f32 0.03125, %v1132_v2  ;;  %v11016_v43 = vpop.f32.mrb[43].mxu0  ;;  %11167 = vmatprep.subr.bf16.mxu0 %v18240_v15  ;;  %11107 = vmatprep.subr.bf16.mxu1 %v18240_v15 }
 0x3fe   :  { %v1266_v8 = vmul.f32 %v14263_v57, %v1239_v55 }
 0x3ff   :  { %12581 = vrsqrt.f32 %v1200_v3  ;;  %v1201_v50 = vadd.f32 1e-05, %v1180_v5 }
 0x400   :  { %v1314_v10 = vpack.c.bf16 %v1266_v8, %v1265_v6  ;;  %11168 = vmatpush3.bf16.msra.mxu0 %v12304_v21  ;;  %11108 = vmatpush3.bf16.msra.mxu1 %v12304_v21 }
 0x401   :  { %v12578_v13 = vpop.eup %12577  ;;  %12583 = vrsqrt.f32 %v1201_v50  ;;  %11273 = vmatprep.subr.bf16.mxu0 %v18240_v15  ;;  %11213 = vmatprep.subr.bf16.mxu1 %v18240_v15 }
 0x402   :  { %v1137_v53 = vpop.f32.mrb[44].mxu0  ;;  %1522 = vmatmul.mubr.bf16.gmra.mrb[40].mxu1 %v1314_v10  ;;  %11066 = vmatmul.mubr.bf16.gmra.mrb[76].mxu0 %v1314_v10  ;;  %v1240_v14 = vmul.f32 %v12578_v13, %v14187_v38 }
 0x403   :  { %v12580_v16 = vpop.eup %12579  ;;  %v1181_v18 = vmul.f32 0.03125, %v1137_v53  ;;  %v11019_v60 = vpop.f32.mrb[45].mxu0  ;;  %1531 = vmatprep.mubr.bf16.mxu1 %v18237_v47  ;;  %11069 = vmatprep.mubr.msk.bf16.mxu0 %vm13585_vm0, %v18240_v15 }
 0x404   :  { %v1140_v22 = vpop.f32.mrb[46].mxu0  ;;  %v1241_v23 = vmul.f32 %v12580_v16, %v14184_v56  ;;  %v1267_v27 = vmul.f32 %v14263_v57, %v1240_v14 }
 0x405   :  { %v1202_v24 = vadd.f32 1e-05, %v1181_v18  ;;  %v1182_v25 = vmul.f32 0.03125, %v1140_v22  ;;  %v11020_v26 = vpop.f32.mrb[47].mxu0 }
 0x406   :  { %v1268_v30 = vmul.f32 %v14263_v57, %v1241_v23 }
 0x407   :  { %12585 = vrsqrt.f32 %v1202_v24  ;;  %v1203_v31 = vadd.f32 1e-05, %v1182_v25 }
 0x408   :  { %v1315_v35 = vpack.c.bf16 %v1268_v30, %v1267_v27 }
 0x409   :  { %v12582_v36 = vpop.eup %12581  ;;  %12587 = vrsqrt.f32 %v1203_v31 }
 0x40a   :  { %v1145_v39 = vpop.f32.mrb[48].mxu0  ;;  %1532 = vmatmul.mubr.bf16.gmra.mrb[44].mxu1 %v1315_v35  ;;  %11070 = vmatmul.mubr.bf16.gmra.mrb[80].mxu0 %v1315_v35  ;;  %v1242_v41 = vmul.f32 %v12582_v36, %v14200_v0 }
 0x40b   :  { %v12584_v45 = vpop.eup %12583  ;;  %v1183_v51 = vmul.f32 0.03125, %v1145_v39  ;;  %v11023_v28 = vpop.f32.mrb[49].mxu0  ;;  %1541 = vmatprep.mubr.bf16.mxu1 %v18237_v47  ;;  %11073 = vmatprep.mubr.msk.bf16.mxu0 %vm13585_vm0, %v18240_v15 }
 0x40c   :  { %v1148_v54 = vpop.f32.mrb[50].mxu0  ;;  %v1243_v58 = vmul.f32 %v12584_v45, %v14196_v61  ;;  %v1269_v62 = vmul.f32 %v14263_v57, %v1242_v41 }
 0x40d   :  { %v1204_v32 = vadd.f32 1e-05, %v1183_v51  ;;  %v1184_v59 = vmul.f32 0.03125, %v1148_v54  ;;  %v11024_v49 = vpop.f32.mrb[51].mxu0 }
 0x40e   :  { %v1270_v42 = vmul.f32 %v14263_v57, %v1243_v58 }
 0x40f   :  { %12589 = vrsqrt.f32 %v1204_v32  ;;  %v1205_v1 = vadd.f32 1e-05, %v1184_v59 }
 0x410   :  { %v1316_v2 = vpack.c.bf16 %v1270_v42, %v1269_v62 }
 0x411   :  { %v12586_v55 = vpop.eup %12585  ;;  %12591 = vrsqrt.f32 %v1205_v1 }
 0x412   :  { %v1153_v21 = vpop.f32.mrb[52].mxu0  ;;  %1542 = vmatmul.mubr.bf16.gmra.mrb[48].mxu1 %v1316_v2  ;;  %11074 = vmatmul.mubr.bf16.gmra.mrb[84].mxu0 %v1316_v2  ;;  %v1244_v3 = vmul.f32 %v12586_v55, %v14210_v63 }
 0x413   :  { %v12588_v5 = vpop.eup %12587  ;;  %v1185_v43 = vmul.f32 0.03125, %v1153_v21  ;;  %v11027_v6 = vpop.f32.mrb[53].mxu0  ;;  %1551 = vmatprep.mubr.bf16.mxu1 %v18237_v47  ;;  %11077 = vmatprep.mubr.msk.bf16.mxu0 %vm13585_vm0, %v18240_v15 }
 0x414   :  { %v1156_v8 = vpop.f32.mrb[54].mxu0  ;;  %v1245_v50 = vmul.f32 %v12588_v5, %v14213_v19  ;;  %v1271_v14 = vmul.f32 %v14263_v57, %v1244_v3 }
 0x415   :  { %v1206_v10 = vadd.f32 1e-05, %v1185_v43  ;;  %v1186_v13 = vmul.f32 0.03125, %v1156_v8  ;;  %v11028_v53 = vpop.f32.mrb[55].mxu0 }
 0x416   :  { %v1272_v16 = vmul.f32 %v14263_v57, %v1245_v50 }
 0x417   :  { %12593 = vrsqrt.f32 %v1206_v10  ;;  %v1207_v18 = vadd.f32 1e-05, %v1186_v13 }
 0x418   :  { %v1317_v60 = vpack.c.bf16 %v1272_v16, %v1271_v14  ;;  %v12305_v16 = vld [vmem:[#allocation12] sm:$0xff]  }
 0x419   :  { %v12590_v22 = vpop.eup %12589  ;;  %12595 = vrsqrt.f32 %v1207_v18 }
 0x41a   :  { %v1161_v23 = vpop.f32.mrb[56].mxu0  ;;  %1552 = vmatmul.mubr.bf16.gmra.mrb[52].mxu1 %v1317_v60  ;;  %11078 = vmatmul.mubr.bf16.gmra.mrb[88].mxu0 %v1317_v60  ;;  %v1246_v24 = vmul.f32 %v12590_v22, %v14222_v4 }
 0x41b   :  { %v12592_v25 = vpop.eup %12591  ;;  %v1187_v26 = vmul.f32 0.03125, %v1161_v23  ;;  %v11031_v27 = vpop.f32.mrb[57].mxu0  ;;  %1561 = vmatprep.mubr.bf16.mxu1 %v18237_v47  ;;  %11081 = vmatprep.mubr.msk.bf16.mxu0 %vm13585_vm0, %v18240_v15 }
 0x41c   :  { %v1164_v30 = vpop.f32.mrb[58].mxu0  ;;  %v1247_v31 = vmul.f32 %v12592_v25, %v14225_v40  ;;  %v1273_v39 = vmul.f32 %v14263_v57, %v1246_v24  ;;  %v12306_v25 = vld [vmem:[#allocation12 + $0x8] sm:$0xff]   ;;  %v18403_v40 = vmov 0.0  }
 0x41d   :  { %v1208_v35 = vadd.f32 1e-05, %v1187_v26  ;;  %v11032_v36 = vpop.f32.mrb[59].mxu0 }
 0x41e   :  { %v1274_v41 = vmul.f32 %v14263_v57, %v1247_v31 }
 0x41f   :  { %12597 = vrsqrt.f32 %v1208_v35 }
 0x420   :  { %v1318_v45 = vpack.c.bf16 %v1274_v41, %v1273_v39 }
 0x421   :  { %v12594_v51 = vpop.eup %12593 }
 0x422   :  { %1562 = vmatmul.mubr.bf16.gmra.mrb[56].mxu1 %v1318_v45  ;;  %11082 = vmatmul.mubr.bf16.gmra.mrb[92].mxu0 %v1318_v45  ;;  %v1248_v28 = vmul.f32 %v12594_v51, %v14234_v7  ;;  %v12307_v51 = vld [vmem:[#allocation12 + $0x10] sm:$0xff]  }
 0x423   :  { %v12596_v54 = vpop.eup %12595  ;;  %1571 = vmatprep.mubr.bf16.mxu1 %v18237_v47  ;;  %11085 = vmatprep.mubr.msk.bf16.mxu0 %vm13585_vm0, %v18240_v15 }
 0x424   :  { %v1249_v58 = vmul.f32 %v12596_v54, %v14237_v46  ;;  %v1275_v32 = vmul.f32 %v14263_v57, %v1248_v28 }
 0x426   :  { %v1276_v59 = vmul.f32 %v14263_v57, %v1249_v58 }
 0x428   :  { %v1319_v49 = vpack.c.bf16 %v1276_v59, %v1275_v32 }
 0x429   :  { %v12598_v62 = vpop.eup %12597 }
 0x42a   :  { %1572 = vmatmul.mubr.bf16.gmra.mrb[60].mxu1 %v1319_v49  ;;  %11086 = vmatmul.mubr.bf16.gmra.mrb[96].mxu0 %v1319_v49  ;;  %v1250_v42 = vmul.f32 %v12598_v62, %v14246_v11  ;;  %v12308_v49 = vld [vmem:[#allocation12 + $0x18] sm:$0xff]  }
 0x42b   :  { %1581 = vmatprep.mubr.bf16.mxu1 %v18237_v47  ;;  %11089 = vmatprep.mubr.msk.bf16.mxu0 %vm13585_vm0, %v18240_v15 }
 0x42c   :  { %v1277_v1 = vmul.f32 %v14263_v57, %v1250_v42 }
 0x42e   :  { %v1320_v2 = vpack.c.bf16 %v1277_v1, %v1277_v1 }
 0x432   :  { %1582 = vmatmul.mubr.bf16.gmra.mrb[64].mxu1 %v1320_v2  ;;  %11090 = vmatmul.mubr.bf16.gmra.mrb[100].mxu0 %v1320_v2 }
 0x433   :  { %11109 = vmatprep.mubr.msk.bf16.mxu1 %vm13585_vm0, %v18240_v15  ;;  %11169 = vmatprep.mubr.msk.bf16.mxu0 %vm13585_vm0, %v18240_v15 }
 0x4b5   :  { %v14360_v55 = vpop.f32.mrb[24].mxu1  ;;  %v14362_v21 = vpop.f32.mrb[60].mxu0 }
 0x4b6   :  { %18390 = vst [vmem:[#allocation46_spill] sm:$0xff] %v14362_v21  ;;  %v14364_v3 = vpop.f32.mrb[25].mxu1  ;;  %v11051_v5 = vpop.f32.mrb[61].mxu0  ;;  %v1710_v57 = vmul.f32 %v14360_v55, %v14360_v55 }
 0x4b7   :  { %v14366_v43 = vpop.f32.mrb[26].mxu1  ;;  %v14368_v6 = vpop.f32.mrb[62].mxu0  ;;  %v2021_v13 = vmul.f32 %v14364_v3, %v14364_v3 }
 0x4b8   :  { %18391 = vst [vmem:[#allocation47_spill] sm:$0xff] %v14368_v6  ;;  %v1711_v8 = vmul.f32 %v14366_v43, %v14366_v43  ;;  %v14374_v50 = vpop.f32.mrb[27].mxu1  ;;  %v11052_v10 = vpop.f32.mrb[63].mxu0 }
 0x4b9   :  { %v2022_v53 = vmul.f32 %v14374_v50, %v14374_v50 }
 0x4ba   :  { %v1731_v14 = vpack.c.bf16 %v1711_v8, %v1710_v57 }
 0x4bb   :  { %v2042_v18 = vpack.c.bf16 %v2022_v53, %v2021_v13  ;;  %v12309_v53 = vld [vmem:[#allocation12 + $0x20] sm:$0xff]  }
 0x4bc   :  { %11110 = vmatmul.mubr.bf16.vlgmr.msra.gmra.mrb[68].mxu1 %v1731_v14 }
 0x4bd   :  { %v14380_v60 = vpop.f32.mrb[28].mxu1  ;;  %v14382_v22 = vpop.f32.mrb[64].mxu0  ;;  %11170 = vmatmul.mubr.bf16.vlgmr.msra.gmra.mrb[104].mxu0 %v2042_v18  ;;  %11113 = vmatprep.mubr.msk.bf16.mxu1 %vm13585_vm0, %v18240_v15 }
 0x4be   :  { %18392 = vst [vmem:[#allocation48_spill] sm:$0xff] %v14382_v22  ;;  %v14386_v23 = vpop.f32.mrb[29].mxu1  ;;  %v11055_v24 = vpop.f32.mrb[65].mxu0  ;;  %11173 = vmatprep.mubr.msk.bf16.mxu0 %vm13585_vm0, %v18240_v15  ;;  %11274 = vmatpush3.bf16.msra.mxu0 %v12305_v16  ;;  %v1712_v30 = vmul.f32 %v14380_v60, %v14380_v60 }
 0x4bf   :  { %v14390_v26 = vpop.f32.mrb[30].mxu1  ;;  %v14392_v27 = vpop.f32.mrb[66].mxu0  ;;  %11275 = vmatprep.subr.bf16.mxu0 %v18240_v15  ;;  %11214 = vmatpush3.bf16.msra.mxu1 %v12305_v16  ;;  %v2023_v39 = vmul.f32 %v14386_v23, %v14386_v23 }
 0x4c0   :  { %18393 = vst [vmem:[#allocation49_spill] sm:$0xff] %v14392_v27  ;;  %v1713_v31 = vmul.f32 %v14390_v26, %v14390_v26  ;;  %v14399_v35 = vpop.f32.mrb[31].mxu1  ;;  %v11056_v36 = vpop.f32.mrb[67].mxu0  ;;  %11215 = vmatprep.subr.bf16.mxu1 %v18240_v15 }
 0x4c1   :  { %v2024_v41 = vmul.f32 %v14399_v35, %v14399_v35 }
 0x4c2   :  { %v1732_v45 = vpack.c.bf16 %v1713_v31, %v1712_v30  ;;  %11276 = vmatpush3.bf16.msra.mxu0 %v12306_v25  ;;  %v12310_v30 = vld [vmem:[#allocation12 + $0x28] sm:$0xff]  }
 0x4c3   :  { %v2043_v28 = vpack.c.bf16 %v2024_v41, %v2023_v39  ;;  %11277 = vmatprep.subr.bf16.mxu0 %v18240_v15  ;;  %11216 = vmatpush3.bf16.msra.mxu1 %v12306_v25 }
 0x4c4   :  { %11114 = vmatmul.mubr.bf16.gmra.mrb[72].mxu1 %v1732_v45  ;;  %11217 = vmatprep.subr.bf16.mxu1 %v18240_v15 }
 0x4c5   :  { %v14408_v54 = vpop.f32.mrb[32].mxu1  ;;  %v14410_v58 = vpop.f32.mrb[68].mxu0  ;;  %11174 = vmatmul.mubr.bf16.gmra.mrb[108].mxu0 %v2043_v28  ;;  %11117 = vmatprep.mubr.msk.bf16.mxu1 %vm13585_vm0, %v18240_v15 }
 0x4c6   :  { %18394 = vst [vmem:[#allocation50_spill] sm:$0xff] %v14410_v58  ;;  %v14414_v32 = vpop.f32.mrb[33].mxu1  ;;  %v11059_v59 = vpop.f32.mrb[69].mxu0  ;;  %11177 = vmatprep.mubr.msk.bf16.mxu0 %vm13585_vm0, %v18240_v15  ;;  %11278 = vmatpush3.bf16.msra.mxu0 %v12307_v51  ;;  %v1714_v1 = vmul.f32 %v14408_v54, %v14408_v54 }
 0x4c7   :  { %v14418_v62 = vpop.f32.mrb[34].mxu1  ;;  %v14420_v42 = vpop.f32.mrb[70].mxu0  ;;  %11279 = vmatprep.subr.bf16.mxu0 %v18240_v15  ;;  %11218 = vmatpush3.bf16.msra.mxu1 %v12307_v51  ;;  %v2025_v8 = vmul.f32 %v14414_v32, %v14414_v32 }
 0x4c8   :  { %18395 = vst [vmem:[#allocation51_spill] sm:$0xff] %v14420_v42  ;;  %v1715_v2 = vmul.f32 %v14418_v62, %v14418_v62  ;;  %v14427_v5 = vpop.f32.mrb[35].mxu1  ;;  %v11060_v57 = vpop.f32.mrb[71].mxu0  ;;  %11219 = vmatprep.subr.bf16.mxu1 %v18240_v15 }
 0x4c9   :  { %v2026_v10 = vmul.f32 %v14427_v5, %v14427_v5 }
 0x4ca   :  { %v1733_v13 = vpack.c.bf16 %v1715_v2, %v1714_v1  ;;  %11280 = vmatpush3.bf16.msra.mxu0 %v12308_v49 }
 0x4cb   :  { %v2044_v14 = vpack.c.bf16 %v2026_v10, %v2025_v8  ;;  %11281 = vmatprep.subr.bf16.mxu0 %v18240_v15  ;;  %11220 = vmatpush3.bf16.msra.mxu1 %v12308_v49 }
 0x4cc   :  { %11118 = vmatmul.mubr.bf16.gmra.mrb[76].mxu1 %v1733_v13  ;;  %11221 = vmatprep.subr.bf16.mxu1 %v18240_v15 }
 0x4cd   :  { %v14436_v16 = vpop.f32.mrb[36].mxu1  ;;  %v14438_v18 = vpop.f32.mrb[72].mxu0  ;;  %11178 = vmatmul.mubr.bf16.gmra.mrb[112].mxu0 %v2044_v14  ;;  %11121 = vmatprep.mubr.msk.bf16.mxu1 %vm13585_vm0, %v18240_v15 }
 0x4ce   :  { %18396 = vst [vmem:[#allocation52_spill] sm:$0xff] %v14438_v18  ;;  %v14442_v24 = vpop.f32.mrb[37].mxu1  ;;  %v11063_v25 = vpop.f32.mrb[73].mxu0  ;;  %11181 = vmatprep.mubr.msk.bf16.mxu0 %vm13585_vm0, %v18240_v15  ;;  %11282 = vmatpush3.bf16.msra.mxu0 %v12309_v53  ;;  %v1716_v39 = vmul.f32 %v14436_v16, %v14436_v16 }
 0x4cf   :  { %v14446_v31 = vpop.f32.mrb[38].mxu1  ;;  %v14448_v36 = vpop.f32.mrb[74].mxu0  ;;  %11283 = vmatprep.subr.bf16.mxu0 %v18240_v15  ;;  %11222 = vmatpush3.bf16.msra.mxu1 %v12309_v53  ;;  %v2027_v28 = vmul.f32 %v14442_v24, %v14442_v24 }
 0x4d0   :  { %18397 = vst [vmem:[#allocation53_spill] sm:$0xff] %v14448_v36  ;;  %v1717_v41 = vmul.f32 %v14446_v31, %v14446_v31  ;;  %v14455_v45 = vpop.f32.mrb[39].mxu1  ;;  %v11064_v51 = vpop.f32.mrb[75].mxu0  ;;  %11223 = vmatprep.subr.bf16.mxu1 %v18240_v15 }
 0x4d1   :  { %v2028_v59 = vmul.f32 %v14455_v45, %v14455_v45 }
 0x4d2   :  { %v1734_v49 = vpack.c.bf16 %v1717_v41, %v1716_v39  ;;  %11284 = vmatpush3.bf16.msra.mxu0 %v12310_v30 }
 0x4d3   :  { %v2045_v1 = vpack.c.bf16 %v2028_v59, %v2027_v28  ;;  %11285 = vmatprep.subr.bf16.mxu0 %v18240_v15  ;;  %11224 = vmatpush3.bf16.msra.mxu1 %v12310_v30 }
 0x4d4   :  { %11122 = vmatmul.mubr.bf16.gmra.mrb[80].mxu1 %v1734_v49  ;;  %11225 = vmatprep.subr.bf16.mxu1 %v18240_v15 }
 0x4d5   :  { %v14464_v2 = vpop.f32.mrb[40].mxu1  ;;  %v14466_v57 = vpop.f32.mrb[76].mxu0  ;;  %11182 = vmatmul.mubr.bf16.gmra.mrb[116].mxu0 %v2045_v1  ;;  %11125 = vmatprep.mubr.msk.bf16.mxu1 %vm13585_vm0, %v18240_v15 }
 0x4d6   :  { %18398 = vst [vmem:[#allocation54_spill] sm:$0xff] %v14466_v57  ;;  %v14470_v8 = vpop.f32.mrb[41].mxu1  ;;  %v11067_v10 = vpop.f32.mrb[77].mxu0  ;;  %11185 = vmatprep.mubr.msk.bf16.mxu0 %vm13585_vm0, %v18240_v15  ;;  %v1718_v14 = vmul.f32 %v14464_v2, %v14464_v2 }
 0x4d7   :  { %v14474_v13 = vpop.f32.mrb[42].mxu1  ;;  %v14476_v53 = vpop.f32.mrb[78].mxu0  ;;  %v2029_v41 = vmul.f32 %v14470_v8, %v14470_v8 }
 0x4d8   :  { %18399 = vst [vmem:[#allocation55_spill] sm:$0xff] %v14476_v53  ;;  %v1719_v25 = vmul.f32 %v14474_v13, %v14474_v13  ;;  %v14482_v30 = vpop.f32.mrb[43].mxu1  ;;  %v11068_v39 = vpop.f32.mrb[79].mxu0 }
 0x4d9   :  { %v2030_v51 = vmul.f32 %v14482_v30, %v14482_v30 }
 0x4da   :  { %v1735_v28 = vpack.c.bf16 %v1719_v25, %v1718_v14 }
 0x4db   :  { %v2046_v59 = vpack.c.bf16 %v2030_v51, %v2029_v41 }
 0x4dc   :  { %11126 = vmatmul.mubr.bf16.gmra.mrb[84].mxu1 %v1735_v28 }
 0x4dd   :  { %v14488_v49 = vpop.f32.mrb[44].mxu1  ;;  %v14490_v1 = vpop.f32.mrb[80].mxu0  ;;  %11186 = vmatmul.mubr.bf16.gmra.mrb[120].mxu0 %v2046_v59  ;;  %11129 = vmatprep.mubr.msk.bf16.mxu1 %vm13585_vm0, %v18240_v15 }
 0x4de   :  { %18400 = vst [vmem:[#allocation56_spill] sm:$0xff] %v14490_v1  ;;  %v14494_v10 = vpop.f32.mrb[45].mxu1  ;;  %v11071_v39 = vpop.f32.mrb[81].mxu0  ;;  %11189 = vmatprep.mubr.msk.bf16.mxu0 %vm13585_vm0, %v18240_v15  ;;  %v1720_v14 = vmul.f32 %v14488_v49, %v14488_v49 }
 0x4df   :  { %v14498_v47 = vpop.f32.mrb[46].mxu1  ;;  %v14500_v11 = vpop.f32.mrb[82].mxu0  ;;  %v2031_v28 = vmul.f32 %v14494_v10, %v14494_v10 }
 0x4e0   :  { %18401 = vst [vmem:[#allocation57_spill] sm:$0xff] %v14500_v11  ;;  %v1721_v25 = vmul.f32 %v14498_v47, %v14498_v47  ;;  %v14506_v41 = vpop.f32.mrb[47].mxu1  ;;  %v11072_v51 = vpop.f32.mrb[83].mxu0 }
 0x4e1   :  { %v2032_v59 = vmul.f32 %v14506_v41, %v14506_v41 }
 0x4e2   :  { %v1736_v39 = vpack.c.bf16 %v1721_v25, %v1720_v14 }
 0x4e3   :  { %v2047_v15 = vpack.c.bf16 %v2032_v59, %v2031_v28 }
 0x4e4   :  { %11130 = vmatmul.mubr.bf16.gmra.mrb[88].mxu1 %v1736_v39 }
 0x4e5   :  { %v14512_v46 = vpop.f32.mrb[48].mxu1  ;;  %v14514_v7 = vpop.f32.mrb[84].mxu0  ;;  %11190 = vmatmul.mubr.bf16.gmra.mrb[124].mxu0 %v2047_v15  ;;  %11133 = vmatprep.mubr.msk.bf16.mxu1 %vm13585_vm0, %v18403_v40 }
 0x4e6   :  { %18402 = vst [vmem:[#allocation58_spill] sm:$0xff] %v14514_v7  ;;  %v14518_v4 = vpop.f32.mrb[49].mxu1  ;;  %v11075_v51 = vpop.f32.mrb[85].mxu0  ;;  %11193 = vmatprep.mubr.msk.bf16.mxu0 %vm13585_vm0, %v18403_v40  ;;  %v1722_v14 = vmul.f32 %v14512_v46, %v14512_v46 }
 0x4e7   :  { %v14522_v19 = vpop.f32.mrb[50].mxu1  ;;  %v14524_v63 = vpop.f32.mrb[86].mxu0  ;;  %v2033_v59 = vmul.f32 %v14518_v4, %v14518_v4 }
 0x4e8   :  { %18404 = vst [vmem:[#allocation59_spill] sm:$0xff] %v14524_v63  ;;  %v1723_v25 = vmul.f32 %v14522_v19, %v14522_v19  ;;  %v14530_v15 = vpop.f32.mrb[51].mxu1  ;;  %v11076_v28 = vpop.f32.mrb[87].mxu0 }
 0x4e9   :  { %v2034_v39 = vmul.f32 %v14530_v15, %v14530_v15 }
 0x4ea   :  { %v1737_v51 = vpack.c.bf16 %v1723_v25, %v1722_v14 }
 0x4eb   :  { %v2048_v61 = vpack.c.bf16 %v2034_v39, %v2033_v59 }
 0x4ec   :  { %11134 = vmatmul.mubr.bf16.gmra.mrb[92].mxu1 %v1737_v51 }
 0x4ed   :  { %v14536_v0 = vpop.f32.mrb[52].mxu1  ;;  %v14538_v56 = vpop.f32.mrb[88].mxu0  ;;  %11194 = vmatmul.mubr.bf16.gmra.mrb[128].mxu0 %v2048_v61  ;;  %11137 = vmatprep.mubr.msk.bf16.mxu1 %vm13585_vm0, %v18403_v40 }
 0x4ee   :  { %18405 = vst [vmem:[#allocation60_spill] sm:$0xff] %v14538_v56  ;;  %v14542_v38 = vpop.f32.mrb[53].mxu1  ;;  %v11079_v28 = vpop.f32.mrb[89].mxu0  ;;  %11197 = vmatprep.mubr.msk.bf16.mxu0 %vm13585_vm0, %v18403_v40  ;;  %v1724_v14 = vmul.f32 %v14536_v0, %v14536_v0 }
 0x4ef   :  { %v14546_v48 = vpop.f32.mrb[54].mxu1  ;;  %v14548_v52 = vpop.f32.mrb[90].mxu0  ;;  %v2035_v39 = vmul.f32 %v14542_v38, %v14542_v38 }
 0x4f0   :  { %18406 = vst [vmem:[#allocation61_spill] sm:$0xff] %v14548_v52  ;;  %v1725_v25 = vmul.f32 %v14546_v48, %v14546_v48  ;;  %v14554_v61 = vpop.f32.mrb[55].mxu1  ;;  %v11080_v59 = vpop.f32.mrb[91].mxu0 }
 0x4f1   :  { %v2036_v51 = vmul.f32 %v14554_v61, %v14554_v61 }
 0x4f2   :  { %v1738_v28 = vpack.c.bf16 %v1725_v25, %v1724_v14 }
 0x4f3   :  { %v2049_v44 = vpack.c.bf16 %v2036_v51, %v2035_v39 }
 0x4f4   :  { %11138 = vmatmul.mubr.bf16.gmra.mrb[96].mxu1 %v1738_v28 }
 0x4f5   :  { %v14560_v37 = vpop.f32.mrb[56].mxu1  ;;  %v14562_v34 = vpop.f32.mrb[92].mxu0  ;;  %11198 = vmatmul.mubr.bf16.gmra.mrb[132].mxu0 %v2049_v44  ;;  %11141 = vmatprep.mubr.msk.bf16.mxu1 %vm13585_vm0, %v18403_v40 }
 0x4f6   :  { %18407 = vst [vmem:[#allocation62_spill] sm:$0xff] %v14562_v34  ;;  %v14566_v33 = vpop.f32.mrb[57].mxu1  ;;  %v11083_v59 = vpop.f32.mrb[93].mxu0  ;;  %11201 = vmatprep.mubr.msk.bf16.mxu0 %vm13585_vm0, %v18403_v40  ;;  %v1726_v14 = vmul.f32 %v14560_v37, %v14560_v37 }
 0x4f7   :  { %v14570_v17 = vpop.f32.mrb[58].mxu1  ;;  %v14572_v20 = vpop.f32.mrb[94].mxu0  ;;  %v2037_v51 = vmul.f32 %v14566_v33, %v14566_v33 }
 0x4f8   :  { %18408 = vst [vmem:[#allocation63_spill] sm:$0xff] %v14572_v20  ;;  %v1727_v25 = vmul.f32 %v14570_v17, %v14570_v17  ;;  %v14578_v44 = vpop.f32.mrb[59].mxu1  ;;  %v11084_v39 = vpop.f32.mrb[95].mxu0 }
 0x4f9   :  { %v2038_v28 = vmul.f32 %v14578_v44, %v14578_v44 }
 0x4fa   :  { %v1739_v59 = vpack.c.bf16 %v1727_v25, %v1726_v14 }
 0x4fb   :  { %v2050_v12 = vpack.c.bf16 %v2038_v28, %v2037_v51 }
 0x4fc   :  { %11142 = vmatmul.mubr.bf16.gmra.mrb[100].mxu1 %v1739_v59 }
 0x4fd   :  { %v14584_v9 = vpop.f32.mrb[60].mxu1  ;;  %v14586_v63 = vpop.f32.mrb[96].mxu0  ;;  %11202 = vmatmul.mubr.bf16.gmra.mrb[136].mxu0 %v2050_v12  ;;  %11145 = vmatprep.mubr.msk.bf16.mxu1 %vm13585_vm0, %v18403_v40 }
 0x4fe   :  { %18409 = vst [vmem:[#allocation64_spill] sm:$0xff] %v14586_v63  ;;  %v14590_v18 = vpop.f32.mrb[61].mxu1  ;;  %v11087_v39 = vpop.f32.mrb[97].mxu0  ;;  %11205 = vmatprep.mubr.msk.bf16.mxu0 %vm13585_vm0, %v18403_v40  ;;  %v1728_v14 = vmul.f32 %v14584_v9, %v14584_v9 }
 0x4ff   :  { %v14594_v20 = vpop.f32.mrb[62].mxu1  ;;  %v14596_v1 = vpop.f32.mrb[98].mxu0  ;;  %v2039_v28 = vmul.f32 %v14590_v18, %v14590_v18 }
 0x500   :  { %18410 = vst [vmem:[#allocation65_spill] sm:$0xff] %v14596_v1  ;;  %v1729_v25 = vmul.f32 %v14594_v20, %v14594_v20  ;;  %v14602_v12 = vpop.f32.mrb[63].mxu1  ;;  %v11088_v51 = vpop.f32.mrb[99].mxu0 }
 0x501   :  { %v2040_v59 = vmul.f32 %v14602_v12, %v14602_v12 }
 0x502   :  { %v1740_v39 = vpack.c.bf16 %v1729_v25, %v1728_v14 }
 0x503   :  { %v2051_v27 = vpack.c.bf16 %v2040_v59, %v2039_v28 }
 0x504   :  { %11146 = vmatmul.mubr.bf16.gmra.mrb[104].mxu1 %v1740_v39 }
 0x505   :  { %v14608_v7 = vpop.f32.mrb[64].mxu1  ;;  %v14610_v1 = vpop.f32.mrb[100].mxu0  ;;  %11206 = vmatmul.mubr.bf16.gmra.mrb[140].mxu0 %v2051_v27  ;;  %11149 = vmatprep.mubr.msk.bf16.mxu1 %vm13585_vm0, %v18403_v40 }
 0x506   :  { %18411 = vst [vmem:[#allocation66_spill] sm:$0xff] %v14610_v1  ;;  %v14614_v42 = vpop.f32.mrb[65].mxu1  ;;  %v11091_v51 = vpop.f32.mrb[101].mxu0  ;;  %v1730_v34 = vmul.f32 %v14608_v7, %v14608_v7  ;;  %11209 = vmatprep.mubr.msk.bf16.mxu0 %vm13585_vm0, %v18403_v40 }
 0x507   :  { %v1587_v14 = vpop.f32.mrb[66].mxu1  ;;  %v1707_v25 = vpop.f32.mrb[102].mxu0  ;;  %v2041_v28 = vmul.f32 %v14614_v42, %v14614_v42  ;;  %v12311_v51 = vld [vmem:[#allocation12 + $0x30] sm:$0xff]  }
 0x508   :  { %v1588_v59 = vpop.f32.mrb[67].mxu1  ;;  %v11092_v39 = vpop.f32.mrb[103].mxu0  ;;  %v1741_v27 = vpack.c.bf16 %v1730_v34, %v1730_v34  ;;  %11286 = vmatpush3.bf16.msra.mxu0 %v12311_v51  ;;  %11226 = vmatpush3.bf16.msra.mxu1 %v12311_v51  ;;  %v12312_v14 = vld [vmem:[#allocation12 + $0x38] sm:$0xff]  }
 0x509   :  { %v2052_v1 = vpack.c.bf16 %v2041_v28, %v2041_v28  ;;  %11287 = vmatprep.subr.bf16.mxu0 %v18403_v40  ;;  %11227 = vmatprep.subr.bf16.mxu1 %v18403_v40 }
 0x50c   :  { %11150 = vmatmul.mubr.bf16.gmra.mrb[108].mxu1 %v1741_v27  ;;  %11288 = vmatpush3.bf16.msra.mxu0 %v12312_v14 }
 0x50d   :  { %11210 = vmatmul.mubr.bf16.gmra.mrb[144].mxu0 %v2052_v1  ;;  %11229 = vmatprep.mubr.msk.bf16.mxu1 %vm13585_vm0, %v18403_v40 }
 0x50e   :  { %11289 = vmatprep.mubr.msk.bf16.mxu0 %vm13585_vm0, %v18403_v40  ;;  %11228 = vmatpush3.bf16.msra.mxu1 %v12312_v14 }
 0x50f   :  { %11333 = vmatprep.subr.bf16.mxu1 %v14268_v29  ;;  %11413 = vmatprep.subr.bf16.mxu0 %v18403_v40 }
 0x58f   :  { %v1824_v34 = vpop.f32.mrb[68].mxu1 }
 0x590   :  { %v1910_v1 = vmul.f32 0.0625, %v1824_v34  ;;  %v11111_v25 = vpop.f32.mrb[69].mxu1  ;;  %v2087_v28 = vpop.f32.mrb[104].mxu0 }
 0x591   :  { %v2173_v59 = vmul.f32 0.0625, %v2087_v28  ;;  %v1827_v39 = vpop.f32.mrb[70].mxu1  ;;  %v11171_v27 = vpop.f32.mrb[105].mxu0 }
 0x592   :  { %v1931_v53 = vadd.f32 1e-05, %v1910_v1  ;;  %v1911_v51 = vmul.f32 0.0625, %v1827_v39  ;;  %v11112_v22 = vpop.f32.mrb[71].mxu1  ;;  %v2090_v63 = vpop.f32.mrb[106].mxu0 }
 0x593   :  { %v2194_v11 = vadd.f32 1e-05, %v2173_v59  ;;  %v2174_v58 = vmul.f32 0.0625, %v2090_v63  ;;  %v11172_v57 = vpop.f32.mrb[107].mxu0 }
 0x594   :  { %12599 = vrsqrt.f32 %v1931_v53  ;;  %v1932_v14 = vadd.f32 1e-05, %v1911_v51 }
 0x595   :  { %12601 = vrsqrt.f32 %v2194_v11  ;;  %v2195_v29 = vadd.f32 1e-05, %v2174_v58 }
 0x596   :  { %12603 = vrsqrt.f32 %v1932_v14 }
 0x597   :  { %12605 = vrsqrt.f32 %v2195_v29  ;;  %v1832_v36 = vpop.f32.mrb[72].mxu1 }
 0x598   :  { %v1912_v34 = vmul.f32 0.0625, %v1832_v36  ;;  %v11115_v25 = vpop.f32.mrb[73].mxu1  ;;  %v2095_v6 = vpop.f32.mrb[108].mxu0 }
 0x599   :  { %v2175_v28 = vmul.f32 0.0625, %v2095_v6  ;;  %v1835_v52 = vpop.f32.mrb[74].mxu1  ;;  %v11175_v27 = vpop.f32.mrb[109].mxu0 }
 0x59a   :  { %v1933_v1 = vadd.f32 1e-05, %v1912_v34  ;;  %v1913_v39 = vmul.f32 0.0625, %v1835_v52  ;;  %v11116_v22 = vpop.f32.mrb[75].mxu1  ;;  %v2098_v56 = vpop.f32.mrb[110].mxu0 }
 0x59b   :  { %v2196_v59 = vadd.f32 1e-05, %v2175_v28  ;;  %v2176_v63 = vmul.f32 0.0625, %v2098_v56  ;;  %v11176_v57 = vpop.f32.mrb[111].mxu0  ;;  %v14632_v28 = vld [vmem:[#allocation9] ss:$0 sm:$0xff] }
 0x59c   :  { %12607 = vrsqrt.f32 %v1933_v1  ;;  %v1934_v53 = vadd.f32 1e-05, %v1913_v39 }
 0x59d   :  { %12609 = vrsqrt.f32 %v2196_v59  ;;  %v2197_v11 = vadd.f32 1e-05, %v2176_v63 }
 0x59e   :  { %v12600_v58 = vpop.eup %12599  ;;  %12611 = vrsqrt.f32 %v1934_v53 }
 0x59f   :  { %v12602_v51 = vpop.eup %12601  ;;  %v1973_v36 = vmul.f32 %v12600_v58, %v14360_v55  ;;  %12613 = vrsqrt.f32 %v2197_v11  ;;  %v1840_v6 = vpop.f32.mrb[76].mxu1 }
 0x5a0   :  { %v12604_v14 = vpop.eup %12603  ;;  %v2236_v29 = vmul.f32 %v12602_v51, %v14364_v3  ;;  %v1914_v52 = vmul.f32 0.0625, %v1840_v6  ;;  %v11119_v34 = vpop.f32.mrb[77].mxu1 }
 0x5a1   :  { %v2103_v25 = vpop.f32.mrb[112].mxu0  ;;  %v12606_v56 = vpop.eup %12605  ;;  %v1974_v27 = vmul.f32 %v12604_v14, %v14366_v43  ;;  %v14637_v51 = vmul.f32 %v14632_v28, %v1973_v36 }
 0x5a2   :  { %v2177_v1 = vmul.f32 0.0625, %v2103_v25  ;;  %v1843_v39 = vpop.f32.mrb[78].mxu1  ;;  %v11179_v22 = vpop.f32.mrb[113].mxu0  ;;  %v2237_v59 = vmul.f32 %v12606_v56, %v14374_v50  ;;  %v1935_v63 = vadd.f32 1e-05, %v1914_v52  ;;  %v14643_v14 = vmul.f32 %v14632_v28, %v2236_v29 }
 0x5a3   :  { %v1915_v55 = vmul.f32 0.0625, %v1843_v39  ;;  %v11120_v57 = vpop.f32.mrb[79].mxu1  ;;  %v2106_v53 = vpop.f32.mrb[114].mxu0  ;;  %v14640_v6 = vmul.f32 %v14632_v28, %v1974_v27 }
 0x5a4   :  { %v2198_v11 = vadd.f32 1e-05, %v2177_v1  ;;  %v2178_v58 = vmul.f32 0.0625, %v2106_v53  ;;  %v11180_v3 = vpop.f32.mrb[115].mxu0  ;;  %12615 = vrsqrt.f32 %v1935_v63  ;;  %v14646_v50 = vmul.f32 %v14632_v28, %v2237_v59 }
 0x5a5   :  { %v1936_v43 = vadd.f32 1e-05, %v1915_v55  ;;  %v2299_v34 = vpack.c.bf16 %v14640_v6, %v14637_v51 }
 0x5a6   :  { %12617 = vrsqrt.f32 %v2198_v11  ;;  %v2199_v52 = vadd.f32 1e-05, %v2178_v58  ;;  %v12608_v25 = vpop.eup %12607  ;;  %v2541_v36 = vpack.c.bf16 %v14646_v50, %v14643_v14 }
 0x5a7   :  { %12619 = vrsqrt.f32 %v1936_v43  ;;  %v12610_v56 = vpop.eup %12609  ;;  %v1848_v27 = vpop.f32.mrb[80].mxu1  ;;  %11230 = vmatmul.mubr.bf16.vlgmr.msra.gmra.mrb[112].mxu1 %v2299_v34  ;;  %v1975_v29 = vmul.f32 %v12608_v25, %v14380_v60  ;;  %v13243_v60 = vld [vmem:[#allocation10] sm:$0xff]  }
 0x5a8   :  { %12621 = vrsqrt.f32 %v2199_v52  ;;  %v12612_v1 = vpop.eup %12611  ;;  %v1916_v39 = vmul.f32 0.0625, %v1848_v27  ;;  %v11123_v22 = vpop.f32.mrb[81].mxu1  ;;  %11290 = vmatmul.mubr.bf16.vlgmr.msra.gmra.mrb[148].mxu0 %v2541_v36  ;;  %11233 = vmatprep.mubr.msk.bf16.mxu1 %vm13585_vm0, %v18403_v40  ;;  %v2238_v63 = vmul.f32 %v12610_v56, %v14386_v23  ;;  %v13244_v36 = vld [vmem:[#allocation10 + $0x8] sm:$0xff]  }
 0x5a9   :  { %v2111_v59 = vpop.f32.mrb[116].mxu0  ;;  %v12614_v55 = vpop.eup %12613  ;;  %v1976_v58 = vmul.f32 %v12612_v1, %v14390_v26  ;;  %11293 = vmatprep.mubr.msk.bf16.mxu0 %vm13585_vm0, %v18403_v40  ;;  %11334 = vmatpush3.bf16.msra.mxu1 %v13243_v60  ;;  %v14661_v22 = vmul.f32 %v14632_v28, %v1975_v29 }
 0x5aa   :  { %v2179_v57 = vmul.f32 0.0625, %v2111_v59  ;;  %v1851_v53 = vpop.f32.mrb[82].mxu1  ;;  %v11183_v11 = vpop.f32.mrb[117].mxu0  ;;  %v1937_v3 = vadd.f32 1e-05, %v1916_v39  ;;  %v2239_v25 = vmul.f32 %v12614_v55, %v14399_v35  ;;  %11335 = vmatprep.subr.bf16.mxu1 %v13244_v36  ;;  %v14667_v39 = vmul.f32 %v14632_v28, %v2238_v63 }
 0x5ab   :  { %v1917_v43 = vmul.f32 0.0625, %v1851_v53  ;;  %v11124_v52 = vpop.f32.mrb[83].mxu1  ;;  %v2114_v34 = vpop.f32.mrb[118].mxu0  ;;  %v14664_v26 = vmul.f32 %v14632_v28, %v1976_v58  ;;  %v13245_v53 = vld [vmem:[#allocation10 + $0x10] sm:$0xff]  }
 0x5ac   :  { %v2200_v23 = vadd.f32 1e-05, %v2179_v57  ;;  %v2180_v56 = vmul.f32 0.0625, %v2114_v34  ;;  %v11184_v27 = vpop.f32.mrb[119].mxu0  ;;  %12623 = vrsqrt.f32 %v1937_v3  ;;  %v14670_v59 = vmul.f32 %v14632_v28, %v2239_v25 }
 0x5ad   :  { %v1938_v1 = vadd.f32 1e-05, %v1917_v43  ;;  %v2300_v55 = vpack.c.bf16 %v14664_v26, %v14661_v22  ;;  %11336 = vmatpush3.bf16.msra.mxu1 %v13244_v36 }
 0x5ae   :  { %12625 = vrsqrt.f32 %v2200_v23  ;;  %v2201_v35 = vadd.f32 1e-05, %v2180_v56  ;;  %v12616_v57 = vpop.eup %12615  ;;  %v2542_v29 = vpack.c.bf16 %v14670_v59, %v14667_v39  ;;  %11337 = vmatprep.subr.bf16.mxu1 %v13245_v53 }
 0x5af   :  { %12627 = vrsqrt.f32 %v1938_v1  ;;  %v1856_v63 = vpop.f32.mrb[84].mxu1  ;;  %11234 = vmatmul.mubr.bf16.gmra.mrb[116].mxu1 %v2300_v55  ;;  %v1977_v58 = vmul.f32 %v12616_v57, %v14408_v54 }
 0x5b0   :  { %v12618_v11 = vpop.eup %12617  ;;  %12629 = vrsqrt.f32 %v2201_v35  ;;  %v1918_v3 = vmul.f32 0.0625, %v1856_v63  ;;  %v11127_v43 = vpop.f32.mrb[85].mxu1  ;;  %11294 = vmatmul.mubr.bf16.gmra.mrb[152].mxu0 %v2542_v29  ;;  %11237 = vmatprep.mubr.msk.bf16.mxu1 %vm13585_vm0, %v18403_v40  ;;  %v13246_v29 = vld [vmem:[#allocation10 + $0x18] sm:$0xff]  }
 0x5b1   :  { %v12620_v60 = vpop.eup %12619  ;;  %v2119_v52 = vpop.f32.mrb[120].mxu0  ;;  %v2240_v34 = vmul.f32 %v12618_v11, %v14414_v32  ;;  %11297 = vmatprep.mubr.msk.bf16.mxu0 %vm13585_vm0, %v18403_v40  ;;  %11338 = vmatpush3.bf16.msra.mxu1 %v13245_v53  ;;  %v14685_v43 = vmul.f32 %v14632_v28, %v1977_v58 }
 0x5b2   :  { %v12622_v25 = vpop.eup %12621  ;;  %v2181_v36 = vmul.f32 0.0625, %v2119_v52  ;;  %v1859_v23 = vpop.f32.mrb[86].mxu1  ;;  %v1978_v27 = vmul.f32 %v12620_v60, %v14418_v62  ;;  %v1939_v54 = vadd.f32 1e-05, %v1918_v3  ;;  %11339 = vmatprep.subr.bf16.mxu1 %v13246_v29 }
 0x5b3   :  { %v11187_v56 = vpop.f32.mrb[121].mxu0  ;;  %v1919_v1 = vmul.f32 0.0625, %v1859_v23  ;;  %v11128_v35 = vpop.f32.mrb[87].mxu1  ;;  %v2241_v57 = vmul.f32 %v12622_v25, %v14427_v5  ;;  %v14691_v53 = vmul.f32 %v14632_v28, %v2240_v34 }
 0x5b4   :  { %v2122_v55 = vpop.f32.mrb[122].mxu0  ;;  %v2202_v63 = vadd.f32 1e-05, %v2181_v36  ;;  %v14688_v62 = vmul.f32 %v14632_v28, %v1978_v27  ;;  %12631 = vrsqrt.f32 %v1939_v54  ;;  %v13247_v36 = vld [vmem:[#allocation10 + $0x20] sm:$0xff]  }
 0x5b5   :  { %v2182_v32 = vmul.f32 0.0625, %v2122_v55  ;;  %v11188_v11 = vpop.f32.mrb[123].mxu0  ;;  %v1940_v60 = vadd.f32 1e-05, %v1919_v1  ;;  %v14694_v3 = vmul.f32 %v14632_v28, %v2241_v57  ;;  %11340 = vmatpush3.bf16.msra.mxu1 %v13246_v29 }
 0x5b6   :  { %12633 = vrsqrt.f32 %v2202_v63  ;;  %v2301_v52 = vpack.c.bf16 %v14688_v62, %v14685_v43  ;;  %v12624_v25 = vpop.eup %12623  ;;  %11341 = vmatprep.subr.bf16.mxu1 %v13247_v36 }
 0x5b7   :  { %v2203_v5 = vadd.f32 1e-05, %v2182_v32  ;;  %12635 = vrsqrt.f32 %v1940_v60  ;;  %v2543_v58 = vpack.c.bf16 %v14694_v3, %v14691_v53  ;;  %v1864_v34 = vpop.f32.mrb[88].mxu1  ;;  %v1979_v56 = vmul.f32 %v12624_v25, %v14436_v16 }
 0x5b8   :  { %v12626_v23 = vpop.eup %12625  ;;  %11238 = vmatmul.mubr.bf16.gmra.mrb[120].mxu1 %v2301_v52  ;;  %v1920_v54 = vmul.f32 0.0625, %v1864_v34  ;;  %v11131_v1 = vpop.f32.mrb[89].mxu1 }
 0x5b9   :  { %12637 = vrsqrt.f32 %v2203_v5  ;;  %v12628_v27 = vpop.eup %12627  ;;  %v2127_v35 = vpop.f32.mrb[124].mxu0  ;;  %11298 = vmatmul.mubr.bf16.gmra.mrb[156].mxu0 %v2543_v58  ;;  %11241 = vmatprep.mubr.msk.bf16.mxu1 %vm13585_vm0, %v18403_v40  ;;  %v2242_v55 = vmul.f32 %v12626_v23, %v14442_v24  ;;  %v13248_v58 = vld [vmem:[#allocation10 + $0x28] sm:$0xff]   ;;  %v14709_v1 = vmul.f32 %v14632_v28, %v1979_v56 }
 0x5ba   :  { %v12630_v57 = vpop.eup %12629  ;;  %v2183_v29 = vmul.f32 0.0625, %v2127_v35  ;;  %v1867_v63 = vpop.f32.mrb[90].mxu1  ;;  %v1980_v11 = vmul.f32 %v12628_v27, %v14446_v31  ;;  %11301 = vmatprep.mubr.msk.bf16.mxu0 %vm13585_vm0, %v18403_v40  ;;  %11342 = vmatpush3.bf16.msra.mxu1 %v13247_v36  ;;  %v1941_v16 = vadd.f32 1e-05, %v1920_v54 }
 0x5bb   :  { %v11191_v32 = vpop.f32.mrb[125].mxu0  ;;  %v1921_v60 = vmul.f32 0.0625, %v1867_v63  ;;  %v11132_v5 = vpop.f32.mrb[91].mxu1  ;;  %v2243_v25 = vmul.f32 %v12630_v57, %v14455_v45  ;;  %11343 = vmatprep.subr.bf16.mxu1 %v13248_v58  ;;  %v14715_v36 = vmul.f32 %v14632_v28, %v2242_v55 }
 0x5bc   :  { %v2130_v52 = vpop.f32.mrb[126].mxu0  ;;  %v2204_v34 = vadd.f32 1e-05, %v2183_v29  ;;  %v14712_v31 = vmul.f32 %v14632_v28, %v1980_v11  ;;  %12639 = vrsqrt.f32 %v1941_v16  ;;  %v13249_v29 = vld [vmem:[#allocation10 + $0x30] sm:$0xff]  }
 0x5bd   :  { %v2184_v24 = vmul.f32 0.0625, %v2130_v52  ;;  %v11192_v23 = vpop.f32.mrb[127].mxu0  ;;  %v1942_v27 = vadd.f32 1e-05, %v1921_v60  ;;  %v14718_v54 = vmul.f32 %v14632_v28, %v2243_v25 }
 0x5be   :  { %12641 = vrsqrt.f32 %v2204_v34  ;;  %v2302_v35 = vpack.c.bf16 %v14712_v31, %v14709_v1  ;;  %11344 = vmatpush3.bf16.msra.mxu1 %v13248_v58  ;;  %v12632_v57 = vpop.eup %12631 }
 0x5bf   :  { %v2205_v45 = vadd.f32 1e-05, %v2184_v24  ;;  %12643 = vrsqrt.f32 %v1942_v27  ;;  %v2544_v56 = vpack.c.bf16 %v14718_v54, %v14715_v36  ;;  %11345 = vmatprep.subr.bf16.mxu1 %v13249_v29  ;;  %v1872_v55 = vpop.f32.mrb[92].mxu1  ;;  %v1981_v32 = vmul.f32 %v12632_v57, %v14464_v2 }
 0x5c0   :  { %v12634_v63 = vpop.eup %12633  ;;  %11242 = vmatmul.mubr.bf16.gmra.mrb[124].mxu1 %v2302_v35  ;;  %v1922_v16 = vmul.f32 0.0625, %v1872_v55  ;;  %v11135_v60 = vpop.f32.mrb[93].mxu1 }
 0x5c1   :  { %12645 = vrsqrt.f32 %v2205_v45  ;;  %v12636_v11 = vpop.eup %12635  ;;  %v2135_v5 = vpop.f32.mrb[128].mxu0  ;;  %11302 = vmatmul.mubr.bf16.gmra.mrb[160].mxu0 %v2544_v56  ;;  %11245 = vmatprep.mubr.msk.bf16.mxu1 %vm13585_vm0, %v18403_v40  ;;  %v2244_v52 = vmul.f32 %v12634_v63, %v14470_v8  ;;  %v13250_v56 = vld [vmem:[#allocation10 + $0x38] sm:$0xff]   ;;  %v14733_v60 = vmul.f32 %v14632_v28, %v1981_v32 }
 0x5c2   :  { %v2185_v58 = vmul.f32 0.0625, %v2135_v5  ;;  %v1875_v34 = vpop.f32.mrb[94].mxu1  ;;  %v11195_v24 = vpop.f32.mrb[129].mxu0  ;;  %v1982_v23 = vmul.f32 %v12636_v11, %v14474_v13  ;;  %11305 = vmatprep.mubr.msk.bf16.mxu0 %vm13585_vm0, %v18403_v40  ;;  %11346 = vmatpush3.bf16.msra.mxu1 %v13249_v29  ;;  %v1943_v2 = vadd.f32 1e-05, %v1922_v16 }
 0x5c3   :  { %v12638_v25 = vpop.eup %12637  ;;  %v1923_v27 = vmul.f32 0.0625, %v1875_v34  ;;  %v11136_v45 = vpop.f32.mrb[95].mxu1  ;;  %11347 = vmatprep.subr.bf16.mxu1 %v13250_v56  ;;  %v14739_v29 = vmul.f32 %v14632_v28, %v2244_v52 }
 0x5c4   :  { %v2138_v35 = vpop.f32.mrb[130].mxu0  ;;  %v2245_v57 = vmul.f32 %v12638_v25, %v14482_v30  ;;  %v2206_v55 = vadd.f32 1e-05, %v2185_v58  ;;  %v14736_v13 = vmul.f32 %v14632_v28, %v1982_v23  ;;  %12647 = vrsqrt.f32 %v1943_v2 }
 0x5c5   :  { %v2186_v8 = vmul.f32 0.0625, %v2138_v35  ;;  %v11196_v63 = vpop.f32.mrb[131].mxu0  ;;  %v1944_v11 = vadd.f32 1e-05, %v1923_v27 }
 0x5c6   :  { %v14742_v16 = vmul.f32 %v14632_v28, %v2245_v57  ;;  %12649 = vrsqrt.f32 %v2206_v55  ;;  %v2303_v5 = vpack.c.bf16 %v14736_v13, %v14733_v60  ;;  %11348 = vmatpush3.bf16.msra.mxu1 %v13250_v56  ;;  %v12640_v25 = vpop.eup %12639 }
 0x5c7   :  { %v2207_v30 = vadd.f32 1e-05, %v2186_v8  ;;  %12651 = vrsqrt.f32 %v1944_v11  ;;  %11473 = vmatprep.subr.bf16.mxu1 %v18403_v40  ;;  %v1880_v52 = vpop.f32.mrb[96].mxu1  ;;  %v1983_v34 = vmul.f32 %v12640_v25, %v14488_v49 }
 0x5c8   :  { %v2545_v32 = vpack.c.bf16 %v14742_v16, %v14739_v29  ;;  %v12642_v58 = vpop.eup %12641  ;;  %11246 = vmatmul.mubr.bf16.gmra.mrb[128].mxu1 %v2303_v5  ;;  %v1924_v23 = vmul.f32 0.0625, %v1880_v52  ;;  %v11139_v2 = vpop.f32.mrb[97].mxu1 }
 0x5c9   :  { %12653 = vrsqrt.f32 %v2207_v30  ;;  %v12644_v24 = vpop.eup %12643  ;;  %v2143_v27 = vpop.f32.mrb[132].mxu0  ;;  %11249 = vmatprep.mubr.msk.bf16.mxu1 %vm13585_vm0, %v18403_v40  ;;  %v2246_v45 = vmul.f32 %v12642_v58, %v14494_v10  ;;  %v14758_v10 = vmul.f32 %v14632_v28, %v1983_v34 }
 0x5ca   :  { %11306 = vmatmul.mubr.bf16.gmra.mrb[164].mxu0 %v2545_v32  ;;  %v2187_v57 = vmul.f32 0.0625, %v2143_v27  ;;  %v1883_v56 = vpop.f32.mrb[98].mxu1  ;;  %v11199_v55 = vpop.f32.mrb[133].mxu0  ;;  %v1984_v8 = vmul.f32 %v12644_v24, %v14498_v47  ;;  %v1945_v49 = vadd.f32 1e-05, %v1924_v23 }
 0x5cb   :  { %v12646_v35 = vpop.eup %12645  ;;  %11309 = vmatprep.mubr.msk.bf16.mxu0 %vm13585_vm0, %v18403_v40  ;;  %v1925_v63 = vmul.f32 0.0625, %v1883_v56  ;;  %v11140_v11 = vpop.f32.mrb[99].mxu1  ;;  %v14764_v24 = vmul.f32 %v14632_v28, %v2246_v45 }
 0x5cc   :  { %v2146_v30 = vpop.f32.mrb[134].mxu0  ;;  %v2247_v5 = vmul.f32 %v12646_v35, %v14506_v41  ;;  %v2208_v25 = vadd.f32 1e-05, %v2187_v57  ;;  %v14761_v58 = vmul.f32 %v14632_v28, %v1984_v8  ;;  %12655 = vrsqrt.f32 %v1945_v49 }
 0x5cd   :  { %v2188_v32 = vmul.f32 0.0625, %v2146_v30  ;;  %v11200_v52 = vpop.f32.mrb[135].mxu0  ;;  %v1946_v47 = vadd.f32 1e-05, %v1925_v63 }
 0x5ce   :  { %v14767_v23 = vmul.f32 %v14632_v28, %v2247_v5  ;;  %12657 = vrsqrt.f32 %v2208_v25  ;;  %v2304_v41 = vpack.c.bf16 %v14761_v58, %v14758_v10  ;;  %v12648_v27 = vpop.eup %12647 }
 0x5cf   :  { %v2209_v2 = vadd.f32 1e-05, %v2188_v32  ;;  %12659 = vrsqrt.f32 %v1946_v47  ;;  %v1888_v57 = vpop.f32.mrb[100].mxu1  ;;  %v1985_v45 = vmul.f32 %v12648_v27, %v14512_v46 }
 0x5d0   :  { %v2546_v34 = vpack.c.bf16 %v14767_v23, %v14764_v24  ;;  %v12650_v35 = vpop.eup %12649  ;;  %11250 = vmatmul.mubr.bf16.gmra.mrb[132].mxu1 %v2304_v41  ;;  %v1926_v55 = vmul.f32 0.0625, %v1888_v57  ;;  %v11143_v8 = vpop.f32.mrb[101].mxu1 }
 0x5d1   :  { %12661 = vrsqrt.f32 %v2209_v2  ;;  %v12652_v56 = vpop.eup %12651  ;;  %v2151_v49 = vpop.f32.mrb[136].mxu0  ;;  %11253 = vmatprep.mubr.msk.bf16.mxu1 %vm13585_vm0, %v18403_v40  ;;  %v2248_v63 = vmul.f32 %v12650_v35, %v14518_v4  ;;  %v14782_v4 = vmul.f32 %v14632_v28, %v1985_v45 }
 0x5d2   :  { %11310 = vmatmul.mubr.bf16.gmra.mrb[168].mxu0 %v2546_v34  ;;  %v2189_v30 = vmul.f32 0.0625, %v2151_v49  ;;  %v1891_v5 = vpop.f32.mrb[102].mxu1  ;;  %v11203_v25 = vpop.f32.mrb[137].mxu0  ;;  %v1986_v32 = vmul.f32 %v12652_v56, %v14522_v19  ;;  %v1947_v46 = vadd.f32 1e-05, %v1926_v55 }
 0x5d3   :  { %v12654_v11 = vpop.eup %12653  ;;  %11313 = vmatprep.mubr.msk.bf16.mxu0 %vm13585_vm0, %v18403_v40  ;;  %v1927_v52 = vmul.f32 0.0625, %v1891_v5  ;;  %v11144_v47 = vpop.f32.mrb[103].mxu1  ;;  %v14788_v56 = vmul.f32 %v14632_v28, %v2248_v63 }
 0x5d4   :  { %v2154_v2 = vpop.f32.mrb[138].mxu0  ;;  %v2249_v41 = vmul.f32 %v12654_v11, %v14530_v15  ;;  %v2210_v27 = vadd.f32 1e-05, %v2189_v30  ;;  %v14785_v35 = vmul.f32 %v14632_v28, %v1986_v32  ;;  %12663 = vrsqrt.f32 %v1947_v46 }
 0x5d5   :  { %v2190_v34 = vmul.f32 0.0625, %v2154_v2  ;;  %v11204_v57 = vpop.f32.mrb[139].mxu0  ;;  %v1948_v19 = vadd.f32 1e-05, %v1927_v52 }
 0x5d6   :  { %v14791_v55 = vmul.f32 %v14632_v28, %v2249_v41  ;;  %12665 = vrsqrt.f32 %v2210_v27  ;;  %v2305_v15 = vpack.c.bf16 %v14785_v35, %v14782_v4  ;;  %v12656_v49 = vpop.eup %12655 }
 0x5d7   :  { %v2211_v8 = vadd.f32 1e-05, %v2190_v34  ;;  %12667 = vrsqrt.f32 %v1948_v19  ;;  %v1896_v30 = vpop.f32.mrb[104].mxu1  ;;  %v1987_v63 = vmul.f32 %v12656_v49, %v14536_v0 }
 0x5d8   :  { %v2547_v45 = vpack.c.bf16 %v14791_v55, %v14788_v56  ;;  %v12658_v11 = vpop.eup %12657  ;;  %11254 = vmatmul.mubr.bf16.gmra.mrb[136].mxu1 %v2305_v15  ;;  %v1928_v25 = vmul.f32 0.0625, %v1896_v30  ;;  %v11147_v32 = vpop.f32.mrb[105].mxu1 }
 0x5d9   :  { %12669 = vrsqrt.f32 %v2211_v8  ;;  %v12660_v5 = vpop.eup %12659  ;;  %v2159_v46 = vpop.f32.mrb[140].mxu0  ;;  %11257 = vmatprep.mubr.msk.bf16.mxu1 %vm13585_vm0, %v18403_v40  ;;  %v2250_v52 = vmul.f32 %v12658_v11, %v14542_v38  ;;  %v14806_v38 = vmul.f32 %v14632_v28, %v1987_v63 }
 0x5da   :  { %11314 = vmatmul.mubr.bf16.gmra.mrb[172].mxu0 %v2547_v45  ;;  %v2191_v2 = vmul.f32 0.0625, %v2159_v46  ;;  %v1899_v41 = vpop.f32.mrb[106].mxu1  ;;  %v11207_v27 = vpop.f32.mrb[141].mxu0  ;;  %v1988_v34 = vmul.f32 %v12660_v5, %v14546_v48  ;;  %v1949_v0 = vadd.f32 1e-05, %v1928_v25 }
 0x5db   :  { %v12662_v47 = vpop.eup %12661  ;;  %11317 = vmatprep.mubr.msk.bf16.mxu0 %vm13585_vm0, %v18403_v40  ;;  %v1929_v57 = vmul.f32 0.0625, %v1899_v41  ;;  %v11148_v19 = vpop.f32.mrb[107].mxu1  ;;  %v14812_v5 = vmul.f32 %v14632_v28, %v2250_v52 }
 0x5dc   :  { %v2162_v8 = vpop.f32.mrb[142].mxu0  ;;  %v2251_v15 = vmul.f32 %v12662_v47, %v14554_v61  ;;  %v2212_v49 = vadd.f32 1e-05, %v2191_v2  ;;  %v14809_v11 = vmul.f32 %v14632_v28, %v1988_v34  ;;  %12671 = vrsqrt.f32 %v1949_v0 }
 0x5dd   :  { %v2192_v45 = vmul.f32 0.0625, %v2162_v8  ;;  %v11208_v30 = vpop.f32.mrb[143].mxu0  ;;  %v1950_v48 = vadd.f32 1e-05, %v1929_v57 }
 0x5de   :  { %v14815_v25 = vmul.f32 %v14632_v28, %v2251_v15  ;;  %12673 = vrsqrt.f32 %v2212_v49  ;;  %v2306_v61 = vpack.c.bf16 %v14809_v11, %v14806_v38  ;;  %v12664_v46 = vpop.eup %12663 }
 0x5df   :  { %v2213_v32 = vadd.f32 1e-05, %v2192_v45  ;;  %12675 = vrsqrt.f32 %v1950_v48  ;;  %v1904_v2 = vpop.f32.mrb[108].mxu1  ;;  %v1989_v52 = vmul.f32 %v12664_v46, %v14560_v37 }
 0x5e0   :  { %v2548_v63 = vpack.c.bf16 %v14815_v25, %v14812_v5  ;;  %v12666_v47 = vpop.eup %12665  ;;  %11258 = vmatmul.mubr.bf16.gmra.mrb[140].mxu1 %v2306_v61  ;;  %v1930_v27 = vmul.f32 0.0625, %v1904_v2  ;;  %v11151_v34 = vpop.f32.mrb[109].mxu1 }
 0x5e1   :  { %12677 = vrsqrt.f32 %v2213_v32  ;;  %v12668_v41 = vpop.eup %12667  ;;  %v2167_v0 = vpop.f32.mrb[144].mxu0  ;;  %11261 = vmatprep.mubr.msk.bf16.mxu1 %vm13585_vm0, %v18403_v40  ;;  %v2252_v57 = vmul.f32 %v12666_v47, %v14566_v33 }
 0x5e2   :  { %11318 = vmatmul.mubr.bf16.gmra.mrb[176].mxu0 %v2548_v63  ;;  %v2193_v8 = vmul.f32 0.0625, %v2167_v0  ;;  %v1907_v15 = vpop.f32.mrb[110].mxu1  ;;  %v11211_v49 = vpop.f32.mrb[145].mxu0  ;;  %v1990_v45 = vmul.f32 %v12668_v41, %v14570_v17  ;;  %v1951_v37 = vadd.f32 1e-05, %v1930_v27  ;;  %v14830_v63 = vmul.f32 %v14632_v28, %v1989_v52 }
 0x5e3   :  { %v12670_v19 = vpop.eup %12669  ;;  %11321 = vmatprep.mubr.msk.bf16.mxu0 %vm13585_vm0, %v18403_v40  ;;  %v11152_v30 = vpop.f32.mrb[111].mxu1  ;;  %v14836_v47 = vmul.f32 %v14632_v28, %v2252_v57 }
 0x5e4   :  { %v2170_v48 = vpop.f32.mrb[146].mxu0  ;;  %v2253_v32 = vmul.f32 %v12670_v19, %v14578_v44  ;;  %v2214_v61 = vadd.f32 1e-05, %v2193_v8  ;;  %v14833_v33 = vmul.f32 %v14632_v28, %v1990_v45  ;;  %12679 = vrsqrt.f32 %v1951_v37 }
 0x5e5   :  { %v11212_v46 = vpop.f32.mrb[147].mxu0 }
 0x5e6   :  { %v14839_v17 = vmul.f32 %v14632_v28, %v2253_v32  ;;  %12681 = vrsqrt.f32 %v2214_v61  ;;  %v2307_v2 = vpack.c.bf16 %v14833_v33, %v14830_v63  ;;  %v12672_v44 = vpop.eup %12671 }
 0x5e7   :  { %v1991_v27 = vmul.f32 %v12672_v44, %v14584_v9 }
 0x5e8   :  { %v2549_v41 = vpack.c.bf16 %v14839_v17, %v14836_v47  ;;  %v12674_v52 = vpop.eup %12673  ;;  %11262 = vmatmul.mubr.bf16.gmra.mrb[144].mxu1 %v2307_v2  ;;  %v14892_v2 = vld [vmem:[#allocation13] ss:$0 sm:$0xff] }
 0x5e9   :  { %v12676_v34 = vpop.eup %12675  ;;  %11265 = vmatprep.mubr.msk.bf16.mxu1 %vm13585_vm0, %v18403_v40  ;;  %v2254_v0 = vmul.f32 %v12674_v52, %v14590_v18  ;;  %v14854_v15 = vmul.f32 %v14632_v28, %v1991_v27 }
 0x5ea   :  { %11322 = vmatmul.mubr.bf16.gmra.mrb[180].mxu0 %v2549_v41  ;;  %v1992_v19 = vmul.f32 %v12676_v34, %v14594_v20 }
 0x5eb   :  { %v12678_v57 = vpop.eup %12677  ;;  %11325 = vmatprep.mubr.msk.bf16.mxu0 %vm13585_vm0, %v18403_v40  ;;  %v14860_v49 = vmul.f32 %v14632_v28, %v2254_v0 }
 0x5ec   :  { %v2255_v8 = vmul.f32 %v12678_v57, %v14602_v12  ;;  %v14857_v9 = vmul.f32 %v14632_v28, %v1992_v19 }
 0x5ee   :  { %v14863_v45 = vmul.f32 %v14632_v28, %v2255_v8  ;;  %v2308_v20 = vpack.c.bf16 %v14857_v9, %v14854_v15  ;;  %v12680_v18 = vpop.eup %12679 }
 0x5ef   :  { %v1993_v30 = vmul.f32 %v12680_v18, %v14608_v7 }
 0x5f0   :  { %v2550_v37 = vpack.c.bf16 %v14863_v45, %v14860_v49  ;;  %v12682_v12 = vpop.eup %12681  ;;  %11266 = vmatmul.mubr.bf16.gmra.mrb[148].mxu1 %v2308_v20 }
 0x5f1   :  { %11269 = vmatprep.mubr.msk.bf16.mxu1 %vm13585_vm0, %v18403_v40  ;;  %v2256_v48 = vmul.f32 %v12682_v12, %v14614_v42  ;;  %v14874_v32 = vmul.f32 %v14632_v28, %v1993_v30  ;;  %v14890_v42 = vld [vmem:[%s18226_s14] ss:$0 sm:$0xff] }
 0x5f2   :  { %11326 = vmatmul.mubr.bf16.gmra.mrb[184].mxu0 %v2550_v37  ;;  %v2278_v44 = vmul.f32 %v14890_v42, %v14637_v51  ;;  %v2520_v34 = vmul.f32 %v14890_v42, %v14643_v14  ;;  %v2279_v20 = vmul.f32 %v14890_v42, %v14640_v6  ;;  %v2521_v30 = vmul.f32 %v14890_v42, %v14646_v50 }
 0x5f3   :  { %11329 = vmatprep.mubr.msk.bf16.mxu0 %vm13585_vm0, %v18403_v40  ;;  %v14879_v61 = vmul.f32 %v14632_v28, %v2256_v48  ;;  %v2309_v46 = vpack.c.bf16 %v14874_v32, %v14874_v32 }
 0x5f5   :  { %v2551_v7 = vpack.c.bf16 %v14879_v61, %v14879_v61 }
 0x5f8   :  { %11270 = vmatmul.mubr.bf16.gmra.mrb[152].mxu1 %v2309_v46 }
 0x5fa   :  { %11330 = vmatmul.mubr.bf16.gmra.mrb[188].mxu0 %v2551_v7 }
 0x5fb   :  { %11429 = vmatprep.mubr.msk.bf16.mxu0 %vm13585_vm0, %v18403_v40 }
 0x67a   :  { %v2392_v28 = vpop.f32.mrb[112].mxu1 }
 0x67b   :  { %v2478_v41 = vmul.f32 %v14892_v2, %v2392_v28  ;;  %v11231_v52 = vpop.f32.mrb[113].mxu1  ;;  %v2586_v27 = vpop.f32.mrb[148].mxu0 }
 0x67c   :  { %v2672_v0 = vmul.f32 %v14892_v2, %v2586_v27  ;;  %v2395_v57 = vpop.f32.mrb[114].mxu1  ;;  %v11291_v19 = vpop.f32.mrb[149].mxu0 }
 0x67d   :  { %v14900_v8 = vadd.f32 %v2478_v41, %v2278_v44  ;;  %v2479_v18 = vmul.f32 %v14892_v2, %v2395_v57  ;;  %v11232_v37 = vpop.f32.mrb[115].mxu1  ;;  %v2589_v51 = vpop.f32.mrb[150].mxu0  ;;  %v2280_v41 = vmul.f32 %v14890_v42, %v14661_v22 }
 0x67e   :  { %v14905_v12 = vadd.f32 %v2672_v0, %v2520_v34  ;;  %v2673_v14 = vmul.f32 %v14892_v2, %v2589_v51  ;;  %v11292_v48 = vpop.f32.mrb[151].mxu0  ;;  %v2522_v34 = vmul.f32 %v14890_v42, %v14667_v39  ;;  %v2281_v37 = vmul.f32 %v14890_v42, %v14664_v26 }
 0x67f   :  { %v14910_v46 = vadd.f32 %v2479_v18, %v2279_v20  ;;  %v2523_v48 = vmul.f32 %v14890_v42, %v14670_v59 }
 0x680   :  { %v14912_v7 = vadd.f32 %v2673_v14, %v2521_v30  ;;  %v2714_v28 = vmul.f32 %v14905_v12, %v14900_v8 }
 0x682   :  { %v2400_v6 = vpop.f32.mrb[116].mxu1  ;;  %v2715_v44 = vmul.f32 %v14912_v7, %v14910_v46 }
 0x683   :  { %v2480_v52 = vmul.f32 %v14892_v2, %v2400_v6  ;;  %v11235_v50 = vpop.f32.mrb[117].mxu1  ;;  %v2594_v27 = vpop.f32.mrb[152].mxu0 }
 0x684   :  { %v2674_v0 = vmul.f32 %v14892_v2, %v2594_v27  ;;  %v2403_v57 = vpop.f32.mrb[118].mxu1  ;;  %v11295_v19 = vpop.f32.mrb[153].mxu0  ;;  %v2777_v20 = vpack.c.bf16 %v2715_v44, %v2714_v28 }
 0x685   :  { %v14924_v18 = vadd.f32 %v2480_v52, %v2280_v41  ;;  %v2481_v51 = vmul.f32 %v14892_v2, %v2403_v57  ;;  %v11236_v22 = vpop.f32.mrb[119].mxu1  ;;  %v2597_v30 = vpop.f32.mrb[154].mxu0  ;;  %v2282_v52 = vmul.f32 %v14890_v42, %v14685_v43 }
 0x686   :  { %v14929_v14 = vadd.f32 %v2674_v0, %v2522_v34  ;;  %v2675_v39 = vmul.f32 %v14892_v2, %v2597_v30  ;;  %v11296_v6 = vpop.f32.mrb[155].mxu0  ;;  %11349 = vmatprep.mubr.bf16.mxu1 %v2777_v20  ;;  %v2524_v0 = vmul.f32 %v14890_v42, %v14691_v53  ;;  %v2283_v22 = vmul.f32 %v14890_v42, %v14688_v62 }
 0x687   :  { %v14934_v50 = vadd.f32 %v2481_v51, %v2281_v37  ;;  %v2525_v6 = vmul.f32 %v14890_v42, %v14694_v3  ;;  %v14971_v3 = vld [vmem:[%s18226_s14 + $0x1] ss:$0 sm:$0xff] }
 0x688   :  { %v2716_v28 = vmul.f32 %v14929_v14, %v14924_v18  ;;  %v14938_v44 = vadd.f32 %v2675_v39, %v2523_v48 }
 0x68a   :  { %v2717_v26 = vmul.f32 %v14938_v44, %v14934_v50 }
 0x68b   :  { %v2408_v41 = vpop.f32.mrb[120].mxu1 }
 0x68c   :  { %v2482_v59 = vmul.f32 %v14892_v2, %v2408_v41  ;;  %v11239_v27 = vpop.f32.mrb[121].mxu1  ;;  %v2602_v34 = vpop.f32.mrb[156].mxu0  ;;  %v2778_v37 = vpack.c.bf16 %v2717_v26, %v2716_v28  ;;  %v13251_v28 = vld [vmem:[%s18223_s11] sm:$0xff]  }
 0x68d   :  { %v2676_v57 = vmul.f32 %v14892_v2, %v2602_v34  ;;  %v2411_v19 = vpop.f32.mrb[122].mxu1  ;;  %v11299_v20 = vpop.f32.mrb[157].mxu0 }
 0x68e   :  { %v14948_v51 = vadd.f32 %v2482_v59, %v2282_v52  ;;  %v2483_v30 = vmul.f32 %v14892_v2, %v2411_v19  ;;  %v11240_v43 = vpop.f32.mrb[123].mxu1  ;;  %v2605_v48 = vpop.f32.mrb[158].mxu0  ;;  %11350 = vmatmul.mubr.bf16.vlgmr.msra.gmra.mrb[156].mxu1 %v2778_v37  ;;  %v14973_v59 = vld [vmem:[#allocation13 + $0x1] ss:$0 sm:$0xff]  ;;  %v13252_v37 = vld [vmem:[%s18223_s11 + $0x8] sm:$0xff]  }
 0x68f   :  { %v14953_v39 = vadd.f32 %v2676_v57, %v2524_v0  ;;  %v2677_v53 = vmul.f32 %v14892_v2, %v2605_v48  ;;  %v11300_v41 = vpop.f32.mrb[159].mxu0  ;;  %11474 = vmatpush3.bf16.msra.mxu1 %v13251_v28  ;;  %v2284_v0 = vmul.f32 %v14890_v42, %v14709_v1 }
 0x690   :  { %v14958_v27 = vadd.f32 %v2483_v30, %v2283_v22  ;;  %11475 = vmatprep.subr.bf16.mxu1 %v18403_v40  ;;  %v2526_v22 = vmul.f32 %v14890_v42, %v14715_v36  ;;  %v2527_v36 = vmul.f32 %v14971_v3, %v14718_v54 }
 0x691   :  { %v14963_v62 = vadd.f32 %v2677_v53, %v2525_v6  ;;  %v2718_v26 = vmul.f32 %v14953_v39, %v14948_v51  ;;  %v2285_v53 = vmul.f32 %v14971_v3, %v14712_v31 }
 0x693   :  { %v2416_v52 = vpop.f32.mrb[124].mxu1  ;;  %v2719_v34 = vmul.f32 %v14963_v62, %v14958_v27  ;;  %11476 = vmatpush3.bf16.msra.mxu1 %v13252_v37 }
 0x694   :  { %v2484_v57 = vmul.f32 %v14892_v2, %v2416_v52  ;;  %v11243_v19 = vpop.f32.mrb[125].mxu1  ;;  %v2610_v20 = vpop.f32.mrb[160].mxu0  ;;  %11477 = vmatprep.subr.bf16.mxu1 %v18403_v40 }
 0x695   :  { %v2678_v30 = vmul.f32 %v14892_v2, %v2610_v20  ;;  %v2419_v43 = vpop.f32.mrb[126].mxu1  ;;  %v11303_v48 = vpop.f32.mrb[161].mxu0  ;;  %v2779_v6 = vpack.c.bf16 %v2719_v34, %v2718_v26  ;;  %v13253_v34 = vld [vmem:[%s18223_s11 + $0x10] sm:$0xff]  }
 0x696   :  { %v14987_v1 = vadd.f32 %v2484_v57, %v2284_v0  ;;  %v2485_v41 = vmul.f32 %v14973_v59, %v2419_v43  ;;  %v11244_v28 = vpop.f32.mrb[127].mxu1  ;;  %v2613_v52 = vpop.f32.mrb[162].mxu0 }
 0x697   :  { %v14992_v19 = vadd.f32 %v2678_v30, %v2526_v22  ;;  %v2679_v42 = vmul.f32 %v14973_v59, %v2613_v52  ;;  %v11304_v2 = vpop.f32.mrb[163].mxu0  ;;  %11353 = vmatprep.mubr.bf16.mxu1 %v2779_v6  ;;  %11478 = vmatpush3.bf16.msra.mxu1 %v13253_v34  ;;  %v2286_v22 = vmul.f32 %v14971_v3, %v14733_v60  ;;  %v13254_v6 = vld [vmem:[%s18223_s11 + $0x18] sm:$0xff]  }
 0x698   :  { %v14997_v26 = vadd.f32 %v2485_v41, %v2285_v53  ;;  %11479 = vmatprep.subr.bf16.mxu1 %v18403_v40  ;;  %v2528_v53 = vmul.f32 %v14971_v3, %v14739_v29  ;;  %v2529_v29 = vmul.f32 %v14971_v3, %v14742_v16 }
 0x699   :  { %v15002_v31 = vadd.f32 %v2679_v42, %v2527_v36  ;;  %v2720_v0 = vmul.f32 %v14992_v19, %v14987_v1  ;;  %v2287_v42 = vmul.f32 %v14971_v3, %v14736_v13  ;;  %v13255_v13 = vld [vmem:[%s18223_s11 + $0x20] sm:$0xff]  }
 0x69a   :  { %v15009_v54 = vmul.f32 %v14905_v12, %v14997_v26 }
 0x69b   :  { %v2424_v57 = vpop.f32.mrb[128].mxu1  ;;  %v2721_v20 = vmul.f32 %v15002_v31, %v14900_v8  ;;  %v15015_v37 = vmul.f32 %v15002_v31, %v14997_v26  ;;  %11480 = vmatpush3.bf16.msra.mxu1 %v13254_v6 }
 0x69c   :  { %v2486_v30 = vmul.f32 %v14973_v59, %v2424_v57  ;;  %v11247_v43 = vpop.f32.mrb[129].mxu1  ;;  %11481 = vmatprep.subr.bf16.mxu1 %v18403_v40 }
 0x69d   :  { %18412 = vst [vmem:[#allocation67_spill] sm:$0xff] %v15015_v37  ;;  %v2618_v48 = vpop.f32.mrb[164].mxu0  ;;  %v2427_v28 = vpop.f32.mrb[130].mxu1  ;;  %v2780_v36 = vpack.c.bf16 %v2721_v20, %v2720_v0 }
 0x69e   :  { %v2680_v41 = vmul.f32 %v14973_v59, %v2618_v48  ;;  %v11307_v52 = vpop.f32.mrb[165].mxu0  ;;  %v15027_v60 = vadd.f32 %v2486_v30, %v2286_v22  ;;  %v2487_v2 = vmul.f32 %v14973_v59, %v2427_v28  ;;  %v11248_v34 = vpop.f32.mrb[131].mxu1 }
 0x69f   :  { %v2621_v57 = vpop.f32.mrb[166].mxu0  ;;  %11354 = vmatmul.mubr.bf16.gmra.mrb[160].mxu1 %v2780_v36 }
 0x6a0   :  { %v15032_v43 = vadd.f32 %v2680_v41, %v2528_v53  ;;  %v2681_v48 = vmul.f32 %v14973_v59, %v2621_v57  ;;  %v11308_v6 = vpop.f32.mrb[167].mxu0  ;;  %v15037_v0 = vadd.f32 %v2487_v2, %v2287_v42  ;;  %v15041_v20 = vmul.f32 %v14912_v7, %v15027_v60  ;;  %11482 = vmatpush3.bf16.msra.mxu1 %v13255_v13 }
 0x6a1   :  { %11483 = vmatprep.subr.bf16.mxu1 %v18403_v40  ;;  %v2288_v42 = vmul.f32 %v14971_v3, %v14758_v10  ;;  %v2530_v6 = vmul.f32 %v14971_v3, %v14764_v24  ;;  %v2531_v24 = vmul.f32 %v14971_v3, %v14767_v23 }
 0x6a2   :  { %18413 = vst [vmem:[#allocation68_spill] sm:$0xff] %v15041_v20  ;;  %v15046_v22 = vadd.f32 %v2681_v48, %v2529_v29  ;;  %v2722_v16 = vmul.f32 %v15032_v43, %v14910_v46  ;;  %v15052_v30 = vmul.f32 %v15032_v43, %v15027_v60  ;;  %v15057_v53 = vmul.f32 %v14929_v14, %v15037_v0  ;;  %v13256_v48 = vld [vmem:[%s18223_s11 + $0x28] sm:$0xff]  }
 0x6a3   :  { %v2432_v41 = vpop.f32.mrb[132].mxu1 }
 0x6a4   :  { %18414 = vst [vmem:[#allocation69_spill] sm:$0xff] %v15052_v30  ;;  %18415 = vst [vmem:[#allocation70_spill] sm:$0xff] %v15057_v53  ;;  %v2723_v28 = vmul.f32 %v15046_v22, %v14924_v18  ;;  %v15065_v36 = vmul.f32 %v15046_v22, %v15037_v0  ;;  %v2488_v2 = vmul.f32 %v14973_v59, %v2432_v41  ;;  %v11251_v34 = vpop.f32.mrb[133].mxu1  ;;  %11484 = vmatpush3.bf16.msra.mxu1 %v13256_v48 }
 0x6a5   :  { %v2626_v57 = vpop.f32.mrb[168].mxu0  ;;  %v2435_v52 = vpop.f32.mrb[134].mxu1  ;;  %11485 = vmatprep.subr.bf16.mxu1 %v18403_v40  ;;  %v2289_v34 = vmul.f32 %v14971_v3, %v14761_v58  ;;  %v13257_v58 = vld [vmem:[%s18223_s11 + $0x30] sm:$0xff]  }
 0x6a6   :  { %18416 = vst [vmem:[#allocation71_spill] sm:$0xff] %v15065_v36  ;;  %v2682_v13 = vmul.f32 %v14973_v59, %v2626_v57  ;;  %v11311_v21 = vpop.f32.mrb[169].mxu0  ;;  %v2781_v10 = vpack.c.bf16 %v2723_v28, %v2722_v16  ;;  %v15079_v41 = vadd.f32 %v2488_v2, %v2288_v42  ;;  %v2489_v29 = vmul.f32 %v14973_v59, %v2435_v52  ;;  %v11252_v37 = vpop.f32.mrb[135].mxu1 }
 0x6a7   :  { %v2629_v30 = vpop.f32.mrb[170].mxu0 }
 0x6a8   :  { %v15084_v48 = vadd.f32 %v2682_v13, %v2530_v6  ;;  %v2683_v57 = vmul.f32 %v14973_v59, %v2629_v30  ;;  %v11312_v21 = vpop.f32.mrb[171].mxu0  ;;  %11357 = vmatprep.mubr.bf16.mxu1 %v2781_v10  ;;  %v15089_v16 = vadd.f32 %v2489_v29, %v2289_v34  ;;  %v15093_v28 = vmul.f32 %v14938_v44, %v15079_v41 }
 0x6a9   :  { %11486 = vmatpush3.bf16.msra.mxu1 %v13257_v58  ;;  %v2290_v13 = vmul.f32 %v14971_v3, %v14782_v4  ;;  %v13258_v21 = vld [vmem:[%s18223_s11 + $0x38] sm:$0xff]   ;;  %v2532_v58 = vmul.f32 %v14971_v3, %v14788_v56 }
 0x6aa   :  { %18417 = vst [vmem:[#allocation72_spill] sm:$0xff] %v15093_v28  ;;  %v15098_v37 = vadd.f32 %v2683_v57, %v2531_v24  ;;  %v2724_v23 = vmul.f32 %v15084_v48, %v14934_v50  ;;  %v15104_v30 = vmul.f32 %v15084_v48, %v15079_v41  ;;  %11487 = vmatprep.subr.bf16.mxu1 %v18403_v40 }
 0x6ab   :  { %v15109_v52 = vmul.f32 %v14953_v39, %v15089_v16  ;;  %v2440_v42 = vpop.f32.mrb[136].mxu1 }
 0x6ac   :  { %18418 = vst [vmem:[#allocation73_spill] sm:$0xff] %v15104_v30  ;;  %v2725_v2 = vmul.f32 %v15098_v37, %v14948_v51  ;;  %v15117_v6 = vmul.f32 %v15098_v37, %v15089_v16  ;;  %v2490_v10 = vmul.f32 %v14973_v59, %v2440_v42  ;;  %v11255_v34 = vpop.f32.mrb[137].mxu1  ;;  %v2291_v42 = vmul.f32 %v14971_v3, %v14785_v35 }
 0x6ad   :  { %18419 = vst [vmem:[#allocation74_spill] sm:$0xff] %v15109_v52  ;;  %v2634_v24 = vpop.f32.mrb[172].mxu0  ;;  %11488 = vmatpush3.bf16.msra.mxu1 %v13258_v21  ;;  %v2443_v40 = vpop.f32.mrb[138].mxu1  ;;  %v2533_v21 = vmul.f32 %v14971_v3, %v14791_v55 }
 0x6ae   :  { %18420 = vst [vmem:[#allocation75_spill] sm:$0xff] %v15117_v6  ;;  %v2684_v29 = vmul.f32 %v14973_v59, %v2634_v24  ;;  %v11315_v36 = vpop.f32.mrb[173].mxu0  ;;  %v2782_v4 = vpack.c.bf16 %v2725_v2, %v2724_v23  ;;  %v15130_v30 = vadd.f32 %v2490_v10, %v2290_v13  ;;  %v2491_v34 = vmul.f32 %v14973_v59, %v2443_v40  ;;  %v11256_v57 = vpop.f32.mrb[139].mxu1  ;;  %v15151_v40 = vld [vmem:[%s18226_s14 + $0x2] ss:$0 sm:$0xff] }
 0x6af   :  { %v2637_v28 = vpop.f32.mrb[174].mxu0  ;;  %v15153_v2 = vld [vmem:[#allocation13 + $0x2] ss:$0 sm:$0xff]  ;;  %v2292_v57 = vmul.f32 %v15151_v40, %v14806_v38  ;;  %v2293_v20 = vmul.f32 %v15151_v40, %v14809_v11 }
 0x6b0   :  { %v15135_v52 = vadd.f32 %v2684_v29, %v2532_v58  ;;  %v2685_v56 = vmul.f32 %v14973_v59, %v2637_v28  ;;  %v11316_v24 = vpop.f32.mrb[175].mxu0  ;;  %11358 = vmatmul.mubr.bf16.gmra.mrb[164].mxu1 %v2782_v4  ;;  %v15140_v36 = vadd.f32 %v2491_v34, %v2291_v42  ;;  %v15144_v23 = vmul.f32 %v14963_v62, %v15130_v30 }
 0x6b1   :  { %v2535_v34 = vmul.f32 %v15151_v40, %v14815_v25 }
 0x6b2   :  { %18421 = vst [vmem:[#allocation76_spill] sm:$0xff] %v15144_v23  ;;  %v15146_v35 = vadd.f32 %v2685_v56, %v2533_v21  ;;  %v2726_v55 = vmul.f32 %v15135_v52, %v14958_v27  ;;  %v15159_v3 = vmul.f32 %v15135_v52, %v15130_v30  ;;  %v15163_v59 = vmul.f32 %v14992_v19, %v15140_v36 }
 0x6b3   :  { %v2448_v28 = vpop.f32.mrb[140].mxu1  ;;  %v2534_v21 = vmul.f32 %v15151_v40, %v14812_v5 }
 0x6b4   :  { %18422 = vst [vmem:[#allocation77_spill] sm:$0xff] %v15159_v3  ;;  %v2727_v29 = vmul.f32 %v15146_v35, %v14987_v1  ;;  %v15171_v10 = vmul.f32 %v15146_v35, %v15140_v36  ;;  %v2492_v58 = vmul.f32 %v15153_v2, %v2448_v28  ;;  %v11259_v4 = vpop.f32.mrb[141].mxu1 }
 0x6b5   :  { %v2642_v42 = vpop.f32.mrb[176].mxu0  ;;  %v2451_v24 = vpop.f32.mrb[142].mxu1 }
 0x6b6   :  { %v2686_v56 = vmul.f32 %v15153_v2, %v2642_v42  ;;  %v11319_v13 = vpop.f32.mrb[177].mxu0  ;;  %v2783_v6 = vpack.c.bf16 %v2727_v29, %v2726_v55  ;;  %v2513_v3 = vadd.f32 %v2492_v58, %v2292_v57  ;;  %v2493_v38 = vmul.f32 %v15153_v2, %v2451_v24  ;;  %v11260_v28 = vpop.f32.mrb[143].mxu1 }
 0x6b7   :  { %v2645_v4 = vpop.f32.mrb[178].mxu0 }
 0x6b8   :  { %v2707_v53 = vadd.f32 %v2686_v56, %v2534_v21  ;;  %v2687_v23 = vmul.f32 %v15153_v2, %v2645_v4  ;;  %v11320_v5 = vpop.f32.mrb[179].mxu0  ;;  %11361 = vmatprep.mubr.bf16.mxu1 %v2783_v6  ;;  %v2514_v42 = vadd.f32 %v2493_v38, %v2293_v20  ;;  %v15188_v13 = vmul.f32 %v14905_v12, %v2513_v3 }
 0x6b9   :  { %v15191_v55 = vmul.f32 %v15002_v31, %v2513_v3 }
 0x6ba   :  { %v2708_v11 = vadd.f32 %v2687_v23, %v2535_v34  ;;  %v2728_v29 = vmul.f32 %v2707_v53, %v14900_v8  ;;  %v15195_v57 = vmul.f32 %v2707_v53, %v14997_v26  ;;  %v15197_v58 = vmul.f32 %v2707_v53, %v2513_v3 }
 0x6bb   :  { %v15200_v25 = vmul.f32 %v14912_v7, %v2514_v42  ;;  %v15203_v6 = vmul.f32 %v15032_v43, %v2514_v42  ;;  %v2456_v20 = vpop.f32.mrb[144].mxu1  ;;  %v2294_v26 = vmul.f32 %v15151_v40, %v14830_v63  ;;  %v2295_v63 = vmul.f32 %v15151_v40, %v14833_v33 }
 0x6bc   :  { %v2729_v12 = vmul.f32 %v2708_v11, %v14910_v46  ;;  %v2794_v31 = vpack.c.bf16 %v15195_v57, %v15171_v10  ;;  %v15209_v23 = vmul.f32 %v2708_v11, %v15027_v60  ;;  %v15211_v8 = vmul.f32 %v2708_v11, %v2514_v42  ;;  %v11263_v53 = vpop.f32.mrb[145].mxu1 }
 0x6bd   :  { %v2494_v7 = vmul.f32 %v15153_v2, %v2456_v20  ;;  %v2650_v3 = vpop.f32.mrb[180].mxu0  ;;  %v2798_v43 = vpack.c.bf16 %v15200_v25, %v15188_v13  ;;  %v2536_v46 = vmul.f32 %v15151_v40, %v14836_v47  ;;  %v2459_v21 = vpop.f32.mrb[146].mxu1  ;;  %v2537_v47 = vmul.f32 %v15151_v40, %v14839_v17  ;;  %v12314_v13 = vld [vmem:[#allocation6 + $0x8] sm:$0xff]   ;;  %v12315_v25 = vld [vmem:[#allocation6 + $0x10] sm:$0xff]  }
 0x6be   :  { %v2688_v34 = vmul.f32 %v15153_v2, %v2650_v3  ;;  %v11323_v60 = vpop.f32.mrb[181].mxu0  ;;  %v2784_v56 = vpack.c.bf16 %v2729_v12, %v2728_v29  ;;  %v2805_v24 = vpack.c.bf16 %v15211_v8, %v15197_v58  ;;  %v2495_v28 = vmul.f32 %v15153_v2, %v2459_v21  ;;  %v11264_v4 = vpop.f32.mrb[147].mxu1  ;;  %v12316_v58 = vld [vmem:[#allocation6 + $0x18] sm:$0xff]  }
 0x6bf   :  { %v2515_v38 = vadd.f32 %v2494_v7, %v2294_v26  ;;  %v2653_v5 = vpop.f32.mrb[182].mxu0  ;;  %v18440_v10 = vmov 0.0   ;;  %v12320_v8 = vld [vmem:[#allocation6 + $0x38] sm:$0xff]  }
 0x6c0   :  { %v2709_v42 = vadd.f32 %v2688_v34, %v2536_v46  ;;  %v2689_v11 = vmul.f32 %v15153_v2, %v2653_v5  ;;  %v11324_v20 = vpop.f32.mrb[183].mxu0  ;;  %11362 = vmatmul.mubr.bf16.gmra.mrb[168].mxu1 %v2784_v56  ;;  %v2516_v29 = vadd.f32 %v2495_v28, %v2295_v63 }
 0x6c1   :  { %v15230_v12 = vmul.f32 %v14929_v14, %v2515_v38  ;;  %v15233_v26 = vmul.f32 %v15046_v22, %v2515_v38 }
 0x6c2   :  { %v2710_v33 = vadd.f32 %v2689_v11, %v2537_v47  ;;  %v2730_v7 = vmul.f32 %v2709_v42, %v14924_v18  ;;  %v15237_v53 = vmul.f32 %v2709_v42, %v15037_v0  ;;  %v15239_v3 = vmul.f32 %v2709_v42, %v2515_v38 }
 0x6c3   :  { %v15242_v17 = vmul.f32 %v14938_v44, %v2516_v29  ;;  %v2802_v46 = vpack.c.bf16 %v15233_v26, %v15203_v6  ;;  %v15247_v14 = vmul.f32 %v15084_v48, %v2516_v29  ;;  %v2464_v34 = vpop.f32.mrb[148].mxu1  ;;  %v2296_v44 = vmul.f32 %v15151_v40, %v14854_v15  ;;  %v12317_v6 = vld [vmem:[#allocation6 + $0x20] sm:$0xff]  }
 0x6c4   :  { %v2731_v22 = vmul.f32 %v2710_v33, %v14934_v50  ;;  %v2795_v18 = vpack.c.bf16 %v15237_v53, %v15209_v23  ;;  %v15253_v0 = vmul.f32 %v2710_v33, %v15079_v41  ;;  %v15255_v21 = vmul.f32 %v2710_v33, %v2516_v29  ;;  %v11267_v56 = vpop.f32.mrb[149].mxu1  ;;  %v12319_v23 = vld [vmem:[#allocation6 + $0x30] sm:$0xff]  }
 0x6c5   :  { %v2496_v60 = vmul.f32 %v15153_v2, %v2464_v34  ;;  %v2658_v38 = vpop.f32.mrb[184].mxu0  ;;  %v2799_v48 = vpack.c.bf16 %v15242_v17, %v15230_v12  ;;  %v2538_v50 = vmul.f32 %v15151_v40, %v14860_v49  ;;  %v2467_v28 = vpop.f32.mrb[150].mxu1  ;;  %v2297_v15 = vmul.f32 %v15151_v40, %v14857_v9 }
 0x6c6   :  { %v2690_v63 = vmul.f32 %v15153_v2, %v2658_v38  ;;  %v11327_v41 = vpop.f32.mrb[185].mxu0  ;;  %v2785_v4 = vpack.c.bf16 %v2731_v22, %v2730_v7  ;;  %v2806_v5 = vpack.c.bf16 %v15255_v21, %v15239_v3  ;;  %v2497_v47 = vmul.f32 %v15153_v2, %v2467_v28  ;;  %v11268_v11 = vpop.f32.mrb[151].mxu1 }
 0x6c7   :  { %v2517_v42 = vadd.f32 %v2496_v60, %v2296_v44  ;;  %v2661_v20 = vpop.f32.mrb[186].mxu0  ;;  %v2539_v49 = vmul.f32 %v15151_v40, %v14863_v45 }
 0x6c8   :  { %v2711_v29 = vadd.f32 %v2690_v63, %v2538_v50  ;;  %v2691_v33 = vmul.f32 %v15153_v2, %v2661_v20  ;;  %v11328_v34 = vpop.f32.mrb[187].mxu0  ;;  %11365 = vmatprep.mubr.bf16.mxu1 %v2785_v4  ;;  %v2518_v7 = vadd.f32 %v2497_v47, %v2297_v15 }
 0x6c9   :  { %v2760_v22 = vmul.f32 %v14953_v39, %v2517_v42  ;;  %v2767_v44 = vmul.f32 %v15098_v37, %v2517_v42 }
 0x6ca   :  { %v2712_v60 = vadd.f32 %v2691_v33, %v2539_v49  ;;  %v2732_v9 = vmul.f32 %v2711_v29, %v14948_v51  ;;  %v2753_v56 = vmul.f32 %v2711_v29, %v15089_v16  ;;  %v2774_v38 = vmul.f32 %v2711_v29, %v2517_v42 }
 0x6cb   :  { %v2761_v50 = vmul.f32 %v14963_v62, %v2518_v7  ;;  %v2803_v63 = vpack.c.bf16 %v2767_v44, %v15247_v14  ;;  %v2768_v45 = vmul.f32 %v15135_v52, %v2518_v7  ;;  %v2472_v28 = vpop.f32.mrb[152].mxu1  ;;  %v2298_v51 = vmul.f32 %v15151_v40, %v14874_v32 }
 0x6cc   :  { %v2733_v41 = vmul.f32 %v2712_v60, %v14958_v27  ;;  %v2796_v4 = vpack.c.bf16 %v2753_v56, %v15253_v0  ;;  %v2754_v39 = vmul.f32 %v2712_v60, %v15130_v30  ;;  %v2775_v37 = vmul.f32 %v2712_v60, %v2518_v7  ;;  %v11271_v42 = vpop.f32.mrb[153].mxu1  ;;  %v18424_v56 = vld [vmem:[#allocation68_spill] sm:$0xff] }
 0x6cd   :  { %v2498_v16 = vmul.f32 %v15153_v2, %v2472_v28  ;;  %v2666_v15 = vpop.f32.mrb[188].mxu0  ;;  %v2800_v62 = vpack.c.bf16 %v2761_v50, %v2760_v22  ;;  %v2540_v14 = vmul.f32 %v15151_v40, %v14879_v61  ;;  %v2475_v47 = vpop.f32.mrb[154].mxu1  ;;  %v18426_v50 = vld [vmem:[#allocation74_spill] sm:$0xff] }
 0x6ce   :  { %v2692_v52 = vmul.f32 %v15153_v2, %v2666_v15  ;;  %v11331_v27 = vpop.f32.mrb[189].mxu0  ;;  %v2786_v11 = vpack.c.bf16 %v2733_v41, %v2732_v9  ;;  %v2807_v0 = vpack.c.bf16 %v2775_v37, %v2774_v38  ;;  %v11272_v30 = vpop.f32.mrb[155].mxu1  ;;  %v18423_v9 = vld [vmem:[#allocation70_spill] sm:$0xff]  ;;  %v18432_v41 = vld [vmem:[#allocation67_spill] sm:$0xff]  ;;  %v18437_v37 = vld [vmem:[#allocation77_spill] sm:$0xff] }
 0x6cf   :  { %v2519_v20 = vadd.f32 %v2498_v16, %v2298_v51  ;;  %v2669_v29 = vpop.f32.mrb[190].mxu0  ;;  %v18425_v38 = vpack.c.bf16 %v18423_v9, %v18424_v56  ;;  %v18438_v51 = vld [vmem:[#allocation75_spill] sm:$0xff] }
 0x6d0   :  { %v2713_v49 = vadd.f32 %v2692_v52, %v2540_v14  ;;  %v11332_v33 = vpop.f32.mrb[191].mxu0  ;;  %11366 = vmatmul.mubr.bf16.gmra.mrb[172].mxu1 %v2786_v11  ;;  %v18439_v16 = vpack.c.bf16 %v18437_v37, %v18438_v51 }
 0x6d1   :  { %v2762_v32 = vmul.f32 %v14992_v19, %v2519_v20  ;;  %v2769_v34 = vmul.f32 %v15146_v35, %v2519_v20  ;;  %v18427_v19 = vld [vmem:[#allocation72_spill] sm:$0xff] }
 0x6d2   :  { %v2734_v7 = vmul.f32 %v2713_v49, %v14987_v1  ;;  %v2755_v61 = vmul.f32 %v2713_v49, %v15140_v36  ;;  %v2776_v40 = vmul.f32 %v2713_v49, %v2519_v20  ;;  %v18428_v28 = vpack.c.bf16 %v18426_v50, %v18427_v19  ;;  %v18429_v1 = vld [vmem:[#allocation76_spill] sm:$0xff]  ;;  %v18431_v36 = vld [vmem:[#allocation69_spill] sm:$0xff] }
 0x6d3   :  { %v2801_v2 = vpack.c.bf16 %v15191_v55, %v2762_v32  ;;  %v2804_v22 = vpack.c.bf16 %v2769_v34, %v2768_v45  ;;  %v18430_v35 = vpack.c.bf16 %v15163_v59, %v18429_v1  ;;  %v18433_v55 = vpack.c.bf16 %v18431_v36, %v18432_v41  ;;  %v18434_v45 = vld [vmem:[#allocation73_spill] sm:$0xff]  ;;  %v12313_v59 = vld [vmem:[#allocation6] sm:$0xff]  }
 0x6d4   :  { %v2787_v44 = vpack.c.bf16 %v15009_v54, %v2734_v7  ;;  %v2797_v60 = vpack.c.bf16 %v2755_v61, %v2754_v39  ;;  %v18435_v54 = vld [vmem:[#allocation71_spill] sm:$0xff]  ;;  %11414 = vmatpush3.bf16.msra.mxu0 %v12313_v59  ;;  %v2808_v57 = vpack.c.bf16 %v2776_v40, %v2776_v40 }
 0x6d5   :  { %v18436_v39 = vpack.c.bf16 %v18434_v45, %v18435_v54  ;;  %11415 = vmatprep.subr.bf16.mxu0 %v18440_v10 }
 0x6d6   :  { %11369 = vmatprep.mubr.bf16.mxu1 %v2787_v44 }
 0x6d8   :  { %11370 = vmatmul.mubr.bf16.gmra.mrb[176].mxu1 %v18425_v38  ;;  %11416 = vmatpush3.bf16.msra.mxu0 %v12314_v13 }
 0x6d9   :  { %11373 = vmatprep.mubr.bf16.mxu1 %v18428_v28  ;;  %11417 = vmatprep.subr.bf16.mxu0 %v18440_v10 }
 0x6dc   :  { %11418 = vmatpush3.bf16.msra.mxu0 %v12315_v25 }
 0x6dd   :  { %11419 = vmatprep.subr.bf16.mxu0 %v18440_v10 }
 0x6e0   :  { %11374 = vmatmul.mubr.bf16.gmra.mrb[180].mxu1 %v18430_v35  ;;  %11420 = vmatpush3.bf16.msra.mxu0 %v12316_v58 }
 0x6e1   :  { %11377 = vmatprep.mubr.bf16.mxu1 %v18433_v55  ;;  %11421 = vmatprep.subr.bf16.mxu0 %v18440_v10 }
 0x6e4   :  { %11422 = vmatpush3.bf16.msra.mxu0 %v12317_v6 }
 0x6e5   :  { %11423 = vmatprep.subr.bf16.mxu0 %v18440_v10 }
 0x6e8   :  { %11378 = vmatmul.mubr.bf16.gmra.mrb[184].mxu1 %v18436_v39 }
 0x6e9   :  { %11381 = vmatprep.mubr.bf16.mxu1 %v18439_v16 }
 0x6f0   :  { %11382 = vmatmul.mubr.bf16.gmra.mrb[188].mxu1 %v2794_v31  ;;  %v12318_v31 = vld [vmem:[#allocation6 + $0x28] sm:$0xff]  }
 0x6f1   :  { %11385 = vmatprep.mubr.bf16.mxu1 %v2795_v18  ;;  %11424 = vmatpush3.bf16.msra.mxu0 %v12318_v31 }
 0x6f2   :  { %11425 = vmatprep.subr.bf16.mxu0 %v18440_v10 }
 0x6f5   :  { %11426 = vmatpush3.bf16.msra.mxu0 %v12319_v23 }
 0x6f6   :  { %11427 = vmatprep.subr.bf16.mxu0 %v18440_v10 }
 0x6f8   :  { %11386 = vmatmul.mubr.bf16.gmra.mrb[192].mxu1 %v2796_v4 }
 0x6f9   :  { %11389 = vmatprep.mubr.bf16.mxu1 %v2797_v60  ;;  %11428 = vmatpush3.bf16.msra.mxu0 %v12320_v8 }
 0x700   :  { %11390 = vmatmul.mubr.bf16.gmra.mrb[196].mxu1 %v2798_v43 }
 0x701   :  { %11393 = vmatprep.mubr.bf16.mxu1 %v2799_v48 }
 0x708   :  { %11394 = vmatmul.mubr.bf16.gmra.mrb[200].mxu1 %v2800_v62 }
 0x709   :  { %11397 = vmatprep.mubr.bf16.mxu1 %v2801_v2 }
 0x710   :  { %11398 = vmatmul.mubr.bf16.gmra.mrb[204].mxu1 %v2802_v46 }
 0x711   :  { %11401 = vmatprep.mubr.bf16.mxu1 %v2803_v63 }
 0x718   :  { %11402 = vmatmul.mubr.bf16.gmra.mrb[208].mxu1 %v2804_v22 }
 0x719   :  { %11405 = vmatprep.mubr.bf16.mxu1 %v2805_v24 }
 0x720   :  { %11406 = vmatmul.mubr.bf16.gmra.mrb[212].mxu1 %v2806_v5 }
 0x721   :  { %11409 = vmatprep.mubr.bf16.mxu1 %v2807_v0 }
 0x728   :  { %11410 = vmatmul.mubr.bf16.gmra.mrb[216].mxu1 %v2808_v57 }
 0x729   :  { %11489 = vmatprep.mubr.msk.bf16.mxu1 %vm13585_vm0, %v18440_v10 }
 0x761   :  { %v11351_v43 = vpop.f32.mrb[156].mxu1 }
 0x762   :  { %v2843_v24 = vpop.f32.mrb[157].mxu1  ;;  %v15353_v0 = vmul.f32 0.25, %v11351_v43 }
 0x763   :  { %v11352_v12 = vpop.f32.mrb[158].mxu1  ;;  %v3097_v46 = vmul.f32 0.25, %v2843_v24 }
 0x764   :  { %v2846_v26 = vpop.f32.mrb[159].mxu1  ;;  %v15343_v63 = vmul.f32 0.25, %v11352_v12  ;;  %v18441_v12 = vld [vmem:[#allocation46_spill] sm:$0xff] }
 0x765   :  { %v3098_v15 = vmul.f32 0.25, %v2846_v26 }
 0x772   :  { %v11355_v53 = vpop.f32.mrb[160].mxu1 }
 0x773   :  { %v2859_v3 = vpop.f32.mrb[161].mxu1  ;;  %v15365_v60 = vmul.f32 0.25, %v11355_v53 }
 0x774   :  { %v11356_v17 = vpop.f32.mrb[162].mxu1  ;;  %v15347_v52 = vmul.f32 0.25, %v2859_v3 }
 0x775   :  { %v3104_v18 = vmul.f32 0.25, %v11356_v17  ;;  %v2862_v21 = vpop.f32.mrb[163].mxu1 }
 0x776   :  { %v15361_v7 = vmul.f32 0.25, %v2862_v21 }
 0x777   :  { %v3160_v48 = vmax.f32 %v3097_v46, %v3104_v18 }
 0x783   :  { %v11359_v5 = vpop.f32.mrb[164].mxu1 }
 0x784   :  { %v15345_v4 = vmul.f32 0.25, %v11359_v5  ;;  %v2875_v42 = vpop.f32.mrb[165].mxu1 }
 0x785   :  { %v3105_v62 = vmul.f32 0.25, %v2875_v42  ;;  %v11360_v14 = vpop.f32.mrb[166].mxu1 }
 0x786   :  { %v3163_v47 = vmax.f32 %v15343_v63, %v15345_v4  ;;  %v15351_v27 = vmul.f32 0.25, %v11360_v14  ;;  %v2878_v11 = vpop.f32.mrb[167].mxu1 }
 0x787   :  { %v3161_v20 = vmax.f32 %v3098_v15, %v3105_v62  ;;  %v15355_v30 = vmul.f32 0.25, %v2878_v11 }
 0x788   :  { %v3164_v29 = vmax.f32 %v15347_v52, %v15351_v27 }
 0x789   :  { %v3162_v49 = vmax.f32 %v15353_v0, %v15355_v30 }
 0x793   :  { %v11363_v33 = vpop.f32.mrb[168].mxu1 }
 0x794   :  { %v3111_v32 = vmul.f32 0.25, %v11363_v33  ;;  %v2891_v34 = vpop.f32.mrb[169].mxu1 }
 0x795   :  { %v15363_v61 = vmul.f32 0.25, %v2891_v34  ;;  %v11364_v40 = vpop.f32.mrb[170].mxu1 }
 0x796   :  { %v3167_v2 = vmax.f32 %v3160_v48, %v3111_v32  ;;  %v3112_v22 = vmul.f32 0.25, %v11364_v40  ;;  %v2894_v44 = vpop.f32.mrb[171].mxu1  ;;  %v18442_v48 = vld [vmem:[#allocation60_spill] sm:$0xff] }
 0x797   :  { %v3165_v9 = vmax.f32 %v15361_v7, %v15363_v61  ;;  %v15369_v56 = vmul.f32 0.25, %v2894_v44 }
 0x798   :  { %v3174_v38 = vsub.f32 %v3097_v46, %v3167_v2  ;;  %v3195_v50 = vsub.f32 %v3104_v18, %v3167_v2  ;;  %v3216_v19 = vsub.f32 %v3111_v32, %v3167_v2  ;;  %v3168_v28 = vmax.f32 %v3161_v20, %v3112_v22 }
 0x799   :  { %v3166_v1 = vmax.f32 %v15365_v60, %v15369_v56 }
 0x79a   :  { %v3181_v35 = vmul.f32 1.442695, %v3174_v38  ;;  %v3202_v36 = vmul.f32 1.442695, %v3195_v50  ;;  %v3223_v41 = vmul.f32 1.442695, %v3216_v19  ;;  %v3175_v55 = vsub.f32 %v3098_v15, %v3168_v28 }
 0x79b   :  { %v3196_v45 = vsub.f32 %v3105_v62, %v3168_v28  ;;  %v3217_v54 = vsub.f32 %v3112_v22, %v3168_v28  ;;  %v18444_v50 = vld [vmem:[#allocation47_spill] sm:$0xff] }
 0x79c   :  { %12683 = vpow2.f32 %v3181_v35  ;;  %v3183_v39 = vmul.f32 1.442695, %v3175_v55 }
 0x79d   :  { %12685 = vpow2.f32 %v3202_v36  ;;  %v3204_v37 = vmul.f32 1.442695, %v3196_v45  ;;  %v3225_v51 = vmul.f32 1.442695, %v3217_v54 }
 0x79e   :  { %12687 = vpow2.f32 %v3223_v41 }
 0x79f   :  { %12689 = vpow2.f32 %v3183_v39 }
 0x7a0   :  { %12691 = vpow2.f32 %v3204_v37 }
 0x7a1   :  { %12693 = vpow2.f32 %v3225_v51 }
 0x7a3   :  { %v11367_v16 = vpop.f32.mrb[172].mxu1 }
 0x7a4   :  { %v3115_v59 = vmul.f32 0.25, %v11367_v16  ;;  %v2907_v13 = vpop.f32.mrb[173].mxu1 }
 0x7a5   :  { %v3113_v57 = vmul.f32 0.25, %v2907_v13  ;;  %v11368_v25 = vpop.f32.mrb[174].mxu1 }
 0x7a6   :  { %v12684_v58 = vpop.eup %12683  ;;  %v3171_v6 = vmax.f32 %v3164_v29, %v3115_v59  ;;  %v2910_v31 = vpop.f32.mrb[175].mxu1  ;;  %v3116_v43 = vmul.f32 0.25, %v11368_v25 }
 0x7a7   :  { %v12686_v23 = vpop.eup %12685  ;;  %v3169_v8 = vmax.f32 %v3162_v49, %v3113_v57  ;;  %v3114_v24 = vmul.f32 0.25, %v2910_v31  ;;  %v3258_v26 = vmul.f32 %v12684_v58, %v18441_v12 }
 0x7a8   :  { %v12688_v53 = vpop.eup %12687  ;;  %v3237_v3 = vadd.f32 %v12686_v23, %v12684_v58  ;;  %v3178_v17 = vsub.f32 %v15347_v52, %v3171_v6  ;;  %v3199_v46 = vsub.f32 %v15351_v27, %v3171_v6  ;;  %v3220_v18 = vsub.f32 %v3115_v59, %v3171_v6  ;;  %v18443_v27 = vld [vmem:[#allocation61_spill] sm:$0xff] }
 0x7a9   :  { %v12690_v21 = vpop.eup %12689  ;;  %v15377_v5 = vmul.f32 %v12688_v53, %v18442_v48  ;;  %v3176_v42 = vsub.f32 %v15353_v0, %v3169_v8  ;;  %v3197_v15 = vsub.f32 %v15355_v30, %v3169_v8  ;;  %v3218_v62 = vsub.f32 %v3113_v57, %v3169_v8  ;;  %v18445_v59 = vld [vmem:[#allocation53_spill] sm:$0xff]  ;;  %v18446_v57 = vld [vmem:[#allocation54_spill] sm:$0xff] }
 0x7aa   :  { %v12692_v14 = vpop.eup %12691  ;;  %v3244_v11 = vadd.f32 %v12688_v53, %v3237_v3  ;;  %v3189_v20 = vmul.f32 1.442695, %v3178_v17  ;;  %v3210_v29 = vmul.f32 1.442695, %v3199_v46  ;;  %v3231_v32 = vmul.f32 1.442695, %v3220_v18 }
 0x7ab   :  { %v12694_v49 = vpop.eup %12693  ;;  %v3238_v33 = vadd.f32 %v12692_v14, %v12690_v21  ;;  %v3185_v52 = vmul.f32 1.442695, %v3176_v42  ;;  %v3206_v34 = vmul.f32 1.442695, %v3197_v15  ;;  %v3172_v2 = vmax.f32 %v3165_v9, %v3116_v43  ;;  %v11371_v22 = vpop.f32.mrb[176].mxu1 }
 0x7ac   :  { %12695 = vrcp.f32 %v3244_v11  ;;  %v3280_v40 = vmul.f32 %v12694_v49, %v18443_v27  ;;  %v3170_v0 = vmax.f32 %v3163_v47, %v3114_v24  ;;  %v3227_v44 = vmul.f32 1.442695, %v3218_v62  ;;  %v2923_v38 = vpop.f32.mrb[177].mxu1 }
 0x7ad   :  { %v3245_v30 = vadd.f32 %v12694_v49, %v3238_v33  ;;  %12697 = vpow2.f32 %v3189_v20  ;;  %v3259_v19 = vmul.f32 %v12690_v21, %v18444_v50  ;;  %v3179_v28 = vsub.f32 %v15361_v7, %v3172_v2  ;;  %v11372_v41 = vpop.f32.mrb[178].mxu1  ;;  %v18447_v33 = vld [vmem:[#allocation50_spill] sm:$0xff] }
 0x7ae   :  { %12699 = vpow2.f32 %v3210_v29  ;;  %v3200_v35 = vsub.f32 %v15363_v61, %v3172_v2  ;;  %v3221_v36 = vsub.f32 %v3116_v43, %v3172_v2  ;;  %v3177_v9 = vsub.f32 %v15343_v63, %v3170_v0  ;;  %v2926_v45 = vpop.f32.mrb[179].mxu1 }
 0x7af   :  { %12701 = vrcp.f32 %v3245_v30  ;;  %v3198_v55 = vsub.f32 %v15345_v4, %v3170_v0  ;;  %v3219_v47 = vsub.f32 %v3114_v24, %v3170_v0  ;;  %v3191_v54 = vmul.f32 1.442695, %v3179_v28  ;;  %v18449_v30 = vld [vmem:[#allocation64_spill] sm:$0xff] }
 0x7b0   :  { %12703 = vpow2.f32 %v3231_v32  ;;  %v3212_v39 = vmul.f32 1.442695, %v3200_v35  ;;  %v3233_v37 = vmul.f32 1.442695, %v3221_v36  ;;  %v15390_v51 = vmul.f32 0.25, %v11371_v22  ;;  %v18450_v28 = vld [vmem:[#allocation48_spill] sm:$0xff] }
 0x7b1   :  { %12705 = vpow2.f32 %v3185_v52  ;;  %v3117_v7 = vmul.f32 0.25, %v2923_v38  ;;  %v3187_v61 = vmul.f32 1.442695, %v3177_v9  ;;  %v3265_v13 = vmul.f32 %v12686_v23, %v18445_v59  ;;  %v18448_v52 = vld [vmem:[#allocation57_spill] sm:$0xff] }
 0x7b2   :  { %12707 = vpow2.f32 %v3206_v34  ;;  %v3266_v63 = vmul.f32 %v12692_v14, %v18446_v57  ;;  %v3208_v4 = vmul.f32 1.442695, %v3198_v55  ;;  %v3229_v25 = vmul.f32 1.442695, %v3219_v47 }
 0x7b3   :  { %12709 = vpow2.f32 %v3227_v44  ;;  %v11375_v16 = vpop.f32.mrb[180].mxu1  ;;  %v3173_v58 = vmax.f32 %v3166_v1, %v3117_v7  ;;  %v15397_v31 = vmul.f32 0.25, %v11372_v41  ;;  %v3272_v43 = vadd.f32 %v3265_v13, %v3258_v26  ;;  %v18452_v13 = vld [vmem:[#allocation62_spill] sm:$0xff] }
 0x7b4   :  { %12711 = vpow2.f32 %v3191_v54  ;;  %v2939_v6 = vpop.f32.mrb[181].mxu1  ;;  %v3273_v24 = vadd.f32 %v3266_v63, %v3259_v19  ;;  %v15405_v1 = vmul.f32 0.25, %v2926_v45  ;;  %v15407_v21 = vmul.f32 0.25, %v11375_v16  ;;  %v18451_v54 = vld [vmem:[#allocation55_spill] sm:$0xff] }
 0x7b5   :  { %12713 = vpow2.f32 %v3212_v39  ;;  %v15399_v8 = vpop.f32.mrb[182].mxu1  ;;  %v3180_v23 = vsub.f32 %v15365_v60, %v3173_v58  ;;  %v3201_v3 = vsub.f32 %v15369_v56, %v3173_v58  ;;  %v3222_v17 = vsub.f32 %v3117_v7, %v3173_v58 }
 0x7b6   :  { %v12696_v53 = vpop.eup %12695  ;;  %12715 = vpow2.f32 %v3233_v37  ;;  %v15403_v46 = vpop.f32.mrb[183].mxu1  ;;  %v3286_v42 = vadd.f32 %v15377_v5, %v3272_v43  ;;  %v3287_v60 = vadd.f32 %v3280_v40, %v3273_v24  ;;  %v15410_v49 = vmul.f32 0.25, %v2939_v6 }
 0x7b7   :  { %v12698_v18 = vpop.eup %12697  ;;  %12717 = vpow2.f32 %v3187_v61  ;;  %v3193_v26 = vmul.f32 1.442695, %v3180_v23  ;;  %v3214_v62 = vmul.f32 1.442695, %v3201_v3  ;;  %v3235_v14 = vmul.f32 1.442695, %v3222_v17 }
 0x7b8   :  { %v12700_v15 = vpop.eup %12699  ;;  %12719 = vpow2.f32 %v3208_v4  ;;  %v3293_v56 = vmul.f32 %v12696_v53, %v3286_v42  ;;  %v3262_v32 = vmul.f32 %v12698_v18, %v18447_v33  ;;  %v18453_v3 = vld [vmem:[#allocation51_spill] sm:$0xff] }
 0x7b9   :  { %v12702_v11 = vpop.eup %12701  ;;  %12721 = vpow2.f32 %v3229_v25  ;;  %v3241_v20 = vadd.f32 %v12700_v15, %v12698_v18  ;;  %v3269_v34 = vmul.f32 %v12700_v15, %v18448_v52  ;;  %v18454_v18 = vld [vmem:[#allocation58_spill] sm:$0xff] }
 0x7ba   :  { %v12704_v29 = vpop.eup %12703  ;;  %12723 = vpow2.f32 %v3193_v26  ;;  %v3294_v0 = vmul.f32 %v12702_v11, %v3287_v60 }
 0x7bb   :  { %v12706_v2 = vpop.eup %12705  ;;  %12725 = vpow2.f32 %v3214_v62  ;;  %v11379_v5 = vpop.f32.mrb[184].mxu1  ;;  %v3248_v22 = vadd.f32 %v12704_v29, %v3241_v20  ;;  %v3283_v44 = vmul.f32 %v12704_v29, %v18449_v30  ;;  %v3276_v36 = vadd.f32 %v3269_v34, %v3262_v32 }
 0x7bc   :  { %v12708_v38 = vpop.eup %12707  ;;  %12727 = vpow2.f32 %v3235_v14  ;;  %v15415_v40 = vmul.f32 0.25, %v11379_v5  ;;  %v2955_v19 = vpop.f32.mrb[185].mxu1  ;;  %v3260_v35 = vmul.f32 %v12706_v2, %v18450_v28  ;;  %v3596_v55 = vpack.c.bf16 %v3294_v0, %v3293_v56  ;;  %v18455_v14 = vld [vmem:[#allocation65_spill] sm:$0xff] }
 0x7bd   :  { %v12710_v41 = vpop.eup %12709  ;;  %v15418_v9 = vmul.f32 0.25, %v2955_v19  ;;  %v11380_v47 = vpop.f32.mrb[186].mxu1  ;;  %v3239_v45 = vadd.f32 %v12708_v38, %v12706_v2  ;;  %v3267_v39 = vmul.f32 %v12708_v38, %v18451_v54  ;;  %12729 = vrcp.f32 %v3248_v22  ;;  %v18456_v56 = vld [vmem:[#allocation49_spill] sm:$0xff]  ;;  %v18457_v19 = vld [vmem:[#allocation56_spill] sm:$0xff] }
 0x7be   :  { %v12712_v37 = vpop.eup %12711  ;;  %v15423_v61 = vmul.f32 0.25, %v11380_v47  ;;  %v2958_v16 = vpop.f32.mrb[187].mxu1  ;;  %v3281_v63 = vmul.f32 %v12710_v41, %v18452_v13  ;;  %11430 = vmatmul.mubr.bf16.vlgmr.msra.gmra.mrb[192].mxu0 %v3596_v55  ;;  %v3290_v34 = vadd.f32 %v3283_v44, %v3276_v36  ;;  %v15441_v5 = vmul.f32 0.25, %v15399_v8 }
 0x7bf   :  { %v12714_v4 = vpop.eup %12713  ;;  %v3300_v25 = vmax.f32 %v15405_v1, %v15418_v9  ;;  %v15428_v58 = vmul.f32 0.25, %v2958_v16  ;;  %v3246_v6 = vadd.f32 %v12710_v41, %v3239_v45  ;;  %v3274_v43 = vadd.f32 %v3267_v39, %v3260_v35  ;;  %11433 = vmatprep.mubr.msk.bf16.mxu0 %vm13585_vm0, %v18440_v10  ;;  %v18458_v45 = vld [vmem:[#allocation63_spill] sm:$0xff] }
 0x7c0   :  { %v12716_v24 = vpop.eup %12715  ;;  %v3303_v53 = vmax.f32 %v15410_v49, %v15423_v61  ;;  %v3242_v23 = vadd.f32 %v12714_v4, %v12712_v37  ;;  %v3263_v17 = vmul.f32 %v12712_v37, %v18453_v3  ;;  %v3270_v42 = vmul.f32 %v12714_v4, %v18454_v18 }
 0x7c1   :  { %v12718_v15 = vpop.eup %12717  ;;  %v3301_v26 = vmax.f32 %v15390_v51, %v15428_v58  ;;  %12731 = vrcp.f32 %v3246_v6  ;;  %v3288_v62 = vadd.f32 %v3281_v63, %v3274_v43  ;;  %v3284_v11 = vmul.f32 %v12716_v24, %v18455_v14 }
 0x7c2   :  { %v12720_v60 = vpop.eup %12719  ;;  %v3261_v20 = vmul.f32 %v12718_v15, %v18456_v56  ;;  %v3249_v29 = vadd.f32 %v12716_v24, %v3242_v23  ;;  %v3277_v32 = vadd.f32 %v3270_v42, %v3263_v17  ;;  %v15444_v0 = vmul.f32 0.25, %v15403_v46  ;;  %v18459_v46 = vld [vmem:[#allocation52_spill] sm:$0xff]  ;;  %v18460_v42 = vld [vmem:[#allocation59_spill] sm:$0xff] }
 0x7c3   :  { %v12722_v2 = vpop.eup %12721  ;;  %v11383_v22 = vpop.f32.mrb[188].mxu1  ;;  %v3240_v38 = vadd.f32 %v12720_v60, %v12718_v15  ;;  %v3268_v35 = vmul.f32 %v12720_v60, %v18457_v19 }
 0x7c4   :  { %v12724_v41 = vpop.eup %12723  ;;  %v15447_v55 = vmul.f32 0.25, %v11383_v22  ;;  %v2971_v47 = vpop.f32.mrb[189].mxu1  ;;  %v3282_v39 = vmul.f32 %v12722_v2, %v18458_v45  ;;  %12733 = vrcp.f32 %v3249_v29  ;;  %v3291_v37 = vadd.f32 %v3284_v11, %v3277_v32 }
 0x7c5   :  { %v12726_v44 = vpop.eup %12725  ;;  %v15450_v36 = vmul.f32 0.25, %v2971_v47  ;;  %v11384_v8 = vpop.f32.mrb[190].mxu1  ;;  %v3247_v16 = vadd.f32 %v12722_v2, %v3240_v38  ;;  %v3275_v63 = vadd.f32 %v3268_v35, %v3261_v20  ;;  %v3264_v4 = vmul.f32 %v12724_v41, %v18459_v46  ;;  %v18461_v38 = vld [vmem:[#allocation66_spill] sm:$0xff] }
 0x7c6   :  { %v12728_v6 = vpop.eup %12727  ;;  %v3132_v24 = vmul.f32 0.25, %v11384_v8  ;;  %v2974_v23 = vpop.f32.mrb[191].mxu1  ;;  %v3243_v17 = vadd.f32 %v12726_v44, %v12724_v41  ;;  %v3271_v15 = vmul.f32 %v12726_v44, %v18460_v42 }
 0x7c7   :  { %v3304_v11 = vmax.f32 %v15444_v0, %v15450_v36  ;;  %v15458_v60 = vmul.f32 0.25, %v2974_v23  ;;  %12735 = vrcp.f32 %v3247_v16  ;;  %v3289_v29 = vadd.f32 %v3282_v39, %v3275_v63  ;;  %v12730_v32 = vpop.eup %12729 }
 0x7c8   :  { %v3307_v20 = vmax.f32 %v3300_v25, %v3132_v24  ;;  %v3250_v2 = vadd.f32 %v12728_v6, %v3243_v17  ;;  %v3278_v22 = vadd.f32 %v3271_v15, %v3264_v4  ;;  %v3285_v35 = vmul.f32 %v12728_v6, %v18461_v38 }
 0x7c9   :  { %v3305_v47 = vmax.f32 %v15407_v21, %v15458_v60  ;;  %v15463_v8 = vmul.f32 %v12730_v32, %v3290_v34 }
 0x7ca   :  { %v3314_v41 = vsub.f32 %v15405_v1, %v3307_v20  ;;  %v3335_v44 = vsub.f32 %v15418_v9, %v3307_v20  ;;  %v3356_v43 = vsub.f32 %v3132_v24, %v3307_v20  ;;  %v15467_v16 = vadd.f32 %v3285_v35, %v3278_v22 }
 0x7cb   :  { %v12732_v23 = vpop.eup %12731  ;;  %v11387_v7 = vpop.f32.mrb[192].mxu1  ;;  %12737 = vrcp.f32 %v3250_v2 }
 0x7cc   :  { %v3321_v39 = vmul.f32 1.442695, %v3314_v41  ;;  %v3342_v25 = vmul.f32 1.442695, %v3335_v44  ;;  %v3363_v63 = vmul.f32 1.442695, %v3356_v43  ;;  %v3295_v4 = vmul.f32 %v12732_v23, %v3288_v62 }
 0x7cd   :  { %v3135_v17 = vmul.f32 0.25, %v11387_v7  ;;  %v2987_v6 = vpop.f32.mrb[193].mxu1 }
 0x7ce   :  { %v12734_v15 = vpop.eup %12733  ;;  %12739 = vpow2.f32 %v3321_v39  ;;  %v3133_v34 = vmul.f32 0.25, %v2987_v6  ;;  %v11388_v32 = vpop.f32.mrb[194].mxu1 }
 0x7cf   :  { %12741 = vpow2.f32 %v3342_v25  ;;  %v3310_v1 = vmax.f32 %v3303_v53, %v3135_v17  ;;  %v3136_v9 = vmul.f32 0.25, %v11388_v32  ;;  %v2990_v24 = vpop.f32.mrb[195].mxu1  ;;  %v15472_v20 = vmul.f32 %v12734_v15, %v3291_v37 }
 0x7d0   :  { %12743 = vpow2.f32 %v3363_v63  ;;  %v3308_v7 = vmax.f32 %v3301_v26, %v3133_v34  ;;  %v3134_v62 = vmul.f32 0.25, %v2990_v24 }
 0x7d1   :  { %v12736_v43 = vpop.eup %12735  ;;  %v3317_v2 = vsub.f32 %v15410_v49, %v3310_v1  ;;  %v3338_v22 = vsub.f32 %v15423_v61, %v3310_v1  ;;  %v3359_v35 = vsub.f32 %v3135_v17, %v3310_v1  ;;  %v3311_v41 = vmax.f32 %v3304_v11, %v3136_v9 }
 0x7d2   :  { %v3315_v44 = vsub.f32 %v15390_v51, %v3308_v7  ;;  %v3336_v53 = vsub.f32 %v15428_v58, %v3308_v7  ;;  %v3357_v23 = vsub.f32 %v3133_v34, %v3308_v7  ;;  %v3296_v37 = vmul.f32 %v12736_v43, %v3289_v29 }
 0x7d3   :  { %v3327_v39 = vmul.f32 1.442695, %v3317_v2  ;;  %v3348_v25 = vmul.f32 1.442695, %v3338_v22  ;;  %v3369_v63 = vmul.f32 1.442695, %v3359_v35  ;;  %v3318_v6 = vsub.f32 %v15444_v0, %v3311_v41 }
 0x7d4   :  { %v3323_v26 = vmul.f32 1.442695, %v3315_v44  ;;  %v3344_v15 = vmul.f32 1.442695, %v3336_v53  ;;  %v3365_v32 = vmul.f32 1.442695, %v3357_v23  ;;  %v3339_v49 = vsub.f32 %v15450_v36, %v3311_v41 }
 0x7d5   :  { %12745 = vpow2.f32 %v3327_v39  ;;  %v3329_v61 = vmul.f32 1.442695, %v3318_v6  ;;  %v3360_v17 = vsub.f32 %v3136_v9, %v3311_v41  ;;  %v3597_v11 = vpack.c.bf16 %v3296_v37, %v3295_v4  ;;  %v11391_v1 = vpop.f32.mrb[196].mxu1  ;;  %v12738_v0 = vpop.eup %12737 }
 0x7d6   :  { %12747 = vpow2.f32 %v3348_v25  ;;  %v3350_v51 = vmul.f32 1.442695, %v3339_v49  ;;  %v18462_v58 = vmax.f32 %v15397_v31, %v15415_v40  ;;  %v15486_v34 = vmul.f32 0.25, %v11391_v1  ;;  %v3003_v24 = vpop.f32.mrb[197].mxu1 }
 0x7d7   :  { %12749 = vpow2.f32 %v3369_v63  ;;  %v3371_v7 = vmul.f32 1.442695, %v3360_v17  ;;  %11434 = vmatmul.mubr.bf16.gmra.mrb[196].mxu0 %v3597_v11  ;;  %v3137_v43 = vmul.f32 0.25, %v3003_v24  ;;  %v11392_v36 = vpop.f32.mrb[198].mxu1  ;;  %v3598_v9 = vpack.c.bf16 %v15472_v20, %v15463_v8 }
 0x7d8   :  { %v3309_v29 = vmax.f32 %v18462_v58, %v3134_v62  ;;  %v12740_v4 = vpop.eup %12739  ;;  %12751 = vpow2.f32 %v3323_v26  ;;  %11437 = vmatprep.mubr.msk.bf16.mxu0 %vm13585_vm0, %v18440_v10  ;;  %v3006_v41 = vpop.f32.mrb[199].mxu1  ;;  %v15497_v23 = vmul.f32 0.25, %v11392_v36  ;;  %v18463_v6 = vmax.f32 %v15441_v5, %v15447_v55 }
 0x7d9   :  { %v12742_v44 = vpop.eup %12741  ;;  %12753 = vpow2.f32 %v3344_v15  ;;  %v3312_v53 = vmax.f32 %v3305_v47, %v3137_v43  ;;  %v3138_v8 = vmul.f32 0.25, %v3006_v41 }
 0x7da   :  { %v3316_v2 = vsub.f32 %v15397_v31, %v3309_v29  ;;  %v3337_v22 = vsub.f32 %v15415_v40, %v3309_v29  ;;  %v3358_v35 = vsub.f32 %v3134_v62, %v3309_v29  ;;  %v12744_v20 = vpop.eup %12743  ;;  %12755 = vpow2.f32 %v3365_v32 }
 0x7db   :  { %12757 = vpow2.f32 %v3329_v61  ;;  %v3319_v40 = vsub.f32 %v15407_v21, %v3312_v53  ;;  %v3340_v62 = vsub.f32 %v15458_v60, %v3312_v53  ;;  %v3361_v25 = vsub.f32 %v3137_v43, %v3312_v53  ;;  %v11395_v63 = vpop.f32.mrb[200].mxu1 }
 0x7dc   :  { %v3325_v37 = vmul.f32 1.442695, %v3316_v2  ;;  %v3346_v31 = vmul.f32 1.442695, %v3337_v22  ;;  %v3367_v39 = vmul.f32 1.442695, %v3358_v35  ;;  %12759 = vpow2.f32 %v3350_v51 }
 0x7dd   :  { %v3313_v47 = vmax.f32 %v18463_v6, %v3138_v8  ;;  %v15504_v26 = vmul.f32 0.25, %v11395_v63  ;;  %v3019_v15 = vpop.f32.mrb[201].mxu1  ;;  %v15507_v32 = vmul.f32 %v12738_v0, %v15467_v16  ;;  %12761 = vpow2.f32 %v3371_v7 }
 0x7de   :  { %v3331_v49 = vmul.f32 1.442695, %v3319_v40  ;;  %v3352_v61 = vmul.f32 1.442695, %v3340_v62  ;;  %v3373_v17 = vmul.f32 1.442695, %v3361_v25  ;;  %12763 = vpow2.f32 %v3325_v37 }
 0x7df   :  { %v3320_v21 = vsub.f32 %v15441_v5, %v3313_v47  ;;  %v3341_v60 = vsub.f32 %v15447_v55, %v3313_v47  ;;  %v3362_v11 = vsub.f32 %v3138_v8, %v3313_v47  ;;  %v11396_v1 = vpop.f32.mrb[202].mxu1  ;;  %v12746_v51 = vpop.eup %12745  ;;  %12765 = vpow2.f32 %v3346_v31  ;;  %11438 = vmatmul.mubr.bf16.gmra.mrb[200].mxu0 %v3598_v9 }
 0x7e0   :  { %v15511_v58 = vmul.f32 0.25, %v3019_v15  ;;  %v15513_v29 = vmul.f32 0.25, %v11396_v1  ;;  %v3022_v16 = vpop.f32.mrb[203].mxu1  ;;  %v3377_v24 = vadd.f32 %v12742_v44, %v12740_v4  ;;  %v12748_v0 = vpop.eup %12747  ;;  %12767 = vpow2.f32 %v3367_v39  ;;  %11441 = vmatprep.mubr.msk.bf16.mxu0 %vm13585_vm0, %v18440_v10 }
 0x7e1   :  { %v3333_v7 = vmul.f32 1.442695, %v3320_v21  ;;  %v3354_v43 = vmul.f32 1.442695, %v3341_v60  ;;  %v3375_v36 = vmul.f32 1.442695, %v3362_v11  ;;  %v12750_v5 = vpop.eup %12749  ;;  %12769 = vpow2.f32 %v3331_v49 }
 0x7e2   :  { %v15517_v55 = vmul.f32 0.25, %v3022_v16  ;;  %v3384_v2 = vadd.f32 %v12744_v20, %v3377_v24  ;;  %v3398_v9 = vmul.f32 %v12740_v4, %v18441_v12  ;;  %v12752_v22 = vpop.eup %12751  ;;  %12771 = vpow2.f32 %v3352_v61 }
 0x7e3   :  { %v3405_v35 = vmul.f32 %v12742_v44, %v18445_v59  ;;  %v3419_v41 = vmul.f32 %v12744_v20, %v18442_v48  ;;  %v3380_v53 = vadd.f32 %v12748_v0, %v12746_v51  ;;  %v12754_v8 = vpop.eup %12753  ;;  %12773 = vpow2.f32 %v3373_v17  ;;  %v11399_v37 = vpop.f32.mrb[204].mxu1 }
 0x7e4   :  { %v3399_v31 = vmul.f32 %v12752_v22, %v18444_v50  ;;  %v3401_v39 = vmul.f32 %v12746_v51, %v18456_v56  ;;  %v3408_v40 = vmul.f32 %v12748_v0, %v18457_v19  ;;  %v12756_v62 = vpop.eup %12755  ;;  %12775 = vpow2.f32 %v3333_v7  ;;  %v3035_v4 = vpop.f32.mrb[205].mxu1 }
 0x7e5   :  { %v15525_v25 = vmul.f32 0.25, %v11399_v37  ;;  %v3412_v63 = vadd.f32 %v3405_v35, %v3398_v9  ;;  %v3378_v6 = vadd.f32 %v12754_v8, %v12752_v22  ;;  %v12758_v44 = vpop.eup %12757  ;;  %12777 = vpow2.f32 %v3354_v43  ;;  %v11400_v47 = vpop.f32.mrb[206].mxu1 }
 0x7e6   :  { %v15527_v20 = vmul.f32 0.25, %v3035_v4  ;;  %v3406_v15 = vmul.f32 %v12754_v8, %v18446_v57  ;;  %v3420_v49 = vmul.f32 %v12756_v62, %v18443_v27  ;;  %v12760_v61 = vpop.eup %12759  ;;  %12779 = vpow2.f32 %v3375_v36  ;;  %v3038_v60 = vpop.f32.mrb[207].mxu1 }
 0x7e7   :  { %v15533_v21 = vmul.f32 0.25, %v11400_v47  ;;  %v3426_v11 = vadd.f32 %v3419_v41, %v3412_v63  ;;  %v12762_v1 = vpop.eup %12761  ;;  %v15535_v51 = vmul.f32 0.25, %v3038_v60  ;;  %12781 = vrcp.f32 %v3384_v2 }
 0x7e8   :  { %v3385_v16 = vadd.f32 %v12756_v62, %v3378_v6  ;;  %v3413_v24 = vadd.f32 %v3406_v15, %v3399_v31  ;;  %v12764_v0 = vpop.eup %12763  ;;  %v3381_v43 = vadd.f32 %v12760_v61, %v12758_v44  ;;  %v3387_v9 = vadd.f32 %v12750_v5, %v3380_v53 }
 0x7e9   :  { %v3402_v36 = vmul.f32 %v12758_v44, %v18447_v33  ;;  %v12766_v22 = vpop.eup %12765  ;;  %v3400_v41 = vmul.f32 %v12764_v0, %v18450_v28  ;;  %v3409_v6 = vmul.f32 %v12760_v61, %v18448_v52  ;;  %v3415_v44 = vadd.f32 %v3408_v40, %v3401_v39 }
 0x7ea   :  { %12783 = vrcp.f32 %v3385_v16  ;;  %v3427_v8 = vadd.f32 %v3420_v49, %v3413_v24  ;;  %v12768_v37 = vpop.eup %12767  ;;  %v3379_v2 = vadd.f32 %v12766_v22, %v12764_v0  ;;  %v3407_v31 = vmul.f32 %v12766_v22, %v18451_v54 }
 0x7eb   :  { %v3388_v62 = vadd.f32 %v12762_v1, %v3381_v43  ;;  %12785 = vrcp.f32 %v3387_v9  ;;  %v12770_v4 = vpop.eup %12769  ;;  %v11403_v63 = vpop.f32.mrb[208].mxu1  ;;  %v3421_v53 = vmul.f32 %v12768_v37, %v18452_v13  ;;  %v3422_v47 = vmul.f32 %v12750_v5, %v18458_v45 }
 0x7ec   :  { %v12772_v15 = vpop.eup %12771  ;;  %v15547_v60 = vmul.f32 0.25, %v11403_v63  ;;  %v3051_v16 = vpop.f32.mrb[209].mxu1  ;;  %v3386_v49 = vadd.f32 %v12768_v37, %v3379_v2  ;;  %v3414_v24 = vadd.f32 %v3407_v31, %v3400_v41  ;;  %v3416_v9 = vadd.f32 %v3409_v6, %v3402_v36 }
 0x7ed   :  { %12787 = vrcp.f32 %v3388_v62  ;;  %v12774_v0 = vpop.eup %12773  ;;  %v15549_v22 = vmul.f32 0.25, %v3051_v16  ;;  %v11404_v43 = vpop.f32.mrb[210].mxu1  ;;  %v3423_v17 = vmul.f32 %v12762_v1, %v18449_v30  ;;  %v3429_v35 = vadd.f32 %v3422_v47, %v3415_v44 }
 0x7ee   :  { %v12776_v7 = vpop.eup %12775  ;;  %v15554_v5 = vmul.f32 0.25, %v11404_v43  ;;  %v3054_v40 = vpop.f32.mrb[211].mxu1  ;;  %12789 = vrcp.f32 %v3386_v49  ;;  %v3428_v61 = vadd.f32 %v3421_v53, %v3414_v24  ;;  %v3382_v36 = vadd.f32 %v12772_v15, %v12770_v4 }
 0x7ef   :  { %v12778_v37 = vpop.eup %12777  ;;  %v3443_v41 = vmax.f32 %v15517_v55, %v15549_v22  ;;  %v15558_v2 = vmul.f32 0.25, %v3054_v40  ;;  %v3430_v31 = vadd.f32 %v3423_v17, %v3416_v9  ;;  %v3403_v6 = vmul.f32 %v12770_v4, %v18453_v3 }
 0x7f0   :  { %v12780_v62 = vpop.eup %12779  ;;  %v3383_v63 = vadd.f32 %v12778_v37, %v12776_v7  ;;  %v3404_v44 = vmul.f32 %v12776_v7, %v18459_v46  ;;  %v3389_v16 = vadd.f32 %v12774_v0, %v3382_v36  ;;  %v3410_v49 = vmul.f32 %v12772_v15, %v18454_v18 }
 0x7f1   :  { %v12782_v47 = vpop.eup %12781  ;;  %v3411_v24 = vmul.f32 %v12778_v37, %v18460_v42  ;;  %v3424_v9 = vmul.f32 %v12774_v0, %v18455_v14  ;;  %v3425_v40 = vmul.f32 %v12780_v62, %v18461_v38 }
 0x7f2   :  { %v3433_v17 = vmul.f32 %v12782_v47, %v3426_v11  ;;  %v3390_v43 = vadd.f32 %v12780_v62, %v3383_v63  ;;  %v3417_v4 = vadd.f32 %v3410_v49, %v3403_v6  ;;  %v18464_v62 = vmax.f32 %v15511_v58, %v15533_v21 }
 0x7f3   :  { %v11407_v1 = vpop.f32.mrb[212].mxu1  ;;  %v3418_v3 = vadd.f32 %v3411_v24, %v3404_v44  ;;  %12791 = vrcp.f32 %v3389_v16 }
 0x7f4   :  { %v12784_v39 = vpop.eup %12783  ;;  %v3599_v30 = vpack.c.bf16 %v3433_v17, %v15507_v32  ;;  %v3155_v52 = vmul.f32 0.25, %v11407_v1  ;;  %v3067_v53 = vpop.f32.mrb[213].mxu1  ;;  %v15573_v11 = vadd.f32 %v3424_v9, %v3417_v4  ;;  %v18465_v32 = vmax.f32 %v15486_v34, %v15535_v51 }
 0x7f5   :  { %v12786_v7 = vpop.eup %12785  ;;  %v3434_v36 = vmul.f32 %v12784_v39, %v3427_v8  ;;  %v3153_v33 = vmul.f32 0.25, %v3067_v53  ;;  %v11408_v15 = vpop.f32.mrb[214].mxu1  ;;  %v15575_v37 = vadd.f32 %v3425_v40, %v3418_v3  ;;  %12793 = vrcp.f32 %v3390_v43 }
 0x7f6   :  { %v15571_v18 = vmul.f32 %v12786_v7, %v3429_v35  ;;  %11442 = vmatmul.mubr.bf16.gmra.mrb[204].mxu0 %v3599_v30  ;;  %v3449_v63 = vmax.f32 %v18464_v62, %v3155_v52  ;;  %v3156_v6 = vmul.f32 0.25, %v11408_v15  ;;  %v3070_v44 = vpop.f32.mrb[215].mxu1 }
 0x7f7   :  { %v12788_v0 = vpop.eup %12787  ;;  %v3447_v8 = vmax.f32 %v18465_v32, %v3153_v33  ;;  %11445 = vmatprep.mubr.msk.bf16.mxu0 %vm13585_vm0, %v18440_v10  ;;  %v3154_v35 = vmul.f32 0.25, %v3070_v44 }
 0x7f8   :  { %v15585_v39 = vmul.f32 %v12788_v0, %v3430_v31  ;;  %v12790_v3 = vpop.eup %12789  ;;  %v3456_v30 = vsub.f32 %v15511_v58, %v3449_v63  ;;  %v3477_v1 = vsub.f32 %v15533_v21, %v3449_v63  ;;  %v3498_v47 = vsub.f32 %v3155_v52, %v3449_v63 }
 0x7f9   :  { %v3450_v53 = vmax.f32 %v3443_v41, %v3156_v6  ;;  %v3454_v16 = vsub.f32 %v15486_v34, %v3447_v8  ;;  %v3475_v49 = vsub.f32 %v15535_v51, %v3447_v8  ;;  %v3496_v24 = vsub.f32 %v3153_v33, %v3447_v8 }
 0x7fa   :  { %v3435_v17 = vmul.f32 %v12790_v3, %v3428_v61  ;;  %v3465_v9 = vmul.f32 1.442695, %v3456_v30  ;;  %v3486_v40 = vmul.f32 1.442695, %v3477_v1  ;;  %v3507_v4 = vmul.f32 1.442695, %v3498_v47 }
 0x7fb   :  { %v3457_v31 = vsub.f32 %v15517_v55, %v3450_v53  ;;  %v3461_v7 = vmul.f32 1.442695, %v3454_v16  ;;  %v3482_v43 = vmul.f32 1.442695, %v3475_v49  ;;  %v3503_v15 = vmul.f32 1.442695, %v3496_v24 }
 0x7fc   :  { %v3478_v58 = vsub.f32 %v15549_v22, %v3450_v53  ;;  %12795 = vpow2.f32 %v3465_v9  ;;  %v3499_v52 = vsub.f32 %v3156_v6, %v3450_v53  ;;  %v3600_v41 = vpack.c.bf16 %v3435_v17, %v3434_v36  ;;  %v11411_v0 = vpop.f32.mrb[216].mxu1 }
 0x7fd   :  { %v3467_v21 = vmul.f32 1.442695, %v3457_v31  ;;  %12797 = vpow2.f32 %v3486_v40  ;;  %v18466_v33 = vmax.f32 %v15497_v23, %v15525_v25  ;;  %v3159_v61 = vmul.f32 0.25, %v11411_v0  ;;  %v3083_v62 = vpop.f32.mrb[217].mxu1  ;;  %v12792_v3 = vpop.eup %12791 }
 0x7fe   :  { %v3488_v34 = vmul.f32 1.442695, %v3478_v58  ;;  %12799 = vpow2.f32 %v3507_v4  ;;  %v3509_v55 = vmul.f32 1.442695, %v3499_v52  ;;  %11446 = vmatmul.mubr.bf16.gmra.mrb[208].mxu0 %v3600_v41  ;;  %v3157_v63 = vmul.f32 0.25, %v3083_v62  ;;  %v11412_v44 = vpop.f32.mrb[218].mxu1 }
 0x7ff   :  { %v3448_v51 = vmax.f32 %v18466_v33, %v3154_v35  ;;  %v3601_v22 = vpack.c.bf16 %v15585_v39, %v15571_v18  ;;  %12801 = vpow2.f32 %v3461_v7  ;;  %11449 = vmatprep.mubr.msk.bf16.mxu0 %vm13585_vm0, %v18440_v10  ;;  %v3086_v8 = vpop.f32.mrb[219].mxu1  ;;  %v18467_v30 = vmax.f32 %v15527_v20, %v15554_v5  ;;  %v12794_v53 = vpop.eup %12793 }
 0x800   :  { %12803 = vpow2.f32 %v3482_v43  ;;  %v18468_v47 = vmax.f32 %v15504_v26, %v15558_v2  ;;  %v3158_v39 = vmul.f32 0.25, %v3086_v8  ;;  %v3438_v58 = vmul.f32 %v12792_v3, %v15573_v11 }
 0x801   :  { %v3455_v36 = vsub.f32 %v15497_v23, %v3448_v51  ;;  %v3476_v6 = vsub.f32 %v15525_v25, %v3448_v51  ;;  %v3497_v32 = vsub.f32 %v3154_v35, %v3448_v51  ;;  %v3453_v1 = vmax.f32 %v18467_v30, %v3159_v61 }
 0x802   :  { %v3451_v18 = vmax.f32 %v18468_v47, %v3157_v63  ;;  %12805 = vpow2.f32 %v3503_v15 }
 0x803   :  { %v3463_v23 = vmul.f32 1.442695, %v3455_v36  ;;  %v3484_v25 = vmul.f32 1.442695, %v3476_v6  ;;  %v3505_v35 = vmul.f32 1.442695, %v3497_v32  ;;  %12807 = vpow2.f32 %v3467_v21 }
 0x804   :  { %v3460_v16 = vsub.f32 %v15527_v20, %v3453_v1  ;;  %v3481_v49 = vsub.f32 %v15554_v5, %v3453_v1  ;;  %v3502_v24 = vsub.f32 %v3159_v61, %v3453_v1  ;;  %12809 = vpow2.f32 %v3488_v34 }
 0x805   :  { %v3458_v17 = vsub.f32 %v15504_v26, %v3451_v18  ;;  %v3479_v9 = vsub.f32 %v15558_v2, %v3451_v18  ;;  %v3500_v40 = vsub.f32 %v3157_v63, %v3451_v18  ;;  %12811 = vpow2.f32 %v3509_v55 }
 0x806   :  { %v3473_v4 = vmul.f32 1.442695, %v3460_v16  ;;  %12813 = vpow2.f32 %v3463_v23  ;;  %v3494_v31 = vmul.f32 1.442695, %v3481_v49  ;;  %v3515_v7 = vmul.f32 1.442695, %v3502_v24  ;;  %v12796_v15 = vpop.eup %12795  ;;  %11450 = vmatmul.mubr.bf16.gmra.mrb[212].mxu0 %v3601_v22 }
 0x807   :  { %v3469_v43 = vmul.f32 1.442695, %v3458_v17  ;;  %12815 = vpow2.f32 %v3484_v25  ;;  %v18469_v20 = vmax.f32 %v15513_v29, %v15547_v60  ;;  %v3439_v26 = vmul.f32 %v12794_v53, %v15575_v37  ;;  %v12798_v21 = vpop.eup %12797  ;;  %11453 = vmatprep.mubr.msk.bf16.mxu0 %vm13585_vm0, %v18440_v10 }
 0x808   :  { %12817 = vpow2.f32 %v3505_v35  ;;  %v3490_v2 = vmul.f32 1.442695, %v3479_v9  ;;  %v3511_v52 = vmul.f32 1.442695, %v3500_v40  ;;  %v3540_v41 = vmul.f32 %v12796_v15, %v18450_v28  ;;  %v12800_v0 = vpop.eup %12799 }
 0x809   :  { %v3452_v5 = vmax.f32 %v18469_v20, %v3158_v39  ;;  %12819 = vpow2.f32 %v3473_v4  ;;  %v12802_v61 = vpop.eup %12801  ;;  %v3602_v11 = vpack.c.bf16 %v3439_v26, %v3438_v58  ;;  %v3519_v37 = vadd.f32 %v12798_v21, %v12796_v15  ;;  %v18470_v26 = vld [vmem:[#allocation50_spill] sm:$0xff] }
 0x80a   :  { %12821 = vpow2.f32 %v3494_v31  ;;  %v3547_v62 = vmul.f32 %v12798_v21, %v18451_v54  ;;  %v12804_v55 = vpop.eup %12803  ;;  %v3538_v6 = vmul.f32 %v12802_v61, %v18441_v12 }
 0x80b   :  { %v3459_v34 = vsub.f32 %v15513_v29, %v3452_v5  ;;  %v3480_v33 = vsub.f32 %v15547_v60, %v3452_v5  ;;  %v3501_v51 = vsub.f32 %v3158_v39, %v3452_v5  ;;  %12823 = vpow2.f32 %v3515_v7 }
 0x80c   :  { %v12806_v36 = vpop.eup %12805  ;;  %12825 = vpow2.f32 %v3469_v43  ;;  %v3517_v28 = vadd.f32 %v12804_v55, %v12802_v61  ;;  %v3545_v29 = vmul.f32 %v12804_v55, %v18445_v59  ;;  %v3526_v8 = vadd.f32 %v12800_v0, %v3519_v37  ;;  %v18473_v37 = vld [vmem:[#allocation51_spill] sm:$0xff] }
 0x80d   :  { %v3471_v63 = vmul.f32 1.442695, %v3459_v34  ;;  %v3492_v44 = vmul.f32 1.442695, %v3480_v33  ;;  %v3513_v22 = vmul.f32 1.442695, %v3501_v51  ;;  %v12808_v60 = vpop.eup %12807  ;;  %12827 = vpow2.f32 %v3490_v2 }
 0x80e   :  { %v3559_v32 = vmul.f32 %v12806_v36, %v18442_v48  ;;  %v3554_v3 = vadd.f32 %v3547_v62, %v3540_v41  ;;  %v12810_v30 = vpop.eup %12809  ;;  %12829 = vpow2.f32 %v3511_v52  ;;  %v3524_v54 = vadd.f32 %v12806_v36, %v3517_v28  ;;  %11454 = vmatmul.mubr.bf16.gmra.mrb[216].mxu0 %v3602_v11 }
 0x80f   :  { %v3552_v1 = vadd.f32 %v3545_v29, %v3538_v6  ;;  %v3541_v47 = vmul.f32 %v12808_v60, %v18456_v56  ;;  %v12812_v18 = vpop.eup %12811  ;;  %12831 = vpow2.f32 %v3471_v63  ;;  %v3520_v39 = vadd.f32 %v12810_v30, %v12808_v60  ;;  %11457 = vmatprep.mubr.msk.bf16.mxu0 %vm13585_vm0, %v18440_v10 }
 0x810   :  { %v3548_v12 = vmul.f32 %v12810_v30, %v18457_v19  ;;  %v3561_v59 = vmul.f32 %v12800_v0, %v18452_v13  ;;  %v12814_v53 = vpop.eup %12813  ;;  %12833 = vpow2.f32 %v3492_v44  ;;  %v3562_v23 = vmul.f32 %v12812_v18, %v18458_v45  ;;  %v18471_v0 = vld [vmem:[#allocation57_spill] sm:$0xff]  ;;  %v18474_v44 = vld [vmem:[#allocation58_spill] sm:$0xff] }
 0x811   :  { %v3566_v48 = vadd.f32 %v3559_v32, %v3552_v1  ;;  %v12816_v25 = vpop.eup %12815  ;;  %12835 = vpow2.f32 %v3513_v22  ;;  %v3539_v56 = vmul.f32 %v12814_v53, %v18444_v50  ;;  %v3527_v35 = vadd.f32 %v12812_v18, %v3520_v39 }
 0x812   :  { %v3555_v16 = vadd.f32 %v3548_v12, %v3541_v47  ;;  %v12818_v49 = vpop.eup %12817  ;;  %v3518_v24 = vadd.f32 %v12816_v25, %v12814_v53  ;;  %12837 = vrcp.f32 %v3524_v54  ;;  %v3546_v19 = vmul.f32 %v12816_v25, %v18446_v57 }
 0x813   :  { %v3568_v13 = vadd.f32 %v3561_v59, %v3554_v3  ;;  %v12820_v17 = vpop.eup %12819  ;;  %v3560_v9 = vmul.f32 %v12818_v49, %v18443_v27  ;;  %12839 = vrcp.f32 %v3526_v8 }
 0x814   :  { %v3569_v40 = vadd.f32 %v3562_v23, %v3555_v16  ;;  %v12822_v4 = vpop.eup %12821  ;;  %v3525_v31 = vadd.f32 %v12818_v49, %v3518_v24  ;;  %v3553_v45 = vadd.f32 %v3546_v19, %v3539_v56  ;;  %12841 = vrcp.f32 %v3527_v35  ;;  %v18476_v24 = vld [vmem:[#allocation25_spill] sm:$0xff] }
 0x815   :  { %v3544_v7 = vmul.f32 %v12820_v17, %v18459_v46  ;;  %v12824_v50 = vpop.eup %12823  ;;  %v3523_v43 = vadd.f32 %v12822_v4, %v12820_v17  ;;  %v3551_v15 = vmul.f32 %v12822_v4, %v18460_v42  ;;  %v18472_v46 = vld [vmem:[#allocation64_spill] sm:$0xff]  ;;  %v18475_v16 = vmov 0  }
 0x816   :  { %v12826_v20 = vpop.eup %12825  ;;  %12843 = vrcp.f32 %v3525_v31  ;;  %v3567_v5 = vadd.f32 %v3560_v9, %v3553_v45  ;;  %v3565_v57 = vmul.f32 %v12824_v50, %v18461_v38  ;;  %v18477_v9 = vld [vmem:[#allocation26_spill] sm:$0xff] }
 0x817   :  { %v12828_v58 = vpop.eup %12827  ;;  %v3542_v27 = vmul.f32 %v12826_v20, %v18470_v26  ;;  %v3530_v21 = vadd.f32 %v12824_v50, %v3523_v43  ;;  %v3558_v2 = vadd.f32 %v3551_v15, %v3544_v7  ;;  %v12321_v7 = vld [vmem:[%s18219_s7] ss:$16 sps:$4 sm:$0xff]   ;;  %v12323_v50 = vld [vmem:[%s18219_s7 + $0x4] ss:$16 sps:$4 sm:$0xff]   ;;  %v12324_v15 = vld [vmem:[%s18219_s7 + $0x8] ss:$16 sps:$4 sm:$0xff]  }
 0x818   :  { %v12830_v52 = vpop.eup %12829  ;;  %v3521_v41 = vadd.f32 %v12828_v58, %v12826_v20  ;;  %v3549_v34 = vmul.f32 %v12828_v58, %v18471_v0  ;;  %v12326_v20 = vld [vmem:[%s18219_s7 + $0xc] ss:$16 sps:$4 sm:$0xff]   ;;  %4256 = vmatprep.subr.bf16.mxu0 %v12323_v50  ;;  %v12327_v58 = vld [vmem:[%s18219_s7 + $0x20] ss:$16 sps:$4 sm:$0xff]   ;;  %v12330_v26 = vld [vmem:[%s18219_s7 + $0x28] ss:$16 sps:$4 sm:$0xff]  }
 0x819   :  { %v12832_v33 = vpop.eup %12831  ;;  %v3563_v51 = vmul.f32 %v12830_v52, %v18472_v46  ;;  %12845 = vrcp.f32 %v3530_v21  ;;  %v3572_v61 = vadd.f32 %v3565_v57, %v3558_v2  ;;  %v12332_v57 = vld [vmem:[%s18219_s7 + $0x2c] ss:$16 sps:$4 sm:$0xff]   ;;  %4397 = vmatprep.subr.bf16.mxu1 %v12326_v20  ;;  %4257 = vmatpush1.bf16.msra.mxu0 %v12321_v7  ;;  %v12333_v2 = vld [vmem:[%s18219_s7 + $0x40] ss:$16 sps:$4 sm:$0xff]  }
 0x81a   :  { %v12834_v42 = vpop.eup %12833  ;;  %v3528_v11 = vadd.f32 %v12830_v52, %v3521_v41  ;;  %v3543_v62 = vmul.f32 %v12832_v33, %v18473_v37  ;;  %v3556_v55 = vadd.f32 %v3549_v34, %v3542_v27  ;;  %v12335_v27 = vld [vmem:[%s18219_s7 + $0x44] ss:$16 sps:$4 sm:$0xff]   ;;  %v12338_v21 = vld [vmem:[%s18219_s7 + $0x4c] ss:$16 sps:$4 sm:$0xff]   ;;  %v12336_v52 = vld [vmem:[%s18219_s7 + $0x48] ss:$16 sps:$4 sm:$0xff]  }
 0x81b   :  { %v12836_v38 = vpop.eup %12835  ;;  %v3522_v63 = vadd.f32 %v12834_v42, %v12832_v33  ;;  %v3550_v22 = vmul.f32 %v12834_v42, %v18474_v44  ;;  %v18478_v0 = vld [vmem:[#allocation28_spill] sm:$0xff] }
 0x81c   :  { %v12838_v36 = vpop.eup %12837  ;;  %12847 = vrcp.f32 %v3528_v11  ;;  %v3564_v28 = vmul.f32 %v12836_v38, %v18455_v14  ;;  %v3570_v6 = vadd.f32 %v3563_v51, %v3556_v55  ;;  %v18479_v51 = vld [vmem:[#allocation27_spill] sm:$0xff] }
 0x81d   :  { %v12840_v29 = vpop.eup %12839  ;;  %v3573_v60 = vmul.f32 %v12838_v36, %v3566_v48  ;;  %v3529_v32 = vadd.f32 %v12836_v38, %v3522_v63  ;;  %v3557_v8 = vadd.f32 %v3550_v22, %v3543_v62  ;;  %v18480_v38 = vld [vmem:[#allocation29_spill] sm:$0xff]  ;;  %v18481_v36 = vld [vmem:[#allocation30_spill] sm:$0xff] }
 0x81e   :  { %v12842_v3 = vpop.eup %12841  ;;  %v3575_v30 = vmul.f32 %v12840_v29, %v3568_v13 }
 0x81f   :  { %v3576_v54 = vmul.f32 %v12842_v3, %v3569_v40  ;;  %12849 = vrcp.f32 %v3529_v32  ;;  %v3571_v1 = vadd.f32 %v3564_v28, %v3557_v8  ;;  %v18482_v3 = vld [vmem:[#allocation31_spill] sm:$0xff] }
 0x820   :  { %v12844_v47 = vpop.eup %12843 }
 0x821   :  { %v3574_v18 = vmul.f32 %v12844_v47, %v3567_v5  ;;  %v3604_v39 = vpack.c.bf16 %v3576_v54, %v3575_v30  ;;  %v12329_v5 = vld [vmem:[%s18219_s7 + $0x24] ss:$16 sps:$4 sm:$0xff]   ;;  %v18483_v47 = vld [vmem:[#allocation32_spill] sm:$0xff] }
 0x822   :  { %4258 = vmatprep.subr.bf16.mxu0 %v12329_v5 }
 0x823   :  { %v12846_v12 = vpop.eup %12845  ;;  %v3603_v59 = vpack.c.bf16 %v3574_v18, %v3573_v60  ;;  %4259 = vmatpush1.bf16.msra.mxu0 %v12327_v58 }
 0x824   :  { %v3579_v53 = vmul.f32 %v12846_v12, %v3572_v61  ;;  %4260 = vmatprep.subr.bf16.mxu0 %v12335_v27  ;;  %v18488_v27 = vld [vmem:[#allocation38_spill] sm:$0xff] }
 0x825   :  { %11458 = vmatmul.mubr.bf16.gmra.mrb[220].mxu0 %v3603_v59 }
 0x826   :  { %v12848_v23 = vpop.eup %12847  ;;  %11461 = vmatprep.mubr.msk.bf16.mxu0 %vm13585_vm0, %v18440_v10  ;;  %v3606_v35 = vpack.c.bf16 %v3579_v53, %v3579_v53 }
 0x827   :  { %v3577_v14 = vmul.f32 %v12848_v23, %v3570_v6  ;;  %4261 = vmatpush1.bf16.msra.mxu0 %v12333_v2 }
 0x829   :  { %v12850_v48 = vpop.eup %12849 }
 0x82a   :  { %v3578_v25 = vmul.f32 %v12850_v48, %v3571_v1 }
 0x82c   :  { %v3605_v56 = vpack.c.bf16 %v3578_v25, %v3577_v14  ;;  %v18484_v14 = vld [vmem:[#allocation34_spill] sm:$0xff] }
 0x82d   :  { %11462 = vmatmul.mubr.bf16.gmra.mrb[224].mxu0 %v3604_v39 }
 0x82e   :  { %11465 = vmatprep.mubr.msk.bf16.mxu0 %vm13585_vm0, %v18440_v10 }
 0x835   :  { %11466 = vmatmul.mubr.bf16.gmra.mrb[228].mxu0 %v3605_v56 }
 0x836   :  { %11469 = vmatprep.mubr.msk.bf16.mxu0 %vm13585_vm0, %v18440_v10 }
 0x83d   :  { %11470 = vmatmul.mubr.bf16.gmra.mrb[232].mxu0 %v3606_v35  ;;  %v18485_v35 = vld [vmem:[#allocation33_spill] sm:$0xff] }
 0x83e   :  { %4288 = vmatprep.mubr.bf16.mxu0 %v18475_v16 }
 0x891   :  { %v3689_v49 = vpop.f32.mrb[192].mxu0 }
 0x892   :  { %v15652_v19 = vadd.f32 %v3689_v49, %v18476_v24  ;;  %v11431_v13 = vpop.f32.mrb[193].mxu0 }
 0x893   :  { %v3692_v17 = vpop.f32.mrb[194].mxu0 }
 0x894   :  { %v15655_v40 = vadd.f32 %v3692_v17, %v18477_v9  ;;  %v11432_v4 = vpop.f32.mrb[195].mxu0  ;;  %v3796_v31 = vmul.f32 %v15652_v19, %v15652_v19 }
 0x896   :  { %v3797_v45 = vmul.f32 %v15655_v40, %v15655_v40 }
 0x898   :  { %v3817_v43 = vpack.c.bf16 %v3797_v45, %v3796_v31  ;;  %v18486_v31 = vld [vmem:[#allocation36_spill] sm:$0xff] }
 0x89a   :  { %11490 = vmatmul.mubr.bf16.vlgmr.msra.gmra.mrb[220].mxu1 %v3817_v43  ;;  %v18487_v43 = vld [vmem:[#allocation35_spill] sm:$0xff] }
 0x89b   :  { %11493 = vmatprep.mubr.msk.bf16.mxu1 %vm13585_vm0, %v18440_v10  ;;  %4398 = vmatpush1.bf16.msra.mxu1 %v12324_v15 }
 0x89c   :  { %4399 = vmatprep.subr.bf16.mxu1 %v12332_v57 }
 0x89f   :  { %4400 = vmatpush1.bf16.msra.mxu1 %v12330_v26 }
 0x8a0   :  { %4401 = vmatprep.subr.bf16.mxu1 %v12338_v21 }
 0x8a3   :  { %4402 = vmatpush1.bf16.msra.mxu1 %v12336_v52 }
 0x8aa   :  { %v3697_v41 = vpop.f32.mrb[196].mxu0 }
 0x8ab   :  { %v15700_v34 = vadd.f32 %v3697_v41, %v18478_v0  ;;  %v11435_v33 = vpop.f32.mrb[197].mxu0  ;;  %v18489_v41 = vld [vmem:[#allocation37_spill] sm:$0xff] }
 0x8ac   :  { %v3700_v46 = vpop.f32.mrb[198].mxu0 }
 0x8ad   :  { %v15703_v61 = vadd.f32 %v3700_v46, %v18479_v51  ;;  %v11436_v42 = vpop.f32.mrb[199].mxu0  ;;  %v3798_v11 = vmul.f32 %v15700_v34, %v15700_v34 }
 0x8af   :  { %v3799_v37 = vmul.f32 %v15703_v61, %v15703_v61 }
 0x8b1   :  { %v3818_v62 = vpack.c.bf16 %v3799_v37, %v3798_v11  ;;  %v18490_v37 = vld [vmem:[#allocation39_spill] sm:$0xff] }
 0x8b2   :  { %v3705_v55 = vpop.f32.mrb[200].mxu0 }
 0x8b3   :  { %v15710_v63 = vadd.f32 %v3705_v55, %v18480_v38  ;;  %v11439_v44 = vpop.f32.mrb[201].mxu0  ;;  %11494 = vmatmul.mubr.bf16.gmra.mrb[224].mxu1 %v3818_v62 }
 0x8b4   :  { %v3708_v22 = vpop.f32.mrb[202].mxu0  ;;  %11497 = vmatprep.mubr.msk.bf16.mxu1 %vm13585_vm0, %v18440_v10  ;;  %v18491_v44 = vld [vmem:[#allocation40_spill] sm:$0xff] }
 0x8b5   :  { %v15715_v28 = vadd.f32 %v3708_v22, %v18481_v36  ;;  %v11440_v6 = vpop.f32.mrb[203].mxu0  ;;  %v3800_v29 = vmul.f32 %v15710_v63, %v15710_v63 }
 0x8b7   :  { %v3801_v60 = vmul.f32 %v15715_v28, %v15715_v28 }
 0x8b9   :  { %v3819_v32 = vpack.c.bf16 %v3801_v60, %v3800_v29  ;;  %v12341_v60 = vld [vmem:[%s18219_s7 + $0x64] ss:$16 sps:$4 sm:$0xff]  }
 0x8ba   :  { %4262 = vmatprep.subr.bf16.mxu0 %v12341_v60 }
 0x8bb   :  { %11498 = vmatmul.mubr.bf16.gmra.mrb[228].mxu1 %v3819_v32  ;;  %v12344_v32 = vld [vmem:[%s18219_s7 + $0x6c] ss:$16 sps:$4 sm:$0xff]  }
 0x8bc   :  { %11501 = vmatprep.mubr.msk.bf16.mxu1 %vm13585_vm0, %v18440_v10  ;;  %4403 = vmatprep.subr.bf16.mxu1 %v12344_v32 }
 0x8c9   :  { %v3713_v8 = vpop.f32.mrb[204].mxu0 }
 0x8ca   :  { %v15724_v30 = vadd.f32 %v3713_v8, %v18482_v3  ;;  %v11443_v54 = vpop.f32.mrb[205].mxu0  ;;  %v12339_v8 = vld [vmem:[%s18219_s7 + $0x60] ss:$16 sps:$4 sm:$0xff]   ;;  %v12342_v3 = vld [vmem:[%s18219_s7 + $0x68] ss:$16 sps:$4 sm:$0xff]  }
 0x8cb   :  { %v3716_v1 = vpop.f32.mrb[206].mxu0  ;;  %4263 = vmatpush1.bf16.msra.mxu0 %v12339_v8  ;;  %4404 = vmatpush1.bf16.msra.mxu1 %v12342_v3 }
 0x8cc   :  { %v15727_v18 = vadd.f32 %v3716_v1, %v18483_v47  ;;  %v11444_v39 = vpop.f32.mrb[207].mxu0  ;;  %v3802_v12 = vmul.f32 %v15724_v30, %v15724_v30  ;;  %v18492_v47 = vld [vmem:[#allocation41_spill] sm:$0xff] }
 0x8ce   :  { %v3803_v59 = vmul.f32 %v15727_v18, %v15727_v18 }
 0x8d0   :  { %v3820_v53 = vpack.c.bf16 %v3803_v59, %v3802_v12  ;;  %v12345_v59 = vld [vmem:[%s18219_s7 + $0x80] ss:$16 sps:$4 sm:$0xff]  }
 0x8d1   :  { %v3721_v23 = vpop.f32.mrb[208].mxu0 }
 0x8d2   :  { %v15734_v48 = vadd.f32 %v3721_v23, %v18484_v14  ;;  %11502 = vmatmul.mubr.bf16.gmra.mrb[232].mxu1 %v3820_v53  ;;  %v11447_v25 = vpop.f32.mrb[209].mxu0  ;;  %v12347_v53 = vld [vmem:[%s18219_s7 + $0x84] ss:$16 sps:$4 sm:$0xff]   ;;  %v12348_v14 = vld [vmem:[%s18219_s7 + $0x88] ss:$16 sps:$4 sm:$0xff]  }
 0x8d3   :  { %v3724_v56 = vpop.f32.mrb[210].mxu0  ;;  %11505 = vmatprep.mubr.msk.bf16.mxu1 %vm13585_vm0, %v18440_v10  ;;  %v12350_v25 = vld [vmem:[%s18219_s7 + $0x8c] ss:$16 sps:$4 sm:$0xff]   ;;  %4264 = vmatprep.subr.bf16.mxu0 %v12347_v53 }
 0x8d4   :  { %v15739_v49 = vadd.f32 %v3724_v56, %v18485_v35  ;;  %v11448_v24 = vpop.f32.mrb[211].mxu0  ;;  %v3804_v13 = vmul.f32 %v15734_v48, %v15734_v48  ;;  %v18493_v56 = vld [vmem:[#allocation42_spill] sm:$0xff]  ;;  %4405 = vmatprep.subr.bf16.mxu1 %v12350_v25  ;;  %4265 = vmatpush1.bf16.msra.mxu0 %v12345_v59 }
 0x8d5   :  { %4406 = vmatpush1.bf16.msra.mxu1 %v12348_v14 }
 0x8d6   :  { %v3805_v17 = vmul.f32 %v15739_v49, %v15739_v49 }
 0x8d8   :  { %v3821_v9 = vpack.c.bf16 %v3805_v17, %v3804_v13  ;;  %v12353_v13 = vld [vmem:[%s18219_s7 + $0xa4] ss:$16 sps:$4 sm:$0xff]   ;;  %v12351_v17 = vld [vmem:[%s18219_s7 + $0xa0] ss:$16 sps:$4 sm:$0xff]  }
 0x8d9   :  { %v3729_v4 = vpop.f32.mrb[212].mxu0  ;;  %4266 = vmatprep.subr.bf16.mxu0 %v12353_v13 }
 0x8da   :  { %v15746_v45 = vadd.f32 %v3729_v4, %v18486_v31  ;;  %v11451_v7 = vpop.f32.mrb[213].mxu0  ;;  %11506 = vmatmul.mubr.bf16.gmra.mrb[236].mxu1 %v3821_v9  ;;  %v12356_v9 = vld [vmem:[%s18219_s7 + $0xac] ss:$16 sps:$4 sm:$0xff]   ;;  %4267 = vmatpush1.bf16.msra.mxu0 %v12351_v17 }
 0x8db   :  { %v3732_v50 = vpop.f32.mrb[214].mxu0  ;;  %11509 = vmatprep.mubr.msk.bf16.mxu1 %vm13585_vm0, %v18440_v10  ;;  %v12359_v7 = vld [vmem:[%s18219_s7 + $0xc4] ss:$16 sps:$4 sm:$0xff]   ;;  %4407 = vmatprep.subr.bf16.mxu1 %v12356_v9  ;;  %v15875_v9 = vld [vmem:[#allocation7] ss:$0 sm:$0xff] }
 0x8dc   :  { %v15751_v15 = vadd.f32 %v3732_v50, %v18487_v43  ;;  %v11452_v20 = vpop.f32.mrb[215].mxu0  ;;  %v3806_v5 = vmul.f32 %v15746_v45, %v15746_v45  ;;  %v12354_v50 = vld [vmem:[%s18219_s7 + $0xa8] ss:$16 sps:$4 sm:$0xff]   ;;  %4268 = vmatprep.subr.bf16.mxu0 %v12359_v7  ;;  %v12369_v7 = vld [vmem:[%s18220_s8 + $0x40] sm:$0xff]  }
 0x8dd   :  { %v12362_v20 = vld [vmem:[%s18219_s7 + $0xcc] ss:$16 sps:$4 sm:$0xff]   ;;  %4408 = vmatpush1.bf16.msra.mxu1 %v12354_v50  ;;  %v12370_v50 = vld [vmem:[%s18220_s8 + $0xc0] sm:$0xff]  }
 0x8de   :  { %v3807_v57 = vmul.f32 %v15751_v15, %v15751_v15  ;;  %4409 = vmatprep.subr.bf16.mxu1 %v12362_v20  ;;  %v12371_v20 = vld [vmem:[%s18220_s8] sm:$0xff]  }
 0x8e0   :  { %v3822_v58 = vpack.c.bf16 %v3807_v57, %v3806_v5  ;;  %v12357_v57 = vld [vmem:[%s18219_s7 + $0xc0] ss:$16 sps:$4 sm:$0xff]  }
 0x8e1   :  { %v3737_v26 = vpop.f32.mrb[216].mxu0  ;;  %4269 = vmatpush1.bf16.msra.mxu0 %v12357_v57  ;;  %v12373_v57 = vld [vmem:[%s18220_s8 + $0x48] sm:$0xff]  }
 0x8e2   :  { %v15758_v21 = vadd.f32 %v3737_v26, %v18488_v27  ;;  %v11455_v2 = vpop.f32.mrb[217].mxu0  ;;  %11510 = vmatmul.mubr.bf16.gmra.mrb[240].mxu1 %v3822_v58  ;;  %v18494_v58 = vld [vmem:[#allocation43_spill] sm:$0xff] }
 0x8e3   :  { %v3740_v52 = vpop.f32.mrb[218].mxu0  ;;  %11513 = vmatprep.mubr.msk.bf16.mxu1 %vm13585_vm0, %v18440_v10 }
 0x8e4   :  { %v15763_v0 = vadd.f32 %v3740_v52, %v18489_v41  ;;  %v11456_v33 = vpop.f32.mrb[219].mxu0  ;;  %v3808_v46 = vmul.f32 %v15758_v21, %v15758_v21  ;;  %v12360_v52 = vld [vmem:[%s18219_s7 + $0xc8] ss:$16 sps:$4 sm:$0xff]  }
 0x8e5   :  { %v18495_v41 = vld [vmem:[#allocation44_spill] sm:$0xff]  ;;  %4410 = vmatpush1.bf16.msra.mxu1 %v12360_v52 }
 0x8e6   :  { %v3809_v51 = vmul.f32 %v15763_v0, %v15763_v0 }
 0x8e8   :  { %v3823_v42 = vpack.c.bf16 %v3809_v51, %v3808_v46 }
 0x8ea   :  { %11514 = vmatmul.mubr.bf16.gmra.mrb[244].mxu1 %v3823_v42 }
 0x8eb   :  { %11517 = vmatprep.mubr.msk.bf16.mxu1 %vm13585_vm0, %v18440_v10 }
 0x8f8   :  { %v3745_v11 = vpop.f32.mrb[220].mxu0 }
 0x8f9   :  { %v15772_v62 = vadd.f32 %v3745_v11, %v18490_v37  ;;  %v11459_v55 = vpop.f32.mrb[221].mxu0  ;;  %v12365_v11 = vld [vmem:[%s18219_s7 + $0xe4] ss:$16 sps:$4 sm:$0xff]   ;;  %v12368_v37 = vld [vmem:[%s18219_s7 + $0xec] ss:$16 sps:$4 sm:$0xff]  }
 0x8fa   :  { %v3748_v38 = vpop.f32.mrb[222].mxu0  ;;  %v12363_v55 = vld [vmem:[%s18219_s7 + $0xe0] ss:$16 sps:$4 sm:$0xff]   ;;  %4270 = vmatprep.subr.bf16.mxu0 %v12365_v11  ;;  %4411 = vmatprep.subr.bf16.mxu1 %v12368_v37 }
 0x8fb   :  { %v15775_v22 = vadd.f32 %v3748_v38, %v18491_v44  ;;  %v11460_v36 = vpop.f32.mrb[223].mxu0  ;;  %v3810_v6 = vmul.f32 %v15772_v62, %v15772_v62  ;;  %v12366_v38 = vld [vmem:[%s18219_s7 + $0xe8] ss:$16 sps:$4 sm:$0xff]   ;;  %4271 = vmatpush1.bf16.msra.mxu0 %v12363_v55  ;;  %v12377_v55 = vld [vmem:[%s18220_s8 + $0x50] sm:$0xff]  }
 0x8fc   :  { %4412 = vmatpush1.bf16.msra.mxu1 %v12366_v38  ;;  %10393 = vmatprep.subr.bf16.mxu0 %v12369_v7  ;;  %v12378_v38 = vld [vmem:[%s18220_s8 + $0xd0] sm:$0xff]  }
 0x8fd   :  { %v3811_v29 = vmul.f32 %v15775_v22, %v15775_v22  ;;  %10475 = vmatprep.subr.bf16.mxu1 %v12370_v50 }
 0x8ff   :  { %v3824_v54 = vpack.c.bf16 %v3811_v29, %v3810_v6  ;;  %v18496_v6 = vld [vmem:[#allocation45_spill] sm:$0xff] }
 0x900   :  { %v3753_v1 = vpop.f32.mrb[224].mxu0 }
 0x901   :  { %v15794_v39 = vadd.f32 %v3753_v1, %v18492_v47  ;;  %v11463_v12 = vpop.f32.mrb[225].mxu0  ;;  %11518 = vmatmul.mubr.bf16.gmra.mrb[248].mxu1 %v3824_v54 }
 0x902   :  { %v3756_v23 = vpop.f32.mrb[226].mxu0  ;;  %11521 = vmatprep.mubr.msk.bf16.mxu1 %vm13585_vm0, %v18440_v10 }
 0x903   :  { %v15811_v35 = vadd.f32 %v3756_v23, %v18493_v56  ;;  %v11464_v24 = vpop.f32.mrb[227].mxu0  ;;  %v3812_v4 = vmul.f32 %v15794_v39, %v15794_v39 }
 0x905   :  { %v3813_v31 = vmul.f32 %v15811_v35, %v15811_v35 }
 0x907   :  { %v3825_v43 = vpack.c.bf16 %v3813_v31, %v3812_v4 }
 0x908   :  { %v3761_v5 = vpop.f32.mrb[228].mxu0 }
 0x909   :  { %v15839_v26 = vadd.f32 %v3761_v5, %v18494_v58  ;;  %v11467_v27 = vpop.f32.mrb[229].mxu0  ;;  %11522 = vmatmul.mubr.bf16.gmra.mrb[252].mxu1 %v3825_v43  ;;  %v12372_v5 = vld [vmem:[%s18220_s8 + $0x80] sm:$0xff]   ;;  %v12374_v58 = vld [vmem:[%s18220_s8 + $0xc8] sm:$0xff]  }
 0x90a   :  { %v3764_v2 = vpop.f32.mrb[230].mxu0  ;;  %11525 = vmatprep.mubr.msk.bf16.mxu1 %vm13585_vm0, %v18440_v10 }
 0x90b   :  { %v15847_v33 = vadd.f32 %v3764_v2, %v18495_v41  ;;  %v11468_v46 = vpop.f32.mrb[231].mxu0  ;;  %v3814_v51 = vmul.f32 %v15839_v26, %v15839_v26 }
 0x90c   :  { %v12375_v46 = vld [vmem:[%s18220_s8 + $0x8] sm:$0xff]  }
 0x90d   :  { %v3815_v42 = vmul.f32 %v15847_v33, %v15847_v33 }
 0x90f   :  { %v3826_v44 = vpack.c.bf16 %v3815_v42, %v3814_v51  ;;  %v12376_v51 = vld [vmem:[%s18220_s8 + $0x88] sm:$0xff]  }
 0x910   :  { %v3769_v36 = vpop.f32.mrb[232].mxu0 }
 0x911   :  { %v15866_v29 = vadd.f32 %v3769_v36, %v18496_v6  ;;  %v11471_v60 = vpop.f32.mrb[233].mxu0  ;;  %11526 = vmatmul.mubr.bf16.gmra.mrb[0].mxu1 %v3826_v44  ;;  %v12379_v36 = vld [vmem:[%s18220_s8 + $0x10] sm:$0xff]  }
 0x912   :  { %v3772_v32 = vpop.f32.mrb[234].mxu0  ;;  %11529 = vmatprep.mubr.msk.bf16.mxu1 %vm13585_vm0, %v18440_v10  ;;  %v12380_v6 = vld [vmem:[%s18220_s8 + $0x90] sm:$0xff]   ;;  %v12381_v60 = vld [vmem:[%s18220_s8 + $0x58] sm:$0xff]  }
 0x913   :  { %v3816_v8 = vmul.f32 %v15866_v29, %v15866_v29  ;;  %v11472_v3 = vpop.f32.mrb[235].mxu0  ;;  %v12382_v32 = vld [vmem:[%s18220_s8 + $0xd8] sm:$0xff]  }
 0x915   :  { %v3827_v54 = vpack.c.bf16 %v3816_v8, %v3816_v8 }
 0x919   :  { %11530 = vmatmul.mubr.bf16.gmra.mrb[4].mxu1 %v3827_v54 }
 0x91a   :  { %4429 = vmatprep.mubr.bf16.mxu1 %v18475_v16 }
 0x96d   :  { %v3862_v1 = vpop.f32.mrb[220].mxu1 }
 0x96e   :  { %v3948_v47 = vmul.f32 0.03125, %v3862_v1  ;;  %v11491_v12 = vpop.f32.mrb[221].mxu1 }
 0x96f   :  { %v3865_v59 = vpop.f32.mrb[222].mxu1  ;;  %v12384_v12 = vld [vmem:[%s18220_s8 + $0x98] sm:$0xff]  }
 0x970   :  { %v3969_v53 = vadd.f32 1e-05, %v3948_v47  ;;  %v3949_v23 = vmul.f32 0.03125, %v3865_v59  ;;  %v11492_v14 = vpop.f32.mrb[223].mxu1  ;;  %v12383_v47 = vld [vmem:[%s18220_s8 + $0x18] sm:$0xff]  }
 0x971   :  { %v12385_v14 = vld [vmem:[%s18220_s8 + $0x60] sm:$0xff]  }
 0x972   :  { %12851 = vrsqrt.f32 %v3969_v53  ;;  %v3970_v25 = vadd.f32 1e-05, %v3949_v23 }
 0x974   :  { %12853 = vrsqrt.f32 %v3970_v25  ;;  %v12386_v25 = vld [vmem:[%s18220_s8 + $0xe0] sm:$0xff]  }
 0x97c   :  { %v12852_v56 = vpop.eup %12851 }
 0x97d   :  { %v4011_v24 = vmul.f32 %v12852_v56, %v15652_v19 }
 0x97e   :  { %v12854_v13 = vpop.eup %12853 }
 0x97f   :  { %v4012_v17 = vmul.f32 %v12854_v13, %v15655_v40  ;;  %v4032_v4 = vmul.f32 %v15875_v9, %v4011_v24  ;;  %v12387_v24 = vld [vmem:[%s18220_s8 + $0x20] sm:$0xff]  }
 0x980   :  { %v12388_v13 = vld [vmem:[%s18220_s8 + $0xa0] sm:$0xff]  }
 0x981   :  { %v4033_v31 = vmul.f32 %v15875_v9, %v4012_v17 }
 0x983   :  { %v4085_v43 = vpack.c.bf16 %v4033_v31, %v4032_v4  ;;  %v12389_v4 = vld [vmem:[%s18220_s8 + $0x68] sm:$0xff]  }
 0x984   :  { %v12390_v31 = vld [vmem:[%s18220_s8 + $0xe8] sm:$0xff]  }
 0x985   :  { %4289 = vmatmul.mubr.bf16.vlgmr.msra.gmra.mrb[236].mxu0 %v4085_v43  ;;  %4430 = vmatmul.mubr.bf16.vlgmr.msra.gmra.mrb[8].mxu1 %v4085_v43 }
 0x986   :  { %v3870_v27 = vpop.f32.mrb[224].mxu1  ;;  %4298 = vmatprep.mubr.bf16.mxu0 %v18475_v16  ;;  %4439 = vmatprep.mubr.bf16.mxu1 %v18475_v16 }
 0x987   :  { %v3950_v2 = vmul.f32 0.03125, %v3870_v27  ;;  %v11495_v52 = vpop.f32.mrb[225].mxu1  ;;  %10394 = vmatpush3.bf16.msra.mxu0 %v12371_v20  ;;  %10476 = vmatpush3.bf16.msra.mxu1 %v12372_v5 }
 0x988   :  { %v3873_v41 = vpop.f32.mrb[226].mxu1  ;;  %10395 = vmatprep.subr.bf16.mxu0 %v12373_v57  ;;  %10477 = vmatprep.subr.bf16.mxu1 %v12374_v58 }
 0x989   :  { %v3971_v42 = vadd.f32 1e-05, %v3950_v2  ;;  %v3951_v11 = vmul.f32 0.03125, %v3873_v41  ;;  %v11496_v37 = vpop.f32.mrb[227].mxu1 }
 0x98b   :  { %12855 = vrsqrt.f32 %v3971_v42  ;;  %v3972_v44 = vadd.f32 1e-05, %v3951_v11  ;;  %10396 = vmatpush3.bf16.msra.mxu0 %v12375_v46  ;;  %10478 = vmatpush3.bf16.msra.mxu1 %v12376_v51 }
 0x98c   :  { %10397 = vmatprep.subr.bf16.mxu0 %v12377_v55  ;;  %10479 = vmatprep.subr.bf16.mxu1 %v12378_v38 }
 0x98d   :  { %12857 = vrsqrt.f32 %v3972_v44 }
 0x98e   :  { %v3878_v8 = vpop.f32.mrb[228].mxu1 }
 0x98f   :  { %v3952_v3 = vmul.f32 0.03125, %v3878_v8  ;;  %v11499_v54 = vpop.f32.mrb[229].mxu1  ;;  %10398 = vmatpush3.bf16.msra.mxu0 %v12379_v36  ;;  %10480 = vmatpush3.bf16.msra.mxu1 %v12380_v6 }
 0x990   :  { %v3881_v1 = vpop.f32.mrb[230].mxu1  ;;  %10399 = vmatprep.subr.bf16.mxu0 %v12381_v60  ;;  %10481 = vmatprep.subr.bf16.mxu1 %v12382_v32 }
 0x991   :  { %v3973_v59 = vadd.f32 1e-05, %v3952_v3  ;;  %v3953_v53 = vmul.f32 0.03125, %v3881_v1  ;;  %v11500_v23 = vpop.f32.mrb[231].mxu1 }
 0x993   :  { %12859 = vrsqrt.f32 %v3973_v59  ;;  %v3974_v56 = vadd.f32 1e-05, %v3953_v53  ;;  %10400 = vmatpush3.bf16.msra.mxu0 %v12383_v47  ;;  %10482 = vmatpush3.bf16.msra.mxu1 %v12384_v12 }
 0x994   :  { %10401 = vmatprep.subr.bf16.mxu0 %v12385_v14  ;;  %10483 = vmatprep.subr.bf16.mxu1 %v12386_v25 }
 0x995   :  { %v12856_v17 = vpop.eup %12855  ;;  %12861 = vrsqrt.f32 %v3974_v56 }
 0x996   :  { %v4013_v7 = vmul.f32 %v12856_v17, %v15700_v34 }
 0x997   :  { %v12858_v50 = vpop.eup %12857  ;;  %10402 = vmatpush3.bf16.msra.mxu0 %v12387_v24  ;;  %10484 = vmatpush3.bf16.msra.mxu1 %v12388_v13 }
 0x998   :  { %v4014_v43 = vmul.f32 %v12858_v50, %v15703_v61  ;;  %10403 = vmatprep.subr.bf16.mxu0 %v12389_v4  ;;  %10485 = vmatprep.subr.bf16.mxu1 %v12390_v31  ;;  %v4034_v20 = vmul.f32 %v15875_v9, %v4013_v7 }
 0x99a   :  { %v4035_v5 = vmul.f32 %v15875_v9, %v4014_v43 }
 0x99c   :  { %v4086_v57 = vpack.c.bf16 %v4035_v5, %v4034_v20 }
 0x99d   :  { %v12860_v58 = vpop.eup %12859 }
 0x99e   :  { %4299 = vmatmul.mubr.bf16.gmra.mrb[240].mxu0 %v4086_v57  ;;  %4440 = vmatmul.mubr.bf16.gmra.mrb[12].mxu1 %v4086_v57  ;;  %v4015_v27 = vmul.f32 %v12860_v58, %v15710_v63 }
 0x99f   :  { %v12862_v2 = vpop.eup %12861  ;;  %4308 = vmatprep.mubr.bf16.mxu0 %v18475_v16  ;;  %4449 = vmatprep.mubr.bf16.mxu1 %v18475_v16 }
 0x9a0   :  { %v4016_v52 = vmul.f32 %v12862_v2, %v15715_v28  ;;  %v4036_v41 = vmul.f32 %v15875_v9, %v4015_v27 }
 0x9a2   :  { %v4037_v46 = vmul.f32 %v15875_v9, %v4016_v52 }
 0x9a4   :  { %v4087_v51 = vpack.c.bf16 %v4037_v46, %v4036_v41 }
 0x9a5   :  { %v3886_v42 = vpop.f32.mrb[232].mxu1 }
 0x9a6   :  { %v3954_v11 = vmul.f32 0.03125, %v3886_v42  ;;  %v11503_v37 = vpop.f32.mrb[233].mxu1  ;;  %4309 = vmatmul.mubr.bf16.gmra.mrb[244].mxu0 %v4087_v51  ;;  %4450 = vmatmul.mubr.bf16.gmra.mrb[16].mxu1 %v4087_v51 }
 0x9a7   :  { %v3889_v55 = vpop.f32.mrb[234].mxu1  ;;  %4318 = vmatprep.mubr.bf16.mxu0 %v18475_v16  ;;  %4459 = vmatprep.mubr.bf16.mxu1 %v18475_v16 }
 0x9a8   :  { %v3975_v38 = vadd.f32 1e-05, %v3954_v11  ;;  %v3955_v44 = vmul.f32 0.03125, %v3889_v55  ;;  %v11504_v36 = vpop.f32.mrb[235].mxu1 }
 0x9aa   :  { %12863 = vrsqrt.f32 %v3975_v38  ;;  %v3976_v6 = vadd.f32 1e-05, %v3955_v44 }
 0x9ac   :  { %12865 = vrsqrt.f32 %v3976_v6 }
 0x9ad   :  { %v3894_v60 = vpop.f32.mrb[236].mxu1 }
 0x9ae   :  { %v3956_v32 = vmul.f32 0.03125, %v3894_v60  ;;  %v11507_v8 = vpop.f32.mrb[237].mxu1 }
 0x9af   :  { %v3897_v3 = vpop.f32.mrb[238].mxu1 }
 0x9b0   :  { %v3977_v54 = vadd.f32 1e-05, %v3956_v32  ;;  %v3957_v1 = vmul.f32 0.03125, %v3897_v3  ;;  %v11508_v47 = vpop.f32.mrb[239].mxu1 }
 0x9b2   :  { %12867 = vrsqrt.f32 %v3977_v54  ;;  %v3978_v12 = vadd.f32 1e-05, %v3957_v1 }
 0x9b4   :  { %v12864_v59 = vpop.eup %12863  ;;  %12869 = vrsqrt.f32 %v3978_v12 }
 0x9b5   :  { %v3902_v53 = vpop.f32.mrb[240].mxu1  ;;  %v4017_v23 = vmul.f32 %v12864_v59, %v15724_v30 }
 0x9b6   :  { %v12866_v14 = vpop.eup %12865  ;;  %v3958_v25 = vmul.f32 0.03125, %v3902_v53  ;;  %v11511_v56 = vpop.f32.mrb[241].mxu1 }
 0x9b7   :  { %v3905_v24 = vpop.f32.mrb[242].mxu1  ;;  %v4018_v13 = vmul.f32 %v12866_v14, %v15727_v18  ;;  %v4038_v7 = vmul.f32 %v15875_v9, %v4017_v23 }
 0x9b8   :  { %v3979_v17 = vadd.f32 1e-05, %v3958_v25  ;;  %v3959_v4 = vmul.f32 0.03125, %v3905_v24  ;;  %v11512_v31 = vpop.f32.mrb[243].mxu1 }
 0x9b9   :  { %v4039_v50 = vmul.f32 %v15875_v9, %v4018_v13 }
 0x9ba   :  { %12871 = vrsqrt.f32 %v3979_v17  ;;  %v3980_v43 = vadd.f32 1e-05, %v3959_v4 }
 0x9bb   :  { %v4088_v20 = vpack.c.bf16 %v4039_v50, %v4038_v7 }
 0x9bc   :  { %v12868_v5 = vpop.eup %12867  ;;  %12873 = vrsqrt.f32 %v3980_v43 }
 0x9bd   :  { %4319 = vmatmul.mubr.bf16.gmra.mrb[248].mxu0 %v4088_v20  ;;  %4460 = vmatmul.mubr.bf16.gmra.mrb[20].mxu1 %v4088_v20  ;;  %v3910_v57 = vpop.f32.mrb[244].mxu1  ;;  %v4019_v58 = vmul.f32 %v12868_v5, %v15734_v48  ;;  %v12391_v5 = vld [vmem:[%s18220_s8 + $0x28] sm:$0xff]  }
 0x9be   :  { %v12870_v27 = vpop.eup %12869  ;;  %v3960_v2 = vmul.f32 0.03125, %v3910_v57  ;;  %v11515_v52 = vpop.f32.mrb[245].mxu1  ;;  %4328 = vmatprep.mubr.bf16.mxu0 %v18475_v16  ;;  %4469 = vmatprep.mubr.bf16.mxu1 %v18475_v16  ;;  %v12392_v57 = vld [vmem:[%s18220_s8 + $0xa8] sm:$0xff]  }
 0x9bf   :  { %v3913_v41 = vpop.f32.mrb[246].mxu1  ;;  %v4020_v46 = vmul.f32 %v12870_v27, %v15739_v49  ;;  %v4040_v37 = vmul.f32 %v15875_v9, %v4019_v58  ;;  %10404 = vmatpush3.bf16.msra.mxu0 %v12391_v5  ;;  %10486 = vmatpush3.bf16.msra.mxu1 %v12392_v57 }
 0x9c0   :  { %v3981_v51 = vadd.f32 1e-05, %v3960_v2  ;;  %v3961_v42 = vmul.f32 0.03125, %v3913_v41  ;;  %v11516_v11 = vpop.f32.mrb[247].mxu1 }
 0x9c1   :  { %v4041_v55 = vmul.f32 %v15875_v9, %v4020_v46  ;;  %v12393_v46 = vld [vmem:[%s18220_s8 + $0x70] sm:$0xff]  }
 0x9c2   :  { %12875 = vrsqrt.f32 %v3981_v51  ;;  %v3982_v38 = vadd.f32 1e-05, %v3961_v42  ;;  %v12394_v51 = vld [vmem:[%s18220_s8 + $0xf0] sm:$0xff]   ;;  %10405 = vmatprep.subr.bf16.mxu0 %v12393_v46 }
 0x9c3   :  { %v4089_v44 = vpack.c.bf16 %v4041_v55, %v4040_v37  ;;  %v12395_v42 = vld [vmem:[%s18220_s8 + $0x30] sm:$0xff]   ;;  %v12397_v37 = vld [vmem:[%s18220_s8 + $0x78] sm:$0xff]   ;;  %10487 = vmatprep.subr.bf16.mxu1 %v12394_v51 }
 0x9c4   :  { %v12872_v36 = vpop.eup %12871  ;;  %12877 = vrsqrt.f32 %v3982_v38  ;;  %v12396_v11 = vld [vmem:[%s18220_s8 + $0xb0] sm:$0xff]   ;;  %v12398_v55 = vld [vmem:[%s18220_s8 + $0xf8] sm:$0xff]   ;;  %10406 = vmatpush3.bf16.msra.mxu0 %v12395_v42 }
 0x9c5   :  { %v4021_v6 = vmul.f32 %v12872_v36, %v15746_v45  ;;  %4329 = vmatmul.mubr.bf16.gmra.mrb[252].mxu0 %v4089_v44  ;;  %4470 = vmatmul.mubr.bf16.gmra.mrb[24].mxu1 %v4089_v44 }
 0x9c6   :  { %v12874_v60 = vpop.eup %12873  ;;  %4338 = vmatprep.mubr.bf16.mxu0 %v18475_v16  ;;  %4479 = vmatprep.mubr.bf16.mxu1 %v18475_v16 }
 0x9c7   :  { %v4022_v32 = vmul.f32 %v12874_v60, %v15751_v15  ;;  %v4042_v8 = vmul.f32 %v15875_v9, %v4021_v6  ;;  %10488 = vmatpush3.bf16.msra.mxu1 %v12396_v11  ;;  %v12399_v6 = vld [vmem:[%s18220_s8 + $0x38] sm:$0xff]   ;;  %10407 = vmatprep.subr.bf16.mxu0 %v12397_v37 }
 0x9c8   :  { %v12400_v60 = vld [vmem:[%s18220_s8 + $0xb8] sm:$0xff]   ;;  %10489 = vmatprep.subr.bf16.mxu1 %v12398_v55  ;;  %10408 = vmatpush3.bf16.msra.mxu0 %v12399_v6 }
 0x9c9   :  { %v4043_v3 = vmul.f32 %v15875_v9, %v4022_v32  ;;  %11533 = vmatprep.subr.bf16.mxu0 %v18440_v10 }
 0x9cb   :  { %v4090_v54 = vpack.c.bf16 %v4043_v3, %v4042_v8  ;;  %10490 = vmatpush3.bf16.msra.mxu1 %v12400_v60 }
 0x9cc   :  { %v12876_v1 = vpop.eup %12875 }
 0x9cd   :  { %v4023_v47 = vmul.f32 %v12876_v1, %v15758_v21  ;;  %4339 = vmatmul.mubr.bf16.gmra.mrb[0].mxu0 %v4090_v54  ;;  %4480 = vmatmul.mubr.bf16.gmra.mrb[28].mxu1 %v4090_v54 }
 0x9ce   :  { %v12878_v12 = vpop.eup %12877  ;;  %4348 = vmatprep.mubr.bf16.mxu0 %v18475_v16  ;;  %4489 = vmatprep.mubr.bf16.mxu1 %v18475_v16 }
 0x9cf   :  { %v4024_v59 = vmul.f32 %v12878_v12, %v15763_v0  ;;  %v4044_v53 = vmul.f32 %v15875_v9, %v4023_v47 }
 0x9d1   :  { %v4045_v23 = vmul.f32 %v15875_v9, %v4024_v59 }
 0x9d3   :  { %v4091_v14 = vpack.c.bf16 %v4045_v23, %v4044_v53 }
 0x9d4   :  { %v3918_v25 = vpop.f32.mrb[248].mxu1 }
 0x9d5   :  { %v3962_v56 = vmul.f32 0.03125, %v3918_v25  ;;  %v11519_v24 = vpop.f32.mrb[249].mxu1  ;;  %4349 = vmatmul.mubr.bf16.gmra.mrb[4].mxu0 %v4091_v14  ;;  %4490 = vmatmul.mubr.bf16.gmra.mrb[32].mxu1 %v4091_v14 }
 0x9d6   :  { %v3921_v13 = vpop.f32.mrb[250].mxu1  ;;  %4358 = vmatprep.mubr.bf16.mxu0 %v18475_v16  ;;  %4499 = vmatprep.mubr.bf16.mxu1 %v18475_v16 }
 0x9d7   :  { %v3983_v17 = vadd.f32 1e-05, %v3962_v56  ;;  %v3963_v4 = vmul.f32 0.03125, %v3921_v13  ;;  %v11520_v31 = vpop.f32.mrb[251].mxu1 }
 0x9d9   :  { %12879 = vrsqrt.f32 %v3983_v17  ;;  %v3984_v7 = vadd.f32 1e-05, %v3963_v4 }
 0x9db   :  { %12881 = vrsqrt.f32 %v3984_v7 }
 0x9dc   :  { %v3926_v50 = vpop.f32.mrb[252].mxu1 }
 0x9dd   :  { %v3964_v43 = vmul.f32 0.03125, %v3926_v50  ;;  %v11523_v20 = vpop.f32.mrb[253].mxu1 }
 0x9de   :  { %v3929_v58 = vpop.f32.mrb[254].mxu1 }
 0x9df   :  { %v3985_v27 = vadd.f32 1e-05, %v3964_v43  ;;  %v3965_v2 = vmul.f32 0.03125, %v3929_v58  ;;  %v11524_v52 = vpop.f32.mrb[255].mxu1 }
 0x9e1   :  { %12883 = vrsqrt.f32 %v3985_v27  ;;  %v3986_v41 = vadd.f32 1e-05, %v3965_v2 }
 0x9e3   :  { %v12880_v38 = vpop.eup %12879  ;;  %12885 = vrsqrt.f32 %v3986_v41 }
 0x9e4   :  { %v4025_v44 = vmul.f32 %v12880_v38, %v15772_v62  ;;  %v3934_v36 = vpop.f32.mrb[0].mxu1 }
 0x9e5   :  { %v12882_v32 = vpop.eup %12881  ;;  %v3966_v8 = vmul.f32 0.03125, %v3934_v36  ;;  %v11527_v3 = vpop.f32.mrb[1].mxu1 }
 0x9e6   :  { %v4026_v54 = vmul.f32 %v12882_v32, %v15775_v22  ;;  %v3937_v1 = vpop.f32.mrb[2].mxu1  ;;  %v4046_v53 = vmul.f32 %v15875_v9, %v4025_v44 }
 0x9e7   :  { %v3987_v47 = vadd.f32 1e-05, %v3966_v8  ;;  %v3967_v12 = vmul.f32 0.03125, %v3937_v1  ;;  %v11528_v59 = vpop.f32.mrb[3].mxu1 }
 0x9e8   :  { %v4047_v23 = vmul.f32 %v15875_v9, %v4026_v54 }
 0x9e9   :  { %12887 = vrsqrt.f32 %v3987_v47  ;;  %v3988_v14 = vadd.f32 1e-05, %v3967_v12 }
 0x9ea   :  { %v4092_v25 = vpack.c.bf16 %v4047_v23, %v4046_v53 }
 0x9eb   :  { %v12884_v56 = vpop.eup %12883  ;;  %12889 = vrsqrt.f32 %v3988_v14 }
 0x9ec   :  { %v4027_v24 = vmul.f32 %v12884_v56, %v15794_v39  ;;  %v3942_v13 = vpop.f32.mrb[4].mxu1  ;;  %4359 = vmatmul.mubr.bf16.gmra.mrb[8].mxu0 %v4092_v25  ;;  %4500 = vmatmul.mubr.bf16.gmra.mrb[36].mxu1 %v4092_v25 }
 0x9ed   :  { %v12886_v17 = vpop.eup %12885  ;;  %v3968_v4 = vmul.f32 0.03125, %v3942_v13  ;;  %v11531_v31 = vpop.f32.mrb[5].mxu1  ;;  %4368 = vmatprep.mubr.bf16.mxu0 %v18475_v16  ;;  %4509 = vmatprep.mubr.bf16.mxu1 %v18475_v16 }
 0x9ee   :  { %v4028_v7 = vmul.f32 %v12886_v17, %v15811_v35  ;;  %v3945_v50 = vpop.f32.mrb[6].mxu1  ;;  %v4048_v5 = vmul.f32 %v15875_v9, %v4027_v24 }
 0x9ef   :  { %v3989_v43 = vadd.f32 1e-05, %v3968_v4  ;;  %v11532_v20 = vpop.f32.mrb[7].mxu1 }
 0x9f0   :  { %v4049_v57 = vmul.f32 %v15875_v9, %v4028_v7 }
 0x9f1   :  { %12891 = vrsqrt.f32 %v3989_v43 }
 0x9f2   :  { %v4093_v58 = vpack.c.bf16 %v4049_v57, %v4048_v5  ;;  %v13260_v57 = vld [vmem:[%s18223_s11] sm:$0xff]  }
 0x9f3   :  { %v12888_v27 = vpop.eup %12887 }
 0x9f4   :  { %v4029_v2 = vmul.f32 %v12888_v27, %v15839_v26  ;;  %4369 = vmatmul.mubr.bf16.gmra.mrb[12].mxu0 %v4093_v58  ;;  %4510 = vmatmul.mubr.bf16.gmra.mrb[40].mxu1 %v4093_v58  ;;  %v13261_v58 = vld [vmem:[%s18223_s11 + $0x8] sm:$0xff]   ;;  %v13262_v27 = vld [vmem:[%s18223_s11 + $0x10] sm:$0xff]  }
 0x9f5   :  { %v12890_v52 = vpop.eup %12889  ;;  %4378 = vmatprep.mubr.bf16.mxu0 %v18475_v16  ;;  %4519 = vmatprep.mubr.bf16.mxu1 %v18475_v16 }
 0x9f6   :  { %v4030_v41 = vmul.f32 %v12890_v52, %v15847_v33  ;;  %v4050_v46 = vmul.f32 %v15875_v9, %v4029_v2 }
 0x9f8   :  { %v4051_v51 = vmul.f32 %v15875_v9, %v4030_v41  ;;  %v13263_v41 = vld [vmem:[%s18223_s11 + $0x18] sm:$0xff]  }
 0x9fa   :  { %v4094_v42 = vpack.c.bf16 %v4051_v51, %v4050_v46 }
 0x9fb   :  { %v12892_v11 = vpop.eup %12891 }
 0x9fc   :  { %v4031_v37 = vmul.f32 %v12892_v11, %v15866_v29  ;;  %4379 = vmatmul.mubr.bf16.gmra.mrb[16].mxu0 %v4094_v42  ;;  %4520 = vmatmul.mubr.bf16.gmra.mrb[44].mxu1 %v4094_v42 }
 0x9fd   :  { %4388 = vmatprep.mubr.bf16.mxu0 %v18475_v16  ;;  %4529 = vmatprep.mubr.bf16.mxu1 %v18475_v16 }
 0x9fe   :  { %v4052_v55 = vmul.f32 %v15875_v9, %v4031_v37 }
 0xa00   :  { %v4095_v38 = vpack.c.bf16 %v4052_v55, %v4052_v55 }
 0xa04   :  { %4389 = vmatmul.mubr.bf16.gmra.mrb[20].mxu0 %v4095_v38  ;;  %4530 = vmatmul.mubr.bf16.gmra.mrb[48].mxu1 %v4095_v38 }
 0xa58   :  { %v4290_v44 = vpop.f32.mrb[236].mxu0  ;;  %v4431_v36 = vpop.f32.mrb[8].mxu1 }
 0xa59   :  { %v4538_v6 = vmax.f32 %v4290_v44, 0.0  ;;  %v4540_v60 = vmax.f32 %v4431_v36, 0.0  ;;  %v4292_v32 = vpop.f32.mrb[237].mxu0  ;;  %v4433_v8 = vpop.f32.mrb[9].mxu1 }
 0xa5a   :  { %v4539_v3 = vmax.f32 %v4292_v32, 0.0  ;;  %v4541_v54 = vmax.f32 %v4433_v8, 0.0  ;;  %v4294_v1 = vpop.f32.mrb[238].mxu0  ;;  %v4435_v47 = vpop.f32.mrb[10].mxu1 }
 0xa5b   :  { %v4542_v12 = vmax.f32 %v4294_v1, 0.0  ;;  %v4544_v59 = vmax.f32 %v4435_v47, 0.0  ;;  %v4296_v53 = vpop.f32.mrb[239].mxu0  ;;  %v4437_v23 = vpop.f32.mrb[11].mxu1  ;;  %v4622_v9 = vmul.f32 %v4538_v6, %v4538_v6  ;;  %v4624_v56 = vmul.f32 %v4540_v60, %v4540_v60 }
 0xa5c   :  { %v4543_v14 = vmax.f32 %v4296_v53, 0.0  ;;  %v4545_v25 = vmax.f32 %v4437_v23, 0.0  ;;  %v4623_v17 = vmul.f32 %v4539_v3, %v4539_v3  ;;  %v4625_v4 = vmul.f32 %v4541_v54, %v4541_v54  ;;  %v13264_v54 = vld [vmem:[%s18223_s11 + $0x20] sm:$0xff]  }
 0xa5d   :  { %v4626_v24 = vmul.f32 %v4542_v12, %v4542_v12  ;;  %v4628_v13 = vmul.f32 %v4544_v59, %v4544_v59 }
 0xa5e   :  { %v4627_v31 = vmul.f32 %v4543_v14, %v4543_v14  ;;  %v4629_v7 = vmul.f32 %v4545_v25, %v4545_v25 }
 0xa5f   :  { %v4770_v50 = vpack.c.bf16 %v4626_v24, %v4622_v9  ;;  %v4772_v43 = vpack.c.bf16 %v4628_v13, %v4624_v56 }
 0xa60   :  { %v4771_v20 = vpack.c.bf16 %v4627_v31, %v4623_v17  ;;  %v4773_v5 = vpack.c.bf16 %v4629_v7, %v4625_v4  ;;  %v13265_v31 = vld [vmem:[%s18223_s11 + $0x28] sm:$0xff]  }
 0xa62   :  { %5038 = vmatprep.mubr.bf16.mxu0 %v4771_v20  ;;  %5158 = vmatprep.mubr.bf16.mxu1 %v4773_v5 }
 0xa63   :  { %5039 = vmatmul.mubr.bf16.vlgmr.msra.gmra.mrb[24].mxu0 %v4770_v50  ;;  %5159 = vmatmul.mubr.bf16.vlgmr.msra.gmra.mrb[52].mxu1 %v4772_v43 }
 0xa64   :  { %11534 = vmatpush3.bf16.msra.mxu0 %v13260_v57 }
 0xa65   :  { %11535 = vmatprep.subr.bf16.mxu0 %v18440_v10 }
 0xa68   :  { %11536 = vmatpush3.bf16.msra.mxu0 %v13261_v58 }
 0xa69   :  { %11537 = vmatprep.subr.bf16.mxu0 %v18440_v10 }
 0xa6c   :  { %11538 = vmatpush3.bf16.msra.mxu0 %v13262_v27 }
 0xa6d   :  { %11539 = vmatprep.subr.bf16.mxu0 %v18440_v10 }
 0xa70   :  { %11540 = vmatpush3.bf16.msra.mxu0 %v13263_v41 }
 0xa71   :  { %v4300_v2 = vpop.f32.mrb[240].mxu0  ;;  %v4441_v52 = vpop.f32.mrb[12].mxu1  ;;  %11541 = vmatprep.subr.bf16.mxu0 %v18440_v10 }
 0xa72   :  { %v4546_v46 = vmax.f32 %v4300_v2, 0.0  ;;  %v4548_v51 = vmax.f32 %v4441_v52, 0.0  ;;  %v4302_v42 = vpop.f32.mrb[241].mxu0  ;;  %v4443_v11 = vpop.f32.mrb[13].mxu1 }
 0xa73   :  { %v4547_v37 = vmax.f32 %v4302_v42, 0.0  ;;  %v4549_v55 = vmax.f32 %v4443_v11, 0.0  ;;  %v4304_v38 = vpop.f32.mrb[242].mxu0  ;;  %v4445_v44 = vpop.f32.mrb[14].mxu1  ;;  %v13266_v11 = vld [vmem:[%s18223_s11 + $0x30] sm:$0xff]  }
 0xa74   :  { %v4550_v36 = vmax.f32 %v4304_v38, 0.0  ;;  %v4552_v6 = vmax.f32 %v4445_v44, 0.0  ;;  %v4306_v60 = vpop.f32.mrb[243].mxu0  ;;  %v4447_v32 = vpop.f32.mrb[15].mxu1  ;;  %11542 = vmatpush3.bf16.msra.mxu0 %v13264_v54  ;;  %v4630_v1 = vmul.f32 %v4546_v46, %v4546_v46  ;;  %v4632_v47 = vmul.f32 %v4548_v51, %v4548_v51 }
 0xa75   :  { %v4551_v8 = vmax.f32 %v4306_v60, 0.0  ;;  %v4553_v3 = vmax.f32 %v4447_v32, 0.0  ;;  %11543 = vmatprep.subr.bf16.mxu0 %v18440_v10  ;;  %v4631_v53 = vmul.f32 %v4547_v37, %v4547_v37  ;;  %v4633_v23 = vmul.f32 %v4549_v55, %v4549_v55 }
 0xa76   :  { %v4634_v12 = vmul.f32 %v4550_v36, %v4550_v36  ;;  %v4636_v59 = vmul.f32 %v4552_v6, %v4552_v6 }
 0xa77   :  { %v4635_v14 = vmul.f32 %v4551_v8, %v4551_v8  ;;  %v4637_v25 = vmul.f32 %v4553_v3, %v4553_v3 }
 0xa78   :  { %v4774_v9 = vpack.c.bf16 %v4634_v12, %v4630_v1  ;;  %v4776_v56 = vpack.c.bf16 %v4636_v59, %v4632_v47  ;;  %11544 = vmatpush3.bf16.msra.mxu0 %v13265_v31  ;;  %v13267_v47 = vld [vmem:[%s18223_s11 + $0x38] sm:$0xff]  }
 0xa79   :  { %v4310_v24 = vpop.f32.mrb[244].mxu0  ;;  %v4451_v13 = vpop.f32.mrb[16].mxu1  ;;  %v4775_v17 = vpack.c.bf16 %v4635_v14, %v4631_v53  ;;  %v4777_v4 = vpack.c.bf16 %v4637_v25, %v4633_v23  ;;  %11545 = vmatprep.subr.bf16.mxu0 %v18440_v10 }
 0xa7a   :  { %v4554_v7 = vmax.f32 %v4310_v24, 0.0  ;;  %v4556_v50 = vmax.f32 %v4451_v13, 0.0  ;;  %v4312_v43 = vpop.f32.mrb[245].mxu0  ;;  %v4453_v20 = vpop.f32.mrb[17].mxu1 }
 0xa7b   :  { %v4555_v5 = vmax.f32 %v4312_v43, 0.0  ;;  %v4557_v57 = vmax.f32 %v4453_v20, 0.0  ;;  %v4314_v58 = vpop.f32.mrb[246].mxu0  ;;  %v4455_v27 = vpop.f32.mrb[18].mxu1  ;;  %5046 = vmatprep.mubr.bf16.mxu0 %v4775_v17  ;;  %5166 = vmatprep.mubr.bf16.mxu1 %v4777_v4 }
 0xa7c   :  { %v4558_v2 = vmax.f32 %v4314_v58, 0.0  ;;  %v4560_v52 = vmax.f32 %v4455_v27, 0.0  ;;  %v4316_v41 = vpop.f32.mrb[247].mxu0  ;;  %v4457_v46 = vpop.f32.mrb[19].mxu1  ;;  %5047 = vmatmul.mubr.bf16.gmra.mrb[28].mxu0 %v4774_v9  ;;  %5167 = vmatmul.mubr.bf16.gmra.mrb[56].mxu1 %v4776_v56  ;;  %v4638_v37 = vmul.f32 %v4554_v7, %v4554_v7  ;;  %v4640_v55 = vmul.f32 %v4556_v50, %v4556_v50 }
 0xa7d   :  { %v4559_v51 = vmax.f32 %v4316_v41, 0.0  ;;  %v4561_v42 = vmax.f32 %v4457_v46, 0.0  ;;  %11546 = vmatpush3.bf16.msra.mxu0 %v13266_v11  ;;  %v4639_v36 = vmul.f32 %v4555_v5, %v4555_v5  ;;  %v4641_v6 = vmul.f32 %v4557_v57, %v4557_v57 }
 0xa7e   :  { %v4642_v38 = vmul.f32 %v4558_v2, %v4558_v2  ;;  %v4644_v44 = vmul.f32 %v4560_v52, %v4560_v52  ;;  %11547 = vmatprep.subr.bf16.mxu0 %v18440_v10 }
 0xa7f   :  { %v4643_v60 = vmul.f32 %v4559_v51, %v4559_v51  ;;  %v4645_v32 = vmul.f32 %v4561_v42, %v4561_v42 }
 0xa80   :  { %v4778_v8 = vpack.c.bf16 %v4642_v38, %v4638_v37  ;;  %v4780_v3 = vpack.c.bf16 %v4644_v44, %v4640_v55 }
 0xa81   :  { %v4779_v54 = vpack.c.bf16 %v4643_v60, %v4639_v36  ;;  %v4781_v1 = vpack.c.bf16 %v4645_v32, %v4641_v6  ;;  %11548 = vmatpush3.bf16.msra.mxu0 %v13267_v47 }
 0xa82   :  { %11593 = vmatprep.subr.bf16.mxu0 %v18440_v10 }
 0xa83   :  { %5054 = vmatprep.mubr.bf16.mxu0 %v4779_v54  ;;  %5174 = vmatprep.mubr.bf16.mxu1 %v4781_v1 }
 0xa84   :  { %5055 = vmatmul.mubr.bf16.gmra.mrb[32].mxu0 %v4778_v8  ;;  %5175 = vmatmul.mubr.bf16.gmra.mrb[60].mxu1 %v4780_v3 }
 0xa90   :  { %v4320_v12 = vpop.f32.mrb[248].mxu0  ;;  %v4461_v59 = vpop.f32.mrb[20].mxu1 }
 0xa91   :  { %v4562_v53 = vmax.f32 %v4320_v12, 0.0  ;;  %v4564_v23 = vmax.f32 %v4461_v59, 0.0  ;;  %v4322_v14 = vpop.f32.mrb[249].mxu0  ;;  %v4463_v25 = vpop.f32.mrb[21].mxu1 }
 0xa92   :  { %v4563_v9 = vmax.f32 %v4322_v14, 0.0  ;;  %v4565_v56 = vmax.f32 %v4463_v25, 0.0  ;;  %v4324_v24 = vpop.f32.mrb[250].mxu0  ;;  %v4465_v13 = vpop.f32.mrb[22].mxu1 }
 0xa93   :  { %v4566_v17 = vmax.f32 %v4324_v24, 0.0  ;;  %v4568_v4 = vmax.f32 %v4465_v13, 0.0  ;;  %v4326_v31 = vpop.f32.mrb[251].mxu0  ;;  %v4467_v7 = vpop.f32.mrb[23].mxu1  ;;  %v4646_v20 = vmul.f32 %v4562_v53, %v4562_v53  ;;  %v4648_v5 = vmul.f32 %v4564_v23, %v4564_v23 }
 0xa94   :  { %v4567_v50 = vmax.f32 %v4326_v31, 0.0  ;;  %v4569_v43 = vmax.f32 %v4467_v7, 0.0  ;;  %v4647_v27 = vmul.f32 %v4563_v9, %v4563_v9  ;;  %v4649_v2 = vmul.f32 %v4565_v56, %v4565_v56 }
 0xa95   :  { %v4650_v57 = vmul.f32 %v4566_v17, %v4566_v17  ;;  %v4652_v58 = vmul.f32 %v4568_v4, %v4568_v4 }
 0xa96   :  { %v4651_v52 = vmul.f32 %v4567_v50, %v4567_v50  ;;  %v4653_v41 = vmul.f32 %v4569_v43, %v4569_v43 }
 0xa97   :  { %v4782_v46 = vpack.c.bf16 %v4650_v57, %v4646_v20  ;;  %v4784_v51 = vpack.c.bf16 %v4652_v58, %v4648_v5 }
 0xa98   :  { %v4330_v42 = vpop.f32.mrb[252].mxu0  ;;  %v4471_v11 = vpop.f32.mrb[24].mxu1  ;;  %v4783_v37 = vpack.c.bf16 %v4651_v52, %v4647_v27  ;;  %v4785_v55 = vpack.c.bf16 %v4653_v41, %v4649_v2 }
 0xa99   :  { %v4570_v38 = vmax.f32 %v4330_v42, 0.0  ;;  %v4572_v44 = vmax.f32 %v4471_v11, 0.0  ;;  %v4332_v36 = vpop.f32.mrb[253].mxu0  ;;  %v4473_v6 = vpop.f32.mrb[25].mxu1 }
 0xa9a   :  { %v4571_v60 = vmax.f32 %v4332_v36, 0.0  ;;  %v4573_v32 = vmax.f32 %v4473_v6, 0.0  ;;  %5062 = vmatprep.mubr.bf16.mxu0 %v4783_v37  ;;  %5182 = vmatprep.mubr.bf16.mxu1 %v4785_v55  ;;  %v4334_v8 = vpop.f32.mrb[254].mxu0  ;;  %v4475_v3 = vpop.f32.mrb[26].mxu1 }
 0xa9b   :  { %v4574_v54 = vmax.f32 %v4334_v8, 0.0  ;;  %v4576_v1 = vmax.f32 %v4475_v3, 0.0  ;;  %5063 = vmatmul.mubr.bf16.gmra.mrb[36].mxu0 %v4782_v46  ;;  %5183 = vmatmul.mubr.bf16.gmra.mrb[64].mxu1 %v4784_v51  ;;  %v4336_v47 = vpop.f32.mrb[255].mxu0  ;;  %v4477_v12 = vpop.f32.mrb[27].mxu1  ;;  %v4654_v23 = vmul.f32 %v4570_v38, %v4570_v38  ;;  %v4656_v14 = vmul.f32 %v4572_v44, %v4572_v44 }
 0xa9c   :  { %v4575_v59 = vmax.f32 %v4336_v47, 0.0  ;;  %v4577_v53 = vmax.f32 %v4477_v12, 0.0  ;;  %v4655_v56 = vmul.f32 %v4571_v60, %v4571_v60  ;;  %v4657_v24 = vmul.f32 %v4573_v32, %v4573_v32 }
 0xa9d   :  { %v4658_v25 = vmul.f32 %v4574_v54, %v4574_v54  ;;  %v4660_v9 = vmul.f32 %v4576_v1, %v4576_v1 }
 0xa9e   :  { %v4659_v13 = vmul.f32 %v4575_v59, %v4575_v59  ;;  %v4661_v17 = vmul.f32 %v4577_v53, %v4577_v53 }
 0xa9f   :  { %v4786_v4 = vpack.c.bf16 %v4658_v25, %v4654_v23  ;;  %v4788_v31 = vpack.c.bf16 %v4660_v9, %v4656_v14 }
 0xaa0   :  { %v4340_v7 = vpop.f32.mrb[0].mxu0  ;;  %v4481_v50 = vpop.f32.mrb[28].mxu1  ;;  %v4787_v43 = vpack.c.bf16 %v4659_v13, %v4655_v56  ;;  %v4789_v20 = vpack.c.bf16 %v4661_v17, %v4657_v24 }
 0xaa1   :  { %v4578_v5 = vmax.f32 %v4340_v7, 0.0  ;;  %v4580_v57 = vmax.f32 %v4481_v50, 0.0  ;;  %v4342_v58 = vpop.f32.mrb[1].mxu0  ;;  %v4483_v27 = vpop.f32.mrb[29].mxu1 }
 0xaa2   :  { %v4579_v2 = vmax.f32 %v4342_v58, 0.0  ;;  %v4581_v52 = vmax.f32 %v4483_v27, 0.0  ;;  %v4344_v41 = vpop.f32.mrb[2].mxu0  ;;  %v4485_v46 = vpop.f32.mrb[30].mxu1  ;;  %5070 = vmatprep.mubr.bf16.mxu0 %v4787_v43  ;;  %5190 = vmatprep.mubr.bf16.mxu1 %v4789_v20 }
 0xaa3   :  { %v4582_v51 = vmax.f32 %v4344_v41, 0.0  ;;  %v4584_v42 = vmax.f32 %v4485_v46, 0.0  ;;  %v4346_v11 = vpop.f32.mrb[3].mxu0  ;;  %v4487_v37 = vpop.f32.mrb[31].mxu1  ;;  %5071 = vmatmul.mubr.bf16.gmra.mrb[40].mxu0 %v4786_v4  ;;  %5191 = vmatmul.mubr.bf16.gmra.mrb[68].mxu1 %v4788_v31  ;;  %v4662_v44 = vmul.f32 %v4578_v5, %v4578_v5  ;;  %v4664_v36 = vmul.f32 %v4580_v57, %v4580_v57 }
 0xaa4   :  { %v4583_v55 = vmax.f32 %v4346_v11, 0.0  ;;  %v4585_v38 = vmax.f32 %v4487_v37, 0.0  ;;  %v4663_v32 = vmul.f32 %v4579_v2, %v4579_v2  ;;  %v4665_v8 = vmul.f32 %v4581_v52, %v4581_v52 }
 0xaa5   :  { %v4666_v6 = vmul.f32 %v4582_v51, %v4582_v51  ;;  %v4668_v60 = vmul.f32 %v4584_v42, %v4584_v42 }
 0xaa6   :  { %v4667_v3 = vmul.f32 %v4583_v55, %v4583_v55  ;;  %v4669_v54 = vmul.f32 %v4585_v38, %v4585_v38 }
 0xaa7   :  { %v4790_v1 = vpack.c.bf16 %v4666_v6, %v4662_v44  ;;  %v4792_v47 = vpack.c.bf16 %v4668_v60, %v4664_v36 }
 0xaa8   :  { %v4350_v12 = vpop.f32.mrb[4].mxu0  ;;  %v4491_v59 = vpop.f32.mrb[32].mxu1  ;;  %v4791_v53 = vpack.c.bf16 %v4667_v3, %v4663_v32  ;;  %v4793_v23 = vpack.c.bf16 %v4669_v54, %v4665_v8 }
 0xaa9   :  { %v4586_v14 = vmax.f32 %v4350_v12, 0.0  ;;  %v4588_v25 = vmax.f32 %v4491_v59, 0.0  ;;  %v4352_v9 = vpop.f32.mrb[5].mxu0  ;;  %v4493_v56 = vpop.f32.mrb[33].mxu1 }
 0xaaa   :  { %v4587_v24 = vmax.f32 %v4352_v9, 0.0  ;;  %v4589_v13 = vmax.f32 %v4493_v56, 0.0  ;;  %v4354_v17 = vpop.f32.mrb[6].mxu0  ;;  %v4495_v4 = vpop.f32.mrb[34].mxu1  ;;  %5078 = vmatprep.mubr.bf16.mxu0 %v4791_v53  ;;  %5198 = vmatprep.mubr.bf16.mxu1 %v4793_v23 }
 0xaab   :  { %v4590_v31 = vmax.f32 %v4354_v17, 0.0  ;;  %v4592_v7 = vmax.f32 %v4495_v4, 0.0  ;;  %v4356_v50 = vpop.f32.mrb[7].mxu0  ;;  %v4497_v43 = vpop.f32.mrb[35].mxu1  ;;  %5079 = vmatmul.mubr.bf16.gmra.mrb[44].mxu0 %v4790_v1  ;;  %5199 = vmatmul.mubr.bf16.gmra.mrb[72].mxu1 %v4792_v47  ;;  %v4670_v57 = vmul.f32 %v4586_v14, %v4586_v14  ;;  %v4672_v58 = vmul.f32 %v4588_v25, %v4588_v25 }
 0xaac   :  { %v4591_v20 = vmax.f32 %v4356_v50, 0.0  ;;  %v4593_v5 = vmax.f32 %v4497_v43, 0.0  ;;  %v4671_v52 = vmul.f32 %v4587_v24, %v4587_v24  ;;  %v4673_v41 = vmul.f32 %v4589_v13, %v4589_v13 }
 0xaad   :  { %v4674_v27 = vmul.f32 %v4590_v31, %v4590_v31  ;;  %v4676_v2 = vmul.f32 %v4592_v7, %v4592_v7 }
 0xaae   :  { %v4675_v46 = vmul.f32 %v4591_v20, %v4591_v20  ;;  %v4677_v51 = vmul.f32 %v4593_v5, %v4593_v5 }
 0xaaf   :  { %v4794_v42 = vpack.c.bf16 %v4674_v27, %v4670_v57  ;;  %v4796_v11 = vpack.c.bf16 %v4676_v2, %v4672_v58 }
 0xab0   :  { %v4795_v37 = vpack.c.bf16 %v4675_v46, %v4671_v52  ;;  %v4797_v55 = vpack.c.bf16 %v4677_v51, %v4673_v41 }
 0xab2   :  { %5086 = vmatprep.mubr.bf16.mxu0 %v4795_v37  ;;  %5206 = vmatprep.mubr.bf16.mxu1 %v4797_v55 }
 0xab3   :  { %5087 = vmatmul.mubr.bf16.gmra.mrb[48].mxu0 %v4794_v42  ;;  %5207 = vmatmul.mubr.bf16.gmra.mrb[76].mxu1 %v4796_v11 }
 0xabf   :  { %v4360_v38 = vpop.f32.mrb[8].mxu0  ;;  %v4501_v44 = vpop.f32.mrb[36].mxu1 }
 0xac0   :  { %v4594_v36 = vmax.f32 %v4360_v38, 0.0  ;;  %v4596_v6 = vmax.f32 %v4501_v44, 0.0  ;;  %v4362_v60 = vpop.f32.mrb[9].mxu0  ;;  %v4503_v32 = vpop.f32.mrb[37].mxu1 }
 0xac1   :  { %v4595_v8 = vmax.f32 %v4362_v60, 0.0  ;;  %v4597_v3 = vmax.f32 %v4503_v32, 0.0  ;;  %v4364_v54 = vpop.f32.mrb[10].mxu0  ;;  %v4505_v1 = vpop.f32.mrb[38].mxu1 }
 0xac2   :  { %v4598_v47 = vmax.f32 %v4364_v54, 0.0  ;;  %v4600_v12 = vmax.f32 %v4505_v1, 0.0  ;;  %v4366_v59 = vpop.f32.mrb[11].mxu0  ;;  %v4507_v53 = vpop.f32.mrb[39].mxu1  ;;  %v4678_v25 = vmul.f32 %v4594_v36, %v4594_v36  ;;  %v4680_v9 = vmul.f32 %v4596_v6, %v4596_v6 }
 0xac3   :  { %v4599_v23 = vmax.f32 %v4366_v59, 0.0  ;;  %v4601_v14 = vmax.f32 %v4507_v53, 0.0  ;;  %v4679_v13 = vmul.f32 %v4595_v8, %v4595_v8  ;;  %v4681_v17 = vmul.f32 %v4597_v3, %v4597_v3 }
 0xac4   :  { %v4682_v56 = vmul.f32 %v4598_v47, %v4598_v47  ;;  %v4684_v24 = vmul.f32 %v4600_v12, %v4600_v12 }
 0xac5   :  { %v4683_v4 = vmul.f32 %v4599_v23, %v4599_v23  ;;  %v4685_v31 = vmul.f32 %v4601_v14, %v4601_v14 }
 0xac6   :  { %v4798_v7 = vpack.c.bf16 %v4682_v56, %v4678_v25  ;;  %v4800_v50 = vpack.c.bf16 %v4684_v24, %v4680_v9 }
 0xac7   :  { %v4370_v43 = vpop.f32.mrb[12].mxu0  ;;  %v4511_v20 = vpop.f32.mrb[40].mxu1  ;;  %v4799_v5 = vpack.c.bf16 %v4683_v4, %v4679_v13  ;;  %v4801_v57 = vpack.c.bf16 %v4685_v31, %v4681_v17 }
 0xac8   :  { %v4602_v58 = vmax.f32 %v4370_v43, 0.0  ;;  %v4604_v27 = vmax.f32 %v4511_v20, 0.0  ;;  %v4372_v2 = vpop.f32.mrb[13].mxu0  ;;  %v4513_v52 = vpop.f32.mrb[41].mxu1 }
 0xac9   :  { %v4603_v41 = vmax.f32 %v4372_v2, 0.0  ;;  %v4605_v46 = vmax.f32 %v4513_v52, 0.0  ;;  %v4374_v51 = vpop.f32.mrb[14].mxu0  ;;  %v4515_v42 = vpop.f32.mrb[42].mxu1  ;;  %5094 = vmatprep.mubr.bf16.mxu0 %v4799_v5  ;;  %5214 = vmatprep.mubr.bf16.mxu1 %v4801_v57 }
 0xaca   :  { %v4606_v11 = vmax.f32 %v4374_v51, 0.0  ;;  %v4608_v37 = vmax.f32 %v4515_v42, 0.0  ;;  %v4376_v55 = vpop.f32.mrb[15].mxu0  ;;  %v4517_v38 = vpop.f32.mrb[43].mxu1  ;;  %5095 = vmatmul.mubr.bf16.gmra.mrb[52].mxu0 %v4798_v7  ;;  %5215 = vmatmul.mubr.bf16.gmra.mrb[80].mxu1 %v4800_v50  ;;  %v4686_v6 = vmul.f32 %v4602_v58, %v4602_v58  ;;  %v4688_v60 = vmul.f32 %v4604_v27, %v4604_v27 }
 0xacb   :  { %v4607_v44 = vmax.f32 %v4376_v55, 0.0  ;;  %v4609_v36 = vmax.f32 %v4517_v38, 0.0  ;;  %v4687_v3 = vmul.f32 %v4603_v41, %v4603_v41  ;;  %v4689_v54 = vmul.f32 %v4605_v46, %v4605_v46 }
 0xacc   :  { %v4690_v32 = vmul.f32 %v4606_v11, %v4606_v11  ;;  %v4692_v8 = vmul.f32 %v4608_v37, %v4608_v37 }
 0xacd   :  { %v4691_v1 = vmul.f32 %v4607_v44, %v4607_v44  ;;  %v4693_v47 = vmul.f32 %v4609_v36, %v4609_v36 }
 0xace   :  { %v4802_v12 = vpack.c.bf16 %v4690_v32, %v4686_v6  ;;  %v4804_v59 = vpack.c.bf16 %v4692_v8, %v4688_v60 }
 0xacf   :  { %v4380_v53 = vpop.f32.mrb[16].mxu0  ;;  %v4521_v23 = vpop.f32.mrb[44].mxu1  ;;  %v4803_v14 = vpack.c.bf16 %v4691_v1, %v4687_v3  ;;  %v4805_v25 = vpack.c.bf16 %v4693_v47, %v4689_v54 }
 0xad0   :  { %v4610_v9 = vmax.f32 %v4380_v53, 0.0  ;;  %v4612_v56 = vmax.f32 %v4521_v23, 0.0  ;;  %v4382_v24 = vpop.f32.mrb[17].mxu0  ;;  %v4523_v13 = vpop.f32.mrb[45].mxu1 }
 0xad1   :  { %v4611_v17 = vmax.f32 %v4382_v24, 0.0  ;;  %v4613_v4 = vmax.f32 %v4523_v13, 0.0  ;;  %v4384_v31 = vpop.f32.mrb[18].mxu0  ;;  %v4525_v7 = vpop.f32.mrb[46].mxu1  ;;  %5102 = vmatprep.mubr.bf16.mxu0 %v4803_v14  ;;  %5222 = vmatprep.mubr.bf16.mxu1 %v4805_v25 }
 0xad2   :  { %v4614_v50 = vmax.f32 %v4384_v31, 0.0  ;;  %v4616_v43 = vmax.f32 %v4525_v7, 0.0  ;;  %v4386_v20 = vpop.f32.mrb[19].mxu0  ;;  %v4527_v5 = vpop.f32.mrb[47].mxu1  ;;  %5103 = vmatmul.mubr.bf16.gmra.mrb[56].mxu0 %v4802_v12  ;;  %5223 = vmatmul.mubr.bf16.gmra.mrb[84].mxu1 %v4804_v59  ;;  %v4694_v27 = vmul.f32 %v4610_v9, %v4610_v9  ;;  %v4696_v2 = vmul.f32 %v4612_v56, %v4612_v56 }
 0xad3   :  { %v4615_v57 = vmax.f32 %v4386_v20, 0.0  ;;  %v4617_v58 = vmax.f32 %v4527_v5, 0.0  ;;  %v4695_v46 = vmul.f32 %v4611_v17, %v4611_v17  ;;  %v4697_v51 = vmul.f32 %v4613_v4, %v4613_v4 }
 0xad4   :  { %v4698_v52 = vmul.f32 %v4614_v50, %v4614_v50  ;;  %v4700_v41 = vmul.f32 %v4616_v43, %v4616_v43 }
 0xad5   :  { %v4699_v42 = vmul.f32 %v4615_v57, %v4615_v57  ;;  %v4701_v11 = vmul.f32 %v4617_v58, %v4617_v58 }
 0xad6   :  { %v4806_v37 = vpack.c.bf16 %v4698_v52, %v4694_v27  ;;  %v4808_v55 = vpack.c.bf16 %v4700_v41, %v4696_v2 }
 0xad7   :  { %v4390_v38 = vpop.f32.mrb[20].mxu0  ;;  %v4531_v44 = vpop.f32.mrb[48].mxu1  ;;  %v4807_v36 = vpack.c.bf16 %v4699_v42, %v4695_v46  ;;  %v4809_v6 = vpack.c.bf16 %v4701_v11, %v4697_v51 }
 0xad8   :  { %v4618_v60 = vmax.f32 %v4390_v38, 0.0  ;;  %v4620_v32 = vmax.f32 %v4531_v44, 0.0  ;;  %v4392_v8 = vpop.f32.mrb[21].mxu0  ;;  %v4533_v3 = vpop.f32.mrb[49].mxu1  ;;  %v12403_v38 = vld [vmem:[#allocation4 + $0xc4] ss:$12 sps:$4 sm:$0xff]  }
 0xad9   :  { %v4619_v54 = vmax.f32 %v4392_v8, 0.0  ;;  %v4621_v1 = vmax.f32 %v4533_v3, 0.0  ;;  %v4394_v47 = vpop.f32.mrb[22].mxu0  ;;  %v4535_v12 = vpop.f32.mrb[50].mxu1  ;;  %5110 = vmatprep.mubr.bf16.mxu0 %v4807_v36  ;;  %5230 = vmatprep.mubr.bf16.mxu1 %v4809_v6  ;;  %v12406_v36 = vld [vmem:[#allocation4 + $0xdc] ss:$12 sps:$4 sm:$0xff]  }
 0xada   :  { %v4395_v59 = vpop.f32.mrb[23].mxu0  ;;  %v4536_v53 = vpop.f32.mrb[51].mxu1  ;;  %5111 = vmatmul.mubr.bf16.gmra.mrb[60].mxu0 %v4806_v37  ;;  %5231 = vmatmul.mubr.bf16.gmra.mrb[88].mxu1 %v4808_v55  ;;  %v4702_v25 = vmul.f32 %v4618_v60, %v4618_v60  ;;  %v4704_v9 = vmul.f32 %v4620_v32, %v4620_v32  ;;  %v12401_v55 = vld [vmem:[#allocation4 + $0xc0] ss:$12 sps:$4 sm:$0xff]   ;;  %v12407_v6 = vld [vmem:[#allocation4 + $0xc8] ss:$12 sps:$4 sm:$0xff]  }
 0xadb   :  { %v4703_v23 = vmul.f32 %v4619_v54, %v4619_v54  ;;  %v4705_v14 = vmul.f32 %v4621_v1, %v4621_v1  ;;  %5706 = vmatprep.subr.bf16.mxu1 %v12403_v38  ;;  %v12408_v60 = vld [vmem:[#allocation4 + $0xe0] ss:$12 sps:$4 sm:$0xff]   ;;  %v12409_v32 = vld [vmem:[#allocation4 + $0xf0] ss:$12 sps:$4 sm:$0xff]  }
 0xadc   :  { %v4810_v13 = vpack.c.bf16 %v4702_v25, %v4702_v25  ;;  %v4812_v17 = vpack.c.bf16 %v4704_v9, %v4704_v9  ;;  %5707 = vmatpush1.bf16.msra.mxu1 %v12401_v55 }
 0xadd   :  { %v4811_v56 = vpack.c.bf16 %v4703_v23, %v4703_v23  ;;  %v4813_v24 = vpack.c.bf16 %v4705_v14, %v4705_v14  ;;  %5708 = vmatprep.subr.bf16.mxu1 %v12406_v36 }
 0xadf   :  { %5118 = vmatprep.mubr.bf16.mxu0 %v4811_v56  ;;  %5238 = vmatprep.mubr.bf16.mxu1 %v4813_v24 }
 0xae2   :  { %5119 = vmatmul.mubr.bf16.gmra.mrb[64].mxu0 %v4810_v13  ;;  %5239 = vmatmul.mubr.bf16.gmra.mrb[92].mxu1 %v4812_v17 }
 0xae3   :  { %11549 = vmatprep.mubr.msk.bf16.mxu0 %vm13585_vm0, %v18440_v10  ;;  %5738 = vmatprep.mubr.bf16.mxu1 %v18475_v16 }
 0xb36   :  { %v10409_v4 = vpop.f32.mrb[24].mxu0  ;;  %v10491_v31 = vpop.f32.mrb[52].mxu1 }
 0xb37   :  { %v10410_v7 = vpop.f32.mrb[25].mxu0  ;;  %v10492_v50 = vpop.f32.mrb[53].mxu1 }
 0xb38   :  { %v10411_v43 = vadd.f32 %v10410_v7, %v10409_v4  ;;  %v10493_v20 = vadd.f32 %v10492_v50, %v10491_v31  ;;  %v10412_v5 = vpop.f32.mrb[26].mxu0  ;;  %v10494_v57 = vpop.f32.mrb[54].mxu1 }
 0xb39   :  { %v10413_v58 = vpop.f32.mrb[27].mxu0  ;;  %v10495_v27 = vpop.f32.mrb[55].mxu1 }
 0xb3a   :  { %v5161_v2 = vadd.f32 %v10493_v20, %v10411_v43  ;;  %v10414_v52 = vadd.f32 %v10413_v58, %v10412_v5  ;;  %v10496_v41 = vadd.f32 %v10495_v27, %v10494_v57 }
 0xb3c   :  { %v16070_v46 = vadd.f32 %v5161_v2, %v15652_v19  ;;  %v5164_v51 = vadd.f32 %v10496_v41, %v10414_v52  ;;  %v12404_v19 = vld [vmem:[#allocation4 + $0xd8] ss:$12 sps:$4 sm:$0xff]  }
 0xb3d   :  { %5709 = vmatpush1.bf16.msra.mxu1 %v12404_v19 }
 0xb3e   :  { %18497 = vst [vmem:[#allocation70_spill] sm:$0xff] %v16070_v46  ;;  %v16073_v42 = vadd.f32 %v5164_v51, %v15655_v40  ;;  %v5271_v11 = vmul.f32 %v16070_v46, %v16070_v46  ;;  %v12411_v40 = vld [vmem:[#allocation4 + $0xf4] ss:$12 sps:$4 sm:$0xff]  }
 0xb3f   :  { %5710 = vmatprep.subr.bf16.mxu1 %v12411_v40 }
 0xb40   :  { %18498 = vst [vmem:[#allocation68_spill] sm:$0xff] %v16073_v42  ;;  %v5272_v37 = vmul.f32 %v16073_v42, %v16073_v42 }
 0xb41   :  { %5711 = vmatpush1.bf16.msra.mxu1 %v12409_v32 }
 0xb42   :  { %v5292_v44 = vpack.c.bf16 %v5272_v37, %v5271_v11 }
 0xb44   :  { %11550 = vmatmul.mubr.bf16.vlgmr.msra.gmra.mrb[68].mxu0 %v5292_v44 }
 0xb45   :  { %11553 = vmatprep.mubr.msk.bf16.mxu0 %vm13585_vm0, %v18440_v10  ;;  %11594 = vmatpush3.bf16.msra.mxu0 %v12407_v6 }
 0xb46   :  { %11595 = vmatprep.subr.bf16.mxu0 %v18440_v10 }
 0xb49   :  { %11596 = vmatpush3.bf16.msra.mxu0 %v12408_v60 }
 0xb4a   :  { %11597 = vmatprep.subr.bf16.mxu0 %v18440_v10 }
 0xb4f   :  { %v10415_v8 = vpop.f32.mrb[28].mxu0  ;;  %v10497_v3 = vpop.f32.mrb[56].mxu1 }
 0xb50   :  { %v10416_v54 = vpop.f32.mrb[29].mxu0  ;;  %v10498_v1 = vpop.f32.mrb[57].mxu1 }
 0xb51   :  { %v10417_v47 = vadd.f32 %v10416_v54, %v10415_v8  ;;  %v10499_v12 = vadd.f32 %v10498_v1, %v10497_v3  ;;  %v10418_v59 = vpop.f32.mrb[30].mxu0  ;;  %v10500_v53 = vpop.f32.mrb[58].mxu1 }
 0xb52   :  { %v10419_v23 = vpop.f32.mrb[31].mxu0  ;;  %v10501_v14 = vpop.f32.mrb[59].mxu1 }
 0xb53   :  { %v5169_v25 = vadd.f32 %v10499_v12, %v10417_v47  ;;  %v10420_v9 = vadd.f32 %v10419_v23, %v10418_v59  ;;  %v10502_v56 = vadd.f32 %v10501_v14, %v10500_v53 }
 0xb55   :  { %v16084_v24 = vadd.f32 %v5169_v25, %v15700_v34  ;;  %v5172_v13 = vadd.f32 %v10502_v56, %v10420_v9 }
 0xb57   :  { %18499 = vst [vmem:[#allocation74_spill] sm:$0xff] %v16084_v24  ;;  %v16087_v17 = vadd.f32 %v5172_v13, %v15703_v61  ;;  %v10421_v4 = vpop.f32.mrb[32].mxu0  ;;  %v10503_v31 = vpop.f32.mrb[60].mxu1  ;;  %v5273_v43 = vmul.f32 %v16084_v24, %v16084_v24 }
 0xb58   :  { %v10422_v7 = vpop.f32.mrb[33].mxu0  ;;  %v10504_v50 = vpop.f32.mrb[61].mxu1 }
 0xb59   :  { %18500 = vst [vmem:[#allocation72_spill] sm:$0xff] %v16087_v17  ;;  %v5274_v20 = vmul.f32 %v16087_v17, %v16087_v17  ;;  %v10423_v5 = vadd.f32 %v10422_v7, %v10421_v4  ;;  %v10505_v57 = vadd.f32 %v10504_v50, %v10503_v31  ;;  %v10424_v58 = vpop.f32.mrb[34].mxu0  ;;  %v10506_v27 = vpop.f32.mrb[62].mxu1 }
 0xb5a   :  { %v10425_v34 = vpop.f32.mrb[35].mxu0  ;;  %v10507_v2 = vpop.f32.mrb[63].mxu1 }
 0xb5b   :  { %v5293_v52 = vpack.c.bf16 %v5274_v20, %v5273_v43  ;;  %v5177_v41 = vadd.f32 %v10505_v57, %v10423_v5  ;;  %v10426_v61 = vadd.f32 %v10425_v34, %v10424_v58  ;;  %v10508_v51 = vadd.f32 %v10507_v2, %v10506_v27 }
 0xb5d   :  { %v16094_v11 = vadd.f32 %v5177_v41, %v15710_v63  ;;  %v5180_v37 = vadd.f32 %v10508_v51, %v10426_v61  ;;  %11554 = vmatmul.mubr.bf16.gmra.mrb[72].mxu0 %v5293_v52 }
 0xb5e   :  { %11557 = vmatprep.mubr.msk.bf16.mxu0 %vm13585_vm0, %v18440_v10 }
 0xb5f   :  { %18501 = vst [vmem:[#allocation76_spill] sm:$0xff] %v16094_v11  ;;  %v16099_v55 = vadd.f32 %v5180_v37, %v15715_v28  ;;  %v5275_v38 = vmul.f32 %v16094_v11, %v16094_v11 }
 0xb61   :  { %18502 = vst [vmem:[#allocation69_spill] sm:$0xff] %v16099_v55  ;;  %v5276_v44 = vmul.f32 %v16099_v55, %v16099_v55 }
 0xb63   :  { %v5294_v36 = vpack.c.bf16 %v5276_v44, %v5275_v38 }
 0xb65   :  { %11558 = vmatmul.mubr.bf16.gmra.mrb[76].mxu0 %v5294_v36 }
 0xb66   :  { %11561 = vmatprep.mubr.msk.bf16.mxu0 %vm13585_vm0, %v18440_v10 }
 0xb6e   :  { %v10427_v63 = vpop.f32.mrb[36].mxu0  ;;  %v10509_v6 = vpop.f32.mrb[64].mxu1 }
 0xb6f   :  { %v10428_v19 = vpop.f32.mrb[37].mxu0  ;;  %v10510_v40 = vpop.f32.mrb[65].mxu1 }
 0xb70   :  { %v10429_v60 = vadd.f32 %v10428_v19, %v10427_v63  ;;  %v10511_v32 = vadd.f32 %v10510_v40, %v10509_v6  ;;  %v10430_v8 = vpop.f32.mrb[38].mxu0  ;;  %v10512_v28 = vpop.f32.mrb[66].mxu1 }
 0xb71   :  { %v10431_v3 = vpop.f32.mrb[39].mxu0  ;;  %v10513_v54 = vpop.f32.mrb[67].mxu1 }
 0xb72   :  { %v5185_v1 = vadd.f32 %v10511_v32, %v10429_v60  ;;  %v10432_v47 = vadd.f32 %v10431_v3, %v10430_v8  ;;  %v10514_v12 = vadd.f32 %v10513_v54, %v10512_v28 }
 0xb74   :  { %v16108_v59 = vadd.f32 %v5185_v1, %v15724_v30  ;;  %v5188_v53 = vadd.f32 %v10514_v12, %v10432_v47 }
 0xb76   :  { %18503 = vst [vmem:[#allocation67_spill] sm:$0xff] %v16108_v59  ;;  %v16111_v23 = vadd.f32 %v5188_v53, %v15727_v18  ;;  %v10433_v14 = vpop.f32.mrb[40].mxu0  ;;  %v10515_v25 = vpop.f32.mrb[68].mxu1  ;;  %v5277_v13 = vmul.f32 %v16108_v59, %v16108_v59 }
 0xb77   :  { %v10434_v9 = vpop.f32.mrb[41].mxu0  ;;  %v10516_v56 = vpop.f32.mrb[69].mxu1 }
 0xb78   :  { %18504 = vst [vmem:[#allocation73_spill] sm:$0xff] %v16111_v23  ;;  %v5278_v4 = vmul.f32 %v16111_v23, %v16111_v23  ;;  %v10435_v31 = vadd.f32 %v10434_v9, %v10433_v14  ;;  %v10517_v7 = vadd.f32 %v10516_v56, %v10515_v25  ;;  %v10436_v50 = vpop.f32.mrb[42].mxu0  ;;  %v10518_v43 = vpop.f32.mrb[70].mxu1 }
 0xb79   :  { %v10437_v30 = vpop.f32.mrb[43].mxu0  ;;  %v10519_v20 = vpop.f32.mrb[71].mxu1 }
 0xb7a   :  { %v5295_v5 = vpack.c.bf16 %v5278_v4, %v5277_v13  ;;  %v5193_v57 = vadd.f32 %v10517_v7, %v10435_v31  ;;  %v10438_v18 = vadd.f32 %v10437_v30, %v10436_v50  ;;  %v10520_v58 = vadd.f32 %v10519_v20, %v10518_v43 }
 0xb7c   :  { %v16118_v27 = vadd.f32 %v5193_v57, %v15734_v48  ;;  %v5196_v34 = vadd.f32 %v10520_v58, %v10438_v18  ;;  %11562 = vmatmul.mubr.bf16.gmra.mrb[80].mxu0 %v5295_v5 }
 0xb7d   :  { %11565 = vmatprep.mubr.msk.bf16.mxu0 %vm13585_vm0, %v18440_v10 }
 0xb7e   :  { %18505 = vst [vmem:[#allocation71_spill] sm:$0xff] %v16118_v27  ;;  %v16123_v2 = vadd.f32 %v5196_v34, %v15739_v49  ;;  %v10439_v52 = vpop.f32.mrb[44].mxu0  ;;  %v10521_v41 = vpop.f32.mrb[72].mxu1  ;;  %v5279_v37 = vmul.f32 %v16118_v27, %v16118_v27 }
 0xb7f   :  { %v10440_v61 = vpop.f32.mrb[45].mxu0  ;;  %v10522_v51 = vpop.f32.mrb[73].mxu1 }
 0xb80   :  { %18506 = vst [vmem:[#allocation77_spill] sm:$0xff] %v16123_v2  ;;  %v5280_v38 = vmul.f32 %v16123_v2, %v16123_v2  ;;  %v10441_v48 = vadd.f32 %v10440_v61, %v10439_v52  ;;  %v10523_v44 = vadd.f32 %v10522_v51, %v10521_v41  ;;  %v10442_v36 = vpop.f32.mrb[46].mxu0  ;;  %v10524_v63 = vpop.f32.mrb[74].mxu1 }
 0xb81   :  { %v10443_v6 = vpop.f32.mrb[47].mxu0  ;;  %v10525_v19 = vpop.f32.mrb[75].mxu1 }
 0xb82   :  { %v5296_v40 = vpack.c.bf16 %v5280_v38, %v5279_v37  ;;  %v5201_v60 = vadd.f32 %v10523_v44, %v10441_v48  ;;  %v10444_v49 = vadd.f32 %v10443_v6, %v10442_v36  ;;  %v10526_v32 = vadd.f32 %v10525_v19, %v10524_v63  ;;  %v12412_v19 = vld [vmem:[#allocation4 + $0xf8] ss:$12 sps:$4 sm:$0xff]  }
 0xb83   :  { %11598 = vmatpush3.bf16.msra.mxu0 %v12412_v19 }
 0xb84   :  { %v16130_v8 = vadd.f32 %v5201_v60, %v15746_v45  ;;  %v5204_v28 = vadd.f32 %v10526_v32, %v10444_v49  ;;  %11566 = vmatmul.mubr.bf16.gmra.mrb[84].mxu0 %v5296_v40  ;;  %11599 = vmatprep.subr.bf16.mxu0 %v18440_v10 }
 0xb85   :  { %11569 = vmatprep.mubr.msk.bf16.mxu0 %vm13585_vm0, %v18440_v10 }
 0xb86   :  { %18507 = vst [vmem:[#allocation75_spill] sm:$0xff] %v16130_v8  ;;  %v16135_v3 = vadd.f32 %v5204_v28, %v15751_v15  ;;  %v10445_v54 = vpop.f32.mrb[48].mxu0  ;;  %v10527_v1 = vpop.f32.mrb[76].mxu1  ;;  %v5281_v53 = vmul.f32 %v16130_v8, %v16130_v8 }
 0xb87   :  { %v10446_v47 = vpop.f32.mrb[49].mxu0  ;;  %v10528_v12 = vpop.f32.mrb[77].mxu1 }
 0xb88   :  { %18508 = vst [vmem:[#allocation46_spill] sm:$0xff] %v16135_v3  ;;  %v5282_v14 = vmul.f32 %v16135_v3, %v16135_v3  ;;  %v10447_v45 = vadd.f32 %v10446_v47, %v10445_v54  ;;  %v10529_v25 = vadd.f32 %v10528_v12, %v10527_v1  ;;  %v10448_v9 = vpop.f32.mrb[50].mxu0  ;;  %v10530_v56 = vpop.f32.mrb[78].mxu1 }
 0xb89   :  { %v10449_v13 = vpop.f32.mrb[51].mxu0  ;;  %v10531_v4 = vpop.f32.mrb[79].mxu1 }
 0xb8a   :  { %v5297_v31 = vpack.c.bf16 %v5282_v14, %v5281_v53  ;;  %v5209_v7 = vadd.f32 %v10529_v25, %v10447_v45  ;;  %v10450_v15 = vadd.f32 %v10449_v13, %v10448_v9  ;;  %v10532_v50 = vadd.f32 %v10531_v4, %v10530_v56  ;;  %v12415_v14 = vld [vmem:[#allocation4 + $0x10c] ss:$12 sps:$4 sm:$0xff]   ;;  %v12413_v25 = vld [vmem:[#allocation4 + $0x108] ss:$12 sps:$4 sm:$0xff]   ;;  %v12416_v9 = vld [vmem:[#allocation4 + $0x110] ss:$12 sps:$4 sm:$0xff]  }
 0xb8b   :  { %5712 = vmatprep.subr.bf16.mxu1 %v12415_v14  ;;  %11600 = vmatpush3.bf16.msra.mxu0 %v12416_v9 }
 0xb8c   :  { %v16142_v43 = vadd.f32 %v5209_v7, %v15758_v21  ;;  %v5212_v30 = vadd.f32 %v10532_v50, %v10450_v15  ;;  %11570 = vmatmul.mubr.bf16.gmra.mrb[88].mxu0 %v5297_v31  ;;  %5713 = vmatpush1.bf16.msra.mxu1 %v12413_v25  ;;  %v12419_v50 = vld [vmem:[#allocation4 + $0x124] ss:$12 sps:$4 sm:$0xff]  }
 0xb8d   :  { %11573 = vmatprep.mubr.msk.bf16.mxu0 %vm13585_vm0, %v18440_v10  ;;  %11601 = vmatprep.subr.bf16.mxu0 %v18440_v10 }
 0xb8e   :  { %18509 = vst [vmem:[#allocation60_spill] sm:$0xff] %v16142_v43  ;;  %v16147_v20 = vadd.f32 %v5212_v30, %v15763_v0  ;;  %v5283_v5 = vmul.f32 %v16142_v43, %v16142_v43  ;;  %v12417_v30 = vld [vmem:[#allocation4 + $0x120] ss:$12 sps:$4 sm:$0xff]   ;;  %5714 = vmatprep.subr.bf16.mxu1 %v12419_v50 }
 0xb90   :  { %18510 = vst [vmem:[#allocation61_spill] sm:$0xff] %v16147_v20  ;;  %v5284_v57 = vmul.f32 %v16147_v20, %v16147_v20  ;;  %5715 = vmatpush1.bf16.msra.mxu1 %v12417_v30 }
 0xb92   :  { %v5298_v18 = vpack.c.bf16 %v5284_v57, %v5283_v5  ;;  %v12420_v5 = vld [vmem:[#allocation4 + $0x128] ss:$12 sps:$4 sm:$0xff]  }
 0xb93   :  { %11602 = vmatpush3.bf16.msra.mxu0 %v12420_v5 }
 0xb94   :  { %11574 = vmatmul.mubr.bf16.gmra.mrb[92].mxu0 %v5298_v18  ;;  %11603 = vmatprep.subr.bf16.mxu0 %v18440_v10 }
 0xb95   :  { %11577 = vmatprep.mubr.msk.bf16.mxu0 %vm13585_vm0, %v18440_v10 }
 0xb9d   :  { %v10451_v21 = vpop.f32.mrb[52].mxu0  ;;  %v10533_v58 = vpop.f32.mrb[80].mxu1 }
 0xb9e   :  { %v10452_v34 = vpop.f32.mrb[53].mxu0  ;;  %v10534_v52 = vpop.f32.mrb[81].mxu1 }
 0xb9f   :  { %v10453_v41 = vadd.f32 %v10452_v34, %v10451_v21  ;;  %v10535_v61 = vadd.f32 %v10534_v52, %v10533_v58  ;;  %v10454_v51 = vpop.f32.mrb[54].mxu0  ;;  %v10536_v0 = vpop.f32.mrb[82].mxu1 }
 0xba0   :  { %v10455_v37 = vpop.f32.mrb[55].mxu0  ;;  %v10537_v38 = vpop.f32.mrb[83].mxu1 }
 0xba1   :  { %v5217_v48 = vadd.f32 %v10535_v61, %v10453_v41  ;;  %v10456_v44 = vadd.f32 %v10455_v37, %v10454_v51  ;;  %v10538_v36 = vadd.f32 %v10537_v38, %v10536_v0  ;;  %v12421_v37 = vld [vmem:[#allocation4 + $0x138] ss:$12 sps:$4 sm:$0xff]  }
 0xba3   :  { %v16156_v63 = vadd.f32 %v5217_v48, %v15772_v62  ;;  %v5220_v6 = vadd.f32 %v10538_v36, %v10456_v44  ;;  %v12424_v44 = vld [vmem:[#allocation4 + $0x140] ss:$12 sps:$4 sm:$0xff]  }
 0xba4   :  { %11604 = vmatpush3.bf16.msra.mxu0 %v12424_v44 }
 0xba5   :  { %18511 = vst [vmem:[#allocation47_spill] sm:$0xff] %v16156_v63  ;;  %v16159_v40 = vadd.f32 %v5220_v6, %v15775_v22  ;;  %v10457_v60 = vpop.f32.mrb[56].mxu0  ;;  %v10539_v49 = vpop.f32.mrb[84].mxu1  ;;  %v5285_v54 = vmul.f32 %v16156_v63, %v16156_v63  ;;  %11605 = vmatprep.subr.bf16.mxu0 %v18440_v10 }
 0xba6   :  { %v10458_v32 = vpop.f32.mrb[57].mxu0  ;;  %v10540_v28 = vpop.f32.mrb[85].mxu1 }
 0xba7   :  { %18512 = vst [vmem:[#allocation53_spill] sm:$0xff] %v16159_v40  ;;  %v5286_v1 = vmul.f32 %v16159_v40, %v16159_v40  ;;  %v10459_v47 = vadd.f32 %v10458_v32, %v10457_v60  ;;  %v10541_v12 = vadd.f32 %v10540_v28, %v10539_v49  ;;  %v10460_v62 = vpop.f32.mrb[58].mxu0  ;;  %v10542_v53 = vpop.f32.mrb[86].mxu1  ;;  %v12427_v49 = vld [vmem:[#allocation4 + $0x154] ss:$12 sps:$4 sm:$0xff]  }
 0xba8   :  { %v10461_v22 = vpop.f32.mrb[59].mxu0  ;;  %v10543_v45 = vpop.f32.mrb[87].mxu1  ;;  %v12425_v32 = vld [vmem:[#allocation4 + $0x150] ss:$12 sps:$4 sm:$0xff]  }
 0xba9   :  { %v5299_v56 = vpack.c.bf16 %v5286_v1, %v5285_v54  ;;  %v5225_v13 = vadd.f32 %v10541_v12, %v10459_v47  ;;  %v10462_v4 = vadd.f32 %v10461_v22, %v10460_v62  ;;  %v10544_v31 = vadd.f32 %v10543_v45, %v10542_v53  ;;  %v12428_v1 = vld [vmem:[#allocation4 + $0x158] ss:$12 sps:$4 sm:$0xff]  }
 0xbaa   :  { %11606 = vmatpush3.bf16.msra.mxu0 %v12428_v1 }
 0xbab   :  { %v16167_v7 = vadd.f32 %v5225_v13, %v15794_v39  ;;  %v5228_v15 = vadd.f32 %v10544_v31, %v10462_v4  ;;  %11578 = vmatmul.mubr.bf16.gmra.mrb[96].mxu0 %v5299_v56  ;;  %v12431_v13 = vld [vmem:[#allocation4 + $0x16c] ss:$12 sps:$4 sm:$0xff]   ;;  %11607 = vmatprep.subr.bf16.mxu0 %v18440_v10  ;;  %v12429_v31 = vld [vmem:[#allocation4 + $0x168] ss:$12 sps:$4 sm:$0xff]  }
 0xbac   :  { %11581 = vmatprep.mubr.msk.bf16.mxu0 %vm13585_vm0, %v18440_v10 }
 0xbad   :  { %18513 = vst [vmem:[#allocation54_spill] sm:$0xff] %v16167_v7  ;;  %v16173_v57 = vadd.f32 %v5228_v15, %v15811_v35  ;;  %v10463_v18 = vpop.f32.mrb[60].mxu0  ;;  %v10545_v21 = vpop.f32.mrb[88].mxu1  ;;  %v5287_v39 = vmul.f32 %v16167_v7, %v16167_v7  ;;  %v12423_v35 = vld [vmem:[#allocation4 + $0x13c] ss:$12 sps:$4 sm:$0xff]  }
 0xbae   :  { %v10464_v58 = vpop.f32.mrb[61].mxu0  ;;  %v10546_v34 = vpop.f32.mrb[89].mxu1  ;;  %5716 = vmatprep.subr.bf16.mxu1 %v12423_v35  ;;  %v12432_v15 = vld [vmem:[#allocation4 + $0x170] ss:$12 sps:$4 sm:$0xff]  }
 0xbaf   :  { %18514 = vst [vmem:[#allocation48_spill] sm:$0xff] %v16173_v57  ;;  %v5288_v52 = vmul.f32 %v16173_v57, %v16173_v57  ;;  %v10465_v41 = vadd.f32 %v10464_v58, %v10463_v18  ;;  %v10547_v61 = vadd.f32 %v10546_v34, %v10545_v21  ;;  %v10466_v51 = vpop.f32.mrb[62].mxu0  ;;  %v10548_v0 = vpop.f32.mrb[90].mxu1  ;;  %5717 = vmatpush1.bf16.msra.mxu1 %v12421_v37 }
 0xbb0   :  { %v10467_v38 = vpop.f32.mrb[63].mxu0  ;;  %v10549_v48 = vpop.f32.mrb[91].mxu1  ;;  %5718 = vmatprep.subr.bf16.mxu1 %v12427_v49  ;;  %11608 = vmatpush3.bf16.msra.mxu0 %v12432_v15 }
 0xbb1   :  { %v5300_v36 = vpack.c.bf16 %v5288_v52, %v5287_v39  ;;  %v5233_v6 = vadd.f32 %v10547_v61, %v10465_v41  ;;  %v10468_v19 = vadd.f32 %v10467_v38, %v10466_v51  ;;  %v10550_v60 = vadd.f32 %v10549_v48, %v10548_v0  ;;  %11713 = vmatprep.subr.bf16.mxu0 %v18440_v10  ;;  %v16206_v38 = vld [vmem:[#allocation7 + $0x1] ss:$0 sm:$0xff] }
 0xbb3   :  { %v16181_v28 = vadd.f32 %v5233_v6, %v15839_v26  ;;  %v5236_v54 = vadd.f32 %v10550_v60, %v10468_v19  ;;  %11582 = vmatmul.mubr.bf16.gmra.mrb[100].mxu0 %v5300_v36  ;;  %5719 = vmatpush1.bf16.msra.mxu1 %v12425_v32 }
 0xbb4   :  { %11585 = vmatprep.mubr.msk.bf16.mxu0 %vm13585_vm0, %v18440_v10  ;;  %5720 = vmatprep.subr.bf16.mxu1 %v12431_v13 }
 0xbb5   :  { %18515 = vst [vmem:[#allocation55_spill] sm:$0xff] %v16181_v28  ;;  %v16187_v47 = vadd.f32 %v5236_v54, %v15847_v33  ;;  %v10469_v12 = vpop.f32.mrb[64].mxu0  ;;  %v10551_v62 = vpop.f32.mrb[92].mxu1  ;;  %v5289_v26 = vmul.f32 %v16181_v28, %v16181_v28  ;;  %v16214_v54 = vld [vmem:[#allocation10] sm:$0xff]  }
 0xbb6   :  { %v10470_v53 = vpop.f32.mrb[65].mxu0  ;;  %v10552_v14 = vpop.f32.mrb[93].mxu1 }
 0xbb7   :  { %18516 = vst [vmem:[#allocation62_spill] sm:$0xff] %v16187_v47  ;;  %v5290_v22 = vmul.f32 %v16187_v47, %v16187_v47  ;;  %v10471_v45 = vadd.f32 %v10470_v53, %v10469_v12  ;;  %v10553_v25 = vadd.f32 %v10552_v14, %v10551_v62  ;;  %v10472_v9 = vpop.f32.mrb[66].mxu0  ;;  %v10554_v56 = vpop.f32.mrb[94].mxu1  ;;  %5721 = vmatpush1.bf16.msra.mxu1 %v12429_v31  ;;  %v16220_v14 = vld [vmem:[#allocation10 + $0x8] sm:$0xff]   ;;  %v16232_v31 = vld [vmem:[#allocation10 + $0x18] sm:$0xff]  }
 0xbb8   :  { %v10473_v33 = vpop.f32.mrb[67].mxu0  ;;  %v10555_v4 = vpop.f32.mrb[95].mxu1  ;;  %11653 = vmatprep.subr.bf16.mxu1 %v18440_v10  ;;  %v16226_v9 = vld [vmem:[#allocation10 + $0x10] sm:$0xff]  }
 0xbb9   :  { %v5301_v50 = vpack.c.bf16 %v5290_v22, %v5289_v26  ;;  %v5241_v30 = vadd.f32 %v10553_v25, %v10471_v45 }
 0xbbb   :  { %v16195_v5 = vadd.f32 %v5241_v30, %v15866_v29  ;;  %11586 = vmatmul.mubr.bf16.gmra.mrb[104].mxu0 %v5301_v50 }
 0xbbc   :  { %11589 = vmatprep.mubr.msk.bf16.mxu0 %vm13585_vm0, %v18440_v10 }
 0xbbd   :  { %18517 = vst [vmem:[#allocation65_spill] sm:$0xff] %v16195_v5  ;;  %v5291_v18 = vmul.f32 %v16195_v5, %v16195_v5 }
 0xbbf   :  { %v5302_v21 = vpack.c.bf16 %v5291_v18, %v5291_v18 }
 0xbc3   :  { %11590 = vmatmul.mubr.bf16.gmra.mrb[108].mxu0 %v5302_v21  ;;  %v16240_v21 = vld [vmem:[#allocation10 + $0x20] sm:$0xff]  }
 0xbc4   :  { %11609 = vmatprep.mubr.msk.bf16.mxu0 %vm13585_vm0, %v18440_v10 }
 0xc17   :  { %v5337_v58 = vpop.f32.mrb[68].mxu0 }
 0xc18   :  { %v5423_v34 = vmul.f32 0.03125, %v5337_v58  ;;  %v11551_v29 = vpop.f32.mrb[69].mxu0 }
 0xc19   :  { %v5340_v39 = vpop.f32.mrb[70].mxu0 }
 0xc1a   :  { %v5444_v52 = vadd.f32 1e-05, %v5423_v34  ;;  %v5424_v41 = vmul.f32 0.03125, %v5340_v39  ;;  %v11552_v61 = vpop.f32.mrb[71].mxu0  ;;  %v13273_v39 = vld [vmem:[#allocation10 + $0x28] sm:$0xff]  }
 0xc1c   :  { %12893 = vrsqrt.f32 %v5444_v52  ;;  %v5445_v51 = vadd.f32 1e-05, %v5424_v41 }
 0xc1e   :  { %12895 = vrsqrt.f32 %v5445_v51 }
 0xc26   :  { %v12894_v0 = vpop.eup %12893 }
 0xc27   :  { %v5486_v37 = vmul.f32 %v12894_v0, %v16070_v46  ;;  %v16255_v0 = vld [vmem:[#allocation10 + $0x30] sm:$0xff]  }
 0xc28   :  { %v12896_v35 = vpop.eup %12895 }
 0xc29   :  { %v5487_v48 = vmul.f32 %v12896_v35, %v16073_v42  ;;  %v5513_v44 = vmul.f32 %v16206_v38, %v5486_v37 }
 0xc2b   :  { %v5514_v36 = vmul.f32 %v16206_v38, %v5487_v48 }
 0xc2d   :  { %v5567_v6 = vpack.c.bf16 %v5514_v36, %v5513_v44  ;;  %v13275_v44 = vld [vmem:[#allocation10 + $0x38] sm:$0xff]  }
 0xc2f   :  { %5739 = vmatmul.mubr.bf16.vlgmr.msra.gmra.mrb[96].mxu1 %v5567_v6  ;;  %11610 = vmatmul.mubr.bf16.vlgmr.msra.gmra.mrb[112].mxu0 %v5567_v6 }
 0xc30   :  { %v5345_v19 = vpop.f32.mrb[72].mxu0  ;;  %5748 = vmatprep.mubr.bf16.mxu1 %v18475_v16  ;;  %11613 = vmatprep.mubr.msk.bf16.mxu0 %vm13585_vm0, %v18440_v10 }
 0xc31   :  { %v5425_v60 = vmul.f32 0.03125, %v5345_v19  ;;  %v11555_v49 = vpop.f32.mrb[73].mxu0  ;;  %11714 = vmatpush3.bf16.msra.mxu0 %v16214_v54  ;;  %11654 = vmatpush3.bf16.msra.mxu1 %v16214_v54 }
 0xc32   :  { %v5348_v32 = vpop.f32.mrb[74].mxu0  ;;  %11715 = vmatprep.subr.bf16.mxu0 %v18440_v10  ;;  %11655 = vmatprep.subr.bf16.mxu1 %v18440_v10 }
 0xc33   :  { %v5446_v1 = vadd.f32 1e-05, %v5425_v60  ;;  %v5426_v12 = vmul.f32 0.03125, %v5348_v32  ;;  %v11556_v62 = vpop.f32.mrb[75].mxu0 }
 0xc35   :  { %12897 = vrsqrt.f32 %v5446_v1  ;;  %v5447_v53 = vadd.f32 1e-05, %v5426_v12  ;;  %11716 = vmatpush3.bf16.msra.mxu0 %v16220_v14  ;;  %11656 = vmatpush3.bf16.msra.mxu1 %v16220_v14 }
 0xc36   :  { %11717 = vmatprep.subr.bf16.mxu0 %v18440_v10  ;;  %11657 = vmatprep.subr.bf16.mxu1 %v18440_v10 }
 0xc37   :  { %12899 = vrsqrt.f32 %v5447_v53 }
 0xc38   :  { %v5353_v26 = vpop.f32.mrb[76].mxu0 }
 0xc39   :  { %v5427_v22 = vmul.f32 0.03125, %v5353_v26  ;;  %v11559_v45 = vpop.f32.mrb[77].mxu0  ;;  %11718 = vmatpush3.bf16.msra.mxu0 %v16226_v9  ;;  %11658 = vmatpush3.bf16.msra.mxu1 %v16226_v9 }
 0xc3a   :  { %v5356_v25 = vpop.f32.mrb[78].mxu0  ;;  %11659 = vmatprep.subr.bf16.mxu1 %v18440_v10  ;;  %11719 = vmatprep.subr.bf16.mxu0 %v18440_v10 }
 0xc3b   :  { %v5448_v56 = vadd.f32 1e-05, %v5427_v22  ;;  %v5428_v13 = vmul.f32 0.03125, %v5356_v25  ;;  %v11560_v33 = vpop.f32.mrb[79].mxu0 }
 0xc3d   :  { %12901 = vrsqrt.f32 %v5448_v56  ;;  %v5449_v4 = vadd.f32 1e-05, %v5428_v13  ;;  %11660 = vmatpush3.bf16.msra.mxu1 %v16232_v31  ;;  %11720 = vmatpush3.bf16.msra.mxu0 %v16232_v31 }
 0xc3e   :  { %11661 = vmatprep.subr.bf16.mxu1 %v18440_v10  ;;  %11721 = vmatprep.subr.bf16.mxu0 %v18440_v10 }
 0xc3f   :  { %v12898_v15 = vpop.eup %12897  ;;  %12903 = vrsqrt.f32 %v5449_v4 }
 0xc40   :  { %v5488_v50 = vmul.f32 %v12898_v15, %v16084_v24 }
 0xc41   :  { %v12900_v30 = vpop.eup %12899  ;;  %11662 = vmatpush3.bf16.msra.mxu1 %v16240_v21  ;;  %11722 = vmatpush3.bf16.msra.mxu0 %v16240_v21 }
 0xc42   :  { %v5489_v18 = vmul.f32 %v12900_v30, %v16087_v17  ;;  %11663 = vmatprep.subr.bf16.mxu1 %v18440_v10  ;;  %11723 = vmatprep.subr.bf16.mxu0 %v18440_v10  ;;  %v5515_v58 = vmul.f32 %v16206_v38, %v5488_v50 }
 0xc44   :  { %v5516_v34 = vmul.f32 %v16206_v38, %v5489_v18 }
 0xc45   :  { %11664 = vmatpush3.bf16.msra.mxu1 %v13273_v39  ;;  %11724 = vmatpush3.bf16.msra.mxu0 %v13273_v39 }
 0xc46   :  { %v5568_v29 = vpack.c.bf16 %v5516_v34, %v5515_v58  ;;  %11665 = vmatprep.subr.bf16.mxu1 %v18440_v10  ;;  %11725 = vmatprep.subr.bf16.mxu0 %v18440_v10 }
 0xc47   :  { %v12902_v52 = vpop.eup %12901 }
 0xc48   :  { %v5490_v41 = vmul.f32 %v12902_v52, %v16094_v11  ;;  %5749 = vmatmul.mubr.bf16.gmra.mrb[100].mxu1 %v5568_v29  ;;  %11614 = vmatmul.mubr.bf16.gmra.mrb[116].mxu0 %v5568_v29 }
 0xc49   :  { %v12904_v61 = vpop.eup %12903  ;;  %5758 = vmatprep.mubr.bf16.mxu1 %v18475_v16  ;;  %11617 = vmatprep.mubr.msk.bf16.mxu0 %vm13585_vm0, %v18440_v10 }
 0xc4a   :  { %v5491_v51 = vmul.f32 %v12904_v61, %v16099_v55  ;;  %11666 = vmatpush3.bf16.msra.mxu1 %v16255_v0  ;;  %11726 = vmatpush3.bf16.msra.mxu0 %v16255_v0  ;;  %v5517_v37 = vmul.f32 %v16206_v38, %v5490_v41 }
 0xc4b   :  { %11667 = vmatprep.subr.bf16.mxu1 %v18440_v10  ;;  %11727 = vmatprep.subr.bf16.mxu0 %v18440_v10 }
 0xc4c   :  { %v5518_v35 = vmul.f32 %v16206_v38, %v5491_v51 }
 0xc4e   :  { %v5569_v48 = vpack.c.bf16 %v5518_v35, %v5517_v37  ;;  %11668 = vmatpush3.bf16.msra.mxu1 %v13275_v44  ;;  %11728 = vmatpush3.bf16.msra.mxu0 %v13275_v44 }
 0xc4f   :  { %v5361_v36 = vpop.f32.mrb[80].mxu0  ;;  %11833 = vmatprep.subr.bf16.mxu0 %v18440_v10  ;;  %11773 = vmatprep.subr.bf16.mxu1 %v18440_v10 }
 0xc50   :  { %v5429_v6 = vmul.f32 0.03125, %v5361_v36  ;;  %v11563_v19 = vpop.f32.mrb[81].mxu0  ;;  %5759 = vmatmul.mubr.bf16.gmra.mrb[104].mxu1 %v5569_v48  ;;  %11618 = vmatmul.mubr.bf16.gmra.mrb[120].mxu0 %v5569_v48 }
 0xc51   :  { %v5364_v60 = vpop.f32.mrb[82].mxu0  ;;  %5768 = vmatprep.mubr.bf16.mxu1 %v18475_v16  ;;  %11621 = vmatprep.mubr.msk.bf16.mxu0 %vm13585_vm0, %v18440_v10 }
 0xc52   :  { %v5450_v49 = vadd.f32 1e-05, %v5429_v6  ;;  %v5430_v32 = vmul.f32 0.03125, %v5364_v60  ;;  %v11564_v1 = vpop.f32.mrb[83].mxu0 }
 0xc54   :  { %12905 = vrsqrt.f32 %v5450_v49  ;;  %v5451_v12 = vadd.f32 1e-05, %v5430_v32 }
 0xc56   :  { %12907 = vrsqrt.f32 %v5451_v12 }
 0xc57   :  { %v5369_v62 = vpop.f32.mrb[84].mxu0 }
 0xc58   :  { %v5431_v53 = vmul.f32 0.03125, %v5369_v62  ;;  %v11567_v26 = vpop.f32.mrb[85].mxu0 }
 0xc59   :  { %v5372_v22 = vpop.f32.mrb[86].mxu0 }
 0xc5a   :  { %v5452_v45 = vadd.f32 1e-05, %v5431_v53  ;;  %v5432_v25 = vmul.f32 0.03125, %v5372_v22  ;;  %v11568_v56 = vpop.f32.mrb[87].mxu0 }
 0xc5c   :  { %12909 = vrsqrt.f32 %v5452_v45  ;;  %v5453_v13 = vadd.f32 1e-05, %v5432_v25 }
 0xc5e   :  { %v12906_v33 = vpop.eup %12905  ;;  %12911 = vrsqrt.f32 %v5453_v13 }
 0xc5f   :  { %v5492_v4 = vmul.f32 %v12906_v33, %v16108_v59  ;;  %v5377_v15 = vpop.f32.mrb[88].mxu0 }
 0xc60   :  { %v12908_v50 = vpop.eup %12907  ;;  %v5433_v30 = vmul.f32 0.03125, %v5377_v15  ;;  %v11571_v18 = vpop.f32.mrb[89].mxu0 }
 0xc61   :  { %v5493_v58 = vmul.f32 %v12908_v50, %v16111_v23  ;;  %v5380_v34 = vpop.f32.mrb[90].mxu0  ;;  %v5519_v41 = vmul.f32 %v16206_v38, %v5492_v4 }
 0xc62   :  { %v5454_v29 = vadd.f32 1e-05, %v5433_v30  ;;  %v5434_v39 = vmul.f32 0.03125, %v5380_v34  ;;  %v11572_v52 = vpop.f32.mrb[91].mxu0 }
 0xc63   :  { %v5520_v61 = vmul.f32 %v16206_v38, %v5493_v58 }
 0xc64   :  { %12913 = vrsqrt.f32 %v5454_v29  ;;  %v5455_v51 = vadd.f32 1e-05, %v5434_v39 }
 0xc65   :  { %v5570_v37 = vpack.c.bf16 %v5520_v61, %v5519_v41 }
 0xc66   :  { %v12910_v35 = vpop.eup %12909  ;;  %12915 = vrsqrt.f32 %v5455_v51 }
 0xc67   :  { %v5494_v48 = vmul.f32 %v12910_v35, %v16118_v27  ;;  %5769 = vmatmul.mubr.bf16.gmra.mrb[108].mxu1 %v5570_v37  ;;  %11622 = vmatmul.mubr.bf16.gmra.mrb[124].mxu0 %v5570_v37  ;;  %v5385_v44 = vpop.f32.mrb[92].mxu0 }
 0xc68   :  { %v12912_v36 = vpop.eup %12911  ;;  %v5435_v6 = vmul.f32 0.03125, %v5385_v44  ;;  %v11575_v19 = vpop.f32.mrb[93].mxu0  ;;  %5778 = vmatprep.mubr.bf16.mxu1 %v18475_v16  ;;  %11625 = vmatprep.mubr.msk.bf16.mxu0 %vm13585_vm0, %v18440_v10 }
 0xc69   :  { %v5495_v60 = vmul.f32 %v12912_v36, %v16123_v2  ;;  %v5388_v49 = vpop.f32.mrb[94].mxu0  ;;  %v5521_v62 = vmul.f32 %v16206_v38, %v5494_v48 }
 0xc6a   :  { %v5456_v32 = vadd.f32 1e-05, %v5435_v6  ;;  %v5436_v1 = vmul.f32 0.03125, %v5388_v49  ;;  %v11576_v12 = vpop.f32.mrb[95].mxu0 }
 0xc6b   :  { %v5522_v53 = vmul.f32 %v16206_v38, %v5495_v60 }
 0xc6c   :  { %12917 = vrsqrt.f32 %v5456_v32  ;;  %v5457_v26 = vadd.f32 1e-05, %v5436_v1 }
 0xc6d   :  { %v5571_v22 = vpack.c.bf16 %v5522_v53, %v5521_v62 }
 0xc6e   :  { %v12914_v45 = vpop.eup %12913  ;;  %12919 = vrsqrt.f32 %v5457_v26 }
 0xc6f   :  { %v5496_v25 = vmul.f32 %v12914_v45, %v16130_v8  ;;  %5779 = vmatmul.mubr.bf16.gmra.mrb[112].mxu1 %v5571_v22  ;;  %11626 = vmatmul.mubr.bf16.gmra.mrb[128].mxu0 %v5571_v22 }
 0xc70   :  { %v12916_v56 = vpop.eup %12915  ;;  %5788 = vmatprep.mubr.bf16.mxu1 %v18475_v16  ;;  %11629 = vmatprep.mubr.msk.bf16.mxu0 %vm13585_vm0, %v18440_v10 }
 0xc71   :  { %v5497_v13 = vmul.f32 %v12916_v56, %v16135_v3  ;;  %v5523_v33 = vmul.f32 %v16206_v38, %v5496_v25 }
 0xc73   :  { %v5524_v4 = vmul.f32 %v16206_v38, %v5497_v13 }
 0xc75   :  { %v5572_v15 = vpack.c.bf16 %v5524_v4, %v5523_v33 }
 0xc76   :  { %v12918_v50 = vpop.eup %12917 }
 0xc77   :  { %v5498_v30 = vmul.f32 %v12918_v50, %v16142_v43  ;;  %5789 = vmatmul.mubr.bf16.gmra.mrb[116].mxu1 %v5572_v15  ;;  %11630 = vmatmul.mubr.bf16.gmra.mrb[132].mxu0 %v5572_v15 }
 0xc78   :  { %v12920_v18 = vpop.eup %12919  ;;  %5798 = vmatprep.mubr.bf16.mxu1 %v18475_v16  ;;  %11633 = vmatprep.mubr.msk.bf16.mxu0 %vm13585_vm0, %v18440_v10 }
 0xc79   :  { %v5499_v58 = vmul.f32 %v12920_v18, %v16147_v20  ;;  %v5525_v34 = vmul.f32 %v16206_v38, %v5498_v30 }
 0xc7b   :  { %v5526_v29 = vmul.f32 %v16206_v38, %v5499_v58 }
 0xc7d   :  { %v5573_v39 = vpack.c.bf16 %v5526_v29, %v5525_v34 }
 0xc7e   :  { %v5393_v52 = vpop.f32.mrb[96].mxu0 }
 0xc7f   :  { %v5437_v41 = vmul.f32 0.03125, %v5393_v52  ;;  %v11579_v61 = vpop.f32.mrb[97].mxu0  ;;  %5799 = vmatmul.mubr.bf16.gmra.mrb[120].mxu1 %v5573_v39  ;;  %11634 = vmatmul.mubr.bf16.gmra.mrb[136].mxu0 %v5573_v39 }
 0xc80   :  { %v5396_v51 = vpop.f32.mrb[98].mxu0  ;;  %5808 = vmatprep.mubr.bf16.mxu1 %v18475_v16  ;;  %11637 = vmatprep.mubr.msk.bf16.mxu0 %vm13585_vm0, %v18440_v10 }
 0xc81   :  { %v5458_v37 = vadd.f32 1e-05, %v5437_v41  ;;  %v5438_v35 = vmul.f32 0.03125, %v5396_v51  ;;  %v11580_v48 = vpop.f32.mrb[99].mxu0 }
 0xc83   :  { %12921 = vrsqrt.f32 %v5458_v37  ;;  %v5459_v44 = vadd.f32 1e-05, %v5438_v35 }
 0xc85   :  { %12923 = vrsqrt.f32 %v5459_v44 }
 0xc86   :  { %v5401_v36 = vpop.f32.mrb[100].mxu0 }
 0xc87   :  { %v5439_v6 = vmul.f32 0.03125, %v5401_v36  ;;  %v11583_v19 = vpop.f32.mrb[101].mxu0 }
 0xc88   :  { %v5404_v60 = vpop.f32.mrb[102].mxu0 }
 0xc89   :  { %v5460_v49 = vadd.f32 1e-05, %v5439_v6  ;;  %v5440_v32 = vmul.f32 0.03125, %v5404_v60  ;;  %v11584_v1 = vpop.f32.mrb[103].mxu0 }
 0xc8b   :  { %12925 = vrsqrt.f32 %v5460_v49  ;;  %v5461_v12 = vadd.f32 1e-05, %v5440_v32 }
 0xc8d   :  { %v12922_v62 = vpop.eup %12921  ;;  %12927 = vrsqrt.f32 %v5461_v12 }
 0xc8e   :  { %v5500_v53 = vmul.f32 %v12922_v62, %v16156_v63  ;;  %v5409_v26 = vpop.f32.mrb[104].mxu0 }
 0xc8f   :  { %v12924_v22 = vpop.eup %12923  ;;  %v5441_v45 = vmul.f32 0.03125, %v5409_v26  ;;  %v11587_v25 = vpop.f32.mrb[105].mxu0 }
 0xc90   :  { %v5501_v56 = vmul.f32 %v12924_v22, %v16159_v40  ;;  %v5412_v13 = vpop.f32.mrb[106].mxu0  ;;  %v5527_v50 = vmul.f32 %v16206_v38, %v5500_v53 }
 0xc91   :  { %v5462_v33 = vadd.f32 1e-05, %v5441_v45  ;;  %v5442_v4 = vmul.f32 0.03125, %v5412_v13  ;;  %v11588_v15 = vpop.f32.mrb[107].mxu0 }
 0xc92   :  { %v5528_v30 = vmul.f32 %v16206_v38, %v5501_v56 }
 0xc93   :  { %12929 = vrsqrt.f32 %v5462_v33  ;;  %v5463_v18 = vadd.f32 1e-05, %v5442_v4 }
 0xc94   :  { %v5574_v58 = vpack.c.bf16 %v5528_v30, %v5527_v50 }
 0xc95   :  { %v12926_v34 = vpop.eup %12925  ;;  %12931 = vrsqrt.f32 %v5463_v18 }
 0xc96   :  { %v5502_v29 = vmul.f32 %v12926_v34, %v16167_v7  ;;  %v5417_v39 = vpop.f32.mrb[108].mxu0  ;;  %5809 = vmatmul.mubr.bf16.gmra.mrb[124].mxu1 %v5574_v58  ;;  %11638 = vmatmul.mubr.bf16.gmra.mrb[140].mxu0 %v5574_v58 }
 0xc97   :  { %v12928_v52 = vpop.eup %12927  ;;  %v5443_v41 = vmul.f32 0.03125, %v5417_v39  ;;  %v11591_v61 = vpop.f32.mrb[109].mxu0  ;;  %5818 = vmatprep.mubr.bf16.mxu1 %v18475_v16  ;;  %11641 = vmatprep.mubr.msk.bf16.mxu0 %vm13585_vm0, %v18440_v10 }
 0xc98   :  { %v5503_v51 = vmul.f32 %v12928_v52, %v16173_v57  ;;  %v5420_v37 = vpop.f32.mrb[110].mxu0  ;;  %v5529_v44 = vmul.f32 %v16206_v38, %v5502_v29  ;;  %v13276_v52 = vld [vmem:[#allocation12] sm:$0xff]   ;;  %v13278_v61 = vld [vmem:[#allocation12 + $0x10] sm:$0xff]  }
 0xc99   :  { %v5464_v35 = vadd.f32 1e-05, %v5443_v41  ;;  %v11592_v48 = vpop.f32.mrb[111].mxu0  ;;  %v13277_v41 = vld [vmem:[#allocation12 + $0x8] sm:$0xff]  }
 0xc9a   :  { %v5530_v36 = vmul.f32 %v16206_v38, %v5503_v51  ;;  %v13279_v51 = vld [vmem:[#allocation12 + $0x18] sm:$0xff]  }
 0xc9b   :  { %12933 = vrsqrt.f32 %v5464_v35 }
 0xc9c   :  { %v5575_v6 = vpack.c.bf16 %v5530_v36, %v5529_v44  ;;  %v13280_v36 = vld [vmem:[#allocation12 + $0x20] sm:$0xff]  }
 0xc9d   :  { %v12930_v19 = vpop.eup %12929 }
 0xc9e   :  { %v5504_v60 = vmul.f32 %v12930_v19, %v16181_v28  ;;  %5819 = vmatmul.mubr.bf16.gmra.mrb[128].mxu1 %v5575_v6  ;;  %11642 = vmatmul.mubr.bf16.gmra.mrb[144].mxu0 %v5575_v6 }
 0xc9f   :  { %v12932_v49 = vpop.eup %12931  ;;  %5828 = vmatprep.mubr.bf16.mxu1 %v18475_v16  ;;  %11645 = vmatprep.mubr.msk.bf16.mxu0 %vm13585_vm0, %v18440_v10 }
 0xca0   :  { %v5505_v32 = vmul.f32 %v12932_v49, %v16187_v47  ;;  %v5531_v1 = vmul.f32 %v16206_v38, %v5504_v60 }
 0xca2   :  { %v5532_v12 = vmul.f32 %v16206_v38, %v5505_v32 }
 0xca4   :  { %v5576_v62 = vpack.c.bf16 %v5532_v12, %v5531_v1 }
 0xca5   :  { %v12934_v53 = vpop.eup %12933 }
 0xca6   :  { %v5506_v26 = vmul.f32 %v12934_v53, %v16195_v5  ;;  %5829 = vmatmul.mubr.bf16.gmra.mrb[132].mxu1 %v5576_v62  ;;  %11646 = vmatmul.mubr.bf16.gmra.mrb[148].mxu0 %v5576_v62 }
 0xca7   :  { %5838 = vmatprep.mubr.bf16.mxu1 %v18475_v16  ;;  %11649 = vmatprep.mubr.msk.bf16.mxu0 %vm13585_vm0, %v18440_v10 }
 0xca8   :  { %v5533_v22 = vmul.f32 %v16206_v38, %v5506_v26  ;;  %v13281_v26 = vld [vmem:[#allocation12 + $0x28] sm:$0xff]  }
 0xcaa   :  { %v5577_v45 = vpack.c.bf16 %v5533_v22, %v5533_v22 }
 0xcae   :  { %5839 = vmatmul.mubr.bf16.gmra.mrb[136].mxu1 %v5577_v45  ;;  %11650 = vmatmul.mubr.bf16.gmra.mrb[152].mxu0 %v5577_v45 }
 0xcaf   :  { %11669 = vmatprep.mubr.msk.bf16.mxu1 %vm13585_vm0, %v18440_v10  ;;  %11729 = vmatprep.mubr.msk.bf16.mxu0 %vm13585_vm0, %v18440_v10 }
 0xd02   :  { %v16323_v25 = vpop.f32.mrb[96].mxu1  ;;  %v16325_v56 = vpop.f32.mrb[112].mxu0 }
 0xd03   :  { %18518 = vst [vmem:[#allocation49_spill] sm:$0xff] %v16325_v56  ;;  %v16327_v13 = vpop.f32.mrb[97].mxu1  ;;  %v11611_v33 = vpop.f32.mrb[113].mxu0  ;;  %v5967_v38 = vmul.f32 %v16323_v25, %v16323_v25 }
 0xd04   :  { %v16329_v4 = vpop.f32.mrb[98].mxu1  ;;  %v16331_v15 = vpop.f32.mrb[114].mxu0  ;;  %v6230_v58 = vmul.f32 %v16327_v13, %v16327_v13 }
 0xd05   :  { %18519 = vst [vmem:[#allocation56_spill] sm:$0xff] %v16331_v15  ;;  %v5968_v50 = vmul.f32 %v16329_v4, %v16329_v4  ;;  %v16337_v30 = vpop.f32.mrb[99].mxu1  ;;  %v11612_v18 = vpop.f32.mrb[115].mxu0 }
 0xd06   :  { %v6231_v34 = vmul.f32 %v16337_v30, %v16337_v30  ;;  %v13282_v18 = vld [vmem:[#allocation12 + $0x30] sm:$0xff]  }
 0xd07   :  { %v5988_v29 = vpack.c.bf16 %v5968_v50, %v5967_v38 }
 0xd08   :  { %v6251_v39 = vpack.c.bf16 %v6231_v34, %v6230_v58 }
 0xd09   :  { %11670 = vmatmul.mubr.bf16.vlgmr.msra.gmra.mrb[140].mxu1 %v5988_v29 }
 0xd0a   :  { %11730 = vmatmul.mubr.bf16.vlgmr.msra.gmra.mrb[156].mxu0 %v6251_v39  ;;  %11673 = vmatprep.mubr.msk.bf16.mxu1 %vm13585_vm0, %v18440_v10 }
 0xd0b   :  { %11733 = vmatprep.mubr.msk.bf16.mxu0 %vm13585_vm0, %v18440_v10  ;;  %11834 = vmatpush3.bf16.msra.mxu0 %v13276_v52 }
 0xd0c   :  { %11835 = vmatprep.subr.bf16.mxu0 %v18440_v10  ;;  %11774 = vmatpush3.bf16.msra.mxu1 %v13276_v52 }
 0xd0d   :  { %11775 = vmatprep.subr.bf16.mxu1 %v18440_v10 }
 0xd0f   :  { %11836 = vmatpush3.bf16.msra.mxu0 %v13277_v41 }
 0xd10   :  { %11776 = vmatpush3.bf16.msra.mxu1 %v13277_v41  ;;  %11837 = vmatprep.subr.bf16.mxu0 %v18440_v10 }
 0xd11   :  { %11777 = vmatprep.subr.bf16.mxu1 %v18440_v10 }
 0xd13   :  { %11838 = vmatpush3.bf16.msra.mxu0 %v13278_v61 }
 0xd14   :  { %11778 = vmatpush3.bf16.msra.mxu1 %v13278_v61  ;;  %11839 = vmatprep.subr.bf16.mxu0 %v18440_v10 }
 0xd15   :  { %11779 = vmatprep.subr.bf16.mxu1 %v18440_v10 }
 0xd17   :  { %11840 = vmatpush3.bf16.msra.mxu0 %v13279_v51 }
 0xd18   :  { %11780 = vmatpush3.bf16.msra.mxu1 %v13279_v51  ;;  %11841 = vmatprep.subr.bf16.mxu0 %v18440_v10 }
 0xd19   :  { %11781 = vmatprep.subr.bf16.mxu1 %v18440_v10 }
 0xd1b   :  { %v16355_v37 = vpop.f32.mrb[100].mxu1  ;;  %v16357_v35 = vpop.f32.mrb[116].mxu0  ;;  %11842 = vmatpush3.bf16.msra.mxu0 %v13280_v36 }
 0xd1c   :  { %18520 = vst [vmem:[#allocation63_spill] sm:$0xff] %v16357_v35  ;;  %v16359_v48 = vpop.f32.mrb[101].mxu1  ;;  %v11615_v44 = vpop.f32.mrb[117].mxu0  ;;  %11782 = vmatpush3.bf16.msra.mxu1 %v13280_v36  ;;  %11843 = vmatprep.subr.bf16.mxu0 %v18440_v10  ;;  %v5969_v60 = vmul.f32 %v16355_v37, %v16355_v37  ;;  %v13283_v36 = vld [vmem:[#allocation12 + $0x38] sm:$0xff]  }
 0xd1d   :  { %v16361_v6 = vpop.f32.mrb[102].mxu1  ;;  %v16363_v19 = vpop.f32.mrb[118].mxu0  ;;  %11783 = vmatprep.subr.bf16.mxu1 %v18440_v10  ;;  %v6232_v12 = vmul.f32 %v16359_v48, %v16359_v48 }
 0xd1e   :  { %18521 = vst [vmem:[#allocation52_spill] sm:$0xff] %v16363_v19  ;;  %v5970_v49 = vmul.f32 %v16361_v6, %v16361_v6  ;;  %v16370_v32 = vpop.f32.mrb[103].mxu1  ;;  %v11616_v1 = vpop.f32.mrb[119].mxu0 }
 0xd1f   :  { %v6233_v62 = vmul.f32 %v16370_v32, %v16370_v32  ;;  %11844 = vmatpush3.bf16.msra.mxu0 %v13281_v26 }
 0xd20   :  { %v5989_v53 = vpack.c.bf16 %v5970_v49, %v5969_v60  ;;  %11784 = vmatpush3.bf16.msra.mxu1 %v13281_v26  ;;  %11845 = vmatprep.subr.bf16.mxu0 %v18440_v10 }
 0xd21   :  { %v6252_v22 = vpack.c.bf16 %v6233_v62, %v6232_v12  ;;  %11785 = vmatprep.subr.bf16.mxu1 %v18440_v10 }
 0xd22   :  { %11674 = vmatmul.mubr.bf16.gmra.mrb[144].mxu1 %v5989_v53 }
 0xd23   :  { %v16379_v45 = vpop.f32.mrb[104].mxu1  ;;  %v16381_v33 = vpop.f32.mrb[120].mxu0  ;;  %11734 = vmatmul.mubr.bf16.gmra.mrb[160].mxu0 %v6252_v22  ;;  %11677 = vmatprep.mubr.msk.bf16.mxu1 %vm13585_vm0, %v18440_v10 }
 0xd24   :  { %18522 = vst [vmem:[#allocation59_spill] sm:$0xff] %v16381_v33  ;;  %v16385_v38 = vpop.f32.mrb[105].mxu1  ;;  %v11619_v50 = vpop.f32.mrb[121].mxu0  ;;  %11737 = vmatprep.mubr.msk.bf16.mxu0 %vm13585_vm0, %v18440_v10  ;;  %11846 = vmatpush3.bf16.msra.mxu0 %v13282_v18  ;;  %v5971_v29 = vmul.f32 %v16379_v45, %v16379_v45 }
 0xd25   :  { %v16389_v58 = vpop.f32.mrb[106].mxu1  ;;  %v16391_v34 = vpop.f32.mrb[122].mxu0  ;;  %11786 = vmatpush3.bf16.msra.mxu1 %v13282_v18  ;;  %11847 = vmatprep.subr.bf16.mxu0 %v18440_v10  ;;  %v6234_v61 = vmul.f32 %v16385_v38, %v16385_v38 }
 0xd26   :  { %18523 = vst [vmem:[#allocation66_spill] sm:$0xff] %v16391_v34  ;;  %v5972_v39 = vmul.f32 %v16389_v58, %v16389_v58  ;;  %v16398_v52 = vpop.f32.mrb[107].mxu1  ;;  %v11620_v41 = vpop.f32.mrb[123].mxu0  ;;  %11787 = vmatprep.subr.bf16.mxu1 %v18440_v10 }
 0xd27   :  { %v6235_v51 = vmul.f32 %v16398_v52, %v16398_v52 }
 0xd28   :  { %v5990_v44 = vpack.c.bf16 %v5972_v39, %v5971_v29  ;;  %11848 = vmatpush3.bf16.msra.mxu0 %v13283_v36 }
 0xd29   :  { %v6253_v60 = vpack.c.bf16 %v6235_v51, %v6234_v61  ;;  %11788 = vmatpush3.bf16.msra.mxu1 %v13283_v36  ;;  %11973 = vmatprep.subr.bf16.mxu0 %v18440_v10 }
 0xd2a   :  { %11678 = vmatmul.mubr.bf16.gmra.mrb[148].mxu1 %v5990_v44  ;;  %11893 = vmatprep.subr.bf16.mxu1 %v16214_v54 }
 0xd2b   :  { %11738 = vmatmul.mubr.bf16.gmra.mrb[164].mxu0 %v6253_v60  ;;  %11681 = vmatprep.mubr.msk.bf16.mxu1 %vm13585_vm0, %v18440_v10 }
 0xd2c   :  { %11741 = vmatprep.mubr.msk.bf16.mxu0 %vm13585_vm0, %v18440_v10 }
 0xd3a   :  { %v16411_v49 = vpop.f32.mrb[108].mxu1  ;;  %v16413_v1 = vpop.f32.mrb[124].mxu0 }
 0xd3b   :  { %18524 = vst [vmem:[#allocation50_spill] sm:$0xff] %v16413_v1  ;;  %v16415_v12 = vpop.f32.mrb[109].mxu1  ;;  %v11623_v62 = vpop.f32.mrb[125].mxu0  ;;  %v5973_v22 = vmul.f32 %v16411_v49, %v16411_v49 }
 0xd3c   :  { %v16417_v53 = vpop.f32.mrb[110].mxu1  ;;  %v16419_v26 = vpop.f32.mrb[126].mxu0  ;;  %v6236_v39 = vmul.f32 %v16415_v12, %v16415_v12 }
 0xd3d   :  { %18525 = vst [vmem:[#allocation57_spill] sm:$0xff] %v16419_v26  ;;  %v5974_v50 = vmul.f32 %v16417_v53, %v16417_v53  ;;  %v16425_v18 = vpop.f32.mrb[111].mxu1  ;;  %v11624_v29 = vpop.f32.mrb[127].mxu0 }
 0xd3e   :  { %v6237_v41 = vmul.f32 %v16425_v18, %v16425_v18 }
 0xd3f   :  { %v5991_v61 = vpack.c.bf16 %v5974_v50, %v5973_v22 }
 0xd40   :  { %v6254_v51 = vpack.c.bf16 %v6237_v41, %v6236_v39 }
 0xd41   :  { %11682 = vmatmul.mubr.bf16.gmra.mrb[152].mxu1 %v5991_v61 }
 0xd42   :  { %11742 = vmatmul.mubr.bf16.gmra.mrb[168].mxu0 %v6254_v51  ;;  %v16431_v44 = vpop.f32.mrb[112].mxu1  ;;  %v16433_v36 = vpop.f32.mrb[128].mxu0  ;;  %11685 = vmatprep.mubr.msk.bf16.mxu1 %vm13585_vm0, %v18440_v10 }
 0xd43   :  { %18526 = vst [vmem:[#allocation64_spill] sm:$0xff] %v16433_v36  ;;  %v16437_v60 = vpop.f32.mrb[113].mxu1  ;;  %v11627_v62 = vpop.f32.mrb[129].mxu0  ;;  %11745 = vmatprep.mubr.msk.bf16.mxu0 %vm13585_vm0, %v18440_v10  ;;  %v5975_v22 = vmul.f32 %v16431_v44, %v16431_v44 }
 0xd44   :  { %v16441_v29 = vpop.f32.mrb[114].mxu1  ;;  %v16443_v5 = vpop.f32.mrb[130].mxu0  ;;  %v6238_v61 = vmul.f32 %v16437_v60, %v16437_v60 }
 0xd45   :  { %18527 = vst [vmem:[#allocation51_spill] sm:$0xff] %v16443_v5  ;;  %v5976_v50 = vmul.f32 %v16441_v29, %v16441_v29  ;;  %v16449_v39 = vpop.f32.mrb[115].mxu1  ;;  %v11628_v41 = vpop.f32.mrb[131].mxu0 }
 0xd46   :  { %v6239_v51 = vmul.f32 %v16449_v39, %v16449_v39 }
 0xd47   :  { %v5992_v62 = vpack.c.bf16 %v5976_v50, %v5975_v22 }
 0xd48   :  { %v6255_v47 = vpack.c.bf16 %v6239_v51, %v6238_v61 }
 0xd49   :  { %11686 = vmatmul.mubr.bf16.gmra.mrb[156].mxu1 %v5992_v62 }
 0xd4a   :  { %v16455_v28 = vpop.f32.mrb[116].mxu1  ;;  %v16457_v57 = vpop.f32.mrb[132].mxu0  ;;  %11746 = vmatmul.mubr.bf16.gmra.mrb[172].mxu0 %v6255_v47  ;;  %11689 = vmatprep.mubr.msk.bf16.mxu1 %vm13585_vm0, %v18440_v10 }
 0xd4b   :  { %18528 = vst [vmem:[#allocation58_spill] sm:$0xff] %v16457_v57  ;;  %v16461_v7 = vpop.f32.mrb[117].mxu1  ;;  %v11631_v41 = vpop.f32.mrb[133].mxu0  ;;  %11749 = vmatprep.mubr.msk.bf16.mxu0 %vm13585_vm0, %v18440_v10  ;;  %v5977_v22 = vmul.f32 %v16455_v28, %v16455_v28 }
 0xd4c   :  { %v16465_v40 = vpop.f32.mrb[118].mxu1  ;;  %v16467_v63 = vpop.f32.mrb[134].mxu0  ;;  %v6240_v51 = vmul.f32 %v16461_v7, %v16461_v7 }
 0xd4d   :  { %18529 = vst [vmem:[#allocation25_spill] sm:$0xff] %v16467_v63  ;;  %v5978_v50 = vmul.f32 %v16465_v40, %v16465_v40  ;;  %v16473_v47 = vpop.f32.mrb[119].mxu1  ;;  %v11632_v61 = vpop.f32.mrb[135].mxu0 }
 0xd4e   :  { %v6241_v62 = vmul.f32 %v16473_v47, %v16473_v47 }
 0xd4f   :  { %v5993_v41 = vpack.c.bf16 %v5978_v50, %v5977_v22 }
 0xd50   :  { %v6256_v20 = vpack.c.bf16 %v6241_v62, %v6240_v51 }
 0xd51   :  { %11690 = vmatmul.mubr.bf16.gmra.mrb[160].mxu1 %v5993_v41 }
 0xd52   :  { %v16479_v43 = vpop.f32.mrb[120].mxu1  ;;  %v16481_v3 = vpop.f32.mrb[136].mxu0  ;;  %11750 = vmatmul.mubr.bf16.gmra.mrb[176].mxu0 %v6256_v20  ;;  %11693 = vmatprep.mubr.msk.bf16.mxu1 %vm13585_vm0, %v18440_v10 }
 0xd53   :  { %18530 = vst [vmem:[#allocation26_spill] sm:$0xff] %v16481_v3  ;;  %v16485_v8 = vpop.f32.mrb[121].mxu1  ;;  %v11635_v61 = vpop.f32.mrb[137].mxu0  ;;  %11753 = vmatprep.mubr.msk.bf16.mxu0 %vm13585_vm0, %v18440_v10  ;;  %v5979_v22 = vmul.f32 %v16479_v43, %v16479_v43 }
 0xd54   :  { %v16489_v2 = vpop.f32.mrb[122].mxu1  ;;  %v16491_v27 = vpop.f32.mrb[138].mxu0  ;;  %v6242_v62 = vmul.f32 %v16485_v8, %v16485_v8 }
 0xd55   :  { %18531 = vst [vmem:[#allocation28_spill] sm:$0xff] %v16491_v27  ;;  %v5980_v50 = vmul.f32 %v16489_v2, %v16489_v2  ;;  %v16497_v20 = vpop.f32.mrb[123].mxu1  ;;  %v11636_v51 = vpop.f32.mrb[139].mxu0 }
 0xd56   :  { %v6243_v41 = vmul.f32 %v16497_v20, %v16497_v20 }
 0xd57   :  { %v5994_v61 = vpack.c.bf16 %v5980_v50, %v5979_v22 }
 0xd58   :  { %v6257_v23 = vpack.c.bf16 %v6243_v41, %v6242_v62 }
 0xd59   :  { %11694 = vmatmul.mubr.bf16.gmra.mrb[164].mxu1 %v5994_v61 }
 0xd5a   :  { %11754 = vmatmul.mubr.bf16.gmra.mrb[180].mxu0 %v6257_v23  ;;  %11697 = vmatprep.mubr.msk.bf16.mxu1 %vm13585_vm0, %v18440_v10 }
 0xd5b   :  { %11757 = vmatprep.mubr.msk.bf16.mxu0 %vm13585_vm0, %v18440_v10 }
 0xd69   :  { %v16507_v59 = vpop.f32.mrb[124].mxu1  ;;  %v16509_v55 = vpop.f32.mrb[140].mxu0 }
 0xd6a   :  { %18532 = vst [vmem:[#allocation27_spill] sm:$0xff] %v16509_v55  ;;  %v16511_v51 = vpop.f32.mrb[125].mxu1  ;;  %v11639_v11 = vpop.f32.mrb[141].mxu0  ;;  %v5981_v23 = vmul.f32 %v16507_v59, %v16507_v59 }
 0xd6b   :  { %v16513_v17 = vpop.f32.mrb[126].mxu1  ;;  %v16515_v24 = vpop.f32.mrb[142].mxu0  ;;  %v6244_v41 = vmul.f32 %v16511_v51, %v16511_v51 }
 0xd6c   :  { %18533 = vst [vmem:[#allocation29_spill] sm:$0xff] %v16515_v24  ;;  %v5982_v22 = vmul.f32 %v16513_v17, %v16513_v17  ;;  %v16521_v50 = vpop.f32.mrb[127].mxu1  ;;  %v11640_v62 = vpop.f32.mrb[143].mxu0 }
 0xd6d   :  { %v6245_v61 = vmul.f32 %v16521_v50, %v16521_v50 }
 0xd6e   :  { %v5995_v11 = vpack.c.bf16 %v5982_v22, %v5981_v23 }
 0xd6f   :  { %v6258_v42 = vpack.c.bf16 %v6245_v61, %v6244_v41 }
 0xd70   :  { %11698 = vmatmul.mubr.bf16.gmra.mrb[168].mxu1 %v5995_v11 }
 0xd71   :  { %v16527_v46 = vpop.f32.mrb[128].mxu1  ;;  %v16529_v16 = vpop.f32.mrb[144].mxu0  ;;  %11758 = vmatmul.mubr.bf16.gmra.mrb[184].mxu0 %v6258_v42  ;;  %11701 = vmatprep.mubr.msk.bf16.mxu1 %vm13585_vm0, %v18440_v10 }
 0xd72   :  { %18534 = vst [vmem:[#allocation30_spill] sm:$0xff] %v16529_v16  ;;  %v16533_v27 = vpop.f32.mrb[129].mxu1  ;;  %v11643_v62 = vpop.f32.mrb[145].mxu0  ;;  %11761 = vmatprep.mubr.msk.bf16.mxu0 %vm13585_vm0, %v18440_v10  ;;  %v5983_v23 = vmul.f32 %v16527_v46, %v16527_v46 }
 0xd73   :  { %v16537_v1 = vpop.f32.mrb[130].mxu1  ;;  %v16539_v57 = vpop.f32.mrb[146].mxu0  ;;  %v6246_v61 = vmul.f32 %v16533_v27, %v16533_v27 }
 0xd74   :  { %18535 = vst [vmem:[#allocation31_spill] sm:$0xff] %v16539_v57  ;;  %v5984_v22 = vmul.f32 %v16537_v1, %v16537_v1  ;;  %v16545_v42 = vpop.f32.mrb[131].mxu1  ;;  %v11644_v41 = vpop.f32.mrb[147].mxu0 }
 0xd75   :  { %v6247_v11 = vmul.f32 %v16545_v42, %v16545_v42 }
 0xd76   :  { %v5996_v62 = vpack.c.bf16 %v5984_v22, %v5983_v23 }
 0xd77   :  { %v6259_v19 = vpack.c.bf16 %v6247_v11, %v6246_v61 }
 0xd78   :  { %11702 = vmatmul.mubr.bf16.gmra.mrb[172].mxu1 %v5996_v62 }
 0xd79   :  { %v16551_v3 = vpop.f32.mrb[132].mxu1  ;;  %v16553_v57 = vpop.f32.mrb[148].mxu0  ;;  %11762 = vmatmul.mubr.bf16.gmra.mrb[188].mxu0 %v6259_v19  ;;  %11705 = vmatprep.mubr.msk.bf16.mxu1 %vm13585_vm0, %v18440_v10 }
 0xd7a   :  { %18536 = vst [vmem:[#allocation32_spill] sm:$0xff] %v16553_v57  ;;  %v16557_v34 = vpop.f32.mrb[133].mxu1  ;;  %v11647_v41 = vpop.f32.mrb[149].mxu0  ;;  %11765 = vmatprep.mubr.msk.bf16.mxu0 %vm13585_vm0, %v18440_v10  ;;  %v5985_v23 = vmul.f32 %v16551_v3, %v16551_v3 }
 0xd7b   :  { %v16561_v16 = vpop.f32.mrb[134].mxu1  ;;  %v16563_v5 = vpop.f32.mrb[150].mxu0  ;;  %v6248_v11 = vmul.f32 %v16557_v34, %v16557_v34 }
 0xd7c   :  { %18537 = vst [vmem:[#allocation34_spill] sm:$0xff] %v16563_v5  ;;  %v5986_v22 = vmul.f32 %v16561_v16, %v16561_v16  ;;  %v16569_v19 = vpop.f32.mrb[135].mxu1  ;;  %v11648_v61 = vpop.f32.mrb[151].mxu0 }
 0xd7d   :  { %18538 = vst [vmem:[#allocation33_spill] sm:$0xff] %v16569_v19  ;;  %v6249_v62 = vmul.f32 %v16569_v19, %v16569_v19  ;;  %v16594_v19 = vld [vmem:[#allocation9 + $0x1] ss:$0 sm:$0xff] }
 0xd7e   :  { %v5997_v41 = vpack.c.bf16 %v5986_v22, %v5985_v23 }
 0xd7f   :  { %v6260_v35 = vpack.c.bf16 %v6249_v62, %v6248_v11 }
 0xd80   :  { %11706 = vmatmul.mubr.bf16.gmra.mrb[176].mxu1 %v5997_v41 }
 0xd81   :  { %v16575_v57 = vpop.f32.mrb[136].mxu1  ;;  %v16577_v5 = vpop.f32.mrb[152].mxu0  ;;  %11766 = vmatmul.mubr.bf16.gmra.mrb[192].mxu0 %v6260_v35  ;;  %11709 = vmatprep.mubr.msk.bf16.mxu1 %vm13585_vm0, %v18440_v10 }
 0xd82   :  { %18539 = vst [vmem:[#allocation36_spill] sm:$0xff] %v16575_v57  ;;  %18540 = vst [vmem:[#allocation35_spill] sm:$0xff] %v16577_v5  ;;  %v5987_v61 = vmul.f32 %v16575_v57, %v16575_v57  ;;  %v16583_v63 = vpop.f32.mrb[137].mxu1  ;;  %v11651_v33 = vpop.f32.mrb[153].mxu0  ;;  %11769 = vmatprep.mubr.msk.bf16.mxu0 %vm13585_vm0, %v18440_v10 }
 0xd83   :  { %18541 = vst [vmem:[#allocation38_spill] sm:$0xff] %v16583_v63  ;;  %v6250_v23 = vmul.f32 %v16583_v63, %v16583_v63  ;;  %v5844_v22 = vpop.f32.mrb[138].mxu1  ;;  %v5964_v11 = vpop.f32.mrb[154].mxu0 }
 0xd84   :  { %v5845_v62 = vpop.f32.mrb[139].mxu1  ;;  %v11652_v41 = vpop.f32.mrb[155].mxu0  ;;  %v5998_v35 = vpack.c.bf16 %v5987_v61, %v5987_v61 }
 0xd85   :  { %v6261_v5 = vpack.c.bf16 %v6250_v23, %v6250_v23 }
 0xd88   :  { %11710 = vmatmul.mubr.bf16.gmra.mrb[180].mxu1 %v5998_v35 }
 0xd89   :  { %11770 = vmatmul.mubr.bf16.gmra.mrb[196].mxu0 %v6261_v5  ;;  %11789 = vmatprep.mubr.msk.bf16.mxu1 %vm13585_vm0, %v18440_v10 }
 0xd8a   :  { %11849 = vmatprep.mubr.msk.bf16.mxu0 %vm13585_vm0, %v18440_v10 }
 0xddc   :  { %v6033_v33 = vpop.f32.mrb[140].mxu1 }
 0xddd   :  { %v6119_v24 = vmul.f32 0.0625, %v6033_v33  ;;  %v11671_v36 = vpop.f32.mrb[141].mxu1  ;;  %v6296_v15 = vpop.f32.mrb[156].mxu0 }
 0xdde   :  { %v6382_v55 = vmul.f32 0.0625, %v6296_v15  ;;  %v6036_v26 = vpop.f32.mrb[142].mxu1  ;;  %v11731_v22 = vpop.f32.mrb[157].mxu0 }
 0xddf   :  { %v6140_v11 = vadd.f32 1e-05, %v6119_v24  ;;  %v6120_v62 = vmul.f32 0.0625, %v6036_v26  ;;  %v11672_v41 = vpop.f32.mrb[143].mxu1  ;;  %v6299_v61 = vpop.f32.mrb[158].mxu0 }
 0xde0   :  { %v6403_v23 = vadd.f32 1e-05, %v6382_v55  ;;  %v6383_v35 = vmul.f32 0.0625, %v6299_v61  ;;  %v11732_v5 = vpop.f32.mrb[159].mxu0 }
 0xde1   :  { %12935 = vrsqrt.f32 %v6140_v11  ;;  %v6141_v56 = vadd.f32 1e-05, %v6120_v62 }
 0xde2   :  { %12937 = vrsqrt.f32 %v6403_v23  ;;  %v6404_v63 = vadd.f32 1e-05, %v6383_v35 }
 0xde3   :  { %12939 = vrsqrt.f32 %v6141_v56 }
 0xde4   :  { %12941 = vrsqrt.f32 %v6404_v63 }
 0xdeb   :  { %v12936_v57 = vpop.eup %12935 }
 0xdec   :  { %v12938_v33 = vpop.eup %12937  ;;  %v6182_v36 = vmul.f32 %v12936_v57, %v16323_v25 }
 0xded   :  { %v12940_v15 = vpop.eup %12939  ;;  %v6445_v24 = vmul.f32 %v12938_v33, %v16327_v13 }
 0xdee   :  { %v12942_v26 = vpop.eup %12941  ;;  %v6183_v55 = vmul.f32 %v12940_v15, %v16329_v4  ;;  %v16600_v11 = vmul.f32 %v16594_v19, %v6182_v36 }
 0xdef   :  { %v6446_v22 = vmul.f32 %v12942_v26, %v16337_v30  ;;  %v16606_v63 = vmul.f32 %v16594_v19, %v6445_v24 }
 0xdf0   :  { %v16603_v56 = vmul.f32 %v16594_v19, %v6183_v55 }
 0xdf1   :  { %v16609_v57 = vmul.f32 %v16594_v19, %v6446_v22 }
 0xdf2   :  { %v6508_v25 = vpack.c.bf16 %v16603_v56, %v16600_v11 }
 0xdf3   :  { %v6702_v13 = vpack.c.bf16 %v16609_v57, %v16606_v63 }
 0xdf4   :  { %11790 = vmatmul.mubr.bf16.vlgmr.msra.gmra.mrb[184].mxu1 %v6508_v25 }
 0xdf5   :  { %v6041_v4 = vpop.f32.mrb[144].mxu1  ;;  %11850 = vmatmul.mubr.bf16.vlgmr.msra.gmra.mrb[200].mxu0 %v6702_v13  ;;  %11793 = vmatprep.mubr.msk.bf16.mxu1 %vm13585_vm0, %v18440_v10 }
 0xdf6   :  { %v6121_v30 = vmul.f32 0.0625, %v6041_v4  ;;  %v11675_v62 = vpop.f32.mrb[145].mxu1  ;;  %v6304_v41 = vpop.f32.mrb[160].mxu0  ;;  %11853 = vmatprep.mubr.msk.bf16.mxu0 %vm13585_vm0, %v18440_v10  ;;  %11894 = vmatpush3.bf16.msra.mxu1 %v16214_v54 }
 0xdf7   :  { %v6384_v61 = vmul.f32 0.0625, %v6304_v41  ;;  %v6044_v23 = vpop.f32.mrb[146].mxu1  ;;  %v11735_v35 = vpop.f32.mrb[161].mxu0  ;;  %11895 = vmatprep.subr.bf16.mxu1 %v16220_v14 }
 0xdf8   :  { %v6142_v5 = vadd.f32 1e-05, %v6121_v30  ;;  %v6122_v33 = vmul.f32 0.0625, %v6044_v23  ;;  %v11676_v36 = vpop.f32.mrb[147].mxu1  ;;  %v6307_v15 = vpop.f32.mrb[162].mxu0 }
 0xdf9   :  { %v6405_v24 = vadd.f32 1e-05, %v6384_v61  ;;  %v6385_v26 = vmul.f32 0.0625, %v6307_v15  ;;  %v11736_v55 = vpop.f32.mrb[163].mxu0  ;;  %v13284_v61 = vld [vmem:[#allocation10 + $0x10] sm:$0xff]  }
 0xdfa   :  { %12943 = vrsqrt.f32 %v6142_v5  ;;  %v6143_v22 = vadd.f32 1e-05, %v6122_v33  ;;  %11896 = vmatpush3.bf16.msra.mxu1 %v16220_v14  ;;  %v13285_v55 = vld [vmem:[#allocation10 + $0x18] sm:$0xff]  }
 0xdfb   :  { %12945 = vrsqrt.f32 %v6405_v24  ;;  %v6406_v25 = vadd.f32 1e-05, %v6385_v26  ;;  %11897 = vmatprep.subr.bf16.mxu1 %v16226_v9 }
 0xdfc   :  { %12947 = vrsqrt.f32 %v6143_v22 }
 0xdfd   :  { %12949 = vrsqrt.f32 %v6406_v25  ;;  %v6049_v54 = vpop.f32.mrb[148].mxu1 }
 0xdfe   :  { %v6123_v13 = vmul.f32 0.0625, %v6049_v54  ;;  %v11679_v4 = vpop.f32.mrb[149].mxu1  ;;  %v6312_v30 = vpop.f32.mrb[164].mxu0  ;;  %11898 = vmatpush3.bf16.msra.mxu1 %v13284_v61 }
 0xdff   :  { %v6386_v62 = vmul.f32 0.0625, %v6312_v30  ;;  %v6052_v41 = vpop.f32.mrb[150].mxu1  ;;  %v11739_v23 = vpop.f32.mrb[165].mxu0  ;;  %11899 = vmatprep.subr.bf16.mxu1 %v16232_v31 }
 0xe00   :  { %v6144_v35 = vadd.f32 1e-05, %v6123_v13  ;;  %v6124_v5 = vmul.f32 0.0625, %v6052_v41  ;;  %v11680_v33 = vpop.f32.mrb[151].mxu1  ;;  %v6315_v36 = vpop.f32.mrb[166].mxu0  ;;  %v13287_v23 = vld [vmem:[#allocation10 + $0x28] sm:$0xff]  }
 0xe01   :  { %v6407_v14 = vadd.f32 1e-05, %v6386_v62  ;;  %v6387_v15 = vmul.f32 0.0625, %v6315_v36  ;;  %v11740_v24 = vpop.f32.mrb[167].mxu0  ;;  %v13286_v62 = vld [vmem:[#allocation10 + $0x20] sm:$0xff]  }
 0xe02   :  { %12951 = vrsqrt.f32 %v6144_v35  ;;  %v6145_v9 = vadd.f32 1e-05, %v6124_v5  ;;  %11900 = vmatpush3.bf16.msra.mxu1 %v13285_v55 }
 0xe03   :  { %12953 = vrsqrt.f32 %v6407_v14  ;;  %v6408_v26 = vadd.f32 1e-05, %v6387_v15  ;;  %11901 = vmatprep.subr.bf16.mxu1 %v16240_v21 }
 0xe04   :  { %v12944_v22 = vpop.eup %12943  ;;  %12955 = vrsqrt.f32 %v6145_v9  ;;  %v13288_v9 = vld [vmem:[#allocation10 + $0x30] sm:$0xff]  }
 0xe05   :  { %v12946_v25 = vpop.eup %12945  ;;  %v6184_v54 = vmul.f32 %v12944_v22, %v16355_v37  ;;  %12957 = vrsqrt.f32 %v6408_v26  ;;  %v13289_v26 = vld [vmem:[#allocation10 + $0x38] sm:$0xff]  }
 0xe06   :  { %v12948_v13 = vpop.eup %12947  ;;  %v6447_v31 = vmul.f32 %v12946_v25, %v16359_v48  ;;  %11902 = vmatpush3.bf16.msra.mxu1 %v13286_v62 }
 0xe07   :  { %v12950_v4 = vpop.eup %12949  ;;  %v6185_v30 = vmul.f32 %v12948_v13, %v16361_v6  ;;  %11903 = vmatprep.subr.bf16.mxu1 %v13287_v23  ;;  %v16630_v61 = vmul.f32 %v16594_v19, %v6184_v54 }
 0xe08   :  { %v6448_v41 = vmul.f32 %v12950_v4, %v16370_v32  ;;  %v16636_v37 = vmul.f32 %v16594_v19, %v6447_v31 }
 0xe09   :  { %v16633_v21 = vmul.f32 %v16594_v19, %v6185_v30 }
 0xe0a   :  { %v16639_v48 = vmul.f32 %v16594_v19, %v6448_v41  ;;  %11904 = vmatpush3.bf16.msra.mxu1 %v13287_v23 }
 0xe0b   :  { %v6509_v6 = vpack.c.bf16 %v16633_v21, %v16630_v61  ;;  %11905 = vmatprep.subr.bf16.mxu1 %v16255_v0 }
 0xe0c   :  { %v12952_v35 = vpop.eup %12951  ;;  %v6703_v32 = vpack.c.bf16 %v16639_v48, %v16636_v37 }
 0xe0d   :  { %v12954_v5 = vpop.eup %12953  ;;  %v6186_v33 = vmul.f32 %v12952_v35, %v16379_v45  ;;  %11794 = vmatmul.mubr.bf16.gmra.mrb[188].mxu1 %v6509_v6 }
 0xe0e   :  { %v12956_v36 = vpop.eup %12955  ;;  %v6449_v14 = vmul.f32 %v12954_v5, %v16385_v38  ;;  %11854 = vmatmul.mubr.bf16.gmra.mrb[204].mxu0 %v6703_v32  ;;  %11797 = vmatprep.mubr.msk.bf16.mxu1 %vm13585_vm0, %v18440_v10 }
 0xe0f   :  { %v12958_v15 = vpop.eup %12957  ;;  %v6187_v24 = vmul.f32 %v12956_v36, %v16389_v58  ;;  %11857 = vmatprep.mubr.msk.bf16.mxu0 %vm13585_vm0, %v18440_v10  ;;  %11906 = vmatpush3.bf16.msra.mxu1 %v13288_v9  ;;  %v16655_v45 = vmul.f32 %v16594_v19, %v6186_v33 }
 0xe10   :  { %v6450_v0 = vmul.f32 %v12958_v15, %v16398_v52  ;;  %11907 = vmatprep.subr.bf16.mxu1 %v13289_v26  ;;  %v16661_v55 = vmul.f32 %v16594_v19, %v6449_v14 }
 0xe11   :  { %v16658_v38 = vmul.f32 %v16594_v19, %v6187_v24 }
 0xe12   :  { %v16664_v58 = vmul.f32 %v16594_v19, %v6450_v0 }
 0xe13   :  { %v6510_v22 = vpack.c.bf16 %v16658_v38, %v16655_v45  ;;  %11908 = vmatpush3.bf16.msra.mxu1 %v13289_v26 }
 0xe14   :  { %v6704_v52 = vpack.c.bf16 %v16664_v58, %v16661_v55  ;;  %v6057_v25 = vpop.f32.mrb[152].mxu1  ;;  %12033 = vmatprep.subr.bf16.mxu1 %v18440_v10 }
 0xe15   :  { %v6125_v54 = vmul.f32 0.0625, %v6057_v25  ;;  %v11683_v13 = vpop.f32.mrb[153].mxu1  ;;  %v6320_v31 = vpop.f32.mrb[168].mxu0  ;;  %11798 = vmatmul.mubr.bf16.gmra.mrb[192].mxu1 %v6510_v22 }
 0xe16   :  { %v6388_v4 = vmul.f32 0.0625, %v6320_v31  ;;  %v6060_v30 = vpop.f32.mrb[154].mxu1  ;;  %v11743_v62 = vpop.f32.mrb[169].mxu0  ;;  %11858 = vmatmul.mubr.bf16.gmra.mrb[208].mxu0 %v6704_v52  ;;  %11801 = vmatprep.mubr.msk.bf16.mxu1 %vm13585_vm0, %v18440_v10 }
 0xe17   :  { %v6146_v41 = vadd.f32 1e-05, %v6125_v54  ;;  %v6126_v23 = vmul.f32 0.0625, %v6060_v30  ;;  %v11684_v6 = vpop.f32.mrb[155].mxu1  ;;  %v6323_v35 = vpop.f32.mrb[170].mxu0  ;;  %11861 = vmatprep.mubr.msk.bf16.mxu0 %vm13585_vm0, %v18440_v10 }
 0xe18   :  { %v6409_v32 = vadd.f32 1e-05, %v6388_v4  ;;  %v6389_v5 = vmul.f32 0.0625, %v6323_v35  ;;  %v11744_v33 = vpop.f32.mrb[171].mxu0 }
 0xe19   :  { %12959 = vrsqrt.f32 %v6146_v41  ;;  %v6147_v36 = vadd.f32 1e-05, %v6126_v23 }
 0xe1a   :  { %12961 = vrsqrt.f32 %v6409_v32  ;;  %v6410_v14 = vadd.f32 1e-05, %v6389_v5 }
 0xe1b   :  { %12963 = vrsqrt.f32 %v6147_v36 }
 0xe1c   :  { %12965 = vrsqrt.f32 %v6410_v14  ;;  %v6065_v15 = vpop.f32.mrb[156].mxu1 }
 0xe1d   :  { %v6127_v24 = vmul.f32 0.0625, %v6065_v15  ;;  %v11687_v9 = vpop.f32.mrb[157].mxu1  ;;  %v6328_v0 = vpop.f32.mrb[172].mxu0 }
 0xe1e   :  { %v6390_v26 = vmul.f32 0.0625, %v6328_v0  ;;  %v6068_v22 = vpop.f32.mrb[158].mxu1  ;;  %v11747_v52 = vpop.f32.mrb[173].mxu0 }
 0xe1f   :  { %v6148_v25 = vadd.f32 1e-05, %v6127_v24  ;;  %v6128_v54 = vmul.f32 0.0625, %v6068_v22  ;;  %v11688_v13 = vpop.f32.mrb[159].mxu1  ;;  %v6331_v31 = vpop.f32.mrb[174].mxu0 }
 0xe20   :  { %v6411_v4 = vadd.f32 1e-05, %v6390_v26  ;;  %v6391_v30 = vmul.f32 0.0625, %v6331_v31  ;;  %v11748_v62 = vpop.f32.mrb[175].mxu0 }
 0xe21   :  { %12967 = vrsqrt.f32 %v6148_v25  ;;  %v6149_v41 = vadd.f32 1e-05, %v6128_v54 }
 0xe22   :  { %12969 = vrsqrt.f32 %v6411_v4  ;;  %v6412_v23 = vadd.f32 1e-05, %v6391_v30 }
 0xe23   :  { %v12960_v6 = vpop.eup %12959  ;;  %12971 = vrsqrt.f32 %v6149_v41 }
 0xe24   :  { %v12962_v35 = vpop.eup %12961  ;;  %v6188_v32 = vmul.f32 %v12960_v6, %v16411_v49  ;;  %12973 = vrsqrt.f32 %v6412_v23  ;;  %v6073_v5 = vpop.f32.mrb[160].mxu1 }
 0xe25   :  { %v12964_v33 = vpop.eup %12963  ;;  %v6451_v36 = vmul.f32 %v12962_v35, %v16415_v12  ;;  %v6129_v14 = vmul.f32 0.0625, %v6073_v5  ;;  %v11691_v15 = vpop.f32.mrb[161].mxu1 }
 0xe26   :  { %v6336_v24 = vpop.f32.mrb[176].mxu0  ;;  %v12966_v9 = vpop.eup %12965  ;;  %v6189_v0 = vmul.f32 %v12964_v33, %v16417_v53  ;;  %v16680_v4 = vmul.f32 %v16594_v19, %v6188_v32 }
 0xe27   :  { %v6392_v26 = vmul.f32 0.0625, %v6336_v24  ;;  %v6076_v22 = vpop.f32.mrb[162].mxu1  ;;  %v11751_v52 = vpop.f32.mrb[177].mxu0  ;;  %v6452_v25 = vmul.f32 %v12966_v9, %v16425_v18  ;;  %v6150_v54 = vadd.f32 1e-05, %v6129_v14  ;;  %v16686_v53 = vmul.f32 %v16594_v19, %v6451_v36 }
 0xe28   :  { %v6130_v13 = vmul.f32 0.0625, %v6076_v22  ;;  %v11692_v31 = vpop.f32.mrb[163].mxu1  ;;  %v6339_v49 = vpop.f32.mrb[178].mxu0  ;;  %v16683_v12 = vmul.f32 %v16594_v19, %v6189_v0 }
 0xe29   :  { %v6413_v30 = vadd.f32 1e-05, %v6392_v26  ;;  %v6393_v62 = vmul.f32 0.0625, %v6339_v49  ;;  %v11752_v41 = vpop.f32.mrb[179].mxu0  ;;  %v16689_v23 = vmul.f32 %v16594_v19, %v6452_v25  ;;  %12975 = vrsqrt.f32 %v6150_v54 }
 0xe2a   :  { %v6151_v18 = vadd.f32 1e-05, %v6130_v13  ;;  %v6511_v6 = vpack.c.bf16 %v16683_v12, %v16680_v4 }
 0xe2b   :  { %12977 = vrsqrt.f32 %v6413_v30  ;;  %v6414_v35 = vadd.f32 1e-05, %v6393_v62  ;;  %v12968_v32 = vpop.eup %12967  ;;  %v6705_v5 = vpack.c.bf16 %v16689_v23, %v16686_v53 }
 0xe2c   :  { %12979 = vrsqrt.f32 %v6151_v18  ;;  %v12970_v33 = vpop.eup %12969  ;;  %v6190_v14 = vmul.f32 %v12968_v32, %v16431_v44  ;;  %11802 = vmatmul.mubr.bf16.gmra.mrb[196].mxu1 %v6511_v6  ;;  %v6081_v36 = vpop.f32.mrb[164].mxu1 }
 0xe2d   :  { %12981 = vrsqrt.f32 %v6414_v35  ;;  %v12972_v15 = vpop.eup %12971  ;;  %v6453_v24 = vmul.f32 %v12970_v33, %v16437_v60  ;;  %v6131_v9 = vmul.f32 0.0625, %v6081_v36  ;;  %11862 = vmatmul.mubr.bf16.gmra.mrb[212].mxu0 %v6705_v5  ;;  %v11695_v0 = vpop.f32.mrb[165].mxu1  ;;  %11805 = vmatprep.mubr.msk.bf16.mxu1 %vm13585_vm0, %v18440_v10 }
 0xe2e   :  { %v6344_v26 = vpop.f32.mrb[180].mxu0  ;;  %v12974_v22 = vpop.eup %12973  ;;  %v6191_v52 = vmul.f32 %v12972_v15, %v16441_v29  ;;  %11865 = vmatprep.mubr.msk.bf16.mxu0 %vm13585_vm0, %v18440_v10  ;;  %v16704_v62 = vmul.f32 %v16594_v19, %v6190_v14 }
 0xe2f   :  { %v6394_v25 = vmul.f32 0.0625, %v6344_v26  ;;  %v6084_v54 = vpop.f32.mrb[166].mxu1  ;;  %v11755_v13 = vpop.f32.mrb[181].mxu0  ;;  %v6454_v44 = vmul.f32 %v12974_v22, %v16449_v39  ;;  %v6152_v31 = vadd.f32 1e-05, %v6131_v9  ;;  %v16710_v35 = vmul.f32 %v16594_v19, %v6453_v24 }
 0xe30   :  { %v6132_v60 = vmul.f32 0.0625, %v6084_v54  ;;  %v11696_v49 = vpop.f32.mrb[167].mxu1  ;;  %v6347_v30 = vpop.f32.mrb[182].mxu0  ;;  %v16707_v41 = vmul.f32 %v16594_v19, %v6191_v52 }
 0xe31   :  { %v6415_v18 = vadd.f32 1e-05, %v6394_v25  ;;  %v6395_v29 = vmul.f32 0.0625, %v6347_v30  ;;  %v11756_v6 = vpop.f32.mrb[183].mxu0  ;;  %v16713_v32 = vmul.f32 %v16594_v19, %v6454_v44  ;;  %12983 = vrsqrt.f32 %v6152_v31 }
 0xe32   :  { %v6153_v39 = vadd.f32 1e-05, %v6132_v60  ;;  %v6512_v5 = vpack.c.bf16 %v16707_v41, %v16704_v62 }
 0xe33   :  { %12985 = vrsqrt.f32 %v6415_v18  ;;  %v6416_v33 = vadd.f32 1e-05, %v6395_v29  ;;  %v12976_v14 = vpop.eup %12975  ;;  %v6706_v36 = vpack.c.bf16 %v16713_v32, %v16710_v35 }
 0xe34   :  { %12987 = vrsqrt.f32 %v6153_v39  ;;  %v6192_v9 = vmul.f32 %v12976_v14, %v16455_v28  ;;  %11806 = vmatmul.mubr.bf16.gmra.mrb[200].mxu1 %v6512_v5 }
 0xe35   :  { %v12978_v15 = vpop.eup %12977  ;;  %12989 = vrsqrt.f32 %v6416_v33  ;;  %11866 = vmatmul.mubr.bf16.gmra.mrb[216].mxu0 %v6706_v36  ;;  %11809 = vmatprep.mubr.msk.bf16.mxu1 %vm13585_vm0, %v18440_v10 }
 0xe36   :  { %v12980_v24 = vpop.eup %12979  ;;  %v6455_v0 = vmul.f32 %v12978_v15, %v16461_v7  ;;  %11869 = vmatprep.mubr.msk.bf16.mxu0 %vm13585_vm0, %v18440_v10  ;;  %v16728_v25 = vmul.f32 %v16594_v19, %v6192_v9 }
 0xe37   :  { %v12982_v26 = vpop.eup %12981  ;;  %v6193_v22 = vmul.f32 %v12980_v24, %v16465_v40 }
 0xe38   :  { %v6456_v52 = vmul.f32 %v12982_v26, %v16473_v47  ;;  %v16734_v7 = vmul.f32 %v16594_v19, %v6455_v0 }
 0xe39   :  { %v16731_v28 = vmul.f32 %v16594_v19, %v6193_v22 }
 0xe3a   :  { %v16737_v54 = vmul.f32 %v16594_v19, %v6456_v52 }
 0xe3b   :  { %v6513_v40 = vpack.c.bf16 %v16731_v28, %v16728_v25  ;;  %v12984_v13 = vpop.eup %12983 }
 0xe3c   :  { %v6707_v44 = vpack.c.bf16 %v16737_v54, %v16734_v7  ;;  %v6194_v31 = vmul.f32 %v12984_v13, %v16479_v43 }
 0xe3d   :  { %v12986_v47 = vpop.eup %12985  ;;  %11810 = vmatmul.mubr.bf16.gmra.mrb[204].mxu1 %v6513_v40 }
 0xe3e   :  { %v12988_v60 = vpop.eup %12987  ;;  %v6457_v49 = vmul.f32 %v12986_v47, %v16485_v8  ;;  %11870 = vmatmul.mubr.bf16.gmra.mrb[220].mxu0 %v6707_v44  ;;  %11813 = vmatprep.mubr.msk.bf16.mxu1 %vm13585_vm0, %v18440_v10  ;;  %v16752_v6 = vmul.f32 %v16594_v19, %v6194_v31 }
 0xe3f   :  { %v12990_v30 = vpop.eup %12989  ;;  %v6195_v18 = vmul.f32 %v12988_v60, %v16489_v2  ;;  %11873 = vmatprep.mubr.msk.bf16.mxu0 %vm13585_vm0, %v18440_v10 }
 0xe40   :  { %v6458_v29 = vmul.f32 %v12990_v30, %v16497_v20  ;;  %v16758_v8 = vmul.f32 %v16594_v19, %v6457_v49 }
 0xe41   :  { %v16755_v43 = vmul.f32 %v16594_v19, %v6195_v18 }
 0xe42   :  { %v16761_v39 = vmul.f32 %v16594_v19, %v6458_v29 }
 0xe43   :  { %v6514_v2 = vpack.c.bf16 %v16755_v43, %v16752_v6  ;;  %v6089_v5 = vpop.f32.mrb[168].mxu1 }
 0xe44   :  { %v6708_v33 = vpack.c.bf16 %v16761_v39, %v16758_v8  ;;  %v6133_v20 = vmul.f32 0.0625, %v6089_v5  ;;  %v11699_v14 = vpop.f32.mrb[169].mxu1  ;;  %v6352_v36 = vpop.f32.mrb[184].mxu0 }
 0xe45   :  { %11814 = vmatmul.mubr.bf16.gmra.mrb[208].mxu1 %v6514_v2  ;;  %v6396_v15 = vmul.f32 0.0625, %v6352_v36  ;;  %v6092_v9 = vpop.f32.mrb[170].mxu1  ;;  %v11759_v24 = vpop.f32.mrb[185].mxu0 }
 0xe46   :  { %v6154_v0 = vadd.f32 1e-05, %v6133_v20  ;;  %11874 = vmatmul.mubr.bf16.gmra.mrb[224].mxu0 %v6708_v33  ;;  %v6134_v26 = vmul.f32 0.0625, %v6092_v9  ;;  %v11700_v22 = vpop.f32.mrb[171].mxu1  ;;  %v6355_v52 = vpop.f32.mrb[186].mxu0  ;;  %11817 = vmatprep.mubr.msk.bf16.mxu1 %vm13585_vm0, %v18440_v10 }
 0xe47   :  { %v6417_v40 = vadd.f32 1e-05, %v6396_v15  ;;  %v6397_v13 = vmul.f32 0.0625, %v6355_v52  ;;  %v11760_v44 = vpop.f32.mrb[187].mxu0  ;;  %11877 = vmatprep.mubr.msk.bf16.mxu0 %vm13585_vm0, %v18440_v10 }
 0xe48   :  { %12991 = vrsqrt.f32 %v6154_v0  ;;  %v6155_v47 = vadd.f32 1e-05, %v6134_v26 }
 0xe49   :  { %12993 = vrsqrt.f32 %v6417_v40  ;;  %v6418_v31 = vadd.f32 1e-05, %v6397_v13 }
 0xe4a   :  { %12995 = vrsqrt.f32 %v6155_v47 }
 0xe4b   :  { %12997 = vrsqrt.f32 %v6418_v31  ;;  %v6097_v60 = vpop.f32.mrb[172].mxu1 }
 0xe4c   :  { %v6135_v49 = vmul.f32 0.0625, %v6097_v60  ;;  %v11703_v30 = vpop.f32.mrb[173].mxu1  ;;  %v6360_v18 = vpop.f32.mrb[188].mxu0 }
 0xe4d   :  { %v6398_v29 = vmul.f32 0.0625, %v6360_v18  ;;  %v6100_v2 = vpop.f32.mrb[174].mxu1  ;;  %v11763_v5 = vpop.f32.mrb[189].mxu0 }
 0xe4e   :  { %v6156_v33 = vadd.f32 1e-05, %v6135_v49  ;;  %v6136_v20 = vmul.f32 0.0625, %v6100_v2  ;;  %v11704_v14 = vpop.f32.mrb[175].mxu1  ;;  %v6363_v36 = vpop.f32.mrb[190].mxu0 }
 0xe4f   :  { %v6419_v15 = vadd.f32 1e-05, %v6398_v29  ;;  %v6399_v9 = vmul.f32 0.0625, %v6363_v36  ;;  %v11764_v24 = vpop.f32.mrb[191].mxu0 }
 0xe50   :  { %12999 = vrsqrt.f32 %v6156_v33  ;;  %v6157_v0 = vadd.f32 1e-05, %v6136_v20 }
 0xe51   :  { %13001 = vrsqrt.f32 %v6419_v15  ;;  %v6420_v26 = vadd.f32 1e-05, %v6399_v9 }
 0xe52   :  { %v12992_v22 = vpop.eup %12991  ;;  %13003 = vrsqrt.f32 %v6157_v0 }
 0xe53   :  { %v12994_v52 = vpop.eup %12993  ;;  %v6196_v40 = vmul.f32 %v12992_v22, %v16507_v59  ;;  %13005 = vrsqrt.f32 %v6420_v26  ;;  %v6105_v13 = vpop.f32.mrb[176].mxu1 }
 0xe54   :  { %v12996_v44 = vpop.eup %12995  ;;  %v6459_v47 = vmul.f32 %v12994_v52, %v16511_v51  ;;  %v6137_v31 = vmul.f32 0.0625, %v6105_v13  ;;  %v11707_v60 = vpop.f32.mrb[177].mxu1 }
 0xe55   :  { %v6368_v49 = vpop.f32.mrb[192].mxu0  ;;  %v12998_v30 = vpop.eup %12997  ;;  %v6197_v18 = vmul.f32 %v12996_v44, %v16513_v17  ;;  %v16776_v15 = vmul.f32 %v16594_v19, %v6196_v40 }
 0xe56   :  { %v6400_v29 = vmul.f32 0.0625, %v6368_v49  ;;  %v6108_v2 = vpop.f32.mrb[178].mxu1  ;;  %v11767_v5 = vpop.f32.mrb[193].mxu0  ;;  %v6460_v33 = vmul.f32 %v12998_v30, %v16521_v50  ;;  %v6158_v20 = vadd.f32 1e-05, %v6137_v31  ;;  %v16782_v17 = vmul.f32 %v16594_v19, %v6459_v47 }
 0xe57   :  { %v6138_v14 = vmul.f32 0.0625, %v6108_v2  ;;  %v11708_v36 = vpop.f32.mrb[179].mxu1  ;;  %v6371_v59 = vpop.f32.mrb[194].mxu0  ;;  %v16779_v51 = vmul.f32 %v16594_v19, %v6197_v18 }
 0xe58   :  { %v6421_v9 = vadd.f32 1e-05, %v6400_v29  ;;  %v6401_v24 = vmul.f32 0.0625, %v6371_v59  ;;  %v11768_v0 = vpop.f32.mrb[195].mxu0  ;;  %v16785_v26 = vmul.f32 %v16594_v19, %v6460_v33  ;;  %13007 = vrsqrt.f32 %v6158_v20 }
 0xe59   :  { %v6159_v50 = vadd.f32 1e-05, %v6138_v14  ;;  %v6515_v22 = vpack.c.bf16 %v16779_v51, %v16776_v15 }
 0xe5a   :  { %13009 = vrsqrt.f32 %v6421_v9  ;;  %v6422_v52 = vadd.f32 1e-05, %v6401_v24  ;;  %v13000_v40 = vpop.eup %12999  ;;  %v6709_v13 = vpack.c.bf16 %v16785_v26, %v16782_v17 }
 0xe5b   :  { %13011 = vrsqrt.f32 %v6159_v50  ;;  %v13002_v44 = vpop.eup %13001  ;;  %v6198_v31 = vmul.f32 %v13000_v40, %v16527_v46  ;;  %v6113_v47 = vpop.f32.mrb[180].mxu1  ;;  %11818 = vmatmul.mubr.bf16.gmra.mrb[212].mxu1 %v6515_v22 }
 0xe5c   :  { %13013 = vrsqrt.f32 %v6422_v52  ;;  %v13004_v60 = vpop.eup %13003  ;;  %v6461_v49 = vmul.f32 %v13002_v44, %v16533_v27  ;;  %v6139_v30 = vmul.f32 0.0625, %v6113_v47  ;;  %v11711_v18 = vpop.f32.mrb[181].mxu1  ;;  %11878 = vmatmul.mubr.bf16.gmra.mrb[228].mxu0 %v6709_v13  ;;  %11821 = vmatprep.mubr.msk.bf16.mxu1 %vm13585_vm0, %v18440_v10 }
 0xe5d   :  { %v6376_v29 = vpop.f32.mrb[196].mxu0  ;;  %v13006_v2 = vpop.eup %13005  ;;  %v6199_v5 = vmul.f32 %v13004_v60, %v16537_v1  ;;  %11881 = vmatprep.mubr.msk.bf16.mxu0 %vm13585_vm0, %v18440_v10  ;;  %v16800_v9 = vmul.f32 %v16594_v19, %v6198_v31 }
 0xe5e   :  { %v6402_v33 = vmul.f32 0.0625, %v6376_v29  ;;  %v6116_v20 = vpop.f32.mrb[182].mxu1  ;;  %v11771_v14 = vpop.f32.mrb[197].mxu0  ;;  %v6462_v46 = vmul.f32 %v13006_v2, %v16545_v42  ;;  %v6160_v36 = vadd.f32 1e-05, %v6139_v30  ;;  %v16806_v1 = vmul.f32 %v16594_v19, %v6461_v49  ;;  %v18542_v30 = vld [vmem:[#allocation33_spill] sm:$0xff] }
 0xe5f   :  { %v11712_v27 = vpop.f32.mrb[183].mxu1  ;;  %v6379_v59 = vpop.f32.mrb[198].mxu0  ;;  %v16803_v24 = vmul.f32 %v16594_v19, %v6199_v5  ;;  %v18543_v14 = vld [vmem:[#allocation36_spill] sm:$0xff] }
 0xe60   :  { %v6423_v0 = vadd.f32 1e-05, %v6402_v33  ;;  %v11772_v50 = vpop.f32.mrb[199].mxu0  ;;  %v16809_v22 = vmul.f32 %v16594_v19, %v6462_v46  ;;  %13015 = vrsqrt.f32 %v6160_v36  ;;  %v18544_v36 = vld [vmem:[#allocation38_spill] sm:$0xff] }
 0xe61   :  { %v6516_v42 = vpack.c.bf16 %v16803_v24, %v16800_v9 }
 0xe62   :  { %13017 = vrsqrt.f32 %v6423_v0  ;;  %v13008_v52 = vpop.eup %13007  ;;  %v6710_v40 = vpack.c.bf16 %v16809_v22, %v16806_v1 }
 0xe63   :  { %v6200_v44 = vmul.f32 %v13008_v52, %v16551_v3  ;;  %11822 = vmatmul.mubr.bf16.gmra.mrb[216].mxu1 %v6516_v42 }
 0xe64   :  { %v13010_v13 = vpop.eup %13009  ;;  %11882 = vmatmul.mubr.bf16.gmra.mrb[232].mxu0 %v6710_v40  ;;  %11825 = vmatprep.mubr.msk.bf16.mxu1 %vm13585_vm0, %v18440_v10  ;;  %v16860_v40 = vld [vmem:[%s18226_s14] ss:$0 sm:$0xff] }
 0xe65   :  { %v13012_v31 = vpop.eup %13011  ;;  %v6463_v47 = vmul.f32 %v13010_v13, %v16557_v34  ;;  %11885 = vmatprep.mubr.msk.bf16.mxu0 %vm13585_vm0, %v18440_v10  ;;  %v16824_v29 = vmul.f32 %v16594_v19, %v6200_v44  ;;  %v16864_v13 = vld [vmem:[#allocation13] ss:$0 sm:$0xff] }
 0xe66   :  { %v13014_v60 = vpop.eup %13013  ;;  %v6201_v49 = vmul.f32 %v13012_v31, %v16561_v16 }
 0xe67   :  { %v6464_v18 = vmul.f32 %v13014_v60, %v18542_v30  ;;  %v16830_v34 = vmul.f32 %v16594_v19, %v6463_v47  ;;  %v6681_v60 = vmul.f32 %v16860_v40, %v16606_v63 }
 0xe68   :  { %v16827_v3 = vmul.f32 %v16594_v19, %v6201_v49 }
 0xe69   :  { %v16833_v2 = vmul.f32 %v16594_v19, %v6464_v18 }
 0xe6a   :  { %v6517_v16 = vpack.c.bf16 %v16827_v3, %v16824_v29  ;;  %v13016_v5 = vpop.eup %13015 }
 0xe6b   :  { %v6711_v33 = vpack.c.bf16 %v16833_v2, %v16830_v34  ;;  %v6202_v46 = vmul.f32 %v13016_v5, %v18543_v14  ;;  %v6488_v5 = vmul.f32 %v16860_v40, %v16603_v56 }
 0xe6c   :  { %v13018_v20 = vpop.eup %13017  ;;  %11826 = vmatmul.mubr.bf16.gmra.mrb[220].mxu1 %v6517_v16 }
 0xe6d   :  { %v6465_v27 = vmul.f32 %v13018_v20, %v18544_v36  ;;  %11886 = vmatmul.mubr.bf16.gmra.mrb[236].mxu0 %v6711_v33  ;;  %11829 = vmatprep.mubr.msk.bf16.mxu1 %vm13585_vm0, %v18440_v10  ;;  %v16844_v59 = vmul.f32 %v16594_v19, %v6202_v46  ;;  %v6682_v46 = vmul.f32 %v16860_v40, %v16609_v57 }
 0xe6e   :  { %11889 = vmatprep.mubr.msk.bf16.mxu0 %vm13585_vm0, %v18440_v10 }
 0xe6f   :  { %v16849_v0 = vmul.f32 %v16594_v19, %v6465_v27  ;;  %v6518_v50 = vpack.c.bf16 %v16844_v59, %v16844_v59  ;;  %v6487_v19 = vmul.f32 %v16860_v40, %v16600_v11 }
 0xe71   :  { %v6712_v42 = vpack.c.bf16 %v16849_v0, %v16849_v0 }
 0xe74   :  { %11830 = vmatmul.mubr.bf16.gmra.mrb[224].mxu1 %v6518_v50 }
 0xe75   :  { %11890 = vmatmul.mubr.bf16.gmra.mrb[240].mxu0 %v6712_v42 }
 0xe76   :  { %11989 = vmatprep.mubr.msk.bf16.mxu0 %vm13585_vm0, %v18440_v10 }
 0xec7   :  { %v6553_v52 = vpop.f32.mrb[184].mxu1 }
 0xec8   :  { %v6639_v44 = vmul.f32 %v16864_v13, %v6553_v52  ;;  %v11791_v31 = vpop.f32.mrb[185].mxu1  ;;  %v6747_v47 = vpop.f32.mrb[200].mxu0 }
 0xec9   :  { %v6833_v49 = vmul.f32 %v16864_v13, %v6747_v47  ;;  %v6556_v30 = vpop.f32.mrb[186].mxu1  ;;  %v11851_v18 = vpop.f32.mrb[201].mxu0 }
 0xeca   :  { %v16870_v16 = vadd.f32 %v6639_v44, %v6487_v19  ;;  %v6640_v11 = vmul.f32 %v16864_v13, %v6556_v30  ;;  %v11792_v33 = vpop.f32.mrb[187].mxu1  ;;  %v6750_v20 = vpop.f32.mrb[202].mxu0  ;;  %v6489_v44 = vmul.f32 %v16860_v40, %v16630_v61 }
 0xecb   :  { %v16875_v14 = vadd.f32 %v6833_v49, %v6681_v60  ;;  %v6834_v63 = vmul.f32 %v16864_v13, %v6750_v20  ;;  %v11852_v36 = vpop.f32.mrb[203].mxu0  ;;  %v6683_v60 = vmul.f32 %v16860_v40, %v16636_v37 }
 0xecc   :  { %v16880_v27 = vadd.f32 %v6640_v11, %v6488_v5  ;;  %v6490_v11 = vmul.f32 %v16860_v40, %v16633_v21 }
 0xecd   :  { %v16882_v50 = vadd.f32 %v6834_v63, %v6682_v46  ;;  %v6875_v42 = vmul.f32 %v16875_v14, %v16870_v16  ;;  %v6684_v63 = vmul.f32 %v16860_v40, %v16639_v48 }
 0xecf   :  { %v6876_v56 = vmul.f32 %v16882_v50, %v16880_v27 }
 0xed1   :  { %v6938_v52 = vpack.c.bf16 %v6876_v56, %v6875_v42 }
 0xed3   :  { %11909 = vmatprep.mubr.bf16.mxu1 %v6938_v52 }
 0xee0   :  { %v6561_v19 = vpop.f32.mrb[188].mxu1 }
 0xee1   :  { %v6641_v57 = vmul.f32 %v16864_v13, %v6561_v19  ;;  %v11795_v31 = vpop.f32.mrb[189].mxu1  ;;  %v6755_v47 = vpop.f32.mrb[204].mxu0 }
 0xee2   :  { %v6835_v49 = vmul.f32 %v16864_v13, %v6755_v47  ;;  %v6564_v30 = vpop.f32.mrb[190].mxu1  ;;  %v11855_v18 = vpop.f32.mrb[205].mxu0 }
 0xee3   :  { %v16894_v5 = vadd.f32 %v6641_v57, %v6489_v44  ;;  %v6642_v33 = vmul.f32 %v16864_v13, %v6564_v30  ;;  %v11796_v20 = vpop.f32.mrb[191].mxu1  ;;  %v6758_v61 = vpop.f32.mrb[206].mxu0  ;;  %v6491_v44 = vmul.f32 %v16860_v40, %v16655_v45 }
 0xee4   :  { %v16899_v46 = vadd.f32 %v6835_v49, %v6683_v60  ;;  %v6836_v37 = vmul.f32 %v16864_v13, %v6758_v61  ;;  %v11856_v36 = vpop.f32.mrb[207].mxu0  ;;  %v6685_v60 = vmul.f32 %v16860_v40, %v16661_v55 }
 0xee5   :  { %v16904_v42 = vadd.f32 %v6642_v33, %v6490_v11  ;;  %v6492_v33 = vmul.f32 %v16860_v40, %v16658_v38 }
 0xee6   :  { %v16906_v56 = vadd.f32 %v6836_v37, %v6684_v63  ;;  %v6877_v52 = vmul.f32 %v16899_v46, %v16894_v5  ;;  %v6686_v37 = vmul.f32 %v16860_v40, %v16664_v58 }
 0xee8   :  { %v6878_v21 = vmul.f32 %v16906_v56, %v16904_v42  ;;  %v6569_v19 = vpop.f32.mrb[192].mxu1 }
 0xee9   :  { %v6643_v57 = vmul.f32 %v16864_v13, %v6569_v19  ;;  %v11799_v48 = vpop.f32.mrb[193].mxu1  ;;  %v6763_v31 = vpop.f32.mrb[208].mxu0 }
 0xeea   :  { %v6939_v47 = vpack.c.bf16 %v6878_v21, %v6877_v52  ;;  %v6837_v49 = vmul.f32 %v16864_v13, %v6763_v31  ;;  %v6572_v30 = vpop.f32.mrb[194].mxu1  ;;  %v11859_v18 = vpop.f32.mrb[209].mxu0  ;;  %v13292_v21 = vld [vmem:[%s18223_s11] sm:$0xff]   ;;  %v13294_v48 = vld [vmem:[%s18223_s11 + $0x10] sm:$0xff]   ;;  %v13295_v31 = vld [vmem:[%s18223_s11 + $0x18] sm:$0xff]  }
 0xeeb   :  { %v16918_v11 = vadd.f32 %v6643_v57, %v6491_v44  ;;  %v6644_v20 = vmul.f32 %v16864_v13, %v6572_v30  ;;  %v11800_v45 = vpop.f32.mrb[195].mxu1  ;;  %v6766_v61 = vpop.f32.mrb[210].mxu0  ;;  %v13293_v44 = vld [vmem:[%s18223_s11 + $0x8] sm:$0xff]  }
 0xeec   :  { %v16923_v63 = vadd.f32 %v6837_v49, %v6685_v60  ;;  %v6838_v55 = vmul.f32 %v16864_v13, %v6766_v61  ;;  %v11860_v36 = vpop.f32.mrb[211].mxu0  ;;  %11910 = vmatmul.mubr.bf16.vlgmr.msra.gmra.mrb[228].mxu1 %v6939_v47  ;;  %v13296_v47 = vld [vmem:[%s18223_s11 + $0x20] sm:$0xff]   ;;  %v6493_v49 = vmul.f32 %v16860_v40, %v16680_v4 }
 0xeed   :  { %v16928_v52 = vadd.f32 %v6644_v20, %v6492_v33  ;;  %12034 = vmatpush3.bf16.msra.mxu1 %v13292_v21  ;;  %v6687_v20 = vmul.f32 %v16860_v40, %v16686_v53  ;;  %v16970_v4 = vld [vmem:[%s18226_s14 + $0x1] ss:$0 sm:$0xff]  ;;  %v16974_v53 = vld [vmem:[#allocation13 + $0x1] ss:$0 sm:$0xff] }
 0xeee   :  { %v16933_v38 = vadd.f32 %v6838_v55, %v6686_v37  ;;  %12035 = vmatprep.subr.bf16.mxu1 %v18440_v10  ;;  %v6879_v19 = vmul.f32 %v16923_v63, %v16918_v11  ;;  %v13297_v55 = vld [vmem:[%s18223_s11 + $0x28] sm:$0xff]   ;;  %v6494_v21 = vmul.f32 %v16970_v4, %v16683_v12  ;;  %v13300_v12 = vld [vmem:[%s18223_s11 + $0x30] sm:$0xff]  }
 0xef0   :  { %v6880_v58 = vmul.f32 %v16933_v38, %v16928_v52 }
 0xef1   :  { %12036 = vmatpush3.bf16.msra.mxu1 %v13293_v44  ;;  %v6688_v44 = vmul.f32 %v16970_v4, %v16689_v23 }
 0xef2   :  { %v6940_v57 = vpack.c.bf16 %v6880_v58, %v6879_v19  ;;  %12037 = vmatprep.subr.bf16.mxu1 %v18440_v10 }
 0xef4   :  { %11913 = vmatprep.mubr.bf16.mxu1 %v6940_v57 }
 0xef5   :  { %12038 = vmatpush3.bf16.msra.mxu1 %v13294_v48 }
 0xef6   :  { %12039 = vmatprep.subr.bf16.mxu1 %v18440_v10 }
 0xef9   :  { %12040 = vmatpush3.bf16.msra.mxu1 %v13295_v31 }
 0xefa   :  { %12041 = vmatprep.subr.bf16.mxu1 %v18440_v10 }
 0xefd   :  { %12042 = vmatpush3.bf16.msra.mxu1 %v13296_v47 }
 0xefe   :  { %12043 = vmatprep.subr.bf16.mxu1 %v18440_v10 }
 0xeff   :  { %v6577_v60 = vpop.f32.mrb[196].mxu1 }
 0xf00   :  { %v6645_v30 = vmul.f32 %v16864_v13, %v6577_v60  ;;  %v11803_v18 = vpop.f32.mrb[197].mxu1  ;;  %v6771_v33 = vpop.f32.mrb[212].mxu0 }
 0xf01   :  { %v6839_v45 = vmul.f32 %v16864_v13, %v6771_v33  ;;  %v6580_v61 = vpop.f32.mrb[198].mxu1  ;;  %v11863_v37 = vpop.f32.mrb[213].mxu0  ;;  %12044 = vmatpush3.bf16.msra.mxu1 %v13297_v55  ;;  %v6495_v18 = vmul.f32 %v16970_v4, %v16704_v62  ;;  %v6496_v62 = vmul.f32 %v16970_v4, %v16707_v41 }
 0xf02   :  { %v16965_v36 = vadd.f32 %v6645_v30, %v6493_v49  ;;  %v6646_v40 = vmul.f32 %v16974_v53, %v6580_v61  ;;  %v11804_v13 = vpop.f32.mrb[199].mxu1  ;;  %v6774_v19 = vpop.f32.mrb[214].mxu0  ;;  %12045 = vmatprep.subr.bf16.mxu1 %v18440_v10  ;;  %v6689_v37 = vmul.f32 %v16970_v4, %v16710_v35  ;;  %v6690_v35 = vmul.f32 %v16970_v4, %v16713_v32 }
 0xf03   :  { %v16978_v58 = vadd.f32 %v6839_v45, %v6687_v20  ;;  %v6840_v57 = vmul.f32 %v16974_v53, %v6774_v19  ;;  %v11864_v48 = vpop.f32.mrb[215].mxu0  ;;  %v13301_v13 = vld [vmem:[%s18223_s11 + $0x38] sm:$0xff]  }
 0xf04   :  { %v16983_v31 = vadd.f32 %v6646_v40, %v6494_v21 }
 0xf05   :  { %v16985_v47 = vadd.f32 %v6840_v57, %v6688_v44  ;;  %12046 = vmatpush3.bf16.msra.mxu1 %v13300_v12  ;;  %v6881_v60 = vmul.f32 %v16978_v58, %v16965_v36 }
 0xf06   :  { %12047 = vmatprep.subr.bf16.mxu1 %v18440_v10 }
 0xf07   :  { %v6882_v23 = vmul.f32 %v16985_v47, %v16870_v16  ;;  %v6585_v49 = vpop.f32.mrb[200].mxu1  ;;  %v16997_v30 = vmul.f32 %v16985_v47, %v16983_v31 }
 0xf08   :  { %v6647_v33 = vmul.f32 %v16974_v53, %v6585_v49  ;;  %v11807_v20 = vpop.f32.mrb[201].mxu1  ;;  %v6779_v45 = vpop.f32.mrb[216].mxu0 }
 0xf09   :  { %18545 = vst [vmem:[#allocation37_spill] sm:$0xff] %v16997_v30  ;;  %v6941_v61 = vpack.c.bf16 %v6882_v23, %v6881_v60  ;;  %v6841_v55 = vmul.f32 %v16974_v53, %v6779_v45  ;;  %v6588_v21 = vpop.f32.mrb[202].mxu1  ;;  %v11867_v40 = vpop.f32.mrb[217].mxu0  ;;  %12048 = vmatpush3.bf16.msra.mxu1 %v13301_v13 }
 0xf0a   :  { %v17008_v19 = vadd.f32 %v6647_v33, %v6495_v18  ;;  %v6648_v44 = vmul.f32 %v16974_v53, %v6588_v21  ;;  %v11808_v57 = vpop.f32.mrb[203].mxu1  ;;  %v6782_v48 = vpop.f32.mrb[218].mxu0  ;;  %v6497_v40 = vmul.f32 %v16970_v4, %v16728_v25 }
 0xf0b   :  { %v17013_v12 = vadd.f32 %v6841_v55, %v6689_v37  ;;  %v6842_v60 = vmul.f32 %v16974_v53, %v6782_v48  ;;  %11914 = vmatmul.mubr.bf16.gmra.mrb[232].mxu1 %v6941_v61  ;;  %v11868_v23 = vpop.f32.mrb[219].mxu0  ;;  %v6691_v57 = vmul.f32 %v16970_v4, %v16734_v7  ;;  %v6498_v55 = vmul.f32 %v16970_v4, %v16731_v28 }
 0xf0c   :  { %v17018_v49 = vadd.f32 %v6648_v44, %v6496_v62  ;;  %v17028_v33 = vmul.f32 %v16882_v50, %v17008_v19 }
 0xf0d   :  { %v17020_v18 = vadd.f32 %v6842_v60, %v6690_v35  ;;  %v17024_v41 = vmul.f32 %v17013_v12, %v17008_v19  ;;  %v6883_v61 = vmul.f32 %v17013_v12, %v16880_v27 }
 0xf0e   :  { %18547 = vst [vmem:[#allocation40_spill] sm:$0xff] %v17028_v33  ;;  %v17032_v20 = vmul.f32 %v16899_v46, %v17018_v49 }
 0xf0f   :  { %18546 = vst [vmem:[#allocation39_spill] sm:$0xff] %v17024_v41  ;;  %v17036_v32 = vmul.f32 %v17020_v18, %v17018_v49  ;;  %v6884_v37 = vmul.f32 %v17020_v18, %v16894_v5 }
 0xf10   :  { %v6593_v45 = vpop.f32.mrb[204].mxu1 }
 0xf11   :  { %18548 = vst [vmem:[#allocation41_spill] sm:$0xff] %v17036_v32  ;;  %v6649_v13 = vmul.f32 %v16974_v53, %v6593_v45  ;;  %v11811_v62 = vpop.f32.mrb[205].mxu1  ;;  %v6787_v44 = vpop.f32.mrb[220].mxu0  ;;  %v6942_v23 = vpack.c.bf16 %v6884_v37, %v6883_v61 }
 0xf12   :  { %v6843_v48 = vmul.f32 %v16974_v53, %v6787_v44  ;;  %v6596_v35 = vpop.f32.mrb[206].mxu1  ;;  %v11871_v60 = vpop.f32.mrb[221].mxu0  ;;  %v6692_v62 = vmul.f32 %v16970_v4, %v16737_v54 }
 0xf13   :  { %v17052_v10 = vadd.f32 %v6649_v13, %v6497_v40  ;;  %v6650_v21 = vmul.f32 %v16974_v53, %v6596_v35  ;;  %v11812_v25 = vpop.f32.mrb[207].mxu1  ;;  %v6790_v30 = vpop.f32.mrb[222].mxu0  ;;  %11917 = vmatprep.mubr.bf16.mxu1 %v6942_v23 }
 0xf14   :  { %v17057_v45 = vadd.f32 %v6843_v48, %v6691_v57  ;;  %v6844_v7 = vmul.f32 %v16974_v53, %v6790_v30  ;;  %v11872_v44 = vpop.f32.mrb[223].mxu0  ;;  %v6499_v57 = vmul.f32 %v16970_v4, %v16752_v6  ;;  %v6500_v6 = vmul.f32 %v16970_v4, %v16755_v43 }
 0xf15   :  { %v17062_v60 = vadd.f32 %v6650_v21, %v6498_v55  ;;  %v17072_v37 = vmul.f32 %v16906_v56, %v17052_v10 }
 0xf16   :  { %v17066_v61 = vmul.f32 %v17057_v45, %v17052_v10  ;;  %v17068_v28 = vadd.f32 %v6844_v7, %v6692_v62  ;;  %v6885_v54 = vmul.f32 %v17057_v45, %v16904_v42  ;;  %v6693_v7 = vmul.f32 %v16970_v4, %v16758_v8 }
 0xf17   :  { %v17076_v40 = vmul.f32 %v16923_v63, %v17062_v60 }
 0xf18   :  { %18549 = vst [vmem:[#allocation42_spill] sm:$0xff] %v17066_v61  ;;  %v6886_v55 = vmul.f32 %v17068_v28, %v16918_v11  ;;  %v6601_v21 = vpop.f32.mrb[208].mxu1  ;;  %v17086_v13 = vmul.f32 %v17068_v28, %v17062_v60 }
 0xf19   :  { %v6651_v48 = vmul.f32 %v16974_v53, %v6601_v21  ;;  %v11815_v35 = vpop.f32.mrb[209].mxu1  ;;  %v6795_v23 = vpop.f32.mrb[224].mxu0 }
 0xf1a   :  { %18550 = vst [vmem:[#allocation43_spill] sm:$0xff] %v17086_v13  ;;  %v6943_v62 = vpack.c.bf16 %v6886_v55, %v6885_v54  ;;  %v6845_v44 = vmul.f32 %v16974_v53, %v6795_v23  ;;  %v6604_v30 = vpop.f32.mrb[210].mxu1  ;;  %v11875_v32 = vpop.f32.mrb[225].mxu0  ;;  %v6694_v54 = vmul.f32 %v16970_v4, %v16761_v39 }
 0xf1b   :  { %v17096_v61 = vadd.f32 %v6651_v48, %v6499_v57  ;;  %v6652_v21 = vmul.f32 %v16974_v53, %v6604_v30  ;;  %v11816_v35 = vpop.f32.mrb[211].mxu1  ;;  %v6798_v41 = vpop.f32.mrb[226].mxu0 }
 0xf1c   :  { %v17101_v33 = vadd.f32 %v6845_v44, %v6693_v7  ;;  %v6846_v8 = vmul.f32 %v16974_v53, %v6798_v41  ;;  %v11876_v55 = vpop.f32.mrb[227].mxu0  ;;  %11918 = vmatmul.mubr.bf16.gmra.mrb[236].mxu1 %v6943_v62  ;;  %v17137_v44 = vld [vmem:[%s18226_s14 + $0x2] ss:$0 sm:$0xff] }
 0xf1d   :  { %v17106_v23 = vadd.f32 %v6652_v21, %v6500_v6  ;;  %v17116_v30 = vmul.f32 %v16933_v38, %v17096_v61  ;;  %v6501_v6 = vmul.f32 %v17137_v44, %v16776_v15  ;;  %v17141_v21 = vld [vmem:[#allocation13 + $0x2] ss:$0 sm:$0xff]  ;;  %v6695_v55 = vmul.f32 %v17137_v44, %v16782_v17 }
 0xf1e   :  { %v17108_v32 = vadd.f32 %v6846_v8, %v6694_v54  ;;  %v17112_v43 = vmul.f32 %v17101_v33, %v17096_v61  ;;  %v6887_v4 = vmul.f32 %v17101_v33, %v16928_v52  ;;  %v6502_v48 = vmul.f32 %v17137_v44, %v16779_v51 }
 0xf1f   :  { %18552 = vst [vmem:[#allocation45_spill] sm:$0xff] %v17116_v30  ;;  %v17120_v57 = vmul.f32 %v16978_v58, %v17106_v23 }
 0xf20   :  { %18551 = vst [vmem:[#allocation44_spill] sm:$0xff] %v17112_v43  ;;  %v17124_v39 = vmul.f32 %v17108_v32, %v17106_v23  ;;  %v6888_v53 = vmul.f32 %v17108_v32, %v16965_v36 }
 0xf22   :  { %v6944_v62 = vpack.c.bf16 %v6888_v53, %v6887_v4 }
 0xf24   :  { %11921 = vmatprep.mubr.bf16.mxu1 %v6944_v62 }
 0xf2e   :  { %v6609_v7 = vpop.f32.mrb[212].mxu1 }
 0xf2f   :  { %v6653_v35 = vmul.f32 %v17141_v21, %v6609_v7  ;;  %v11819_v54 = vpop.f32.mrb[213].mxu1  ;;  %v6803_v8 = vpop.f32.mrb[228].mxu0  ;;  %v6696_v7 = vmul.f32 %v17137_v44, %v16785_v26 }
 0xf30   :  { %v6847_v4 = vmul.f32 %v17141_v21, %v6803_v8  ;;  %v6612_v53 = vpop.f32.mrb[214].mxu1  ;;  %v11879_v62 = vpop.f32.mrb[229].mxu0 }
 0xf31   :  { %v6674_v41 = vadd.f32 %v6653_v35, %v6501_v6  ;;  %v6654_v25 = vmul.f32 %v17141_v21, %v6612_v53  ;;  %v11820_v15 = vpop.f32.mrb[215].mxu1  ;;  %v6806_v13 = vpop.f32.mrb[230].mxu0 }
 0xf32   :  { %v6868_v43 = vadd.f32 %v6847_v4, %v6695_v55  ;;  %v6848_v54 = vmul.f32 %v17141_v21, %v6806_v13  ;;  %v11880_v30 = vpop.f32.mrb[231].mxu0 }
 0xf33   :  { %v6675_v17 = vadd.f32 %v6654_v25, %v6502_v48  ;;  %v17154_v8 = vmul.f32 %v16985_v47, %v6674_v41  ;;  %v17162_v53 = vmul.f32 %v16875_v14, %v6674_v41 }
 0xf34   :  { %v17157_v6 = vmul.f32 %v6868_v43, %v16983_v31  ;;  %v6869_v35 = vadd.f32 %v6848_v54, %v6696_v7  ;;  %v17159_v51 = vmul.f32 %v6868_v43, %v6674_v41  ;;  %v6889_v55 = vmul.f32 %v6868_v43, %v16870_v16 }
 0xf35   :  { %v17166_v26 = vmul.f32 %v16882_v50, %v6675_v17  ;;  %v17169_v13 = vmul.f32 %v17013_v12, %v6675_v17  ;;  %v6503_v50 = vmul.f32 %v17137_v44, %v16800_v9 }
 0xf36   :  { %v6955_v47 = vpack.c.bf16 %v17157_v6, %v17124_v39  ;;  %v6890_v25 = vmul.f32 %v6869_v35, %v16880_v27  ;;  %v6617_v30 = vpop.f32.mrb[216].mxu1  ;;  %v17175_v48 = vmul.f32 %v6869_v35, %v17008_v19  ;;  %v17177_v4 = vmul.f32 %v6869_v35, %v6675_v17 }
 0xf37   :  { %v6655_v12 = vmul.f32 %v17141_v21, %v6617_v30  ;;  %v11823_v43 = vpop.f32.mrb[217].mxu1  ;;  %v6811_v41 = vpop.f32.mrb[232].mxu0  ;;  %v6697_v27 = vmul.f32 %v17137_v44, %v16806_v1  ;;  %v6504_v35 = vmul.f32 %v17137_v44, %v16803_v24 }
 0xf38   :  { %v6945_v62 = vpack.c.bf16 %v6890_v25, %v6889_v55  ;;  %v6849_v15 = vmul.f32 %v17141_v21, %v6811_v41  ;;  %v6620_v19 = vpop.f32.mrb[218].mxu1  ;;  %v11883_v7 = vpop.f32.mrb[233].mxu0  ;;  %v6698_v55 = vmul.f32 %v17137_v44, %v16809_v22  ;;  %v18569_v39 = vpack.c.bf16 %v17177_v4, %v17159_v51  ;;  %v12437_v51 = vld [vmem:[#allocation6 + $0x60] sm:$0xff]   ;;  %v12440_v4 = vld [vmem:[#allocation6 + $0x78] sm:$0xff]  }
 0xf39   :  { %v6676_v17 = vadd.f32 %v6655_v12, %v6503_v50  ;;  %v6656_v9 = vmul.f32 %v17141_v21, %v6620_v19  ;;  %v11824_v30 = vpop.f32.mrb[219].mxu1  ;;  %v6814_v43 = vpop.f32.mrb[234].mxu0 }
 0xf3a   :  { %v6870_v16 = vadd.f32 %v6849_v15, %v6697_v27  ;;  %v6850_v1 = vmul.f32 %v17141_v21, %v6814_v43  ;;  %v11884_v25 = vpop.f32.mrb[235].mxu0  ;;  %11922 = vmatmul.mubr.bf16.gmra.mrb[240].mxu1 %v6945_v62  ;;  %v6699_v30 = vmul.f32 %v17137_v44, %v16830_v34 }
 0xf3b   :  { %v17196_v41 = vmul.f32 %v17020_v18, %v6676_v17  ;;  %v6677_v7 = vadd.f32 %v6656_v9, %v6504_v35  ;;  %v17204_v19 = vmul.f32 %v16899_v46, %v6676_v17 }
 0xf3c   :  { %v17198_v50 = vmul.f32 %v6870_v16, %v6676_v17  ;;  %v6871_v12 = vadd.f32 %v6850_v1, %v6698_v55  ;;  %v17201_v24 = vmul.f32 %v6870_v16, %v17018_v49  ;;  %v6891_v27 = vmul.f32 %v6870_v16, %v16894_v5 }
 0xf3d   :  { %v6963_v22 = vpack.c.bf16 %v17196_v41, %v17169_v13  ;;  %v17210_v62 = vmul.f32 %v16906_v56, %v6677_v7  ;;  %v17213_v18 = vmul.f32 %v17057_v45, %v6677_v7  ;;  %v6505_v5 = vmul.f32 %v17137_v44, %v16824_v29  ;;  %v12436_v13 = vld [vmem:[#allocation6 + $0x58] sm:$0xff]  }
 0xf3e   :  { %v17216_v15 = vmul.f32 %v6871_v12, %v17052_v10  ;;  %v17218_v35 = vmul.f32 %v6871_v12, %v6677_v7  ;;  %v6892_v46 = vmul.f32 %v6871_v12, %v16904_v42  ;;  %v6956_v17 = vpack.c.bf16 %v17201_v24, %v17175_v48  ;;  %v12439_v48 = vld [vmem:[#allocation6 + $0x70] sm:$0xff]  }
 0xf3f   :  { %v6625_v49 = vpop.f32.mrb[220].mxu1  ;;  %v6960_v45 = vpack.c.bf16 %v17210_v62, %v17204_v19  ;;  %v6506_v29 = vmul.f32 %v17137_v44, %v16827_v3  ;;  %v6700_v10 = vmul.f32 %v17137_v44, %v16833_v2 }
 0xf40   :  { %v6657_v56 = vmul.f32 %v17141_v21, %v6625_v49  ;;  %v11827_v16 = vpop.f32.mrb[221].mxu1  ;;  %v6819_v9 = vpop.f32.mrb[236].mxu0  ;;  %v6946_v1 = vpack.c.bf16 %v6892_v46, %v6891_v27  ;;  %v18570_v6 = vpack.c.bf16 %v17218_v35, %v17198_v50 }
 0xf41   :  { %v6851_v42 = vmul.f32 %v17141_v21, %v6819_v9  ;;  %v6628_v43 = vpop.f32.mrb[222].mxu1  ;;  %v11887_v55 = vpop.f32.mrb[237].mxu0 }
 0xf42   :  { %v6678_v25 = vadd.f32 %v6657_v56, %v6505_v5  ;;  %v6658_v7 = vmul.f32 %v17141_v21, %v6628_v43  ;;  %v11828_v12 = vpop.f32.mrb[223].mxu1  ;;  %v6822_v49 = vpop.f32.mrb[238].mxu0  ;;  %11925 = vmatprep.mubr.bf16.mxu1 %v6946_v1 }
 0xf43   :  { %v6872_v16 = vadd.f32 %v6851_v42, %v6699_v30  ;;  %v6852_v54 = vmul.f32 %v17141_v21, %v6822_v49  ;;  %v11888_v34 = vpop.f32.mrb[239].mxu0 }
 0xf44   :  { %v6679_v9 = vadd.f32 %v6658_v7, %v6506_v29  ;;  %v17240_v55 = vmul.f32 %v17068_v28, %v6678_v25  ;;  %v6921_v27 = vmul.f32 %v16923_v63, %v6678_v25 }
 0xf45   :  { %v6914_v3 = vmul.f32 %v6872_v16, %v17062_v60  ;;  %v6873_v46 = vadd.f32 %v6852_v54, %v6700_v10  ;;  %v17244_v5 = vmul.f32 %v6872_v16, %v6678_v25  ;;  %v6893_v56 = vmul.f32 %v6872_v16, %v16918_v11 }
 0xf46   :  { %v6922_v30 = vmul.f32 %v16933_v38, %v6679_v9  ;;  %v6929_v2 = vmul.f32 %v17101_v33, %v6679_v9  ;;  %v6964_v42 = vpack.c.bf16 %v17240_v55, %v17213_v18  ;;  %v6507_v10 = vmul.f32 %v17137_v44, %v16844_v59 }
 0xf47   :  { %v6957_v43 = vpack.c.bf16 %v6914_v3, %v17216_v15  ;;  %v6894_v28 = vmul.f32 %v6873_v46, %v16928_v52  ;;  %v6633_v1 = vpop.f32.mrb[224].mxu1  ;;  %v6915_v63 = vmul.f32 %v6873_v46, %v17096_v61  ;;  %v6936_v60 = vmul.f32 %v6873_v46, %v6679_v9 }
 0xf48   :  { %v6961_v54 = vpack.c.bf16 %v6922_v30, %v6921_v27  ;;  %v6659_v11 = vmul.f32 %v17141_v21, %v6633_v1  ;;  %v11831_v38 = vpop.f32.mrb[225].mxu1  ;;  %v6827_v25 = vpop.f32.mrb[240].mxu0  ;;  %v6701_v18 = vmul.f32 %v17137_v44, %v16849_v0  ;;  %v6896_v0 = vmul.f32 %v16875_v14, %v16983_v31  ;;  %v18558_v14 = vld [vmem:[#allocation39_spill] sm:$0xff]  ;;  %v18559_v31 = vld [vmem:[#allocation37_spill] sm:$0xff]  ;;  %v18564_v1 = vld [vmem:[#allocation44_spill] sm:$0xff] }
 0xf49   :  { %v6947_v33 = vpack.c.bf16 %v6894_v28, %v6893_v56  ;;  %v6853_v15 = vmul.f32 %v17141_v21, %v6827_v25  ;;  %v6636_v29 = vpop.f32.mrb[226].mxu1  ;;  %v11891_v52 = vpop.f32.mrb[241].mxu0  ;;  %v6968_v7 = vpack.c.bf16 %v6936_v60, %v17244_v5  ;;  %v18553_v56 = vld [vmem:[#allocation40_spill] sm:$0xff]  ;;  %v18568_v60 = vpack.c.bf16 %v17166_v26, %v17162_v53  ;;  %v12435_v26 = vld [vmem:[#allocation6 + $0x50] sm:$0xff]  }
 0xf4a   :  { %v6680_v61 = vadd.f32 %v6659_v11, %v6507_v10  ;;  %v11832_v12 = vpop.f32.mrb[227].mxu1  ;;  %v6830_v49 = vpop.f32.mrb[242].mxu0  ;;  %v18554_v30 = vpack.c.bf16 %v17032_v20, %v18553_v56 }
 0xf4b   :  { %v6874_v16 = vadd.f32 %v6853_v15, %v6701_v18  ;;  %v11892_v34 = vpop.f32.mrb[243].mxu0  ;;  %11926 = vmatmul.mubr.bf16.gmra.mrb[244].mxu1 %v6947_v33 }
 0xf4c   :  { %v6930_v59 = vmul.f32 %v17108_v32, %v6680_v61  ;;  %v6923_v9 = vmul.f32 %v16978_v58, %v6680_v61  ;;  %v18555_v58 = vpack.c.bf16 %v17076_v40, %v17072_v37  ;;  %v12433_v37 = vld [vmem:[#allocation6 + $0x40] sm:$0xff]   ;;  %v12434_v40 = vld [vmem:[#allocation6 + $0x48] sm:$0xff]  }
 0xf4d   :  { %v6937_v55 = vmul.f32 %v6874_v16, %v6680_v61  ;;  %v6895_v27 = vmul.f32 %v6874_v16, %v16965_v36  ;;  %v6916_v44 = vmul.f32 %v6874_v16, %v17106_v23  ;;  %v18556_v36 = vld [vmem:[#allocation45_spill] sm:$0xff]  ;;  %v18560_v23 = vpack.c.bf16 %v18558_v14, %v18559_v31  ;;  %11974 = vmatpush3.bf16.msra.mxu0 %v12433_v37 }
 0xf4e   :  { %v6965_v21 = vpack.c.bf16 %v6930_v59, %v6929_v2  ;;  %v6962_v3 = vpack.c.bf16 %v17154_v8, %v6923_v9  ;;  %v18557_v32 = vpack.c.bf16 %v17120_v57, %v18556_v36  ;;  %v18561_v8 = vld [vmem:[#allocation42_spill] sm:$0xff]  ;;  %v18562_v2 = vld [vmem:[#allocation41_spill] sm:$0xff]  ;;  %v18567_v57 = vmov 0.0  }
 0xf4f   :  { %v6948_v46 = vpack.c.bf16 %v6896_v0, %v6895_v27  ;;  %v6958_v5 = vpack.c.bf16 %v6916_v44, %v6915_v63  ;;  %v18563_v28 = vpack.c.bf16 %v18561_v8, %v18562_v2  ;;  %v18565_v63 = vld [vmem:[#allocation43_spill] sm:$0xff]  ;;  %11975 = vmatprep.subr.bf16.mxu0 %v18567_v57  ;;  %v6969_v53 = vpack.c.bf16 %v6937_v55, %v6937_v55 }
 0xf50   :  { %v18566_v20 = vpack.c.bf16 %v18564_v1, %v18565_v63 }
 0xf51   :  { %11929 = vmatprep.mubr.bf16.mxu1 %v6948_v46  ;;  %11976 = vmatpush3.bf16.msra.mxu0 %v12434_v40 }
 0xf52   :  { %11977 = vmatprep.subr.bf16.mxu0 %v18567_v57 }
 0xf53   :  { %11930 = vmatmul.mubr.bf16.gmra.mrb[248].mxu1 %v18554_v30 }
 0xf54   :  { %11933 = vmatprep.mubr.bf16.mxu1 %v18555_v58 }
 0xf55   :  { %11978 = vmatpush3.bf16.msra.mxu0 %v12435_v26 }
 0xf56   :  { %11979 = vmatprep.subr.bf16.mxu0 %v18567_v57 }
 0xf59   :  { %11980 = vmatpush3.bf16.msra.mxu0 %v12436_v13 }
 0xf5a   :  { %11981 = vmatprep.subr.bf16.mxu0 %v18567_v57 }
 0xf5b   :  { %11934 = vmatmul.mubr.bf16.gmra.mrb[252].mxu1 %v18557_v32 }
 0xf5c   :  { %11937 = vmatprep.mubr.bf16.mxu1 %v18560_v23 }
 0xf5d   :  { %11982 = vmatpush3.bf16.msra.mxu0 %v12437_v51 }
 0xf5e   :  { %11983 = vmatprep.subr.bf16.mxu0 %v18567_v57 }
 0xf63   :  { %11938 = vmatmul.mubr.bf16.gmra.mrb[0].mxu1 %v18563_v28 }
 0xf64   :  { %11941 = vmatprep.mubr.bf16.mxu1 %v18566_v20 }
 0xf6b   :  { %11942 = vmatmul.mubr.bf16.gmra.mrb[4].mxu1 %v6955_v47  ;;  %v12438_v47 = vld [vmem:[#allocation6 + $0x68] sm:$0xff]  }
 0xf6c   :  { %11945 = vmatprep.mubr.bf16.mxu1 %v6956_v17  ;;  %11984 = vmatpush3.bf16.msra.mxu0 %v12438_v47 }
 0xf6d   :  { %11985 = vmatprep.subr.bf16.mxu0 %v18567_v57 }
 0xf70   :  { %11986 = vmatpush3.bf16.msra.mxu0 %v12439_v48 }
 0xf71   :  { %11987 = vmatprep.subr.bf16.mxu0 %v18567_v57 }
 0xf73   :  { %11946 = vmatmul.mubr.bf16.gmra.mrb[8].mxu1 %v6957_v43 }
 0xf74   :  { %11949 = vmatprep.mubr.bf16.mxu1 %v6958_v5  ;;  %11988 = vmatpush3.bf16.msra.mxu0 %v12440_v4  ;;  %v18571_v4 = vld [vmem:[#allocation49_spill] sm:$0xff] }
 0xf7b   :  { %11950 = vmatmul.mubr.bf16.gmra.mrb[12].mxu1 %v18568_v60 }
 0xf7c   :  { %11953 = vmatprep.mubr.bf16.mxu1 %v6960_v45 }
 0xf83   :  { %11954 = vmatmul.mubr.bf16.gmra.mrb[16].mxu1 %v6961_v54 }
 0xf84   :  { %11957 = vmatprep.mubr.bf16.mxu1 %v6962_v3 }
 0xf8b   :  { %11958 = vmatmul.mubr.bf16.gmra.mrb[20].mxu1 %v6963_v22 }
 0xf8c   :  { %11961 = vmatprep.mubr.bf16.mxu1 %v6964_v42 }
 0xf93   :  { %11962 = vmatmul.mubr.bf16.gmra.mrb[24].mxu1 %v6965_v21 }
 0xf94   :  { %11965 = vmatprep.mubr.bf16.mxu1 %v18569_v39 }
 0xf9b   :  { %11966 = vmatmul.mubr.bf16.gmra.mrb[28].mxu1 %v18570_v6 }
 0xf9c   :  { %11969 = vmatprep.mubr.bf16.mxu1 %v6968_v7 }
 0xfa3   :  { %11970 = vmatmul.mubr.bf16.gmra.mrb[32].mxu1 %v6969_v53 }
 0xfa4   :  { %12049 = vmatprep.mubr.msk.bf16.mxu1 %vm13585_vm0, %v18567_v57 }
 0xfbf   :  { %v11911_v41 = vpop.f32.mrb[228].mxu1 }
 0xfc0   :  { %v7004_v50 = vpop.f32.mrb[229].mxu1  ;;  %v17326_v61 = vmul.f32 0.25, %v11911_v41 }
 0xfc1   :  { %v11912_v24 = vpop.f32.mrb[230].mxu1  ;;  %v7258_v17 = vmul.f32 0.25, %v7004_v50 }
 0xfc2   :  { %v7007_v19 = vpop.f32.mrb[231].mxu1  ;;  %v17316_v10 = vmul.f32 0.25, %v11912_v24 }
 0xfc3   :  { %v7259_v25 = vmul.f32 0.25, %v7007_v19 }
 0xfde   :  { %v11915_v22 = vpop.f32.mrb[232].mxu1 }
 0xfdf   :  { %v7020_v62 = vpop.f32.mrb[233].mxu1  ;;  %v17338_v5 = vmul.f32 0.25, %v11915_v22 }
 0xfe0   :  { %v11916_v35 = vpop.f32.mrb[234].mxu1  ;;  %v17320_v15 = vmul.f32 0.25, %v7020_v62 }
 0xfe1   :  { %v7265_v45 = vmul.f32 0.25, %v11916_v35  ;;  %v7023_v42 = vpop.f32.mrb[235].mxu1  ;;  %v18572_v35 = vld [vmem:[#allocation57_spill] sm:$0xff] }
 0xfe2   :  { %v17334_v27 = vmul.f32 0.25, %v7023_v42 }
 0xfe3   :  { %v7321_v43 = vmax.f32 %v7258_v17, %v7265_v45 }
 0xfef   :  { %v11919_v54 = vpop.f32.mrb[236].mxu1 }
 0xff0   :  { %v17318_v11 = vmul.f32 0.25, %v11919_v54  ;;  %v7036_v38 = vpop.f32.mrb[237].mxu1  ;;  %v18573_v54 = vld [vmem:[#allocation27_spill] sm:$0xff] }
 0xff1   :  { %v7266_v33 = vmul.f32 0.25, %v7036_v38  ;;  %v11920_v18 = vpop.f32.mrb[238].mxu1 }
 0xff2   :  { %v7324_v29 = vmax.f32 %v17316_v10, %v17318_v11  ;;  %v17324_v52 = vmul.f32 0.25, %v11920_v18  ;;  %v7039_v7 = vpop.f32.mrb[239].mxu1 }
 0xff3   :  { %v7322_v12 = vmax.f32 %v7259_v25, %v7266_v33  ;;  %v17328_v49 = vmul.f32 0.25, %v7039_v7 }
 0xff4   :  { %v7325_v16 = vmax.f32 %v17320_v15, %v17324_v52 }
 0xff5   :  { %v7323_v34 = vmax.f32 %v17326_v61, %v17328_v49 }
0x100d   :  { %v11923_v59 = vpop.f32.mrb[240].mxu1 }
0x100e   :  { %v7272_v9 = vmul.f32 0.25, %v11923_v59  ;;  %v7052_v55 = vpop.f32.mrb[241].mxu1 }
0x100f   :  { %v17336_v0 = vmul.f32 0.25, %v7052_v55  ;;  %v11924_v44 = vpop.f32.mrb[242].mxu1 }
0x1010   :  { %v7328_v21 = vmax.f32 %v7321_v43, %v7272_v9  ;;  %v7273_v3 = vmul.f32 0.25, %v11924_v44  ;;  %v7055_v46 = vpop.f32.mrb[243].mxu1 }
0x1011   :  { %v7326_v56 = vmax.f32 %v17334_v27, %v17336_v0  ;;  %v17342_v30 = vmul.f32 0.25, %v7055_v46 }
0x1012   :  { %v7335_v58 = vsub.f32 %v7258_v17, %v7328_v21  ;;  %v7356_v36 = vsub.f32 %v7265_v45, %v7328_v21  ;;  %v7377_v32 = vsub.f32 %v7272_v9, %v7328_v21  ;;  %v7329_v14 = vmax.f32 %v7322_v12, %v7273_v3  ;;  %v18575_v21 = vld [vmem:[#allocation64_spill] sm:$0xff] }
0x1013   :  { %v7327_v31 = vmax.f32 %v17338_v5, %v17342_v30 }
0x1014   :  { %v7342_v23 = vmul.f32 1.442695, %v7335_v58  ;;  %v7363_v8 = vmul.f32 1.442695, %v7356_v36  ;;  %v7384_v2 = vmul.f32 1.442695, %v7377_v32  ;;  %v7336_v28 = vsub.f32 %v7259_v25, %v7329_v14 }
0x1015   :  { %v7357_v1 = vsub.f32 %v7266_v33, %v7329_v14  ;;  %v7378_v63 = vsub.f32 %v7273_v3, %v7329_v14  ;;  %v18576_v36 = vld [vmem:[#allocation29_spill] sm:$0xff] }
0x1016   :  { %13019 = vpow2.f32 %v7342_v23  ;;  %v7344_v20 = vmul.f32 1.442695, %v7336_v28 }
0x1017   :  { %13021 = vpow2.f32 %v7363_v8  ;;  %v7365_v37 = vmul.f32 1.442695, %v7357_v1  ;;  %v7386_v40 = vmul.f32 1.442695, %v7378_v63 }
0x1018   :  { %13023 = vpow2.f32 %v7384_v2 }
0x1019   :  { %13025 = vpow2.f32 %v7344_v20 }
0x101a   :  { %13027 = vpow2.f32 %v7365_v37 }
0x101b   :  { %13029 = vpow2.f32 %v7386_v40 }
0x101e   :  { %v11927_v60 = vpop.f32.mrb[244].mxu1 }
0x101f   :  { %v7276_v39 = vmul.f32 0.25, %v11927_v60  ;;  %v7068_v6 = vpop.f32.mrb[245].mxu1 }
0x1020   :  { %v7274_v53 = vmul.f32 0.25, %v7068_v6  ;;  %v11928_v26 = vpop.f32.mrb[246].mxu1  ;;  %v13020_v13 = vpop.eup %13019 }
0x1021   :  { %v7332_v51 = vmax.f32 %v7325_v16, %v7276_v39  ;;  %v7071_v47 = vpop.f32.mrb[247].mxu1  ;;  %v13022_v48 = vpop.eup %13021  ;;  %v7419_v41 = vmul.f32 %v13020_v13, %v18571_v4  ;;  %v7277_v24 = vmul.f32 0.25, %v11928_v26 }
0x1022   :  { %v7330_v50 = vmax.f32 %v7323_v34, %v7274_v53  ;;  %v7275_v19 = vmul.f32 0.25, %v7071_v47  ;;  %v13024_v22 = vpop.eup %13023  ;;  %v7398_v62 = vadd.f32 %v13022_v48, %v13020_v13  ;;  %v7426_v17 = vmul.f32 %v13022_v48, %v18572_v35  ;;  %v18574_v34 = vld [vmem:[#allocation56_spill] sm:$0xff] }
0x1023   :  { %v7339_v45 = vsub.f32 %v17320_v15, %v7332_v51  ;;  %v7360_v42 = vsub.f32 %v17324_v52, %v7332_v51  ;;  %v13026_v43 = vpop.eup %13025  ;;  %v7440_v38 = vmul.f32 %v13024_v22, %v18573_v54  ;;  %v7381_v25 = vsub.f32 %v7276_v39, %v7332_v51 }
0x1024   :  { %v7337_v33 = vsub.f32 %v17326_v61, %v7330_v50  ;;  %v7358_v18 = vsub.f32 %v17328_v49, %v7330_v50  ;;  %v13028_v7 = vpop.eup %13027  ;;  %v7405_v12 = vadd.f32 %v13024_v22, %v7398_v62  ;;  %v7433_v16 = vadd.f32 %v7426_v17, %v7419_v41 }
0x1025   :  { %v7420_v59 = vmul.f32 %v13026_v43, %v18574_v34  ;;  %v7350_v9 = vmul.f32 1.442695, %v7339_v45  ;;  %v13030_v55 = vpop.eup %13029  ;;  %v7399_v44 = vadd.f32 %v13028_v7, %v13026_v43  ;;  %v7427_v15 = vmul.f32 %v13028_v7, %v18575_v21 }
0x1026   :  { %v7371_v3 = vmul.f32 1.442695, %v7360_v42  ;;  %v7392_v52 = vmul.f32 1.442695, %v7381_v25  ;;  %v11931_v46 = vpop.f32.mrb[248].mxu1  ;;  %13031 = vrcp.f32 %v7405_v12  ;;  %v7447_v58 = vadd.f32 %v7440_v38, %v7433_v16  ;;  %v18577_v25 = vld [vmem:[#allocation59_spill] sm:$0xff] }
0x1027   :  { %v7441_v32 = vmul.f32 %v13030_v55, %v18576_v36  ;;  %v7346_v61 = vmul.f32 1.442695, %v7337_v33  ;;  %v7084_v14 = vpop.f32.mrb[249].mxu1  ;;  %v7406_v49 = vadd.f32 %v13030_v55, %v7399_v44  ;;  %v7434_v23 = vadd.f32 %v7427_v15, %v7420_v59  ;;  %v18578_v12 = vld [vmem:[#allocation25_spill] sm:$0xff] }
0x1028   :  { %13033 = vpow2.f32 %v7350_v9  ;;  %v7367_v8 = vmul.f32 1.442695, %v7358_v18  ;;  %v11932_v2 = vpop.f32.mrb[250].mxu1  ;;  %v7379_v28 = vsub.f32 %v7274_v53, %v7330_v50  ;;  %v7333_v1 = vmax.f32 %v7326_v56, %v7277_v24 }
0x1029   :  { %13035 = vpow2.f32 %v7371_v3  ;;  %v7331_v63 = vmax.f32 %v7324_v29, %v7275_v19  ;;  %v7087_v20 = vpop.f32.mrb[251].mxu1  ;;  %v7448_v37 = vadd.f32 %v7441_v32, %v7434_v23  ;;  %v7278_v40 = vmul.f32 0.25, %v7084_v14  ;;  %v18580_v23 = vld [vmem:[#allocation63_spill] sm:$0xff] }
0x102a   :  { %13037 = vrcp.f32 %v7406_v49  ;;  %v7388_v60 = vmul.f32 1.442695, %v7379_v28  ;;  %v7340_v39 = vsub.f32 %v17334_v27, %v7333_v1  ;;  %v7361_v6 = vsub.f32 %v17336_v0, %v7333_v1 }
0x102b   :  { %13039 = vpow2.f32 %v7392_v52  ;;  %v7382_v53 = vsub.f32 %v7277_v24, %v7333_v1  ;;  %v7338_v26 = vsub.f32 %v17316_v10, %v7331_v63  ;;  %v7359_v56 = vsub.f32 %v17318_v11, %v7331_v63 }
0x102c   :  { %13041 = vpow2.f32 %v7346_v61  ;;  %v7352_v13 = vmul.f32 1.442695, %v7340_v39  ;;  %v7373_v51 = vmul.f32 1.442695, %v7361_v6  ;;  %v7380_v29 = vsub.f32 %v7275_v19, %v7331_v63  ;;  %v18582_v6 = vld [vmem:[#allocation30_spill] sm:$0xff] }
0x102d   :  { %13043 = vpow2.f32 %v7367_v8  ;;  %v7394_v47 = vmul.f32 1.442695, %v7382_v53  ;;  %v7348_v48 = vmul.f32 1.442695, %v7338_v26  ;;  %v7369_v41 = vmul.f32 1.442695, %v7359_v56 }
0x102e   :  { %13045 = vpow2.f32 %v7388_v60  ;;  %v7334_v27 = vmax.f32 %v7327_v31, %v7278_v40  ;;  %v17369_v0 = vpop.f32.mrb[252].mxu1  ;;  %v7390_v50 = vmul.f32 1.442695, %v7380_v29  ;;  %v17375_v42 = vmul.f32 0.25, %v11931_v46 }
0x102f   :  { %13047 = vpow2.f32 %v7352_v13  ;;  %v7100_v10 = vpop.f32.mrb[253].mxu1  ;;  %v17377_v31 = vmul.f32 0.25, %v11932_v2  ;;  %v17383_v44 = vmul.f32 0.25, %v7087_v20 }
0x1030   :  { %13049 = vpow2.f32 %v7373_v51  ;;  %v13032_v24 = vpop.eup %13031  ;;  %v7341_v11 = vsub.f32 %v17338_v5, %v7334_v27  ;;  %v7362_v19 = vsub.f32 %v17342_v30, %v7334_v27  ;;  %v7383_v22 = vsub.f32 %v7278_v40, %v7334_v27  ;;  %v17373_v62 = vpop.f32.mrb[254].mxu1 }
0x1031   :  { %13051 = vpow2.f32 %v7394_v47  ;;  %v7454_v45 = vmul.f32 %v13032_v24, %v7447_v58  ;;  %v17379_v43 = vpop.f32.mrb[255].mxu1  ;;  %v17385_v15 = vmul.f32 0.25, %v7100_v10  ;;  %v18579_v58 = vld [vmem:[#allocation32_spill] sm:$0xff] }
0x1032   :  { %v13034_v17 = vpop.eup %13033  ;;  %13053 = vpow2.f32 %v7348_v48  ;;  %v7354_v18 = vmul.f32 1.442695, %v7341_v11  ;;  %v7375_v5 = vmul.f32 1.442695, %v7362_v19  ;;  %v7396_v59 = vmul.f32 1.442695, %v7383_v22 }
0x1033   :  { %v13036_v38 = vpop.eup %13035  ;;  %v7423_v33 = vmul.f32 %v13034_v17, %v18577_v25  ;;  %13055 = vpow2.f32 %v7369_v41  ;;  %v18583_v41 = vld [vmem:[#allocation66_spill] sm:$0xff] }
0x1034   :  { %v13038_v7 = vpop.eup %13037  ;;  %v7402_v30 = vadd.f32 %v13036_v38, %v13034_v17  ;;  %v7430_v16 = vmul.f32 %v13036_v38, %v18578_v12  ;;  %13057 = vpow2.f32 %v7390_v50  ;;  %v18584_v11 = vld [vmem:[#allocation26_spill] sm:$0xff] }
0x1035   :  { %v13040_v9 = vpop.eup %13039  ;;  %v7455_v55 = vmul.f32 %v13038_v7, %v7448_v37  ;;  %13059 = vpow2.f32 %v7354_v18  ;;  %v18581_v37 = vld [vmem:[#allocation51_spill] sm:$0xff] }
0x1036   :  { %v13042_v3 = vpop.eup %13041  ;;  %v7409_v52 = vadd.f32 %v13040_v9, %v7402_v30  ;;  %v7437_v46 = vadd.f32 %v7430_v16, %v7423_v33  ;;  %v7444_v32 = vmul.f32 %v13040_v9, %v18579_v58  ;;  %13061 = vpow2.f32 %v7375_v5  ;;  %v11939_v61 = vpop.f32.mrb[0].mxu1  ;;  %v18585_v33 = vld [vmem:[#allocation34_spill] sm:$0xff] }
0x1037   :  { %v13044_v14 = vpop.eup %13043  ;;  %v7758_v49 = vpack.c.bf16 %v7455_v55, %v7454_v45  ;;  %v7421_v8 = vmul.f32 %v13042_v3, %v18580_v23  ;;  %13063 = vpow2.f32 %v7396_v59  ;;  %v17389_v2 = vmul.f32 0.25, %v11939_v61  ;;  %v7116_v28 = vpop.f32.mrb[1].mxu1  ;;  %v18586_v59 = vld [vmem:[#allocation52_spill] sm:$0xff] }
0x1038   :  { %v13046_v1 = vpop.eup %13045  ;;  %13065 = vrcp.f32 %v7409_v52  ;;  %v7451_v63 = vadd.f32 %v7444_v32, %v7437_v46  ;;  %v7400_v20 = vadd.f32 %v13044_v14, %v13042_v3  ;;  %v7428_v40 = vmul.f32 %v13044_v14, %v18581_v37  ;;  %v11940_v60 = vpop.f32.mrb[2].mxu1  ;;  %v18587_v52 = vld [vmem:[#allocation58_spill] sm:$0xff] }
0x1039   :  { %v13048_v39 = vpop.eup %13047  ;;  %v7442_v53 = vmul.f32 %v13046_v1, %v18582_v6  ;;  %v7463_v26 = vmax.f32 %v17377_v31, %v17389_v2  ;;  %v17395_v56 = vmul.f32 0.25, %v7116_v28  ;;  %11990 = vmatmul.mubr.bf16.vlgmr.msra.gmra.mrb[244].mxu0 %v7758_v49  ;;  %v17397_v13 = vmul.f32 0.25, %v11940_v60  ;;  %v7119_v51 = vpop.f32.mrb[3].mxu1  ;;  %v18588_v28 = vld [vmem:[#allocation31_spill] sm:$0xff] }
0x103a   :  { %v13050_v29 = vpop.eup %13049  ;;  %v7407_v47 = vadd.f32 %v13046_v1, %v7400_v20  ;;  %v7435_v48 = vadd.f32 %v7428_v40, %v7421_v8  ;;  %v7424_v27 = vmul.f32 %v13048_v39, %v18583_v41  ;;  %v17400_v50 = vmul.f32 0.25, %v7119_v51  ;;  %11993 = vmatprep.mubr.msk.bf16.mxu0 %vm13585_vm0, %v18567_v57  ;;  %v18589_v51 = vld [vmem:[#allocation50_spill] sm:$0xff] }
0x103b   :  { %v13052_v10 = vpop.eup %13051  ;;  %v7403_v24 = vadd.f32 %v13050_v29, %v13048_v39  ;;  %v7431_v19 = vmul.f32 %v13050_v29, %v18584_v11  ;;  %v7461_v22 = vmax.f32 %v17383_v44, %v17395_v56  ;;  %v7464_v17 = vmax.f32 %v17385_v15, %v17397_v13 }
0x103c   :  { %v13054_v45 = vpop.eup %13053  ;;  %13067 = vrcp.f32 %v7407_v47  ;;  %v7449_v38 = vadd.f32 %v7442_v53, %v7435_v48  ;;  %v7445_v18 = vmul.f32 %v13052_v10, %v18585_v33  ;;  %v7462_v5 = vmax.f32 %v17375_v42, %v17400_v50 }
0x103d   :  { %v13056_v7 = vpop.eup %13055  ;;  %v7410_v30 = vadd.f32 %v13052_v10, %v7403_v24  ;;  %v7438_v16 = vadd.f32 %v7431_v19, %v7424_v27  ;;  %v7422_v9 = vmul.f32 %v13054_v45, %v18586_v59  ;;  %v17415_v32 = vmul.f32 0.25, %v17373_v62  ;;  %v18590_v27 = vld [vmem:[#allocation28_spill] sm:$0xff] }
0x103e   :  { %v13058_v55 = vpop.eup %13057  ;;  %v7401_v3 = vadd.f32 %v13056_v7, %v13054_v45  ;;  %v7429_v46 = vmul.f32 %v13056_v7, %v18587_v52  ;;  %v17418_v61 = vmul.f32 0.25, %v17379_v43  ;;  %v11943_v14 = vpop.f32.mrb[4].mxu1 }
0x103f   :  { %v13060_v49 = vpop.eup %13059  ;;  %13069 = vrcp.f32 %v7410_v30  ;;  %v7452_v8 = vadd.f32 %v7445_v18, %v7438_v16  ;;  %v7443_v1 = vmul.f32 %v13058_v55, %v18588_v28  ;;  %v17421_v20 = vmul.f32 0.25, %v11943_v14  ;;  %v7132_v40 = vpop.f32.mrb[5].mxu1  ;;  %v18591_v30 = vld [vmem:[#allocation35_spill] sm:$0xff] }
0x1040   :  { %v13062_v60 = vpop.eup %13061  ;;  %v7408_v39 = vadd.f32 %v13058_v55, %v7401_v3  ;;  %v7436_v53 = vadd.f32 %v7429_v46, %v7422_v9  ;;  %v7425_v29 = vmul.f32 %v13060_v49, %v18589_v51  ;;  %v17424_v47 = vmul.f32 0.25, %v7132_v40  ;;  %v11944_v62 = vpop.f32.mrb[6].mxu1 }
0x1041   :  { %v13064_v48 = vpop.eup %13063  ;;  %v7404_v43 = vadd.f32 %v13062_v60, %v13060_v49  ;;  %v7432_v10 = vmul.f32 %v13062_v60, %v18590_v27  ;;  %v7293_v19 = vmul.f32 0.25, %v11944_v62  ;;  %v7135_v45 = vpop.f32.mrb[7].mxu1  ;;  %v17435_v49 = vmul.f32 0.25, %v17369_v0 }
0x1042   :  { %v13066_v18 = vpop.eup %13065  ;;  %13071 = vrcp.f32 %v7408_v39  ;;  %v7450_v7 = vadd.f32 %v7443_v1, %v7436_v53  ;;  %v7446_v16 = vmul.f32 %v13064_v48, %v18591_v30  ;;  %v7465_v9 = vmax.f32 %v17418_v61, %v17424_v47 }
0x1043   :  { %v17432_v55 = vmul.f32 %v13066_v18, %v7451_v63  ;;  %v7411_v3 = vadd.f32 %v13064_v48, %v7404_v43  ;;  %v7439_v46 = vadd.f32 %v7432_v10, %v7425_v29  ;;  %v7468_v14 = vmax.f32 %v7461_v22, %v7293_v19 }
0x1044   :  { %v17437_v40 = vmul.f32 0.25, %v7135_v45 }
0x1045   :  { %13073 = vrcp.f32 %v7411_v3  ;;  %v7453_v60 = vadd.f32 %v7446_v16, %v7439_v46  ;;  %v7475_v39 = vsub.f32 %v17383_v44, %v7468_v14  ;;  %v7496_v1 = vsub.f32 %v17395_v56, %v7468_v14 }
0x1046   :  { %v13068_v53 = vpop.eup %13067  ;;  %v7517_v62 = vsub.f32 %v7293_v19, %v7468_v14  ;;  %v7466_v63 = vmax.f32 %v17435_v49, %v17437_v40  ;;  %v11947_v18 = vpop.f32.mrb[8].mxu1 }
0x1047   :  { %v7456_v48 = vmul.f32 %v13068_v53, %v7449_v38  ;;  %v7482_v29 = vmul.f32 1.442695, %v7475_v39  ;;  %v7503_v22 = vmul.f32 1.442695, %v7496_v1  ;;  %v7296_v43 = vmul.f32 0.25, %v11947_v18  ;;  %v7148_v0 = vpop.f32.mrb[9].mxu1 }
0x1048   :  { %v7524_v10 = vmul.f32 1.442695, %v7517_v62  ;;  %v7294_v45 = vmul.f32 0.25, %v7148_v0  ;;  %v11948_v24 = vpop.f32.mrb[10].mxu1 }
0x1049   :  { %v13070_v3 = vpop.eup %13069  ;;  %13075 = vpow2.f32 %v7482_v29  ;;  %v7471_v44 = vmax.f32 %v7464_v17, %v7296_v43  ;;  %v7297_v56 = vmul.f32 0.25, %v11948_v24  ;;  %v7151_v19 = vpop.f32.mrb[11].mxu1 }
0x104a   :  { %v17446_v16 = vmul.f32 %v13070_v3, %v7452_v8  ;;  %13077 = vpow2.f32 %v7503_v22  ;;  %v7469_v38 = vmax.f32 %v7462_v5, %v7294_v45  ;;  %v7295_v46 = vmul.f32 0.25, %v7151_v19 }
0x104b   :  { %13079 = vpow2.f32 %v7524_v10  ;;  %v7478_v14 = vsub.f32 %v17385_v15, %v7471_v44  ;;  %v7499_v39 = vsub.f32 %v17397_v13, %v7471_v44  ;;  %v7520_v1 = vsub.f32 %v7296_v43, %v7471_v44 }
0x104c   :  { %v13072_v53 = vpop.eup %13071  ;;  %v7760_v17 = vpack.c.bf16 %v17446_v16, %v17432_v55  ;;  %v7476_v24 = vsub.f32 %v17375_v42, %v7469_v38  ;;  %v7497_v8 = vsub.f32 %v17400_v50, %v7469_v38  ;;  %v7518_v62 = vsub.f32 %v7294_v45, %v7469_v38 }
0x104d   :  { %v7457_v18 = vmul.f32 %v13072_v53, %v7450_v7  ;;  %v7488_v29 = vmul.f32 1.442695, %v7478_v14  ;;  %v7509_v22 = vmul.f32 1.442695, %v7499_v39  ;;  %v7530_v5 = vmul.f32 1.442695, %v7520_v1 }
0x104e   :  { %v7484_v0 = vmul.f32 1.442695, %v7476_v24  ;;  %v7505_v10 = vmul.f32 1.442695, %v7497_v8  ;;  %v7472_v3 = vmax.f32 %v7465_v9, %v7297_v56  ;;  %v7526_v13 = vmul.f32 1.442695, %v7518_v62 }
0x104f   :  { %v13074_v15 = vpop.eup %13073  ;;  %v7759_v19 = vpack.c.bf16 %v7457_v18, %v7456_v48  ;;  %13081 = vpow2.f32 %v7488_v29  ;;  %v7470_v43 = vmax.f32 %v7463_v26, %v7295_v46  ;;  %v11951_v44 = vpop.f32.mrb[12].mxu1 }
0x1050   :  { %v17460_v42 = vmul.f32 %v13074_v15, %v7453_v60  ;;  %13083 = vpow2.f32 %v7509_v22  ;;  %v7479_v50 = vsub.f32 %v17418_v61, %v7472_v3  ;;  %v7500_v7 = vsub.f32 %v17424_v47, %v7472_v3  ;;  %v7164_v45 = vpop.f32.mrb[13].mxu1 }
0x1051   :  { %13085 = vpow2.f32 %v7530_v5  ;;  %v7521_v38 = vsub.f32 %v7297_v56, %v7472_v3  ;;  %11994 = vmatmul.mubr.bf16.gmra.mrb[248].mxu0 %v7759_v19  ;;  %v7477_v9 = vsub.f32 %v17377_v31, %v7470_v43  ;;  %v7498_v48 = vsub.f32 %v17389_v2, %v7470_v43  ;;  %v11952_v14 = vpop.f32.mrb[14].mxu1 }
0x1052   :  { %13087 = vpow2.f32 %v7484_v0  ;;  %v7490_v39 = vmul.f32 1.442695, %v7479_v50  ;;  %v7511_v26 = vmul.f32 1.442695, %v7500_v7  ;;  %v7519_v1 = vsub.f32 %v7295_v46, %v7470_v43  ;;  %11997 = vmatprep.mubr.msk.bf16.mxu0 %vm13585_vm0, %v18567_v57  ;;  %v7167_v60 = vpop.f32.mrb[15].mxu1 }
0x1053   :  { %v13076_v61 = vpop.eup %13075  ;;  %13089 = vpow2.f32 %v7505_v10  ;;  %v7532_v47 = vmul.f32 1.442695, %v7521_v38  ;;  %v7486_v53 = vmul.f32 1.442695, %v7477_v9  ;;  %v7507_v31 = vmul.f32 1.442695, %v7498_v48 }
0x1054   :  { %v13078_v24 = vpop.eup %13077  ;;  %v7559_v56 = vmul.f32 %v13076_v61, %v18571_v4  ;;  %13091 = vpow2.f32 %v7526_v13  ;;  %v7528_v8 = vmul.f32 1.442695, %v7519_v1  ;;  %v7298_v46 = vmul.f32 0.25, %v7164_v45 }
0x1055   :  { %v13080_v2 = vpop.eup %13079  ;;  %v7538_v62 = vadd.f32 %v13078_v24, %v13076_v61  ;;  %v7566_v18 = vmul.f32 %v13078_v24, %v18572_v35  ;;  %13093 = vpow2.f32 %v7490_v39  ;;  %v17471_v22 = vmul.f32 0.25, %v11951_v44 }
0x1056   :  { %v7580_v29 = vmul.f32 %v13080_v2, %v18573_v54  ;;  %13095 = vpow2.f32 %v7511_v26  ;;  %v17473_v5 = vmul.f32 0.25, %v7167_v60  ;;  %v11955_v0 = vpop.f32.mrb[16].mxu1  ;;  %v7473_v15 = vmax.f32 %v7466_v63, %v7298_v46 }
0x1057   :  { %v7545_v10 = vadd.f32 %v13080_v2, %v7538_v62  ;;  %v7573_v3 = vadd.f32 %v7566_v18, %v7559_v56  ;;  %13097 = vpow2.f32 %v7532_v47  ;;  %v17478_v19 = vpop.f32.mrb[17].mxu1  ;;  %v17480_v13 = vmul.f32 0.25, %v11952_v14 }
0x1058   :  { %13099 = vpow2.f32 %v7486_v53  ;;  %v18592_v43 = vmax.f32 %v17415_v32, %v17421_v20  ;;  %v17486_v50 = vmul.f32 0.25, %v11955_v0  ;;  %v17488_v7 = vpop.f32.mrb[18].mxu1  ;;  %v7480_v9 = vsub.f32 %v17435_v49, %v7473_v15 }
0x1059   :  { %v13082_v45 = vpop.eup %13081  ;;  %13101 = vrcp.f32 %v7545_v10  ;;  %v7587_v38 = vadd.f32 %v7580_v29, %v7573_v3  ;;  %v7501_v63 = vsub.f32 %v17437_v40, %v7473_v15  ;;  %11998 = vmatmul.mubr.bf16.gmra.mrb[252].mxu0 %v7760_v17  ;;  %v17495_v48 = vpop.f32.mrb[19].mxu1  ;;  %v7522_v26 = vsub.f32 %v7298_v46, %v7473_v15 }
0x105a   :  { %v7474_v44 = vmax.f32 %v18592_v43, %v17473_v5  ;;  %v13084_v14 = vpop.eup %13083  ;;  %v7562_v39 = vmul.f32 %v13082_v45, %v18586_v59  ;;  %13103 = vpow2.f32 %v7507_v31  ;;  %12001 = vmatprep.mubr.msk.bf16.mxu0 %vm13585_vm0, %v18567_v57  ;;  %v7492_v61 = vmul.f32 1.442695, %v7480_v9 }
0x105b   :  { %v13086_v60 = vpop.eup %13085  ;;  %v7541_v49 = vadd.f32 %v13084_v14, %v13082_v45  ;;  %v7569_v40 = vmul.f32 %v13084_v14, %v18587_v52  ;;  %13105 = vpow2.f32 %v7528_v8  ;;  %v7513_v17 = vmul.f32 1.442695, %v7501_v63 }
0x105c   :  { %v7481_v1 = vsub.f32 %v17415_v32, %v7474_v44  ;;  %v13088_v55 = vpop.eup %13087  ;;  %v7583_v16 = vmul.f32 %v13086_v60, %v18588_v28  ;;  %v7534_v47 = vmul.f32 1.442695, %v7522_v26  ;;  %13107 = vpow2.f32 %v7492_v61 }
0x105d   :  { %v13090_v24 = vpop.eup %13089  ;;  %v7548_v56 = vadd.f32 %v13086_v60, %v7541_v49  ;;  %v7576_v31 = vadd.f32 %v7569_v40, %v7562_v39  ;;  %v7560_v32 = vmul.f32 %v13088_v55, %v18574_v34  ;;  %13109 = vpow2.f32 %v7513_v17 }
0x105e   :  { %v7494_v53 = vmul.f32 1.442695, %v7481_v1  ;;  %v13092_v2 = vpop.eup %13091  ;;  %v7539_v62 = vadd.f32 %v13090_v24, %v13088_v55  ;;  %v7567_v18 = vmul.f32 %v13090_v24, %v18575_v21  ;;  %v7502_v8 = vsub.f32 %v17421_v20, %v7474_v44  ;;  %v11959_v46 = vpop.f32.mrb[20].mxu1 }
0x105f   :  { %v13094_v29 = vpop.eup %13093  ;;  %13111 = vrcp.f32 %v7548_v56  ;;  %v7590_v0 = vadd.f32 %v7583_v16, %v7576_v31  ;;  %v7581_v10 = vmul.f32 %v13092_v2, %v18576_v36  ;;  %v7523_v3 = vsub.f32 %v17473_v5, %v7474_v44  ;;  %v17508_v15 = vpop.f32.mrb[21].mxu1 }
0x1060   :  { %v13096_v43 = vpop.eup %13095  ;;  %v7546_v45 = vadd.f32 %v13092_v2, %v7539_v62  ;;  %v7574_v9 = vadd.f32 %v7567_v18, %v7560_v32  ;;  %v7563_v63 = vmul.f32 %v13094_v29, %v18577_v25  ;;  %13113 = vpow2.f32 %v7534_v47  ;;  %v11960_v14 = vpop.f32.mrb[22].mxu1 }
0x1061   :  { %v13098_v39 = vpop.eup %13097  ;;  %v7542_v26 = vadd.f32 %v13096_v43, %v13094_v29  ;;  %v7570_v20 = vmul.f32 %v13096_v43, %v18578_v12  ;;  %13115 = vpow2.f32 %v7494_v53  ;;  %v7515_v1 = vmul.f32 1.442695, %v7502_v8  ;;  %v7199_v60 = vpop.f32.mrb[23].mxu1 }
0x1062   :  { %v13100_v49 = vpop.eup %13099  ;;  %13117 = vrcp.f32 %v7546_v45  ;;  %v7588_v40 = vadd.f32 %v7581_v10, %v7574_v9  ;;  %v7584_v5 = vmul.f32 %v13098_v39, %v18579_v58  ;;  %v7536_v44 = vmul.f32 1.442695, %v7523_v3 }
0x1063   :  { %v13102_v61 = vpop.eup %13101  ;;  %v7549_v55 = vadd.f32 %v13098_v39, %v7542_v26  ;;  %v7577_v16 = vadd.f32 %v7570_v20, %v7563_v63  ;;  %v7561_v17 = vmul.f32 %v13100_v49, %v18580_v23  ;;  %13119 = vpow2.f32 %v7515_v1 }
0x1064   :  { %v13104_v47 = vpop.eup %13103  ;;  %v7594_v24 = vmul.f32 %v13102_v61, %v7587_v38  ;;  %13121 = vpow2.f32 %v7536_v44  ;;  %v17515_v56 = vmul.f32 0.25, %v17478_v19  ;;  %v17518_v53 = vmul.f32 0.25, %v17488_v7 }
0x1065   :  { %v13106_v31 = vpop.eup %13105  ;;  %13123 = vrcp.f32 %v7549_v55  ;;  %v7591_v32 = vadd.f32 %v7584_v5, %v7577_v16  ;;  %v7540_v2 = vadd.f32 %v13104_v47, %v13100_v49  ;;  %v7568_v62 = vmul.f32 %v13104_v47, %v18581_v37 }
0x1066   :  { %v7761_v18 = vpack.c.bf16 %v7594_v24, %v17460_v42  ;;  %v7582_v8 = vmul.f32 %v13106_v31, %v18582_v6  ;;  %v17524_v29 = vmul.f32 0.25, %v17495_v48  ;;  %v17526_v38 = vmul.f32 0.25, %v11959_v46  ;;  %v11963_v19 = vpop.f32.mrb[24].mxu1  ;;  %v13108_v10 = vpop.eup %13107 }
0x1067   :  { %v7547_v3 = vadd.f32 %v13106_v31, %v7540_v2  ;;  %v7575_v7 = vadd.f32 %v7568_v62, %v7561_v17  ;;  %v17528_v43 = vmul.f32 0.25, %v11960_v14  ;;  %v17530_v45 = vmul.f32 0.25, %v7199_v60  ;;  %v7212_v9 = vpop.f32.mrb[25].mxu1  ;;  %v13110_v63 = vpop.eup %13109 }
0x1068   :  { %v7564_v39 = vmul.f32 %v13108_v10, %v18583_v41  ;;  %v17535_v26 = vmul.f32 0.25, %v11963_v19  ;;  %v17537_v48 = vmul.f32 0.25, %v7212_v9  ;;  %12002 = vmatmul.mubr.bf16.gmra.mrb[0].mxu0 %v7761_v18  ;;  %v11964_v46 = vpop.f32.mrb[26].mxu1  ;;  %v7543_v14 = vadd.f32 %v13110_v63, %v13108_v10 }
0x1069   :  { %v13112_v20 = vpop.eup %13111  ;;  %13125 = vrcp.f32 %v7547_v3  ;;  %v7589_v1 = vadd.f32 %v7582_v8, %v7575_v7  ;;  %v7571_v60 = vmul.f32 %v13110_v63, %v18584_v11  ;;  %v7215_v49 = vpop.f32.mrb[27].mxu1  ;;  %12005 = vmatprep.mubr.msk.bf16.mxu0 %vm13585_vm0, %v18567_v57  ;;  %v7603_v61 = vmax.f32 %v17515_v56, %v17528_v43 }
0x106a   :  { %v13114_v5 = vpop.eup %13113  ;;  %v17542_v44 = vmul.f32 %v13112_v20, %v7590_v0  ;;  %v7601_v55 = vmax.f32 %v17471_v22, %v17530_v45  ;;  %v7604_v2 = vmax.f32 %v17524_v29, %v17537_v48  ;;  %v17555_v18 = vmul.f32 0.25, %v17508_v15 }
0x106b   :  { %v13116_v17 = vpop.eup %13115  ;;  %v7550_v47 = vadd.f32 %v13114_v5, %v7543_v14  ;;  %v7578_v24 = vadd.f32 %v7571_v60, %v7564_v39  ;;  %v7585_v31 = vmul.f32 %v13114_v5, %v18585_v33  ;;  %v17557_v8 = vmul.f32 0.25, %v11964_v46 }
0x106c   :  { %v13118_v62 = vpop.eup %13117  ;;  %v7565_v0 = vmul.f32 %v13116_v17, %v18589_v51  ;;  %v17559_v19 = vmul.f32 0.25, %v7215_v49 }
0x106d   :  { %v13120_v10 = vpop.eup %13119  ;;  %v7595_v3 = vmul.f32 %v13118_v62, %v7588_v40  ;;  %13127 = vrcp.f32 %v7550_v47  ;;  %v7592_v7 = vadd.f32 %v7585_v31, %v7578_v24  ;;  %v7607_v20 = vmax.f32 %v17555_v18, %v17557_v8 }
0x106e   :  { %v13122_v9 = vpop.eup %13121  ;;  %v7544_v63 = vadd.f32 %v13120_v10, %v13116_v17  ;;  %v7572_v39 = vmul.f32 %v13120_v10, %v18590_v27  ;;  %v7605_v14 = vmax.f32 %v17486_v50, %v17559_v19  ;;  %v11967_v15 = vpop.f32.mrb[28].mxu1 }
0x106f   :  { %v13124_v60 = vpop.eup %13123  ;;  %v7586_v46 = vmul.f32 %v13122_v9, %v18591_v30  ;;  %v7316_v49 = vmul.f32 0.25, %v11967_v15  ;;  %v7228_v5 = vpop.f32.mrb[29].mxu1 }
0x1070   :  { %v17567_v16 = vmul.f32 %v13124_v60, %v7591_v32  ;;  %v7551_v40 = vadd.f32 %v13122_v9, %v7544_v63  ;;  %v7579_v47 = vadd.f32 %v7572_v39, %v7565_v0  ;;  %v7314_v24 = vmul.f32 0.25, %v7228_v5  ;;  %v11968_v17 = vpop.f32.mrb[30].mxu1 }
0x1071   :  { %v7610_v31 = vmax.f32 %v7603_v61, %v7316_v49  ;;  %v7317_v62 = vmul.f32 0.25, %v11968_v17  ;;  %v7231_v10 = vpop.f32.mrb[31].mxu1 }
0x1072   :  { %13129 = vrcp.f32 %v7551_v40  ;;  %v7593_v33 = vadd.f32 %v7586_v46, %v7579_v47  ;;  %v7608_v11 = vmax.f32 %v7601_v55, %v7314_v24 }
0x1073   :  { %v13126_v41 = vpop.eup %13125  ;;  %v7617_v58 = vsub.f32 %v17515_v56, %v7610_v31  ;;  %v7638_v15 = vsub.f32 %v17528_v43, %v7610_v31  ;;  %v7659_v32 = vsub.f32 %v7316_v49, %v7610_v31  ;;  %v7611_v60 = vmax.f32 %v7604_v2, %v7317_v62 }
0x1074   :  { %v7596_v9 = vmul.f32 %v13126_v41, %v7589_v1  ;;  %v7615_v0 = vsub.f32 %v17471_v22, %v7608_v11  ;;  %v7636_v61 = vsub.f32 %v17530_v45, %v7608_v11  ;;  %v7657_v63 = vsub.f32 %v7314_v24, %v7608_v11 }
0x1075   :  { %v7626_v39 = vmul.f32 1.442695, %v7617_v58  ;;  %v7647_v5 = vmul.f32 1.442695, %v7638_v15  ;;  %v7668_v17 = vmul.f32 1.442695, %v7659_v32  ;;  %v7618_v40 = vsub.f32 %v17524_v29, %v7611_v60 }
0x1076   :  { %v7762_v46 = vpack.c.bf16 %v7596_v9, %v7595_v3  ;;  %v7622_v55 = vmul.f32 1.442695, %v7615_v0  ;;  %v7643_v47 = vmul.f32 1.442695, %v7636_v61  ;;  %v7664_v56 = vmul.f32 1.442695, %v7657_v63 }
0x1077   :  { %v13128_v42 = vpop.eup %13127  ;;  %13131 = vpow2.f32 %v7626_v39  ;;  %v7639_v43 = vsub.f32 %v17537_v48, %v7611_v60  ;;  %v7660_v2 = vsub.f32 %v7317_v62, %v7611_v60  ;;  %v11971_v41 = vpop.f32.mrb[32].mxu1  ;;  %v7315_v11 = vmul.f32 0.25, %v7231_v10 }
0x1078   :  { %v17577_v1 = vmul.f32 %v13128_v42, %v7592_v7  ;;  %13133 = vpow2.f32 %v7647_v5  ;;  %12006 = vmatmul.mubr.bf16.gmra.mrb[4].mxu0 %v7762_v46  ;;  %v7320_v58 = vmul.f32 0.25, %v11971_v41  ;;  %v7244_v22 = vpop.f32.mrb[33].mxu1  ;;  %v7628_v45 = vmul.f32 1.442695, %v7618_v40 }
0x1079   :  { %13135 = vpow2.f32 %v7668_v17  ;;  %v7318_v29 = vmul.f32 0.25, %v7244_v22  ;;  %12009 = vmatprep.mubr.msk.bf16.mxu0 %vm13585_vm0, %v18567_v57  ;;  %v11972_v3 = vpop.f32.mrb[34].mxu1  ;;  %v7649_v49 = vmul.f32 1.442695, %v7639_v43  ;;  %v18593_v48 = vmax.f32 %v17480_v13, %v17526_v38 }
0x107a   :  { %13137 = vpow2.f32 %v7622_v55  ;;  %v7614_v42 = vmax.f32 %v7607_v20, %v7320_v58  ;;  %v7247_v7 = vpop.f32.mrb[35].mxu1  ;;  %v7670_v31 = vmul.f32 1.442695, %v7660_v2  ;;  %v18595_v55 = vmax.f32 %v17518_v53, %v17535_v26 }
0x107b   :  { %v7609_v24 = vmax.f32 %v18593_v48, %v7315_v11  ;;  %13139 = vpow2.f32 %v7643_v47  ;;  %v7612_v62 = vmax.f32 %v7605_v14, %v7318_v29  ;;  %v17584_v10 = vmul.f32 0.25, %v7247_v7 }
0x107c   :  { %v13130_v15 = vpop.eup %13129  ;;  %13141 = vpow2.f32 %v7664_v56  ;;  %v7621_v61 = vsub.f32 %v17555_v18, %v7614_v42  ;;  %v7642_v63 = vsub.f32 %v17557_v8, %v7614_v42  ;;  %v18594_v18 = vpack.c.bf16 %v17567_v16, %v17542_v44 }
0x107d   :  { %v7616_v32 = vsub.f32 %v17480_v13, %v7609_v24  ;;  %v7637_v60 = vsub.f32 %v17526_v38, %v7609_v24  ;;  %v7658_v9 = vsub.f32 %v7315_v11, %v7609_v24  ;;  %v7600_v0 = vmul.f32 %v13130_v15, %v7593_v33 }
0x107e   :  { %13143 = vpow2.f32 %v7628_v45  ;;  %v7634_v17 = vmul.f32 1.442695, %v7621_v61  ;;  %v7655_v40 = vmul.f32 1.442695, %v7642_v63  ;;  %v7663_v13 = vsub.f32 %v7320_v58, %v7614_v42 }
0x107f   :  { %13145 = vpow2.f32 %v7649_v49  ;;  %v7624_v20 = vmul.f32 1.442695, %v7616_v32  ;;  %v7645_v39 = vmul.f32 1.442695, %v7637_v60  ;;  %v7666_v5 = vmul.f32 1.442695, %v7658_v9 }
0x1080   :  { %v7764_v14 = vpack.c.bf16 %v7600_v0, %v17577_v1  ;;  %13147 = vpow2.f32 %v7670_v31  ;;  %v7619_v38 = vsub.f32 %v17486_v50, %v7612_v62  ;;  %v7640_v33 = vsub.f32 %v17559_v19, %v7612_v62  ;;  %12010 = vmatmul.mubr.bf16.gmra.mrb[8].mxu0 %v18594_v18 }
0x1081   :  { %13149 = vpow2.f32 %v7624_v20  ;;  %v13132_v8 = vpop.eup %13131  ;;  %v7661_v46 = vsub.f32 %v7318_v29, %v7612_v62  ;;  %v7613_v47 = vmax.f32 %v18595_v55, %v17584_v10  ;;  %12013 = vmatprep.mubr.msk.bf16.mxu0 %vm13585_vm0, %v18567_v57  ;;  %v7676_v19 = vmul.f32 1.442695, %v7663_v13 }
0x1082   :  { %13151 = vpow2.f32 %v7645_v39  ;;  %v13134_v56 = vpop.eup %13133  ;;  %v7701_v50 = vmul.f32 %v13132_v8, %v18580_v23  ;;  %v7630_v43 = vmul.f32 1.442695, %v7619_v38  ;;  %v7651_v41 = vmul.f32 1.442695, %v7640_v33 }
0x1083   :  { %13153 = vpow2.f32 %v7666_v5  ;;  %v13136_v2 = vpop.eup %13135  ;;  %v7680_v44 = vadd.f32 %v13134_v56, %v13132_v8  ;;  %v7708_v16 = vmul.f32 %v13134_v56, %v18581_v37  ;;  %v7672_v58 = vmul.f32 1.442695, %v7661_v46 }
0x1084   :  { %13155 = vpow2.f32 %v7634_v17  ;;  %v13138_v1 = vpop.eup %13137  ;;  %v7722_v11 = vmul.f32 %v13136_v2, %v18582_v6  ;;  %v7620_v22 = vsub.f32 %v17518_v53, %v7613_v47  ;;  %v7641_v31 = vsub.f32 %v17535_v26, %v7613_v47 }
0x1085   :  { %13157 = vpow2.f32 %v7655_v40  ;;  %v13140_v45 = vpop.eup %13139  ;;  %v7687_v29 = vadd.f32 %v13136_v2, %v7680_v44  ;;  %v7715_v3 = vadd.f32 %v7708_v16, %v7701_v50  ;;  %v7699_v23 = vmul.f32 %v13138_v1, %v18571_v4 }
0x1086   :  { %13159 = vpow2.f32 %v7676_v19  ;;  %v13142_v49 = vpop.eup %13141  ;;  %v7678_v48 = vadd.f32 %v13140_v45, %v13138_v1  ;;  %v7706_v24 = vmul.f32 %v13140_v45, %v18572_v35  ;;  %v7632_v37 = vmul.f32 1.442695, %v7620_v22 }
0x1087   :  { %13161 = vpow2.f32 %v7630_v43  ;;  %v7729_v7 = vadd.f32 %v7722_v11, %v7715_v3  ;;  %v7720_v6 = vmul.f32 %v13142_v49, %v18573_v54  ;;  %v7653_v9 = vmul.f32 1.442695, %v7641_v31  ;;  %v18597_v3 = vld [vmem:[#allocation66_spill] sm:$0xff] }
0x1088   :  { %v13144_v42 = vpop.eup %13143  ;;  %13163 = vrcp.f32 %v7687_v29  ;;  %v7685_v62 = vadd.f32 %v13142_v49, %v7678_v48  ;;  %v7713_v15 = vadd.f32 %v7706_v24, %v7699_v23  ;;  %12014 = vmatmul.mubr.bf16.gmra.mrb[12].mxu0 %v7764_v14  ;;  %v7662_v61 = vsub.f32 %v17584_v10, %v7613_v47  ;;  %v18598_v24 = vld [vmem:[#allocation26_spill] sm:$0xff] }
0x1089   :  { %v13146_v53 = vpop.eup %13145  ;;  %v7702_v32 = vmul.f32 %v13144_v42, %v18586_v59  ;;  %13165 = vpow2.f32 %v7651_v41  ;;  %12017 = vmatprep.mubr.msk.bf16.mxu0 %vm13585_vm0, %v18567_v57  ;;  %v18599_v31 = vld [vmem:[#allocation34_spill] sm:$0xff] }
0x108a   :  { %v13148_v4 = vpop.eup %13147  ;;  %v7681_v60 = vadd.f32 %v13146_v53, %v13144_v42  ;;  %v7709_v35 = vmul.f32 %v13146_v53, %v18587_v52  ;;  %13167 = vpow2.f32 %v7672_v58  ;;  %v7727_v54 = vadd.f32 %v7720_v6, %v7713_v15 }
0x108b   :  { %v13150_v0 = vpop.eup %13149  ;;  %13169 = vrcp.f32 %v7685_v62  ;;  %v7723_v26 = vmul.f32 %v13148_v4, %v18588_v28  ;;  %v7674_v17 = vmul.f32 1.442695, %v7662_v61 }
0x108c   :  { %v13152_v63 = vpop.eup %13151  ;;  %v7688_v59 = vadd.f32 %v13148_v4, %v7681_v60  ;;  %v7716_v20 = vadd.f32 %v7709_v35, %v7702_v32  ;;  %v7700_v39 = vmul.f32 %v13150_v0, %v18574_v34  ;;  %13171 = vpow2.f32 %v7632_v37 }
0x108d   :  { %v13154_v5 = vpop.eup %13153  ;;  %v7679_v52 = vadd.f32 %v13152_v63, %v13150_v0  ;;  %v7707_v14 = vmul.f32 %v13152_v63, %v18575_v21  ;;  %13173 = vpow2.f32 %v7653_v9 }
0x108e   :  { %v13156_v40 = vpop.eup %13155  ;;  %13175 = vrcp.f32 %v7688_v59  ;;  %v7730_v13 = vadd.f32 %v7723_v26, %v7716_v20  ;;  %v7721_v38 = vmul.f32 %v13154_v5, %v18576_v36  ;;  %v18600_v20 = vmov 0  }
0x108f   :  { %v13158_v28 = vpop.eup %13157  ;;  %v7686_v33 = vadd.f32 %v13154_v5, %v7679_v52  ;;  %v7714_v10 = vadd.f32 %v7707_v14, %v7700_v39  ;;  %v7705_v18 = vmul.f32 %v13156_v40, %v18589_v51  ;;  %13177 = vpow2.f32 %v7674_v17  ;;  %v18601_v5 = vld [vmem:[#allocation70_spill] sm:$0xff] }
0x1090   :  { %v13160_v8 = vpop.eup %13159  ;;  %v7684_v34 = vadd.f32 %v13158_v28, %v13156_v40  ;;  %v7712_v46 = vmul.f32 %v13158_v28, %v18590_v27  ;;  %v18596_v27 = vld [vmem:[#allocation32_spill] sm:$0xff] }
0x1091   :  { %v13162_v55 = vpop.eup %13161  ;;  %13179 = vrcp.f32 %v7686_v33  ;;  %v7728_v21 = vadd.f32 %v7721_v38, %v7714_v10  ;;  %v7726_v47 = vmul.f32 %v13160_v8, %v18591_v30  ;;  %v18602_v40 = vld [vmem:[#allocation68_spill] sm:$0xff] }
0x1092   :  { %v13164_v56 = vpop.eup %13163  ;;  %v7691_v50 = vadd.f32 %v13160_v8, %v7684_v34  ;;  %v7719_v19 = vadd.f32 %v7712_v46, %v7705_v18  ;;  %v7703_v36 = vmul.f32 %v13162_v55, %v18577_v25  ;;  %v12441_v18 = vld [vmem:[%s18219_s7 + $0x100] ss:$16 sps:$4 sm:$0xff]   ;;  %v12443_v8 = vld [vmem:[%s18219_s7 + $0x104] ss:$16 sps:$4 sm:$0xff]   ;;  %v12444_v34 = vld [vmem:[%s18219_s7 + $0x108] ss:$16 sps:$4 sm:$0xff]  }
0x1093   :  { %v13166_v43 = vpop.eup %13165  ;;  %v7736_v2 = vmul.f32 %v13164_v56, %v7729_v7  ;;  %v12446_v46 = vld [vmem:[%s18219_s7 + $0x10c] ss:$16 sps:$4 sm:$0xff]   ;;  %8419 = vmatprep.subr.bf16.mxu0 %v12443_v8  ;;  %v12450_v56 = vld [vmem:[%s18219_s7 + $0x128] ss:$16 sps:$4 sm:$0xff]   ;;  %v18611_v8 = vld [vmem:[#allocation75_spill] sm:$0xff] }
0x1094   :  { %v13168_v44 = vpop.eup %13167  ;;  %13181 = vrcp.f32 %v7691_v50  ;;  %v7733_v51 = vadd.f32 %v7726_v47, %v7719_v19  ;;  %v7682_v16 = vadd.f32 %v13166_v43, %v13162_v55  ;;  %v7710_v41 = vmul.f32 %v13166_v43, %v18578_v12  ;;  %v12449_v55 = vld [vmem:[%s18219_s7 + $0x124] ss:$16 sps:$4 sm:$0xff]   ;;  %8560 = vmatprep.subr.bf16.mxu1 %v12446_v46  ;;  %8420 = vmatpush1.bf16.msra.mxu0 %v12441_v18  ;;  %v12447_v47 = vld [vmem:[%s18219_s7 + $0x120] ss:$16 sps:$4 sm:$0xff]   ;;  %v12458_v19 = vld [vmem:[%s18219_s7 + $0x14c] ss:$16 sps:$4 sm:$0xff]  }
0x1095   :  { %v13170_v1 = vpop.eup %13169  ;;  %v7724_v11 = vmul.f32 %v13168_v44, %v18596_v27  ;;  %8421 = vmatprep.subr.bf16.mxu0 %v12449_v55  ;;  %v12455_v50 = vld [vmem:[%s18219_s7 + $0x144] ss:$16 sps:$4 sm:$0xff]   ;;  %v12456_v43 = vld [vmem:[%s18219_s7 + $0x148] ss:$16 sps:$4 sm:$0xff]  }
0x1096   :  { %v13172_v58 = vpop.eup %13171  ;;  %v7734_v22 = vmul.f32 %v13170_v1, %v7727_v54  ;;  %v7689_v45 = vadd.f32 %v13168_v44, %v7682_v16  ;;  %v7717_v30 = vadd.f32 %v7710_v41, %v7703_v36  ;;  %v12453_v36 = vld [vmem:[%s18219_s7 + $0x140] ss:$16 sps:$4 sm:$0xff]   ;;  %v12464_v44 = vld [vmem:[%s18219_s7 + $0x16c] ss:$16 sps:$4 sm:$0xff]   ;;  %v12462_v16 = vld [vmem:[%s18219_s7 + $0x168] ss:$16 sps:$4 sm:$0xff]  }
0x1097   :  { %v13174_v29 = vpop.eup %13173  ;;  %v7704_v23 = vmul.f32 %v13172_v58, %v18597_v3  ;;  %v18603_v1 = vld [vmem:[#allocation74_spill] sm:$0xff] }
0x1098   :  { %v13176_v49 = vpop.eup %13175  ;;  %13183 = vrcp.f32 %v7689_v45  ;;  %v7731_v25 = vadd.f32 %v7724_v11, %v7717_v30  ;;  %v7683_v48 = vadd.f32 %v13174_v29, %v13172_v58  ;;  %v7711_v37 = vmul.f32 %v13174_v29, %v18598_v24  ;;  %8422 = vmatpush1.bf16.msra.mxu0 %v12447_v47 }
0x1099   :  { %v13178_v42 = vpop.eup %13177  ;;  %v7737_v7 = vmul.f32 %v13176_v49, %v7730_v13  ;;  %8423 = vmatprep.subr.bf16.mxu0 %v12455_v50 }
0x109a   :  { %v7690_v6 = vadd.f32 %v13178_v42, %v7683_v48  ;;  %v7718_v12 = vadd.f32 %v7711_v37, %v7704_v23  ;;  %v7725_v53 = vmul.f32 %v13178_v42, %v18599_v31  ;;  %v18606_v42 = vld [vmem:[#allocation69_spill] sm:$0xff] }
0x109b   :  { %v13180_v62 = vpop.eup %13179  ;;  %v7766_v15 = vpack.c.bf16 %v7737_v7, %v7736_v2  ;;  %v12461_v2 = vld [vmem:[%s18219_s7 + $0x164] ss:$16 sps:$4 sm:$0xff]  }
0x109c   :  { %v7735_v32 = vmul.f32 %v13180_v62, %v7728_v21  ;;  %13185 = vrcp.f32 %v7690_v6  ;;  %v7732_v4 = vadd.f32 %v7725_v53, %v7718_v12  ;;  %v12452_v21 = vld [vmem:[%s18219_s7 + $0x12c] ss:$16 sps:$4 sm:$0xff]   ;;  %8424 = vmatpush1.bf16.msra.mxu0 %v12453_v36 }
0x109d   :  { %8425 = vmatprep.subr.bf16.mxu0 %v12461_v2  ;;  %v18613_v2 = vld [vmem:[#allocation60_spill] sm:$0xff] }
0x109e   :  { %v13182_v60 = vpop.eup %13181  ;;  %v7765_v35 = vpack.c.bf16 %v7735_v32, %v7734_v22  ;;  %v18604_v22 = vld [vmem:[#allocation72_spill] sm:$0xff] }
0x109f   :  { %v7740_v9 = vmul.f32 %v13182_v60, %v7733_v51  ;;  %v12459_v51 = vld [vmem:[%s18219_s7 + $0x160] ss:$16 sps:$4 sm:$0xff]  }
0x10a0   :  { %12018 = vmatmul.mubr.bf16.gmra.mrb[16].mxu0 %v7765_v35  ;;  %v18608_v35 = vld [vmem:[#allocation73_spill] sm:$0xff] }
0x10a1   :  { %12021 = vmatprep.mubr.msk.bf16.mxu0 %vm13585_vm0, %v18567_v57  ;;  %v7768_v59 = vpack.c.bf16 %v7740_v9, %v7740_v9  ;;  %8426 = vmatpush1.bf16.msra.mxu0 %v12459_v51 }
0x10a2   :  { %v13184_v0 = vpop.eup %13183 }
0x10a3   :  { %v7738_v54 = vmul.f32 %v13184_v0, %v7731_v25  ;;  %v18605_v25 = vld [vmem:[#allocation76_spill] sm:$0xff] }
0x10a6   :  { %v13186_v26 = vpop.eup %13185 }
0x10a7   :  { %v7739_v61 = vmul.f32 %v13186_v26, %v7732_v4 }
0x10a8   :  { %12022 = vmatmul.mubr.bf16.gmra.mrb[20].mxu0 %v7766_v15  ;;  %v18607_v15 = vld [vmem:[#allocation67_spill] sm:$0xff] }
0x10a9   :  { %v7767_v63 = vpack.c.bf16 %v7739_v61, %v7738_v54  ;;  %12025 = vmatprep.mubr.msk.bf16.mxu0 %vm13585_vm0, %v18567_v57 }
0x10b0   :  { %12026 = vmatmul.mubr.bf16.gmra.mrb[24].mxu0 %v7767_v63 }
0x10b1   :  { %12029 = vmatprep.mubr.msk.bf16.mxu0 %vm13585_vm0, %v18567_v57 }
0x10b8   :  { %12030 = vmatmul.mubr.bf16.gmra.mrb[28].mxu0 %v7768_v59  ;;  %v18609_v59 = vld [vmem:[#allocation71_spill] sm:$0xff] }
0x10b9   :  { %8451 = vmatprep.mubr.bf16.mxu0 %v18600_v20 }
0x110c   :  { %v7851_v39 = vpop.f32.mrb[244].mxu0 }
0x110d   :  { %v17636_v52 = vadd.f32 %v7851_v39, %v18601_v5  ;;  %v11991_v14 = vpop.f32.mrb[245].mxu0 }
0x110e   :  { %v7854_v17 = vpop.f32.mrb[246].mxu0 }
0x110f   :  { %v17639_v13 = vadd.f32 %v7854_v17, %v18602_v40  ;;  %v11992_v38 = vpop.f32.mrb[247].mxu0  ;;  %v7958_v28 = vmul.f32 %v17636_v52, %v17636_v52  ;;  %v18610_v17 = vld [vmem:[#allocation77_spill] sm:$0xff] }
0x1111   :  { %v7959_v33 = vmul.f32 %v17639_v13, %v17639_v13 }
0x1113   :  { %v7979_v10 = vpack.c.bf16 %v7959_v33, %v7958_v28 }
0x1115   :  { %12050 = vmatmul.mubr.bf16.vlgmr.msra.gmra.mrb[36].mxu1 %v7979_v10 }
0x1116   :  { %12053 = vmatprep.mubr.msk.bf16.mxu1 %vm13585_vm0, %v18567_v57  ;;  %8561 = vmatpush1.bf16.msra.mxu1 %v12444_v34 }
0x1117   :  { %8562 = vmatprep.subr.bf16.mxu1 %v12452_v21  ;;  %v18612_v21 = vld [vmem:[#allocation46_spill] sm:$0xff] }
0x111a   :  { %8563 = vmatpush1.bf16.msra.mxu1 %v12450_v56 }
0x111b   :  { %8564 = vmatprep.subr.bf16.mxu1 %v12458_v19 }
0x111e   :  { %8565 = vmatpush1.bf16.msra.mxu1 %v12456_v43 }
0x111f   :  { %8566 = vmatprep.subr.bf16.mxu1 %v12464_v44 }
0x1122   :  { %8567 = vmatpush1.bf16.msra.mxu1 %v12462_v16 }
0x1124   :  { %v7859_v41 = vpop.f32.mrb[248].mxu0 }
0x1125   :  { %v17696_v27 = vadd.f32 %v7859_v41, %v18603_v1  ;;  %v11995_v11 = vpop.f32.mrb[249].mxu0  ;;  %v18614_v41 = vld [vmem:[#allocation61_spill] sm:$0xff] }
0x1126   :  { %v7862_v58 = vpop.f32.mrb[250].mxu0 }
0x1127   :  { %v17699_v45 = vadd.f32 %v7862_v58, %v18604_v22  ;;  %v11996_v30 = vpop.f32.mrb[251].mxu0  ;;  %v7960_v29 = vmul.f32 %v17696_v27, %v17696_v27 }
0x1129   :  { %v7961_v3 = vmul.f32 %v17699_v45, %v17699_v45 }
0x112b   :  { %v7980_v23 = vpack.c.bf16 %v7961_v3, %v7960_v29  ;;  %v18615_v3 = vld [vmem:[#allocation47_spill] sm:$0xff] }
0x112c   :  { %v7867_v49 = vpop.f32.mrb[252].mxu0 }
0x112d   :  { %v17706_v48 = vadd.f32 %v7867_v49, %v18605_v25  ;;  %v11999_v24 = vpop.f32.mrb[253].mxu0  ;;  %12054 = vmatmul.mubr.bf16.gmra.mrb[40].mxu1 %v7980_v23 }
0x112e   :  { %v7870_v37 = vpop.f32.mrb[254].mxu0  ;;  %12057 = vmatprep.mubr.msk.bf16.mxu1 %vm13585_vm0, %v18567_v57  ;;  %v18616_v24 = vld [vmem:[#allocation53_spill] sm:$0xff] }
0x112f   :  { %v17711_v7 = vadd.f32 %v7870_v37, %v18606_v42  ;;  %v12000_v6 = vpop.f32.mrb[255].mxu0  ;;  %v7962_v12 = vmul.f32 %v17706_v48, %v17706_v48 }
0x1131   :  { %v7963_v31 = vmul.f32 %v17711_v7, %v17711_v7 }
0x1133   :  { %v7981_v53 = vpack.c.bf16 %v7963_v31, %v7962_v12  ;;  %v12467_v31 = vld [vmem:[%s18219_s7 + $0x184] ss:$16 sps:$4 sm:$0xff]  }
0x1134   :  { %8427 = vmatprep.subr.bf16.mxu0 %v12467_v31 }
0x1135   :  { %12058 = vmatmul.mubr.bf16.gmra.mrb[44].mxu1 %v7981_v53  ;;  %v12470_v53 = vld [vmem:[%s18219_s7 + $0x18c] ss:$16 sps:$4 sm:$0xff]  }
0x1136   :  { %12061 = vmatprep.mubr.msk.bf16.mxu1 %vm13585_vm0, %v18567_v57  ;;  %8568 = vmatprep.subr.bf16.mxu1 %v12470_v53 }
0x113b   :  { %v7875_v62 = vpop.f32.mrb[0].mxu0 }
0x113c   :  { %v17720_v32 = vadd.f32 %v7875_v62, %v18607_v15  ;;  %v12003_v4 = vpop.f32.mrb[1].mxu0  ;;  %v12465_v15 = vld [vmem:[%s18219_s7 + $0x180] ss:$16 sps:$4 sm:$0xff]  }
0x113d   :  { %v7878_v60 = vpop.f32.mrb[2].mxu0  ;;  %v12468_v4 = vld [vmem:[%s18219_s7 + $0x188] ss:$16 sps:$4 sm:$0xff]   ;;  %8428 = vmatpush1.bf16.msra.mxu0 %v12465_v15 }
0x113e   :  { %v17723_v9 = vadd.f32 %v7878_v60, %v18608_v35  ;;  %v12004_v0 = vpop.f32.mrb[3].mxu0  ;;  %v7964_v54 = vmul.f32 %v17720_v32, %v17720_v32  ;;  %v18617_v35 = vld [vmem:[#allocation54_spill] sm:$0xff]  ;;  %8569 = vmatpush1.bf16.msra.mxu1 %v12468_v4 }
0x1140   :  { %v7965_v26 = vmul.f32 %v17723_v9, %v17723_v9 }
0x1142   :  { %v7982_v61 = vpack.c.bf16 %v7965_v26, %v7964_v54 }
0x1144   :  { %12062 = vmatmul.mubr.bf16.gmra.mrb[48].mxu1 %v7982_v61  ;;  %v12473_v61 = vld [vmem:[%s18219_s7 + $0x1a4] ss:$16 sps:$4 sm:$0xff]  }
0x1145   :  { %12065 = vmatprep.mubr.msk.bf16.mxu1 %vm13585_vm0, %v18567_v57  ;;  %8429 = vmatprep.subr.bf16.mxu0 %v12473_v61 }
0x114b   :  { %v7883_v63 = vpop.f32.mrb[4].mxu0 }
0x114c   :  { %v17732_v39 = vadd.f32 %v7883_v63, %v18609_v59  ;;  %v12007_v5 = vpop.f32.mrb[5].mxu0  ;;  %v12476_v63 = vld [vmem:[%s18219_s7 + $0x1ac] ss:$16 sps:$4 sm:$0xff]  }
0x114d   :  { %v7886_v14 = vpop.f32.mrb[6].mxu0  ;;  %v18618_v59 = vld [vmem:[#allocation48_spill] sm:$0xff]  ;;  %8570 = vmatprep.subr.bf16.mxu1 %v12476_v63 }
0x114e   :  { %v17735_v40 = vadd.f32 %v7886_v14, %v18610_v17  ;;  %v12008_v38 = vpop.f32.mrb[7].mxu0  ;;  %v7966_v28 = vmul.f32 %v17732_v39, %v17732_v39  ;;  %v12471_v17 = vld [vmem:[%s18219_s7 + $0x1a0] ss:$16 sps:$4 sm:$0xff]  }
0x114f   :  { %v12474_v38 = vld [vmem:[%s18219_s7 + $0x1a8] ss:$16 sps:$4 sm:$0xff]   ;;  %8430 = vmatpush1.bf16.msra.mxu0 %v12471_v17 }
0x1150   :  { %v7967_v33 = vmul.f32 %v17735_v40, %v17735_v40  ;;  %8571 = vmatpush1.bf16.msra.mxu1 %v12474_v38 }
0x1152   :  { %v7983_v10 = vpack.c.bf16 %v7967_v33, %v7966_v28  ;;  %v12479_v28 = vld [vmem:[%s18219_s7 + $0x1c4] ss:$16 sps:$4 sm:$0xff]  }
0x1153   :  { %v7891_v18 = vpop.f32.mrb[8].mxu0  ;;  %8431 = vmatprep.subr.bf16.mxu0 %v12479_v28 }
0x1154   :  { %v17742_v34 = vadd.f32 %v7891_v18, %v18611_v8  ;;  %v12011_v46 = vpop.f32.mrb[9].mxu0  ;;  %12066 = vmatmul.mubr.bf16.gmra.mrb[52].mxu1 %v7983_v10  ;;  %v12477_v18 = vld [vmem:[%s18219_s7 + $0x1c0] ss:$16 sps:$4 sm:$0xff]   ;;  %v12482_v8 = vld [vmem:[%s18219_s7 + $0x1cc] ss:$16 sps:$4 sm:$0xff]  }
0x1155   :  { %v7894_v55 = vpop.f32.mrb[10].mxu0  ;;  %12069 = vmatprep.mubr.msk.bf16.mxu1 %vm13585_vm0, %v18567_v57  ;;  %v12480_v46 = vld [vmem:[%s18219_s7 + $0x1c8] ss:$16 sps:$4 sm:$0xff]   ;;  %8572 = vmatprep.subr.bf16.mxu1 %v12482_v8 }
0x1156   :  { %v17747_v47 = vadd.f32 %v7894_v55, %v18612_v21  ;;  %v12012_v56 = vpop.f32.mrb[11].mxu0  ;;  %v7968_v50 = vmul.f32 %v17742_v34, %v17742_v34  ;;  %8432 = vmatpush1.bf16.msra.mxu0 %v12477_v18  ;;  %8573 = vmatpush1.bf16.msra.mxu1 %v12480_v46  ;;  %v12493_v8 = vld [vmem:[%s18220_s8 + $0x148] sm:$0xff]  }
0x1157   :  { %v18619_v56 = vld [vmem:[#allocation55_spill] sm:$0xff]  ;;  %v12494_v46 = vld [vmem:[%s18220_s8 + $0x1c8] sm:$0xff]  }
0x1158   :  { %v7969_v19 = vmul.f32 %v17747_v47, %v17747_v47 }
0x115a   :  { %v7984_v36 = vpack.c.bf16 %v7969_v19, %v7968_v50 }
0x115b   :  { %v7899_v43 = vpop.f32.mrb[12].mxu0 }
0x115c   :  { %v17754_v44 = vadd.f32 %v7899_v43, %v18613_v2  ;;  %v12015_v51 = vpop.f32.mrb[13].mxu0  ;;  %12070 = vmatmul.mubr.bf16.gmra.mrb[56].mxu1 %v7984_v36  ;;  %v12485_v43 = vld [vmem:[%s18219_s7 + $0x1e4] ss:$16 sps:$4 sm:$0xff]   ;;  %v12488_v2 = vld [vmem:[%s18219_s7 + $0x1ec] ss:$16 sps:$4 sm:$0xff]  }
0x115d   :  { %v7902_v16 = vpop.f32.mrb[14].mxu0  ;;  %12073 = vmatprep.mubr.msk.bf16.mxu1 %vm13585_vm0, %v18567_v57  ;;  %v18620_v51 = vld [vmem:[#allocation62_spill] sm:$0xff]  ;;  %8433 = vmatprep.subr.bf16.mxu0 %v12485_v43 }
0x115e   :  { %v17759_v1 = vadd.f32 %v7902_v16, %v18614_v41  ;;  %v12016_v11 = vpop.f32.mrb[15].mxu0  ;;  %v7970_v58 = vmul.f32 %v17754_v44, %v17754_v44  ;;  %8574 = vmatprep.subr.bf16.mxu1 %v12488_v2  ;;  %v12495_v2 = vld [vmem:[%s18220_s8 + $0x108] sm:$0xff]  }
0x115f   :  { %v12483_v11 = vld [vmem:[%s18219_s7 + $0x1e0] ss:$16 sps:$4 sm:$0xff]  }
0x1160   :  { %v7971_v22 = vmul.f32 %v17759_v1, %v17759_v1  ;;  %8434 = vmatpush1.bf16.msra.mxu0 %v12483_v11  ;;  %v12498_v11 = vld [vmem:[%s18220_s8 + $0x1d0] sm:$0xff]  }
0x1162   :  { %v7985_v30 = vpack.c.bf16 %v7971_v22, %v7970_v58  ;;  %v12486_v58 = vld [vmem:[%s18219_s7 + $0x1e8] ss:$16 sps:$4 sm:$0xff]  }
0x1163   :  { %8575 = vmatpush1.bf16.msra.mxu1 %v12486_v58 }
0x1164   :  { %12074 = vmatmul.mubr.bf16.gmra.mrb[60].mxu1 %v7985_v30 }
0x1165   :  { %12077 = vmatprep.mubr.msk.bf16.mxu1 %vm13585_vm0, %v18567_v57 }
0x1173   :  { %v7907_v29 = vpop.f32.mrb[16].mxu0 }
0x1174   :  { %v17768_v23 = vadd.f32 %v7907_v29, %v18615_v3  ;;  %v12019_v49 = vpop.f32.mrb[17].mxu0 }
0x1175   :  { %v7910_v25 = vpop.f32.mrb[18].mxu0  ;;  %v18621_v49 = vld [vmem:[#allocation65_spill] sm:$0xff] }
0x1176   :  { %v17771_v37 = vadd.f32 %v7910_v25, %v18616_v24  ;;  %v12020_v42 = vpop.f32.mrb[19].mxu0  ;;  %v7972_v6 = vmul.f32 %v17768_v23, %v17768_v23 }
0x1178   :  { %v7973_v12 = vmul.f32 %v17771_v37, %v17771_v37 }
0x117a   :  { %v7986_v62 = vpack.c.bf16 %v7973_v12, %v7972_v6 }
0x117b   :  { %v7915_v60 = vpop.f32.mrb[20].mxu0 }
0x117c   :  { %v17790_v0 = vadd.f32 %v7915_v60, %v18617_v35  ;;  %v12023_v54 = vpop.f32.mrb[21].mxu0  ;;  %12078 = vmatmul.mubr.bf16.gmra.mrb[64].mxu1 %v7986_v62 }
0x117d   :  { %v7918_v26 = vpop.f32.mrb[22].mxu0  ;;  %12081 = vmatprep.mubr.msk.bf16.mxu1 %vm13585_vm0, %v18567_v57 }
0x117e   :  { %v17801_v5 = vadd.f32 %v7918_v26, %v18618_v59  ;;  %v12024_v14 = vpop.f32.mrb[23].mxu0  ;;  %v7974_v33 = vmul.f32 %v17790_v0, %v17790_v0 }
0x117f   :  { %v17859_v14 = vld [vmem:[#allocation7 + $0x1] ss:$0 sm:$0xff] }
0x1180   :  { %v7975_v10 = vmul.f32 %v17801_v5, %v17801_v5 }
0x1182   :  { %v7987_v55 = vpack.c.bf16 %v7975_v10, %v7974_v33  ;;  %v12489_v33 = vld [vmem:[%s18220_s8 + $0x140] sm:$0xff]  }
0x1183   :  { %v7923_v21 = vpop.f32.mrb[24].mxu0  ;;  %v12490_v10 = vld [vmem:[%s18220_s8 + $0x1c0] sm:$0xff]   ;;  %10749 = vmatprep.subr.bf16.mxu0 %v12489_v33 }
0x1184   :  { %v17826_v50 = vadd.f32 %v7923_v21, %v18619_v56  ;;  %v12027_v19 = vpop.f32.mrb[25].mxu0  ;;  %12082 = vmatmul.mubr.bf16.gmra.mrb[68].mxu1 %v7987_v55  ;;  %10831 = vmatprep.subr.bf16.mxu1 %v12490_v10 }
0x1185   :  { %v7926_v36 = vpop.f32.mrb[26].mxu0  ;;  %12085 = vmatprep.mubr.msk.bf16.mxu1 %vm13585_vm0, %v18567_v57 }
0x1186   :  { %v17837_v16 = vadd.f32 %v7926_v36, %v18620_v51  ;;  %v12028_v41 = vpop.f32.mrb[27].mxu0  ;;  %v7976_v22 = vmul.f32 %v17826_v50, %v17826_v50  ;;  %v12496_v51 = vld [vmem:[%s18220_s8 + $0x188] sm:$0xff]  }
0x1187   :  { %v12497_v41 = vld [vmem:[%s18220_s8 + $0x150] sm:$0xff]  }
0x1188   :  { %v7977_v30 = vmul.f32 %v17837_v16, %v17837_v16 }
0x118a   :  { %v7988_v29 = vpack.c.bf16 %v7977_v30, %v7976_v22  ;;  %v12499_v22 = vld [vmem:[%s18220_s8 + $0x110] sm:$0xff]  }
0x118b   :  { %v7931_v3 = vpop.f32.mrb[28].mxu0  ;;  %v12500_v30 = vld [vmem:[%s18220_s8 + $0x190] sm:$0xff]  }
0x118c   :  { %v17850_v25 = vadd.f32 %v7931_v3, %v18621_v49  ;;  %v12031_v24 = vpop.f32.mrb[29].mxu0  ;;  %12086 = vmatmul.mubr.bf16.gmra.mrb[72].mxu1 %v7988_v29  ;;  %v12501_v3 = vld [vmem:[%s18220_s8 + $0x158] sm:$0xff]  }
0x118d   :  { %v7934_v42 = vpop.f32.mrb[30].mxu0  ;;  %12089 = vmatprep.mubr.msk.bf16.mxu1 %vm13585_vm0, %v18567_v57  ;;  %v12502_v49 = vld [vmem:[%s18220_s8 + $0x1d8] sm:$0xff]  }
0x118e   :  { %v7978_v6 = vmul.f32 %v17850_v25, %v17850_v25  ;;  %v12032_v12 = vpop.f32.mrb[31].mxu0 }
0x1190   :  { %v7989_v31 = vpack.c.bf16 %v7978_v6, %v7978_v6 }
0x1194   :  { %12090 = vmatmul.mubr.bf16.gmra.mrb[76].mxu1 %v7989_v31 }
0x1195   :  { %8592 = vmatprep.mubr.bf16.mxu1 %v18600_v20 }
0x11e8   :  { %v8024_v53 = vpop.f32.mrb[36].mxu1 }
0x11e9   :  { %v8110_v62 = vmul.f32 0.03125, %v8024_v53  ;;  %v12051_v15 = vpop.f32.mrb[37].mxu1 }
0x11ea   :  { %v8027_v4 = vpop.f32.mrb[38].mxu1  ;;  %v12504_v15 = vld [vmem:[%s18220_s8 + $0x198] sm:$0xff]  }
0x11eb   :  { %v8131_v60 = vadd.f32 1e-05, %v8110_v62  ;;  %v8111_v35 = vmul.f32 0.03125, %v8027_v4  ;;  %v12052_v54 = vpop.f32.mrb[39].mxu1  ;;  %v12503_v62 = vld [vmem:[%s18220_s8 + $0x118] sm:$0xff]   ;;  %v12505_v4 = vld [vmem:[%s18220_s8 + $0x160] sm:$0xff]  }
0x11ed   :  { %13187 = vrsqrt.f32 %v8131_v60  ;;  %v8132_v26 = vadd.f32 1e-05, %v8111_v35  ;;  %v12506_v60 = vld [vmem:[%s18220_s8 + $0x1e0] sm:$0xff]  }
0x11ef   :  { %13189 = vrsqrt.f32 %v8132_v26  ;;  %v12507_v26 = vld [vmem:[%s18220_s8 + $0x120] sm:$0xff]  }
0x11f7   :  { %v13188_v61 = vpop.eup %13187 }
0x11f8   :  { %v8173_v57 = vmul.f32 %v13188_v61, %v17636_v52  ;;  %v12491_v52 = vld [vmem:[%s18220_s8 + $0x100] sm:$0xff]  }
0x11f9   :  { %v13190_v63 = vpop.eup %13189  ;;  %v12508_v61 = vld [vmem:[%s18220_s8 + $0x1a0] sm:$0xff]  }
0x11fa   :  { %v8174_v59 = vmul.f32 %v13190_v63, %v17639_v13  ;;  %v8194_v17 = vmul.f32 %v17859_v14, %v8173_v57  ;;  %v12492_v13 = vld [vmem:[%s18220_s8 + $0x180] sm:$0xff]   ;;  %v12509_v63 = vld [vmem:[%s18220_s8 + $0x168] sm:$0xff]  }
0x11fc   :  { %v8195_v38 = vmul.f32 %v17859_v14, %v8174_v59  ;;  %v12510_v59 = vld [vmem:[%s18220_s8 + $0x1e8] sm:$0xff]  }
0x11fe   :  { %v8248_v28 = vpack.c.bf16 %v8195_v38, %v8194_v17 }
0x1200   :  { %v8032_v18 = vpop.f32.mrb[40].mxu1  ;;  %8452 = vmatmul.mubr.bf16.vlgmr.msra.gmra.mrb[32].mxu0 %v8248_v28  ;;  %8593 = vmatmul.mubr.bf16.vlgmr.msra.gmra.mrb[80].mxu1 %v8248_v28 }
0x1201   :  { %v8112_v55 = vmul.f32 0.03125, %v8032_v18  ;;  %v12055_v21 = vpop.f32.mrb[41].mxu1  ;;  %8461 = vmatprep.mubr.bf16.mxu0 %v18600_v20  ;;  %8602 = vmatprep.mubr.bf16.mxu1 %v18600_v20 }
0x1202   :  { %v8035_v56 = vpop.f32.mrb[42].mxu1  ;;  %10750 = vmatpush3.bf16.msra.mxu0 %v12491_v52  ;;  %10832 = vmatpush3.bf16.msra.mxu1 %v12492_v13 }
0x1203   :  { %v8133_v19 = vadd.f32 1e-05, %v8112_v55  ;;  %v8113_v36 = vmul.f32 0.03125, %v8035_v56  ;;  %v12056_v43 = vpop.f32.mrb[43].mxu1  ;;  %10751 = vmatprep.subr.bf16.mxu0 %v12493_v8  ;;  %10833 = vmatprep.subr.bf16.mxu1 %v12494_v46 }
0x1205   :  { %13191 = vrsqrt.f32 %v8133_v19  ;;  %v8134_v58 = vadd.f32 1e-05, %v8113_v36 }
0x1206   :  { %10752 = vmatpush3.bf16.msra.mxu0 %v12495_v2  ;;  %10834 = vmatpush3.bf16.msra.mxu1 %v12496_v51 }
0x1207   :  { %13193 = vrsqrt.f32 %v8134_v58  ;;  %10753 = vmatprep.subr.bf16.mxu0 %v12497_v41  ;;  %10835 = vmatprep.subr.bf16.mxu1 %v12498_v11 }
0x1208   :  { %v8040_v29 = vpop.f32.mrb[44].mxu1 }
0x1209   :  { %v8114_v24 = vmul.f32 0.03125, %v8040_v29  ;;  %v12059_v42 = vpop.f32.mrb[45].mxu1 }
0x120a   :  { %v8043_v6 = vpop.f32.mrb[46].mxu1  ;;  %10754 = vmatpush3.bf16.msra.mxu0 %v12499_v22  ;;  %10836 = vmatpush3.bf16.msra.mxu1 %v12500_v30 }
0x120b   :  { %v8135_v12 = vadd.f32 1e-05, %v8114_v24  ;;  %v8115_v31 = vmul.f32 0.03125, %v8043_v6  ;;  %v12060_v53 = vpop.f32.mrb[47].mxu1  ;;  %10755 = vmatprep.subr.bf16.mxu0 %v12501_v3  ;;  %10837 = vmatprep.subr.bf16.mxu1 %v12502_v49 }
0x120d   :  { %13195 = vrsqrt.f32 %v8135_v12  ;;  %v8136_v35 = vadd.f32 1e-05, %v8115_v31 }
0x120e   :  { %10756 = vmatpush3.bf16.msra.mxu0 %v12503_v62  ;;  %10838 = vmatpush3.bf16.msra.mxu1 %v12504_v15 }
0x120f   :  { %v13192_v54 = vpop.eup %13191  ;;  %13197 = vrsqrt.f32 %v8136_v35  ;;  %10757 = vmatprep.subr.bf16.mxu0 %v12505_v4  ;;  %10839 = vmatprep.subr.bf16.mxu1 %v12506_v60 }
0x1210   :  { %v8175_v57 = vmul.f32 %v13192_v54, %v17696_v27 }
0x1211   :  { %v13194_v17 = vpop.eup %13193 }
0x1212   :  { %v8176_v38 = vmul.f32 %v13194_v17, %v17699_v45  ;;  %10758 = vmatpush3.bf16.msra.mxu0 %v12507_v26  ;;  %10840 = vmatpush3.bf16.msra.mxu1 %v12508_v61  ;;  %v8196_v28 = vmul.f32 %v17859_v14, %v8175_v57 }
0x1213   :  { %10759 = vmatprep.subr.bf16.mxu0 %v12509_v63  ;;  %10841 = vmatprep.subr.bf16.mxu1 %v12510_v59 }
0x1214   :  { %v8197_v33 = vmul.f32 %v17859_v14, %v8176_v38 }
0x1216   :  { %v8249_v27 = vpack.c.bf16 %v8197_v33, %v8196_v28 }
0x1217   :  { %v13196_v10 = vpop.eup %13195  ;;  %v8048_v52 = vpop.f32.mrb[48].mxu1 }
0x1218   :  { %v8177_v13 = vmul.f32 %v13196_v10, %v17706_v48  ;;  %8462 = vmatmul.mubr.bf16.gmra.mrb[36].mxu0 %v8249_v27  ;;  %8603 = vmatmul.mubr.bf16.gmra.mrb[84].mxu1 %v8249_v27  ;;  %v8116_v18 = vmul.f32 0.03125, %v8048_v52  ;;  %v12063_v8 = vpop.f32.mrb[49].mxu1 }
0x1219   :  { %v13198_v46 = vpop.eup %13197  ;;  %8471 = vmatprep.mubr.bf16.mxu0 %v18600_v20  ;;  %8612 = vmatprep.mubr.bf16.mxu1 %v18600_v20  ;;  %v8051_v45 = vpop.f32.mrb[50].mxu1 }
0x121a   :  { %v8178_v55 = vmul.f32 %v13198_v46, %v17711_v7  ;;  %v8137_v21 = vadd.f32 1e-05, %v8116_v18  ;;  %v8117_v56 = vmul.f32 0.03125, %v8051_v45  ;;  %v12064_v19 = vpop.f32.mrb[51].mxu1  ;;  %v8198_v36 = vmul.f32 %v17859_v14, %v8177_v13 }
0x121c   :  { %v8199_v43 = vmul.f32 %v17859_v14, %v8178_v55  ;;  %13199 = vrsqrt.f32 %v8137_v21  ;;  %v8138_v48 = vadd.f32 1e-05, %v8117_v56 }
0x121e   :  { %v8250_v2 = vpack.c.bf16 %v8199_v43, %v8198_v36  ;;  %13201 = vrsqrt.f32 %v8138_v48 }
0x1220   :  { %8472 = vmatmul.mubr.bf16.gmra.mrb[40].mxu0 %v8250_v2  ;;  %8613 = vmatmul.mubr.bf16.gmra.mrb[88].mxu1 %v8250_v2 }
0x1221   :  { %8481 = vmatprep.mubr.bf16.mxu0 %v18600_v20  ;;  %8622 = vmatprep.mubr.bf16.mxu1 %v18600_v20 }
0x1226   :  { %v13200_v51 = vpop.eup %13199 }
0x1227   :  { %v8179_v7 = vmul.f32 %v13200_v51, %v17720_v32  ;;  %v8056_v41 = vpop.f32.mrb[52].mxu1 }
0x1228   :  { %v13202_v11 = vpop.eup %13201  ;;  %v8118_v58 = vmul.f32 0.03125, %v8056_v41  ;;  %v12067_v22 = vpop.f32.mrb[53].mxu1 }
0x1229   :  { %v8180_v30 = vmul.f32 %v13202_v11, %v17723_v9  ;;  %v8059_v29 = vpop.f32.mrb[54].mxu1  ;;  %v8200_v42 = vmul.f32 %v17859_v14, %v8179_v7 }
0x122a   :  { %v8139_v3 = vadd.f32 1e-05, %v8118_v58  ;;  %v8119_v49 = vmul.f32 0.03125, %v8059_v29  ;;  %v12068_v24 = vpop.f32.mrb[55].mxu1 }
0x122b   :  { %v8201_v6 = vmul.f32 %v17859_v14, %v8180_v30 }
0x122c   :  { %13203 = vrsqrt.f32 %v8139_v3  ;;  %v8140_v12 = vadd.f32 1e-05, %v8119_v49 }
0x122d   :  { %v8251_v31 = vpack.c.bf16 %v8201_v6, %v8200_v42 }
0x122e   :  { %13205 = vrsqrt.f32 %v8140_v12  ;;  %v12511_v12 = vld [vmem:[%s18220_s8 + $0x128] sm:$0xff]  }
0x122f   :  { %v8064_v53 = vpop.f32.mrb[56].mxu1  ;;  %8482 = vmatmul.mubr.bf16.gmra.mrb[44].mxu0 %v8251_v31  ;;  %8623 = vmatmul.mubr.bf16.gmra.mrb[92].mxu1 %v8251_v31  ;;  %v12512_v31 = vld [vmem:[%s18220_s8 + $0x1a8] sm:$0xff]  }
0x1230   :  { %v8120_v32 = vmul.f32 0.03125, %v8064_v53  ;;  %v12071_v62 = vpop.f32.mrb[57].mxu1  ;;  %8491 = vmatprep.mubr.bf16.mxu0 %v18600_v20  ;;  %8632 = vmatprep.mubr.bf16.mxu1 %v18600_v20 }
0x1231   :  { %v8067_v15 = vpop.f32.mrb[58].mxu1  ;;  %10760 = vmatpush3.bf16.msra.mxu0 %v12511_v12  ;;  %10842 = vmatpush3.bf16.msra.mxu1 %v12512_v31 }
0x1232   :  { %v8141_v4 = vadd.f32 1e-05, %v8120_v32  ;;  %v8121_v60 = vmul.f32 0.03125, %v8067_v15  ;;  %v12072_v35 = vpop.f32.mrb[59].mxu1 }
0x1234   :  { %13207 = vrsqrt.f32 %v8141_v4  ;;  %v8142_v54 = vadd.f32 1e-05, %v8121_v60 }
0x1236   :  { %v13204_v26 = vpop.eup %13203  ;;  %13209 = vrsqrt.f32 %v8142_v54  ;;  %v12513_v54 = vld [vmem:[%s18220_s8 + $0x170] sm:$0xff]  }
0x1237   :  { %v8181_v61 = vmul.f32 %v13204_v26, %v17732_v39  ;;  %v8072_v57 = vpop.f32.mrb[60].mxu1  ;;  %v12514_v26 = vld [vmem:[%s18220_s8 + $0x1f0] sm:$0xff]   ;;  %10761 = vmatprep.subr.bf16.mxu0 %v12513_v54 }
0x1238   :  { %v13206_v63 = vpop.eup %13205  ;;  %v8122_v59 = vmul.f32 0.03125, %v8072_v57  ;;  %v12075_v17 = vpop.f32.mrb[61].mxu1  ;;  %v12516_v57 = vld [vmem:[%s18220_s8 + $0x1b0] sm:$0xff]   ;;  %10843 = vmatprep.subr.bf16.mxu1 %v12514_v26 }
0x1239   :  { %v8182_v38 = vmul.f32 %v13206_v63, %v17735_v40  ;;  %v8075_v28 = vpop.f32.mrb[62].mxu1  ;;  %v8202_v52 = vmul.f32 %v17859_v14, %v8181_v61  ;;  %v12515_v61 = vld [vmem:[%s18220_s8 + $0x130] sm:$0xff]   ;;  %v12517_v63 = vld [vmem:[%s18220_s8 + $0x178] sm:$0xff]   ;;  %10844 = vmatpush3.bf16.msra.mxu1 %v12516_v57 }
0x123a   :  { %v8143_v33 = vadd.f32 1e-05, %v8122_v59  ;;  %v8123_v27 = vmul.f32 0.03125, %v8075_v28  ;;  %v12076_v10 = vpop.f32.mrb[63].mxu1  ;;  %v12518_v59 = vld [vmem:[%s18220_s8 + $0x1f8] sm:$0xff]   ;;  %10762 = vmatpush3.bf16.msra.mxu0 %v12515_v61 }
0x123b   :  { %v8203_v13 = vmul.f32 %v17859_v14, %v8182_v38  ;;  %10763 = vmatprep.subr.bf16.mxu0 %v12517_v63  ;;  %10845 = vmatprep.subr.bf16.mxu1 %v12518_v59 }
0x123c   :  { %13211 = vrsqrt.f32 %v8143_v33  ;;  %v8144_v18 = vadd.f32 1e-05, %v8123_v27  ;;  %v12519_v33 = vld [vmem:[%s18220_s8 + $0x138] sm:$0xff]  }
0x123d   :  { %v8252_v8 = vpack.c.bf16 %v8203_v13, %v8202_v52  ;;  %v12520_v27 = vld [vmem:[%s18220_s8 + $0x1b8] sm:$0xff]  }
0x123e   :  { %v13208_v46 = vpop.eup %13207  ;;  %13213 = vrsqrt.f32 %v8144_v18  ;;  %10764 = vmatpush3.bf16.msra.mxu0 %v12519_v33  ;;  %10846 = vmatpush3.bf16.msra.mxu1 %v12520_v27 }
0x123f   :  { %v8183_v45 = vmul.f32 %v13208_v46, %v17742_v34  ;;  %8492 = vmatmul.mubr.bf16.gmra.mrb[48].mxu0 %v8252_v8  ;;  %8633 = vmatmul.mubr.bf16.gmra.mrb[96].mxu1 %v8252_v8 }
0x1240   :  { %v13210_v55 = vpop.eup %13209  ;;  %8501 = vmatprep.mubr.bf16.mxu0 %v18600_v20  ;;  %8642 = vmatprep.mubr.bf16.mxu1 %v18600_v20 }
0x1241   :  { %v8184_v21 = vmul.f32 %v13210_v55, %v17747_v47  ;;  %v8204_v56 = vmul.f32 %v17859_v14, %v8183_v45 }
0x1243   :  { %v8205_v19 = vmul.f32 %v17859_v14, %v8184_v21 }
0x1245   :  { %v8253_v36 = vpack.c.bf16 %v8205_v19, %v8204_v56  ;;  %v18004_v19 = vld [vmem:[%s18223_s11] sm:$0xff]  }
0x1246   :  { %v13212_v43 = vpop.eup %13211  ;;  %12093 = vmatprep.subr.bf16.mxu0 %v18004_v19 }
0x1247   :  { %v8185_v48 = vmul.f32 %v13212_v43, %v17754_v44  ;;  %8502 = vmatmul.mubr.bf16.gmra.mrb[52].mxu0 %v8253_v36  ;;  %8643 = vmatmul.mubr.bf16.gmra.mrb[100].mxu1 %v8253_v36 }
0x1248   :  { %v13214_v2 = vpop.eup %13213  ;;  %8511 = vmatprep.mubr.bf16.mxu0 %v18600_v20  ;;  %8652 = vmatprep.mubr.bf16.mxu1 %v18600_v20 }
0x1249   :  { %v8186_v51 = vmul.f32 %v13214_v2, %v17759_v1  ;;  %v8206_v7 = vmul.f32 %v17859_v14, %v8185_v48 }
0x124b   :  { %v8207_v41 = vmul.f32 %v17859_v14, %v8186_v51 }
0x124d   :  { %v8254_v11 = vpack.c.bf16 %v8207_v41, %v8206_v7 }
0x124f   :  { %v8080_v58 = vpop.f32.mrb[64].mxu1  ;;  %8512 = vmatmul.mubr.bf16.gmra.mrb[56].mxu0 %v8254_v11  ;;  %8653 = vmatmul.mubr.bf16.gmra.mrb[104].mxu1 %v8254_v11 }
0x1250   :  { %v8124_v22 = vmul.f32 0.03125, %v8080_v58  ;;  %v12079_v30 = vpop.f32.mrb[65].mxu1  ;;  %8521 = vmatprep.mubr.bf16.mxu0 %v18600_v20  ;;  %8662 = vmatprep.mubr.bf16.mxu1 %v18600_v20 }
0x1251   :  { %v8083_v29 = vpop.f32.mrb[66].mxu1 }
0x1252   :  { %v8145_v3 = vadd.f32 1e-05, %v8124_v22  ;;  %v8125_v49 = vmul.f32 0.03125, %v8083_v29  ;;  %v12080_v24 = vpop.f32.mrb[67].mxu1 }
0x1254   :  { %13215 = vrsqrt.f32 %v8145_v3  ;;  %v8146_v42 = vadd.f32 1e-05, %v8125_v49 }
0x1256   :  { %13217 = vrsqrt.f32 %v8146_v42 }
0x1257   :  { %v8088_v6 = vpop.f32.mrb[68].mxu1 }
0x1258   :  { %v8126_v53 = vmul.f32 0.03125, %v8088_v6  ;;  %v12083_v32 = vpop.f32.mrb[69].mxu1 }
0x1259   :  { %v8091_v62 = vpop.f32.mrb[70].mxu1 }
0x125a   :  { %v8147_v15 = vadd.f32 1e-05, %v8126_v53  ;;  %v8127_v4 = vmul.f32 0.03125, %v8091_v62  ;;  %v12084_v60 = vpop.f32.mrb[71].mxu1 }
0x125c   :  { %13219 = vrsqrt.f32 %v8147_v15  ;;  %v8148_v35 = vadd.f32 1e-05, %v8127_v4 }
0x125e   :  { %v13216_v17 = vpop.eup %13215  ;;  %13221 = vrsqrt.f32 %v8148_v35 }
0x125f   :  { %v8187_v38 = vmul.f32 %v13216_v17, %v17768_v23  ;;  %v8096_v28 = vpop.f32.mrb[72].mxu1 }
0x1260   :  { %v13218_v10 = vpop.eup %13217  ;;  %v8128_v52 = vmul.f32 0.03125, %v8096_v28  ;;  %v12087_v13 = vpop.f32.mrb[73].mxu1 }
0x1261   :  { %v8188_v18 = vmul.f32 %v13218_v10, %v17771_v37  ;;  %v8099_v8 = vpop.f32.mrb[74].mxu1  ;;  %v8208_v55 = vmul.f32 %v17859_v14, %v8187_v38 }
0x1262   :  { %v8149_v23 = vadd.f32 1e-05, %v8128_v52  ;;  %v8129_v46 = vmul.f32 0.03125, %v8099_v8  ;;  %v12088_v45 = vpop.f32.mrb[75].mxu1 }
0x1263   :  { %v8209_v21 = vmul.f32 %v17859_v14, %v8188_v18 }
0x1264   :  { %13223 = vrsqrt.f32 %v8149_v23  ;;  %v8150_v56 = vadd.f32 1e-05, %v8129_v46 }
0x1265   :  { %v8255_v37 = vpack.c.bf16 %v8209_v21, %v8208_v55  ;;  %v18027_v55 = vld [vmem:[%s18223_s11 + $0x8] sm:$0xff]   ;;  %v18034_v21 = vld [vmem:[%s18223_s11 + $0x10] sm:$0xff]  }
0x1266   :  { %v13220_v36 = vpop.eup %13219  ;;  %13225 = vrsqrt.f32 %v8150_v56  ;;  %v18041_v56 = vld [vmem:[%s18223_s11 + $0x18] sm:$0xff]  }
0x1267   :  { %v8189_v43 = vmul.f32 %v13220_v36, %v17790_v0  ;;  %v8104_v48 = vpop.f32.mrb[76].mxu1  ;;  %8522 = vmatmul.mubr.bf16.gmra.mrb[60].mxu0 %v8255_v37  ;;  %8663 = vmatmul.mubr.bf16.gmra.mrb[108].mxu1 %v8255_v37 }
0x1268   :  { %v13222_v2 = vpop.eup %13221  ;;  %v8130_v51 = vmul.f32 0.03125, %v8104_v48  ;;  %v12091_v7 = vpop.f32.mrb[77].mxu1  ;;  %8531 = vmatprep.mubr.bf16.mxu0 %v18600_v20  ;;  %8672 = vmatprep.mubr.bf16.mxu1 %v18600_v20 }
0x1269   :  { %v8190_v41 = vmul.f32 %v13222_v2, %v17801_v5  ;;  %v8107_v11 = vpop.f32.mrb[78].mxu1  ;;  %v8210_v30 = vmul.f32 %v17859_v14, %v8189_v43  ;;  %v18048_v7 = vld [vmem:[%s18223_s11 + $0x20] sm:$0xff]  }
0x126a   :  { %v8151_v58 = vadd.f32 1e-05, %v8130_v51  ;;  %v12092_v22 = vpop.f32.mrb[79].mxu1 }
0x126b   :  { %v8211_v29 = vmul.f32 %v17859_v14, %v8190_v41 }
0x126c   :  { %13227 = vrsqrt.f32 %v8151_v58 }
0x126d   :  { %v8256_v0 = vpack.c.bf16 %v8211_v29, %v8210_v30 }
0x126e   :  { %v13224_v3 = vpop.eup %13223 }
0x126f   :  { %v8191_v49 = vmul.f32 %v13224_v3, %v17826_v50  ;;  %8532 = vmatmul.mubr.bf16.gmra.mrb[64].mxu0 %v8256_v0  ;;  %8673 = vmatmul.mubr.bf16.gmra.mrb[112].mxu1 %v8256_v0 }
0x1270   :  { %v13226_v24 = vpop.eup %13225  ;;  %8541 = vmatprep.mubr.bf16.mxu0 %v18600_v20  ;;  %8682 = vmatprep.mubr.bf16.mxu1 %v18600_v20 }
0x1271   :  { %v8192_v5 = vmul.f32 %v13226_v24, %v17837_v16  ;;  %v8212_v42 = vmul.f32 %v17859_v14, %v8191_v49 }
0x1273   :  { %v8213_v6 = vmul.f32 %v17859_v14, %v8192_v5 }
0x1275   :  { %v8257_v12 = vpack.c.bf16 %v8213_v6, %v8212_v42 }
0x1276   :  { %v13228_v31 = vpop.eup %13227 }
0x1277   :  { %v8193_v53 = vmul.f32 %v13228_v31, %v17850_v25  ;;  %8542 = vmatmul.mubr.bf16.gmra.mrb[68].mxu0 %v8257_v12  ;;  %8683 = vmatmul.mubr.bf16.gmra.mrb[116].mxu1 %v8257_v12  ;;  %v18055_v31 = vld [vmem:[%s18223_s11 + $0x28] sm:$0xff]  }
0x1278   :  { %8551 = vmatprep.mubr.bf16.mxu0 %v18600_v20  ;;  %8692 = vmatprep.mubr.bf16.mxu1 %v18600_v20 }
0x1279   :  { %v8214_v50 = vmul.f32 %v17859_v14, %v8193_v53 }
0x127b   :  { %v8258_v32 = vpack.c.bf16 %v8214_v50, %v8214_v50 }
0x127f   :  { %8552 = vmatmul.mubr.bf16.gmra.mrb[72].mxu0 %v8258_v32  ;;  %8693 = vmatmul.mubr.bf16.gmra.mrb[120].mxu1 %v8258_v32 }
0x12d3   :  { %v8453_v16 = vpop.f32.mrb[32].mxu0  ;;  %v8594_v62 = vpop.f32.mrb[80].mxu1 }
0x12d4   :  { %v8701_v15 = vmax.f32 %v8453_v16, 0.0  ;;  %v8703_v4 = vmax.f32 %v8594_v62, 0.0  ;;  %v8455_v60 = vpop.f32.mrb[33].mxu0  ;;  %v8596_v35 = vpop.f32.mrb[81].mxu1 }
0x12d5   :  { %v8702_v54 = vmax.f32 %v8455_v60, 0.0  ;;  %v8704_v26 = vmax.f32 %v8596_v35, 0.0  ;;  %v8457_v25 = vpop.f32.mrb[34].mxu0  ;;  %v8598_v61 = vpop.f32.mrb[82].mxu1 }
0x12d6   :  { %v8705_v57 = vmax.f32 %v8457_v25, 0.0  ;;  %v8707_v63 = vmax.f32 %v8598_v61, 0.0  ;;  %v8459_v59 = vpop.f32.mrb[35].mxu0  ;;  %v8600_v17 = vpop.f32.mrb[83].mxu1  ;;  %v8785_v14 = vmul.f32 %v8701_v15, %v8701_v15  ;;  %v8787_v28 = vmul.f32 %v8703_v4, %v8703_v4 }
0x12d7   :  { %v8706_v20 = vmax.f32 %v8459_v59, 0.0  ;;  %v8708_v38 = vmax.f32 %v8600_v17, 0.0  ;;  %v8786_v10 = vmul.f32 %v8702_v54, %v8702_v54  ;;  %v8788_v52 = vmul.f32 %v8704_v26, %v8704_v26 }
0x12d8   :  { %v8789_v33 = vmul.f32 %v8705_v57, %v8705_v57  ;;  %v8791_v27 = vmul.f32 %v8707_v63, %v8707_v63  ;;  %v18062_v63 = vld [vmem:[%s18223_s11 + $0x30] sm:$0xff]  }
0x12d9   :  { %v8790_v13 = vmul.f32 %v8706_v20, %v8706_v20  ;;  %v8792_v18 = vmul.f32 %v8708_v38, %v8708_v38 }
0x12da   :  { %v8934_v8 = vpack.c.bf16 %v8789_v33, %v8785_v14  ;;  %v8936_v23 = vpack.c.bf16 %v8791_v27, %v8787_v28 }
0x12db   :  { %v8935_v46 = vpack.c.bf16 %v8790_v13, %v8786_v10  ;;  %v8937_v45 = vpack.c.bf16 %v8792_v18, %v8788_v52 }
0x12dd   :  { %9202 = vmatprep.mubr.bf16.mxu0 %v8935_v46  ;;  %9308 = vmatprep.mubr.bf16.mxu1 %v8937_v45  ;;  %v18069_v46 = vld [vmem:[%s18223_s11 + $0x38] sm:$0xff]  }
0x12de   :  { %9203 = vmatmul.mubr.bf16.vlgmr.msra.gmra.mrb[76].mxu0 %v8934_v8  ;;  %9309 = vmatmul.mubr.bf16.vlgmr.msra.gmra.mrb[124].mxu1 %v8936_v23 }
0x12df   :  { %12094 = vmatpush3.bf16.msra.mxu0 %v18004_v19 }
0x12e0   :  { %12095 = vmatprep.subr.bf16.mxu0 %v18027_v55 }
0x12e3   :  { %12096 = vmatpush3.bf16.msra.mxu0 %v18027_v55 }
0x12e4   :  { %12097 = vmatprep.subr.bf16.mxu0 %v18034_v21 }
0x12e7   :  { %12098 = vmatpush3.bf16.msra.mxu0 %v18034_v21 }
0x12e8   :  { %12099 = vmatprep.subr.bf16.mxu0 %v18041_v56 }
0x12eb   :  { %v8463_v37 = vpop.f32.mrb[36].mxu0  ;;  %v8604_v36 = vpop.f32.mrb[84].mxu1  ;;  %12100 = vmatpush3.bf16.msra.mxu0 %v18041_v56 }
0x12ec   :  { %v8709_v43 = vmax.f32 %v8463_v37, 0.0  ;;  %v8711_v48 = vmax.f32 %v8604_v36, 0.0  ;;  %v8465_v2 = vpop.f32.mrb[37].mxu0  ;;  %v8606_v51 = vpop.f32.mrb[85].mxu1  ;;  %12101 = vmatprep.subr.bf16.mxu0 %v18048_v7 }
0x12ed   :  { %v8710_v41 = vmax.f32 %v8465_v2, 0.0  ;;  %v8712_v11 = vmax.f32 %v8606_v51, 0.0  ;;  %v8467_v58 = vpop.f32.mrb[38].mxu0  ;;  %v8608_v22 = vpop.f32.mrb[86].mxu1 }
0x12ee   :  { %v8713_v30 = vmax.f32 %v8467_v58, 0.0  ;;  %v8715_v29 = vmax.f32 %v8608_v22, 0.0  ;;  %v8469_v0 = vpop.f32.mrb[39].mxu0  ;;  %v8610_v3 = vpop.f32.mrb[87].mxu1  ;;  %v8793_v5 = vmul.f32 %v8709_v43, %v8709_v43  ;;  %v8795_v42 = vmul.f32 %v8711_v48, %v8711_v48 }
0x12ef   :  { %v8714_v49 = vmax.f32 %v8469_v0, 0.0  ;;  %v8716_v24 = vmax.f32 %v8610_v3, 0.0  ;;  %12102 = vmatpush3.bf16.msra.mxu0 %v18048_v7  ;;  %v8794_v53 = vmul.f32 %v8710_v41, %v8710_v41  ;;  %v8796_v50 = vmul.f32 %v8712_v11, %v8712_v11 }
0x12f0   :  { %v8797_v6 = vmul.f32 %v8713_v30, %v8713_v30  ;;  %v8799_v12 = vmul.f32 %v8715_v29, %v8715_v29  ;;  %12103 = vmatprep.subr.bf16.mxu0 %v18055_v31 }
0x12f1   :  { %v8798_v32 = vmul.f32 %v8714_v49, %v8714_v49  ;;  %v8800_v16 = vmul.f32 %v8716_v24, %v8716_v24 }
0x12f2   :  { %v8938_v62 = vpack.c.bf16 %v8797_v6, %v8793_v5  ;;  %v8940_v15 = vpack.c.bf16 %v8799_v12, %v8795_v42 }
0x12f3   :  { %v8939_v4 = vpack.c.bf16 %v8798_v32, %v8794_v53  ;;  %v8941_v60 = vpack.c.bf16 %v8800_v16, %v8796_v50  ;;  %v8473_v35 = vpop.f32.mrb[40].mxu0  ;;  %v8614_v54 = vpop.f32.mrb[88].mxu1  ;;  %12104 = vmatpush3.bf16.msra.mxu0 %v18055_v31 }
0x12f4   :  { %v8717_v26 = vmax.f32 %v8473_v35, 0.0  ;;  %v8719_v25 = vmax.f32 %v8614_v54, 0.0  ;;  %v8475_v61 = vpop.f32.mrb[41].mxu0  ;;  %v8616_v57 = vpop.f32.mrb[89].mxu1  ;;  %12105 = vmatprep.subr.bf16.mxu0 %v18062_v63 }
0x12f5   :  { %v8718_v59 = vmax.f32 %v8475_v61, 0.0  ;;  %v8720_v17 = vmax.f32 %v8616_v57, 0.0  ;;  %v8477_v20 = vpop.f32.mrb[42].mxu0  ;;  %v8618_v38 = vpop.f32.mrb[90].mxu1  ;;  %9208 = vmatprep.mubr.bf16.mxu0 %v8939_v4  ;;  %9314 = vmatprep.mubr.bf16.mxu1 %v8941_v60 }
0x12f6   :  { %v8721_v14 = vmax.f32 %v8477_v20, 0.0  ;;  %v8723_v28 = vmax.f32 %v8618_v38, 0.0  ;;  %v8479_v33 = vpop.f32.mrb[43].mxu0  ;;  %v8620_v27 = vpop.f32.mrb[91].mxu1  ;;  %9209 = vmatmul.mubr.bf16.gmra.mrb[80].mxu0 %v8938_v62  ;;  %9315 = vmatmul.mubr.bf16.gmra.mrb[128].mxu1 %v8940_v15  ;;  %v8801_v13 = vmul.f32 %v8717_v26, %v8717_v26  ;;  %v8803_v18 = vmul.f32 %v8719_v25, %v8719_v25 }
0x12f7   :  { %v8722_v10 = vmax.f32 %v8479_v33, 0.0  ;;  %v8724_v52 = vmax.f32 %v8620_v27, 0.0  ;;  %12106 = vmatpush3.bf16.msra.mxu0 %v18062_v63  ;;  %v8802_v45 = vmul.f32 %v8718_v59, %v8718_v59  ;;  %v8804_v37 = vmul.f32 %v8720_v17, %v8720_v17 }
0x12f8   :  { %v8805_v8 = vmul.f32 %v8721_v14, %v8721_v14  ;;  %v8807_v23 = vmul.f32 %v8723_v28, %v8723_v28  ;;  %12107 = vmatprep.subr.bf16.mxu0 %v18069_v46 }
0x12f9   :  { %v8806_v36 = vmul.f32 %v8722_v10, %v8722_v10  ;;  %v8808_v43 = vmul.f32 %v8724_v52, %v8724_v52 }
0x12fa   :  { %v8942_v48 = vpack.c.bf16 %v8805_v8, %v8801_v13  ;;  %v8944_v2 = vpack.c.bf16 %v8807_v23, %v8803_v18 }
0x12fb   :  { %v8943_v51 = vpack.c.bf16 %v8806_v36, %v8802_v45  ;;  %v8945_v41 = vpack.c.bf16 %v8808_v43, %v8804_v37  ;;  %12108 = vmatpush3.bf16.msra.mxu0 %v18069_v46 }
0x12fc   :  { %12117 = vmatprep.subr.bf16.mxu0 %v18004_v19 }
0x12fd   :  { %9214 = vmatprep.mubr.bf16.mxu0 %v8943_v51  ;;  %9320 = vmatprep.mubr.bf16.mxu1 %v8945_v41 }
0x12fe   :  { %9215 = vmatmul.mubr.bf16.gmra.mrb[84].mxu0 %v8942_v48  ;;  %9321 = vmatmul.mubr.bf16.gmra.mrb[132].mxu1 %v8944_v2 }
0x1302   :  { %v8483_v11 = vpop.f32.mrb[44].mxu0  ;;  %v8624_v58 = vpop.f32.mrb[92].mxu1 }
0x1303   :  { %v8725_v22 = vmax.f32 %v8483_v11, 0.0  ;;  %v8727_v30 = vmax.f32 %v8624_v58, 0.0  ;;  %v8485_v29 = vpop.f32.mrb[45].mxu0  ;;  %v8626_v0 = vpop.f32.mrb[93].mxu1 }
0x1304   :  { %v8726_v3 = vmax.f32 %v8485_v29, 0.0  ;;  %v8728_v49 = vmax.f32 %v8626_v0, 0.0  ;;  %v8487_v24 = vpop.f32.mrb[46].mxu0  ;;  %v8628_v5 = vpop.f32.mrb[94].mxu1 }
0x1305   :  { %v8729_v42 = vmax.f32 %v8487_v24, 0.0  ;;  %v8731_v6 = vmax.f32 %v8628_v5, 0.0  ;;  %v8489_v12 = vpop.f32.mrb[47].mxu0  ;;  %v8630_v53 = vpop.f32.mrb[95].mxu1  ;;  %v8809_v16 = vmul.f32 %v8725_v22, %v8725_v22  ;;  %v8811_v62 = vmul.f32 %v8727_v30, %v8727_v30 }
0x1306   :  { %v8730_v50 = vmax.f32 %v8489_v12, 0.0  ;;  %v8732_v32 = vmax.f32 %v8630_v53, 0.0  ;;  %v8810_v60 = vmul.f32 %v8726_v3, %v8726_v3  ;;  %v8812_v35 = vmul.f32 %v8728_v49, %v8728_v49 }
0x1307   :  { %v8813_v15 = vmul.f32 %v8729_v42, %v8729_v42  ;;  %v8815_v4 = vmul.f32 %v8731_v6, %v8731_v6 }
0x1308   :  { %v8814_v54 = vmul.f32 %v8730_v50, %v8730_v50  ;;  %v8816_v26 = vmul.f32 %v8732_v32, %v8732_v32 }
0x1309   :  { %v8946_v25 = vpack.c.bf16 %v8813_v15, %v8809_v16  ;;  %v8948_v61 = vpack.c.bf16 %v8815_v4, %v8811_v62 }
0x130a   :  { %v8947_v57 = vpack.c.bf16 %v8814_v54, %v8810_v60  ;;  %v8949_v59 = vpack.c.bf16 %v8816_v26, %v8812_v35 }
0x130c   :  { %9220 = vmatprep.mubr.bf16.mxu0 %v8947_v57  ;;  %9326 = vmatprep.mubr.bf16.mxu1 %v8949_v59 }
0x130d   :  { %9221 = vmatmul.mubr.bf16.gmra.mrb[88].mxu0 %v8946_v25  ;;  %9327 = vmatmul.mubr.bf16.gmra.mrb[136].mxu1 %v8948_v61 }
0x1312   :  { %v8493_v17 = vpop.f32.mrb[48].mxu0  ;;  %v8634_v20 = vpop.f32.mrb[96].mxu1 }
0x1313   :  { %v8733_v38 = vmax.f32 %v8493_v17, 0.0  ;;  %v8735_v14 = vmax.f32 %v8634_v20, 0.0  ;;  %v8495_v28 = vpop.f32.mrb[49].mxu0  ;;  %v8636_v33 = vpop.f32.mrb[97].mxu1 }
0x1314   :  { %v8734_v27 = vmax.f32 %v8495_v28, 0.0  ;;  %v8736_v10 = vmax.f32 %v8636_v33, 0.0  ;;  %v8497_v52 = vpop.f32.mrb[50].mxu0  ;;  %v8638_v13 = vpop.f32.mrb[98].mxu1 }
0x1315   :  { %v8737_v18 = vmax.f32 %v8497_v52, 0.0  ;;  %v8739_v8 = vmax.f32 %v8638_v13, 0.0  ;;  %v8499_v23 = vpop.f32.mrb[51].mxu0  ;;  %v8640_v45 = vpop.f32.mrb[99].mxu1  ;;  %v8817_v43 = vmul.f32 %v8733_v38, %v8733_v38  ;;  %v8819_v48 = vmul.f32 %v8735_v14, %v8735_v14 }
0x1316   :  { %v8738_v37 = vmax.f32 %v8499_v23, 0.0  ;;  %v8740_v36 = vmax.f32 %v8640_v45, 0.0  ;;  %v8818_v41 = vmul.f32 %v8734_v27, %v8734_v27  ;;  %v8820_v11 = vmul.f32 %v8736_v10, %v8736_v10 }
0x1317   :  { %v8821_v2 = vmul.f32 %v8737_v18, %v8737_v18  ;;  %v8823_v51 = vmul.f32 %v8739_v8, %v8739_v8 }
0x1318   :  { %v8822_v58 = vmul.f32 %v8738_v37, %v8738_v37  ;;  %v8824_v22 = vmul.f32 %v8740_v36, %v8740_v36 }
0x1319   :  { %v8950_v30 = vpack.c.bf16 %v8821_v2, %v8817_v43  ;;  %v8952_v29 = vpack.c.bf16 %v8823_v51, %v8819_v48 }
0x131a   :  { %v8951_v0 = vpack.c.bf16 %v8822_v58, %v8818_v41  ;;  %v8953_v3 = vpack.c.bf16 %v8824_v22, %v8820_v11  ;;  %v8503_v49 = vpop.f32.mrb[52].mxu0  ;;  %v8644_v24 = vpop.f32.mrb[100].mxu1 }
0x131b   :  { %v8741_v5 = vmax.f32 %v8503_v49, 0.0  ;;  %v8743_v42 = vmax.f32 %v8644_v24, 0.0  ;;  %v8505_v6 = vpop.f32.mrb[53].mxu0  ;;  %v8646_v12 = vpop.f32.mrb[101].mxu1 }
0x131c   :  { %v8742_v53 = vmax.f32 %v8505_v6, 0.0  ;;  %v8744_v50 = vmax.f32 %v8646_v12, 0.0  ;;  %v8507_v32 = vpop.f32.mrb[54].mxu0  ;;  %v8648_v16 = vpop.f32.mrb[102].mxu1  ;;  %9227 = vmatprep.mubr.bf16.mxu0 %v8951_v0  ;;  %9333 = vmatprep.mubr.bf16.mxu1 %v8953_v3 }
0x131d   :  { %v8745_v62 = vmax.f32 %v8507_v32, 0.0  ;;  %v8747_v15 = vmax.f32 %v8648_v16, 0.0  ;;  %v8509_v4 = vpop.f32.mrb[55].mxu0  ;;  %v8650_v60 = vpop.f32.mrb[103].mxu1  ;;  %9228 = vmatmul.mubr.bf16.gmra.mrb[92].mxu0 %v8950_v30  ;;  %9334 = vmatmul.mubr.bf16.gmra.mrb[140].mxu1 %v8952_v29  ;;  %v8825_v26 = vmul.f32 %v8741_v5, %v8741_v5  ;;  %v8827_v25 = vmul.f32 %v8743_v42, %v8743_v42 }
0x131e   :  { %v8746_v35 = vmax.f32 %v8509_v4, 0.0  ;;  %v8748_v54 = vmax.f32 %v8650_v60, 0.0  ;;  %v8826_v59 = vmul.f32 %v8742_v53, %v8742_v53  ;;  %v8828_v17 = vmul.f32 %v8744_v50, %v8744_v50 }
0x131f   :  { %v8829_v61 = vmul.f32 %v8745_v62, %v8745_v62  ;;  %v8831_v57 = vmul.f32 %v8747_v15, %v8747_v15 }
0x1320   :  { %v8830_v20 = vmul.f32 %v8746_v35, %v8746_v35  ;;  %v8832_v38 = vmul.f32 %v8748_v54, %v8748_v54 }
0x1321   :  { %v8954_v14 = vpack.c.bf16 %v8829_v61, %v8825_v26  ;;  %v8956_v28 = vpack.c.bf16 %v8831_v57, %v8827_v25 }
0x1322   :  { %v8955_v33 = vpack.c.bf16 %v8830_v20, %v8826_v59  ;;  %v8957_v27 = vpack.c.bf16 %v8832_v38, %v8828_v17  ;;  %v8513_v10 = vpop.f32.mrb[56].mxu0  ;;  %v8654_v52 = vpop.f32.mrb[104].mxu1 }
0x1323   :  { %v8749_v13 = vmax.f32 %v8513_v10, 0.0  ;;  %v8751_v18 = vmax.f32 %v8654_v52, 0.0  ;;  %v8515_v8 = vpop.f32.mrb[57].mxu0  ;;  %v8656_v23 = vpop.f32.mrb[105].mxu1 }
0x1324   :  { %v8750_v45 = vmax.f32 %v8515_v8, 0.0  ;;  %v8752_v37 = vmax.f32 %v8656_v23, 0.0  ;;  %v8517_v36 = vpop.f32.mrb[58].mxu0  ;;  %v8658_v43 = vpop.f32.mrb[106].mxu1  ;;  %9235 = vmatprep.mubr.bf16.mxu0 %v8955_v33  ;;  %9341 = vmatprep.mubr.bf16.mxu1 %v8957_v27 }
0x1325   :  { %v8753_v48 = vmax.f32 %v8517_v36, 0.0  ;;  %v8755_v2 = vmax.f32 %v8658_v43, 0.0  ;;  %v8519_v51 = vpop.f32.mrb[59].mxu0  ;;  %v8660_v41 = vpop.f32.mrb[107].mxu1  ;;  %9236 = vmatmul.mubr.bf16.gmra.mrb[96].mxu0 %v8954_v14  ;;  %9342 = vmatmul.mubr.bf16.gmra.mrb[144].mxu1 %v8956_v28  ;;  %v8833_v22 = vmul.f32 %v8749_v13, %v8749_v13  ;;  %v8835_v30 = vmul.f32 %v8751_v18, %v8751_v18 }
0x1326   :  { %v8754_v11 = vmax.f32 %v8519_v51, 0.0  ;;  %v8756_v58 = vmax.f32 %v8660_v41, 0.0  ;;  %v8834_v3 = vmul.f32 %v8750_v45, %v8750_v45  ;;  %v8836_v49 = vmul.f32 %v8752_v37, %v8752_v37 }
0x1327   :  { %v8837_v29 = vmul.f32 %v8753_v48, %v8753_v48  ;;  %v8839_v0 = vmul.f32 %v8755_v2, %v8755_v2 }
0x1328   :  { %v8838_v24 = vmul.f32 %v8754_v11, %v8754_v11  ;;  %v8840_v5 = vmul.f32 %v8756_v58, %v8756_v58 }
0x1329   :  { %v8958_v42 = vpack.c.bf16 %v8837_v29, %v8833_v22  ;;  %v8960_v6 = vpack.c.bf16 %v8839_v0, %v8835_v30 }
0x132a   :  { %v8959_v12 = vpack.c.bf16 %v8838_v24, %v8834_v3  ;;  %v8961_v53 = vpack.c.bf16 %v8840_v5, %v8836_v49 }
0x132c   :  { %9243 = vmatprep.mubr.bf16.mxu0 %v8959_v12  ;;  %9349 = vmatprep.mubr.bf16.mxu1 %v8961_v53 }
0x132d   :  { %9244 = vmatmul.mubr.bf16.gmra.mrb[100].mxu0 %v8958_v42  ;;  %9350 = vmatmul.mubr.bf16.gmra.mrb[148].mxu1 %v8960_v6 }
0x133a   :  { %v8523_v50 = vpop.f32.mrb[60].mxu0  ;;  %v8664_v32 = vpop.f32.mrb[108].mxu1 }
0x133b   :  { %v8757_v16 = vmax.f32 %v8523_v50, 0.0  ;;  %v8759_v62 = vmax.f32 %v8664_v32, 0.0  ;;  %v8525_v15 = vpop.f32.mrb[61].mxu0  ;;  %v8666_v4 = vpop.f32.mrb[109].mxu1 }
0x133c   :  { %v8758_v60 = vmax.f32 %v8525_v15, 0.0  ;;  %v8760_v35 = vmax.f32 %v8666_v4, 0.0  ;;  %v8527_v54 = vpop.f32.mrb[62].mxu0  ;;  %v8668_v26 = vpop.f32.mrb[110].mxu1 }
0x133d   :  { %v8761_v25 = vmax.f32 %v8527_v54, 0.0  ;;  %v8763_v61 = vmax.f32 %v8668_v26, 0.0  ;;  %v8529_v57 = vpop.f32.mrb[63].mxu0  ;;  %v8670_v59 = vpop.f32.mrb[111].mxu1  ;;  %v8841_v38 = vmul.f32 %v8757_v16, %v8757_v16  ;;  %v8843_v14 = vmul.f32 %v8759_v62, %v8759_v62 }
0x133e   :  { %v8762_v17 = vmax.f32 %v8529_v57, 0.0  ;;  %v8764_v20 = vmax.f32 %v8670_v59, 0.0  ;;  %v8842_v27 = vmul.f32 %v8758_v60, %v8758_v60  ;;  %v8844_v10 = vmul.f32 %v8760_v35, %v8760_v35 }
0x133f   :  { %v8845_v28 = vmul.f32 %v8761_v25, %v8761_v25  ;;  %v8847_v33 = vmul.f32 %v8763_v61, %v8763_v61 }
0x1340   :  { %v8846_v52 = vmul.f32 %v8762_v17, %v8762_v17  ;;  %v8848_v13 = vmul.f32 %v8764_v20, %v8764_v20 }
0x1341   :  { %v8962_v18 = vpack.c.bf16 %v8845_v28, %v8841_v38  ;;  %v8964_v8 = vpack.c.bf16 %v8847_v33, %v8843_v14 }
0x1342   :  { %v8963_v23 = vpack.c.bf16 %v8846_v52, %v8842_v27  ;;  %v8965_v45 = vpack.c.bf16 %v8848_v13, %v8844_v10  ;;  %v8533_v37 = vpop.f32.mrb[64].mxu0  ;;  %v8674_v36 = vpop.f32.mrb[112].mxu1 }
0x1343   :  { %v8765_v43 = vmax.f32 %v8533_v37, 0.0  ;;  %v8767_v48 = vmax.f32 %v8674_v36, 0.0  ;;  %v8535_v2 = vpop.f32.mrb[65].mxu0  ;;  %v8676_v51 = vpop.f32.mrb[113].mxu1 }
0x1344   :  { %v8766_v41 = vmax.f32 %v8535_v2, 0.0  ;;  %v8768_v11 = vmax.f32 %v8676_v51, 0.0  ;;  %v8537_v58 = vpop.f32.mrb[66].mxu0  ;;  %v8678_v22 = vpop.f32.mrb[114].mxu1  ;;  %9251 = vmatprep.mubr.bf16.mxu0 %v8963_v23  ;;  %9357 = vmatprep.mubr.bf16.mxu1 %v8965_v45 }
0x1345   :  { %v8769_v30 = vmax.f32 %v8537_v58, 0.0  ;;  %v8771_v29 = vmax.f32 %v8678_v22, 0.0  ;;  %v8539_v0 = vpop.f32.mrb[67].mxu0  ;;  %v8680_v3 = vpop.f32.mrb[115].mxu1  ;;  %9252 = vmatmul.mubr.bf16.gmra.mrb[104].mxu0 %v8962_v18  ;;  %9358 = vmatmul.mubr.bf16.gmra.mrb[152].mxu1 %v8964_v8  ;;  %v8849_v5 = vmul.f32 %v8765_v43, %v8765_v43  ;;  %v8851_v42 = vmul.f32 %v8767_v48, %v8767_v48 }
0x1346   :  { %v8770_v49 = vmax.f32 %v8539_v0, 0.0  ;;  %v8772_v24 = vmax.f32 %v8680_v3, 0.0  ;;  %v8850_v53 = vmul.f32 %v8766_v41, %v8766_v41  ;;  %v8852_v50 = vmul.f32 %v8768_v11, %v8768_v11 }
0x1347   :  { %v8853_v6 = vmul.f32 %v8769_v30, %v8769_v30  ;;  %v8855_v12 = vmul.f32 %v8771_v29, %v8771_v29 }
0x1348   :  { %v8854_v32 = vmul.f32 %v8770_v49, %v8770_v49  ;;  %v8856_v16 = vmul.f32 %v8772_v24, %v8772_v24 }
0x1349   :  { %v8966_v62 = vpack.c.bf16 %v8853_v6, %v8849_v5  ;;  %v8968_v15 = vpack.c.bf16 %v8855_v12, %v8851_v42 }
0x134a   :  { %v8967_v4 = vpack.c.bf16 %v8854_v32, %v8850_v53  ;;  %v8969_v60 = vpack.c.bf16 %v8856_v16, %v8852_v50  ;;  %v8543_v35 = vpop.f32.mrb[68].mxu0  ;;  %v8684_v54 = vpop.f32.mrb[116].mxu1 }
0x134b   :  { %v8773_v26 = vmax.f32 %v8543_v35, 0.0  ;;  %v8775_v25 = vmax.f32 %v8684_v54, 0.0  ;;  %v8545_v61 = vpop.f32.mrb[69].mxu0  ;;  %v8686_v57 = vpop.f32.mrb[117].mxu1 }
0x134c   :  { %v8774_v59 = vmax.f32 %v8545_v61, 0.0  ;;  %v8776_v17 = vmax.f32 %v8686_v57, 0.0  ;;  %v8547_v20 = vpop.f32.mrb[70].mxu0  ;;  %v8688_v38 = vpop.f32.mrb[118].mxu1  ;;  %9257 = vmatprep.mubr.bf16.mxu0 %v8967_v4  ;;  %9363 = vmatprep.mubr.bf16.mxu1 %v8969_v60 }
0x134d   :  { %v8777_v14 = vmax.f32 %v8547_v20, 0.0  ;;  %v8779_v28 = vmax.f32 %v8688_v38, 0.0  ;;  %v8549_v33 = vpop.f32.mrb[71].mxu0  ;;  %v8690_v27 = vpop.f32.mrb[119].mxu1  ;;  %9258 = vmatmul.mubr.bf16.gmra.mrb[108].mxu0 %v8966_v62  ;;  %9364 = vmatmul.mubr.bf16.gmra.mrb[156].mxu1 %v8968_v15  ;;  %v8857_v13 = vmul.f32 %v8773_v26, %v8773_v26  ;;  %v8859_v18 = vmul.f32 %v8775_v25, %v8775_v25 }
0x134e   :  { %v8778_v10 = vmax.f32 %v8549_v33, 0.0  ;;  %v8780_v52 = vmax.f32 %v8690_v27, 0.0  ;;  %v8858_v45 = vmul.f32 %v8774_v59, %v8774_v59  ;;  %v8860_v37 = vmul.f32 %v8776_v17, %v8776_v17 }
0x134f   :  { %v8861_v8 = vmul.f32 %v8777_v14, %v8777_v14  ;;  %v8863_v23 = vmul.f32 %v8779_v28, %v8779_v28 }
0x1350   :  { %v8862_v36 = vmul.f32 %v8778_v10, %v8778_v10  ;;  %v8864_v43 = vmul.f32 %v8780_v52, %v8780_v52 }
0x1351   :  { %v8970_v48 = vpack.c.bf16 %v8861_v8, %v8857_v13  ;;  %v8972_v2 = vpack.c.bf16 %v8863_v23, %v8859_v18 }
0x1352   :  { %v8971_v51 = vpack.c.bf16 %v8862_v36, %v8858_v45  ;;  %v8973_v41 = vpack.c.bf16 %v8864_v43, %v8860_v37  ;;  %v8553_v11 = vpop.f32.mrb[72].mxu0  ;;  %v8694_v58 = vpop.f32.mrb[120].mxu1 }
0x1353   :  { %v8781_v22 = vmax.f32 %v8553_v11, 0.0  ;;  %v8783_v30 = vmax.f32 %v8694_v58, 0.0  ;;  %v8555_v29 = vpop.f32.mrb[73].mxu0  ;;  %v8696_v0 = vpop.f32.mrb[121].mxu1 }
0x1354   :  { %v8782_v3 = vmax.f32 %v8555_v29, 0.0  ;;  %v8784_v49 = vmax.f32 %v8696_v0, 0.0  ;;  %v8557_v24 = vpop.f32.mrb[74].mxu0  ;;  %v8698_v5 = vpop.f32.mrb[122].mxu1  ;;  %9263 = vmatprep.mubr.bf16.mxu0 %v8971_v51  ;;  %9369 = vmatprep.mubr.bf16.mxu1 %v8973_v41 }
0x1355   :  { %v8558_v42 = vpop.f32.mrb[75].mxu0  ;;  %v8699_v6 = vpop.f32.mrb[123].mxu1  ;;  %9264 = vmatmul.mubr.bf16.gmra.mrb[112].mxu0 %v8970_v48  ;;  %9370 = vmatmul.mubr.bf16.gmra.mrb[160].mxu1 %v8972_v2  ;;  %v8865_v50 = vmul.f32 %v8781_v22, %v8781_v22  ;;  %v8867_v32 = vmul.f32 %v8783_v30, %v8783_v30 }
0x1356   :  { %v8866_v12 = vmul.f32 %v8782_v3, %v8782_v3  ;;  %v8868_v53 = vmul.f32 %v8784_v49, %v8784_v49 }
0x1357   :  { %v8974_v15 = vpack.c.bf16 %v8865_v50, %v8865_v50  ;;  %v8976_v4 = vpack.c.bf16 %v8867_v32, %v8867_v32 }
0x1358   :  { %v8975_v16 = vpack.c.bf16 %v8866_v12, %v8866_v12  ;;  %v8977_v62 = vpack.c.bf16 %v8868_v53, %v8868_v53 }
0x135a   :  { %9269 = vmatprep.mubr.bf16.mxu0 %v8975_v16  ;;  %9375 = vmatprep.mubr.bf16.mxu1 %v8977_v62 }
0x135d   :  { %9270 = vmatmul.mubr.bf16.gmra.mrb[116].mxu0 %v8974_v15  ;;  %9376 = vmatmul.mubr.bf16.gmra.mrb[164].mxu1 %v8976_v4 }
0x13b1   :  { %v10765_v60 = vpop.f32.mrb[76].mxu0  ;;  %v10847_v35 = vpop.f32.mrb[124].mxu1 }
0x13b2   :  { %v10766_v54 = vpop.f32.mrb[77].mxu0  ;;  %v10848_v26 = vpop.f32.mrb[125].mxu1 }
0x13b3   :  { %v10768_v25 = vpop.f32.mrb[78].mxu0  ;;  %v10850_v61 = vpop.f32.mrb[126].mxu1 }
0x13b4   :  { %v10769_v57 = vpop.f32.mrb[79].mxu0  ;;  %v10851_v59 = vpop.f32.mrb[127].mxu1 }
0x13c9   :  { %v10771_v17 = vpop.f32.mrb[80].mxu0  ;;  %v10853_v20 = vpop.f32.mrb[128].mxu1 }
0x13ca   :  { %v10772_v38 = vpop.f32.mrb[81].mxu0  ;;  %v10854_v14 = vpop.f32.mrb[129].mxu1 }
0x13cb   :  { %v10774_v28 = vpop.f32.mrb[82].mxu0  ;;  %v10856_v33 = vpop.f32.mrb[130].mxu1 }
0x13cc   :  { %v10775_v27 = vpop.f32.mrb[83].mxu0  ;;  %v10857_v10 = vpop.f32.mrb[131].mxu1 }
0x13d1   :  { %v10777_v52 = vpop.f32.mrb[84].mxu0  ;;  %v10859_v13 = vpop.f32.mrb[132].mxu1 }
0x13d2   :  { %v10778_v18 = vpop.f32.mrb[85].mxu0  ;;  %v10860_v8 = vpop.f32.mrb[133].mxu1 }
0x13d3   :  { %v10780_v23 = vpop.f32.mrb[86].mxu0  ;;  %v10862_v45 = vpop.f32.mrb[134].mxu1 }
0x13d4   :  { %v10781_v37 = vpop.f32.mrb[87].mxu0  ;;  %v10863_v36 = vpop.f32.mrb[135].mxu1 }
0x13e0   :  { %v10783_v43 = vpop.f32.mrb[88].mxu0  ;;  %v10865_v48 = vpop.f32.mrb[136].mxu1 }
0x13e1   :  { %v10784_v2 = vpop.f32.mrb[89].mxu0  ;;  %v10866_v51 = vpop.f32.mrb[137].mxu1 }
0x13e2   :  { %v10786_v41 = vpop.f32.mrb[90].mxu0  ;;  %v10868_v11 = vpop.f32.mrb[138].mxu1 }
0x13e3   :  { %v10787_v58 = vpop.f32.mrb[91].mxu0  ;;  %v10869_v22 = vpop.f32.mrb[139].mxu1 }
0x13e4   :  { %v10788_v30 = vadd.f32 %v10787_v58, %v10786_v41  ;;  %v10870_v29 = vadd.f32 %v10869_v22, %v10868_v11 }
0x13e6   :  { %v9331_v0 = vadd.f32 %v10870_v29, %v10788_v30 }
0x13e8   :  { %v18075_v4 = vadd.f32 %v9331_v0, %v17723_v9 }
0x13f0   :  { %v10789_v3 = vpop.f32.mrb[92].mxu0  ;;  %v10871_v49 = vpop.f32.mrb[140].mxu1 }
0x13f1   :  { %v10790_v24 = vpop.f32.mrb[93].mxu0  ;;  %v10872_v5 = vpop.f32.mrb[141].mxu1 }
0x13f2   :  { %v10791_v42 = vadd.f32 %v10790_v24, %v10789_v3  ;;  %v10873_v6 = vadd.f32 %v10872_v5, %v10871_v49  ;;  %v10792_v12 = vpop.f32.mrb[94].mxu0  ;;  %v10874_v53 = vpop.f32.mrb[142].mxu1 }
0x13f3   :  { %v10793_v50 = vpop.f32.mrb[95].mxu0  ;;  %v10875_v32 = vpop.f32.mrb[143].mxu1 }
0x13f4   :  { %v9336_v16 = vadd.f32 %v10873_v6, %v10791_v42  ;;  %v10794_v62 = vadd.f32 %v10793_v50, %v10792_v12  ;;  %v10876_v15 = vadd.f32 %v10875_v32, %v10874_v53 }
0x13f6   :  { %v18078_v60 = vadd.f32 %v9336_v16, %v17732_v39  ;;  %v9339_v35 = vadd.f32 %v10876_v15, %v10794_v62 }
0x13f8   :  { %v10795_v54 = vpop.f32.mrb[96].mxu0  ;;  %v10877_v26 = vpop.f32.mrb[144].mxu1  ;;  %v9389_v25 = vpack.c.bf16 %v18078_v60, %v18075_v4  ;;  %v18083_v39 = vadd.f32 %v9339_v35, %v17735_v40 }
0x13f9   :  { %v10796_v61 = vpop.f32.mrb[97].mxu0  ;;  %v10878_v57 = vpop.f32.mrb[145].mxu1 }
0x13fa   :  { %v10797_v59 = vadd.f32 %v10796_v61, %v10795_v54  ;;  %v10879_v17 = vadd.f32 %v10878_v57, %v10877_v26  ;;  %v10798_v20 = vpop.f32.mrb[98].mxu0  ;;  %v10880_v38 = vpop.f32.mrb[146].mxu1  ;;  %12109 = vmatprep.mubr.bf16.mxu0 %v9389_v25 }
0x13fb   :  { %v10799_v14 = vpop.f32.mrb[99].mxu0  ;;  %v10881_v28 = vpop.f32.mrb[147].mxu1 }
0x13fc   :  { %v9344_v9 = vadd.f32 %v10879_v17, %v10797_v59  ;;  %v10800_v33 = vadd.f32 %v10799_v14, %v10798_v20  ;;  %v10882_v27 = vadd.f32 %v10881_v28, %v10880_v38  ;;  %v12521_v20 = vld [vmem:[%s18230_s18] sm:$0xff]  }
0x13fe   :  { %v18086_v10 = vadd.f32 %v9344_v9, %v17742_v34  ;;  %v9347_v52 = vadd.f32 %v10882_v27, %v10800_v33 }
0x1400   :  { %v9390_v13 = vpack.c.bf16 %v18086_v10, %v18083_v39  ;;  %v10801_v18 = vpop.f32.mrb[100].mxu0  ;;  %v10883_v8 = vpop.f32.mrb[148].mxu1  ;;  %v18093_v11 = vadd.f32 %v9347_v52, %v17747_v47 }
0x1401   :  { %v10802_v23 = vpop.f32.mrb[101].mxu0  ;;  %v10884_v45 = vpop.f32.mrb[149].mxu1 }
0x1402   :  { %v10803_v37 = vadd.f32 %v10802_v23, %v10801_v18  ;;  %v10885_v36 = vadd.f32 %v10884_v45, %v10883_v8  ;;  %v10804_v43 = vpop.f32.mrb[102].mxu0  ;;  %v10886_v48 = vpop.f32.mrb[150].mxu1  ;;  %12110 = vmatmul.mubr.bf16.vlgmr.msra.gmra.mrb[120].mxu0 %v9390_v13 }
0x1403   :  { %v10805_v2 = vpop.f32.mrb[103].mxu0  ;;  %v10887_v51 = vpop.f32.mrb[151].mxu1  ;;  %12118 = vmatpush3.bf16.msra.mxu0 %v18004_v19 }
0x1404   :  { %v9352_v40 = vadd.f32 %v10885_v36, %v10803_v37  ;;  %v10806_v34 = vadd.f32 %v10805_v2, %v10804_v43  ;;  %v10888_v41 = vadd.f32 %v10887_v51, %v10886_v48  ;;  %12119 = vmatprep.subr.bf16.mxu0 %v18027_v55 }
0x1406   :  { %v18096_v58 = vadd.f32 %v9352_v40, %v17754_v44  ;;  %v9355_v22 = vadd.f32 %v10888_v41, %v10806_v34 }
0x1407   :  { %12120 = vmatpush3.bf16.msra.mxu0 %v18027_v55 }
0x1408   :  { %v18100_v30 = vadd.f32 %v9355_v22, %v17759_v1  ;;  %v9391_v19 = vpack.c.bf16 %v18096_v58, %v18093_v11  ;;  %12121 = vmatprep.subr.bf16.mxu0 %v18034_v21 }
0x140a   :  { %v9392_v29 = vpack.c.bf16 %v18100_v30, %v18100_v30  ;;  %12113 = vmatprep.mubr.bf16.mxu0 %v9391_v19 }
0x140b   :  { %12122 = vmatpush3.bf16.msra.mxu0 %v18034_v21 }
0x140c   :  { %12114 = vmatmul.mubr.bf16.gmra.mrb[124].mxu0 %v9392_v29  ;;  %12123 = vmatprep.subr.bf16.mxu0 %v18041_v56 }
0x140f   :  { %12124 = vmatpush3.bf16.msra.mxu0 %v18041_v56 }
0x1410   :  { %12125 = vmatprep.subr.bf16.mxu0 %v18048_v7 }
0x1413   :  { %12126 = vmatpush3.bf16.msra.mxu0 %v18048_v7 }
0x1414   :  { %12127 = vmatprep.subr.bf16.mxu0 %v18055_v31 }
0x1417   :  { %12128 = vmatpush3.bf16.msra.mxu0 %v18055_v31 }
0x1418   :  { %v10807_v47 = vpop.f32.mrb[104].mxu0  ;;  %v10889_v44 = vpop.f32.mrb[152].mxu1  ;;  %12129 = vmatprep.subr.bf16.mxu0 %v18062_v63 }
0x1419   :  { %v10808_v1 = vpop.f32.mrb[105].mxu0  ;;  %v10890_v55 = vpop.f32.mrb[153].mxu1 }
0x141a   :  { %v10810_v21 = vpop.f32.mrb[106].mxu0  ;;  %v10892_v0 = vpop.f32.mrb[154].mxu1 }
0x141b   :  { %v10811_v3 = vpop.f32.mrb[107].mxu0  ;;  %v10893_v49 = vpop.f32.mrb[155].mxu1  ;;  %12130 = vmatpush3.bf16.msra.mxu0 %v18062_v63  ;;  %v12524_v21 = vld [vmem:[%s18230_s18 + $0x18] sm:$0xff]   ;;  %v12525_v0 = vld [vmem:[%s18230_s18 + $0x20] sm:$0xff]  }
0x141c   :  { %12131 = vmatprep.subr.bf16.mxu0 %v18069_v46  ;;  %v12526_v3 = vld [vmem:[%s18230_s18 + $0x28] sm:$0xff]   ;;  %v12527_v49 = vld [vmem:[%s18230_s18 + $0x30] sm:$0xff]  }
0x141f   :  { %12132 = vmatpush3.bf16.msra.mxu0 %v18069_v46 }
0x1420   :  { %v10813_v56 = vpop.f32.mrb[108].mxu0  ;;  %v10895_v7 = vpop.f32.mrb[156].mxu1  ;;  %12141 = vmatprep.subr.bf16.mxu0 %v12521_v20 }
0x1421   :  { %v10814_v24 = vpop.f32.mrb[109].mxu0  ;;  %v10896_v5 = vpop.f32.mrb[157].mxu1  ;;  %v12528_v56 = vld [vmem:[%s18230_s18 + $0x38] sm:$0xff]  }
0x1422   :  { %v10816_v42 = vpop.f32.mrb[110].mxu0  ;;  %v10898_v31 = vpop.f32.mrb[158].mxu1 }
0x1423   :  { %v10817_v6 = vpop.f32.mrb[111].mxu0  ;;  %v10899_v12 = vpop.f32.mrb[159].mxu1 }
0x1428   :  { %v10819_v53 = vpop.f32.mrb[112].mxu0  ;;  %v10901_v50 = vpop.f32.mrb[160].mxu1 }
0x1429   :  { %v10820_v32 = vpop.f32.mrb[113].mxu0  ;;  %v10902_v16 = vpop.f32.mrb[161].mxu1 }
0x142a   :  { %v10822_v62 = vpop.f32.mrb[114].mxu0  ;;  %v10904_v15 = vpop.f32.mrb[162].mxu1 }
0x142b   :  { %v10823_v35 = vpop.f32.mrb[115].mxu0  ;;  %v10905_v63 = vpop.f32.mrb[163].mxu1 }
0x1430   :  { %v10825_v54 = vpop.f32.mrb[116].mxu0  ;;  %v10907_v26 = vpop.f32.mrb[164].mxu1 }
0x1431   :  { %v10826_v25 = vpop.f32.mrb[117].mxu0  ;;  %v10908_v61 = vpop.f32.mrb[165].mxu1 }
0x1432   :  { %v10828_v57 = vpop.f32.mrb[118].mxu0  ;;  %v10910_v46 = vpop.f32.mrb[166].mxu1 }
0x1433   :  { %v10829_v59 = vpop.f32.mrb[119].mxu0  ;;  %v10911_v17 = vpop.f32.mrb[167].mxu1 }
0x1434   :  { %v10138_v17 = vld [vmem:[#allocation15] ss:$0 sm:$0xff] }
0x14d5   :  { %v12111_v38 = vpop.f32.mrb[120].mxu0 }
0x14d6   :  { %v9459_v14 = vmul.f32 0.03125, %v12111_v38  ;;  %v9427_v28 = vpop.f32.mrb[121].mxu0 }
0x14d7   :  { %v9457_v9 = vmul.f32 0.03125, %v9427_v28  ;;  %v12112_v33 = vpop.f32.mrb[122].mxu0 }
0x14d8   :  { %v9460_v27 = vmul.f32 0.03125, %v12112_v33  ;;  %v9430_v52 = vpop.f32.mrb[123].mxu0  ;;  %v18125_v8 = vsub.f32 %v18083_v39, %v9459_v14 }
0x14d9   :  { %v18122_v13 = vsub.f32 %v18075_v4, %v9457_v9  ;;  %v9458_v18 = vmul.f32 0.03125, %v9430_v52 }
0x14da   :  { %v18128_v23 = vsub.f32 %v18086_v10, %v9460_v27  ;;  %v9473_v43 = vmul.f32 %v18125_v8, %v18125_v8 }
0x14db   :  { %v18131_v45 = vsub.f32 %v18078_v60, %v9458_v18  ;;  %v9471_v36 = vmul.f32 %v18122_v13, %v18122_v13  ;;  %v10139_v18 = vld [vmem:[#allocation16] ss:$0 sm:$0xff] }
0x14dc   :  { %v9474_v37 = vmul.f32 %v18128_v23, %v18128_v23 }
0x14dd   :  { %v9472_v4 = vmul.f32 %v18131_v45, %v18131_v45 }
0x14de   :  { %v9479_v2 = vpack.c.bf16 %v9474_v37, %v9473_v43 }
0x14df   :  { %v12115_v39 = vpop.f32.mrb[124].mxu0  ;;  %v9478_v48 = vpack.c.bf16 %v9472_v4, %v9471_v36 }
0x14e0   :  { %v9463_v10 = vmul.f32 0.03125, %v12115_v39  ;;  %v9443_v51 = vpop.f32.mrb[125].mxu0 }
0x14e1   :  { %v9461_v40 = vmul.f32 0.03125, %v9443_v51  ;;  %v12116_v60 = vpop.f32.mrb[126].mxu0  ;;  %12133 = vmatprep.mubr.bf16.mxu0 %v9478_v48 }
0x14e2   :  { %v18142_v34 = vsub.f32 %v18100_v30, %v9463_v10  ;;  %v9446_v41 = vpop.f32.mrb[127].mxu0  ;;  %12134 = vmatmul.mubr.bf16.vlgmr.msra.gmra.mrb[128].mxu0 %v9479_v2 }
0x14e3   :  { %v18145_v22 = vsub.f32 %v18093_v11, %v9461_v40  ;;  %v9462_v19 = vmul.f32 0.03125, %v9446_v41  ;;  %12142 = vmatpush3.bf16.msra.mxu0 %v12521_v20  ;;  %v12522_v11 = vld [vmem:[%s18230_s18 + $0x8] sm:$0xff]  }
0x14e4   :  { %v9477_v47 = vmul.f32 %v18142_v34, %v18142_v34  ;;  %12143 = vmatprep.subr.bf16.mxu0 %v12522_v11 }
0x14e5   :  { %v18148_v29 = vsub.f32 %v18096_v58, %v9462_v19  ;;  %v9475_v44 = vmul.f32 %v18145_v22, %v18145_v22  ;;  %v12523_v58 = vld [vmem:[%s18230_s18 + $0x10] sm:$0xff]  }
0x14e6   :  { %v9481_v55 = vpack.c.bf16 %v9477_v47, %v9477_v47 }
0x14e7   :  { %v9476_v30 = vmul.f32 %v18148_v29, %v18148_v29  ;;  %12144 = vmatpush3.bf16.msra.mxu0 %v12522_v11 }
0x14e8   :  { %12145 = vmatprep.subr.bf16.mxu0 %v12523_v58 }
0x14e9   :  { %v9480_v1 = vpack.c.bf16 %v9476_v30, %v9475_v44 }
0x14eb   :  { %12137 = vmatprep.mubr.bf16.mxu0 %v9480_v1  ;;  %12146 = vmatpush3.bf16.msra.mxu0 %v12523_v58 }
0x14ec   :  { %12138 = vmatmul.mubr.bf16.gmra.mrb[132].mxu0 %v9481_v55  ;;  %12147 = vmatprep.subr.bf16.mxu0 %v12524_v21 }
0x14ef   :  { %12148 = vmatpush3.bf16.msra.mxu0 %v12524_v21  ;;  %v10140_v21 = vld [vmem:[#allocation18] ss:$0 sm:$0xff] }
0x14f0   :  { %12149 = vmatprep.subr.bf16.mxu0 %v12525_v0 }
0x14f3   :  { %12150 = vmatpush3.bf16.msra.mxu0 %v12525_v0 }
0x14f4   :  { %12151 = vmatprep.subr.bf16.mxu0 %v12526_v3 }
0x14f7   :  { %12152 = vmatpush3.bf16.msra.mxu0 %v12526_v3 }
0x14f8   :  { %12153 = vmatprep.subr.bf16.mxu0 %v12527_v49 }
0x14fb   :  { %12154 = vmatpush3.bf16.msra.mxu0 %v12527_v49 }
0x14fc   :  { %12155 = vmatprep.subr.bf16.mxu0 %v12528_v56 }
0x14ff   :  { %12156 = vmatpush3.bf16.msra.mxu0 %v12528_v56 }
0x15b5   :  { %v12135_v7 = vpop.f32.mrb[128].mxu0 }
0x15b6   :  { %v9548_v24 = vmul.f32 0.03125, %v12135_v7  ;;  %v9516_v5 = vpop.f32.mrb[129].mxu0 }
0x15b7   :  { %v9546_v42 = vmul.f32 0.03125, %v9516_v5  ;;  %v12136_v31 = vpop.f32.mrb[130].mxu0 }
0x15b8   :  { %v9555_v6 = vadd.f32 1e-05, %v9548_v24  ;;  %v9549_v12 = vmul.f32 0.03125, %v12136_v31  ;;  %v9519_v53 = vpop.f32.mrb[131].mxu0 }
0x15b9   :  { %v9553_v50 = vadd.f32 1e-05, %v9546_v42  ;;  %v9547_v32 = vmul.f32 0.03125, %v9519_v53 }
0x15ba   :  { %13229 = vrsqrt.f32 %v9555_v6  ;;  %v9556_v16 = vadd.f32 1e-05, %v9549_v12 }
0x15bb   :  { %13231 = vrsqrt.f32 %v9553_v50  ;;  %v9554_v62 = vadd.f32 1e-05, %v9547_v32 }
0x15bc   :  { %13233 = vrsqrt.f32 %v9556_v16 }
0x15bd   :  { %13235 = vrsqrt.f32 %v9554_v62 }
0x15bf   :  { %v12139_v15 = vpop.f32.mrb[132].mxu0 }
0x15c0   :  { %v9552_v35 = vmul.f32 0.03125, %v12139_v15  ;;  %v9532_v63 = vpop.f32.mrb[133].mxu0 }
0x15c1   :  { %v9550_v54 = vmul.f32 0.03125, %v9532_v63  ;;  %v12140_v26 = vpop.f32.mrb[134].mxu0 }
0x15c2   :  { %v9559_v25 = vadd.f32 1e-05, %v9552_v35  ;;  %v9535_v61 = vpop.f32.mrb[135].mxu0 }
0x15c3   :  { %v9557_v57 = vadd.f32 1e-05, %v9550_v54  ;;  %v9551_v46 = vmul.f32 0.03125, %v9535_v61 }
0x15c4   :  { %v13230_v59 = vpop.eup %13229  ;;  %13237 = vrsqrt.f32 %v9559_v25 }
0x15c5   :  { %v13232_v20 = vpop.eup %13231  ;;  %v9569_v38 = vmul.f32 %v13230_v59, %v18125_v8  ;;  %13239 = vrsqrt.f32 %v9557_v57  ;;  %v9558_v14 = vadd.f32 1e-05, %v9551_v46 }
0x15c6   :  { %v13234_v28 = vpop.eup %13233  ;;  %v9567_v9 = vmul.f32 %v13232_v20, %v18122_v13 }
0x15c7   :  { %v13236_v33 = vpop.eup %13235  ;;  %v9583_v27 = vmul.f32 %v10138_v17, %v9569_v38  ;;  %v9570_v52 = vmul.f32 %v13234_v28, %v18128_v23  ;;  %13241 = vrsqrt.f32 %v9558_v14 }
0x15c8   :  { %v9568_v37 = vmul.f32 %v13236_v33, %v18131_v45  ;;  %v9581_v36 = vmul.f32 %v10138_v17, %v9567_v9 }
0x15c9   :  { %v9584_v4 = vmul.f32 %v10138_v17, %v9570_v52  ;;  %v9597_v39 = vadd.f32 %v10139_v18, %v9583_v27 }
0x15ca   :  { %v9582_v43 = vmul.f32 %v10138_v17, %v9568_v37  ;;  %v9595_v2 = vadd.f32 %v10139_v18, %v9581_v36 }
0x15cb   :  { %v9598_v48 = vadd.f32 %v10139_v18, %v9584_v4 }
0x15cc   :  { %v9596_v8 = vadd.f32 %v10139_v18, %v9582_v43 }
0x15cd   :  { %v9619_v10 = vpack.c.bf16 %v9598_v48, %v9597_v39 }
0x15ce   :  { %v13238_v51 = vpop.eup %13237  ;;  %v9618_v40 = vpack.c.bf16 %v9596_v8, %v9595_v2 }
0x15cf   :  { %v13240_v60 = vpop.eup %13239  ;;  %v9573_v13 = vmul.f32 %v13238_v51, %v18142_v34 }
0x15d0   :  { %12157 = vmatprep.mubr.bf16.mxu0 %v9618_v40  ;;  %v9571_v23 = vmul.f32 %v13240_v60, %v18145_v22 }
0x15d1   :  { %v13242_v41 = vpop.eup %13241  ;;  %v9587_v19 = vmul.f32 %v10138_v17, %v9573_v13  ;;  %12158 = vmatmul.mubr.bf16.vlgmr.msra.gmra.mrb[136].mxu0 %v9619_v10 }
0x15d2   :  { %v9572_v45 = vmul.f32 %v13242_v41, %v18148_v29  ;;  %v9585_v47 = vmul.f32 %v10138_v17, %v9571_v23 }
0x15d3   :  { %v9601_v30 = vadd.f32 %v10139_v18, %v9587_v19 }
0x15d4   :  { %v9586_v44 = vmul.f32 %v10138_v17, %v9572_v45  ;;  %v9599_v1 = vadd.f32 %v10139_v18, %v9585_v47 }
0x15d5   :  { %v9621_v58 = vpack.c.bf16 %v9601_v30, %v9601_v30 }
0x15d6   :  { %v9600_v55 = vadd.f32 %v10139_v18, %v9586_v44 }
0x15d8   :  { %v9620_v11 = vpack.c.bf16 %v9600_v55, %v9599_v1 }
0x15da   :  { %12161 = vmatprep.mubr.bf16.mxu0 %v9620_v11 }
0x15db   :  { %12162 = vmatmul.mubr.bf16.gmra.mrb[140].mxu0 %v9621_v58 }
0x16a4   :  { %v12159_v0 = vpop.f32.mrb[136].mxu0 }
0x16a5   :  { %v9720_v34 = vadd.f32 %v12159_v0, %v10140_v21  ;;  %v9711_v3 = vpop.f32.mrb[137].mxu0 }
0x16a6   :  { %v9712_v22 = vadd.f32 %v10140_v21, %v9711_v3  ;;  %v12160_v49 = vpop.f32.mrb[138].mxu0 }
0x16a7   :  { %9744 = vst.msk [vmem:[%s18232_s20 + $0x10] sm:$0xff] %vm9741_vm1, %v9720_v34  ;;  %v9723_v29 = vadd.f32 %v12160_v49, %v10140_v21  ;;  %v9714_v56 = vpop.f32.mrb[139].mxu0 }
0x16a8   :  { %9742 = vst.msk [vmem:[%s18232_s20] sm:$0xff] %vm9741_vm1, %v9712_v22  ;;  %v9715_v7 = vadd.f32 %v10140_v21, %v9714_v56 }
0x16a9   :  { %9745 = vst.msk [vmem:[%s18232_s20 + $0x18] sm:$0xff] %vm9741_vm1, %v9723_v29 }
0x16aa   :  { %9743 = vst.msk [vmem:[%s18232_s20 + $0x8] sm:$0xff] %vm9741_vm1, %v9715_v7 }
0x16ae   :  { %v12163_v24 = vpop.f32.mrb[140].mxu0 }
0x16af   :  { %v9736_v5 = vadd.f32 %v12163_v24, %v10140_v21  ;;  %v9727_v42 = vpop.f32.mrb[141].mxu0 }
0x16b0   :  { %v9728_v31 = vadd.f32 %v10140_v21, %v9727_v42  ;;  %v12164_v6 = vpop.f32.mrb[142].mxu0 }
0x16b1   :  { %9748 = vst.msk [vmem:[%s18232_s20 + $0x30] sm:$0xff] %vm9741_vm1, %v9736_v5  ;;  %v9730_v12 = vpop.f32.mrb[143].mxu0 }
0x16b2   :  { %9746 = vst.msk [vmem:[%s18232_s20 + $0x20] sm:$0xff] %vm9741_vm1, %v9728_v31  ;;  %v9731_v53 = vadd.f32 %v10140_v21, %v9730_v12 }
0x16b4   :  { %9747 = vst.msk [vmem:[%s18232_s20 + $0x28] sm:$0xff] %vm9741_vm1, %v9731_v53 }
0x16b5   :  { %9753 = vsyncpa [#allocation3], 1 }
0x16b6   :  { %9754 = vsyncpa [#allocation5], 1 }
0x16b7   :  { %9755 = vsyncpa [#allocation8], 1 }
0x16b8   :  { %9756 = vsyncpa [#allocation11], 1 }
0x16b9   :  { %9757 = vsyncpa [#allocation14], 1 }
0x16ba   :  { %9758 = vsyncpa [#allocation17], 1 }

</bundles_post_ra>
